<compile_context>
chip_gen: v6e
topology: v6e:2x2x1
jax: 0.10.0
libtpu: 0.0.40
codegen_flags: <defaults>
</compile_context>

<pallas_src>
import itertools
import numpy as np

import jax
import jax.numpy as jnp
from jax import lax
from jax.experimental import pallas as pl
from jax.experimental.pallas import tpu as pltpu

EPS = 1e-5          # BatchNorm eps (PyTorch default)
LANE = 128          # lane padding granularity for the flattened spatial axis
SUB = 8             # sublane padding granularity for the channel axis


def _round_up(x, m):
    return ((x + m - 1) // m) * m


def _vmem_limit_bytes():
    """~3/4 of physical VMEM, capped at 100 MiB (v5e/v6e: 128 MiB, v7x: 64 MiB)."""
    try:
        cap = int(getattr(pltpu.get_tpu_info(), "vmem_capacity_bytes",
                          64 * 1024 * 1024))
    except Exception:
        cap = 64 * 1024 * 1024
    return max(32 * 1024 * 1024, min(cap * 3 // 4, 100 * 1024 * 1024))


VMEM_LIMIT = _vmem_limit_bytes()
_CPARAMS = pltpu.CompilerParams(dimension_semantics=("parallel",),
                                vmem_limit_bytes=VMEM_LIMIT)


# ----------------------------- Pallas kernels -----------------------------

def _make_conv_kernel(shifts, halo, with_prologue):
    """3^d conv as shifted-slice MXU dots over one batch element, fused with
    per-batch per-channel (sum, sumsq, max, min) statistics over valid positions.
    Optional prologue applies BN1 scale/shift + ReLU + interior re-zeroing to the
    input block (conv2 path)."""

    def _compute(a, w_ref, m_ref, o_ref, st_ref):
        c_in, ppad = a.shape
        zero = jnp.zeros((c_in, halo), jnp.float32)
        ah = jnp.concatenate([zero, a, zero], axis=1)           # flat halo in VMEM
        acc = jnp.zeros(o_ref.shape, jnp.float32)
        for k, s in enumerate(shifts):                          # 3^d small dots
            acc = acc + jnp.dot(w_ref[k], ah[:, halo + s: halo + s + ppad],
                                preferred_element_type=jnp.float32)
        o_ref[...] = acc

        m = m_ref[...]                                          # 1 at valid positions
        am = acc * m
        s1 = jnp.sum(am, axis=1, keepdims=True)
        s2 = jnp.sum(am * acc, axis=1, keepdims=True)
        mx = jnp.max(jnp.where(m > 0.0, acc, -jnp.inf), axis=1, keepdims=True)
        mn = jnp.min(jnp.where(m > 0.0, acc, jnp.inf), axis=1, keepdims=True)
        st_ref[...] = jnp.concatenate(
            [s1, s2, mx, mn, jnp.zeros((acc.shape[0], 4), jnp.float32)], axis=1)

    if with_prologue:
        def kernel(x_ref, w_ref, m_ref, sc_ref, sh_ref, o_ref, st_ref):
            a = jnp.maximum(x_ref[...] * sc_ref[...] + sh_ref[...], 0.0) * m_ref[...]
            _compute(a, w_ref, m_ref, o_ref, st_ref)
    else:
        def kernel(x_ref, w_ref, m_ref, o_ref, st_ref):
            _compute(x_ref[...], w_ref, m_ref, o_ref, st_ref)
    return kernel


def _make_camap_kernel(planes):
    """Channel mean / max map of o3 = conv2*alpha + beta (o3 never hits HBM)."""
    inv = 1.0 / float(planes)

    def kernel(x_ref, a_ref, b_ref, o_ref):
        o3 = x_ref[...] * a_ref[...] + b_ref[...]               # (C8, Ppad)
        top = o3[:planes, :]                                    # real channels only
        avg = jnp.sum(top, axis=0, keepdims=True) * inv
        mx = jnp.max(top, axis=0, keepdims=True)
        o_ref[...] = jnp.concatenate([avg, mx], axis=0)         # (2, Ppad)
    return kernel


def _tail_kernel(x_ref, a_ref, b_ref, sa_ref, id_ref, o_ref):
    """Fused tail: o3 = conv2*alpha + beta; out = relu(o3 * sigmoid(sa) + identity)."""
    o3 = x_ref[...] * a_ref[...] + b_ref[...]
    sa = 1.0 / (1.0 + jnp.exp(-sa_ref[...]))
    o_ref[...] = jnp.maximum(o3 * sa + id_ref[...], 0.0)


# ----------------------------- pallas_call wrappers -----------------------------

def conv3_call(x, w, mask, prologue, shifts, halo):
    """x: (N, Cin8, Ppad); w: (3^d, C8, Cin8); mask: (1, Ppad);
    prologue: optional (scale, shift) each (Cin8, 1)."""
    n, c_in8, ppad = x.shape
    k3, c8, _ = w.shape
    kernel = _make_conv_kernel(tuple(shifts), halo, prologue is not None)

    in_specs = [pl.BlockSpec((None, c_in8, ppad), lambda i: (i, 0, 0)),
                pl.BlockSpec((k3, c8, c_in8), lambda i: (0, 0, 0)),   # resident
                pl.BlockSpec((1, ppad), lambda i: (0, 0))]            # resident
    args = [x, w, mask]
    if prologue is not None:
        sc, sh = prologue
        in_specs += [pl.BlockSpec((c_in8, 1), lambda i: (0, 0)),
                     pl.BlockSpec((c_in8, 1), lambda i: (0, 0))]
        args += [sc, sh]

    return pl.pallas_call(
        kernel,
        out_shape=(jax.ShapeDtypeStruct((n, c8, ppad), jnp.float32),
                   jax.ShapeDtypeStruct((n, c8, 8), jnp.float32)),
        grid=(n,),
        in_specs=in_specs,
        out_specs=(pl.BlockSpec((None, c8, ppad), lambda i: (i, 0, 0)),
                   pl.BlockSpec((None, c8, 8), lambda i: (i, 0, 0))),
        compiler_params=_CPARAMS,
    )(*args)


def camap_call(x, alpha, beta, planes):
    n, c8, ppad = x.shape
    return pl.pallas_call(
        _make_camap_kernel(planes),
        out_shape=jax.ShapeDtypeStruct((n, 2, ppad), jnp.float32),
        grid=(n,),
        in_specs=[pl.BlockSpec((None, c8, ppad), lambda i: (i, 0, 0)),
                  pl.BlockSpec((None, c8, 1), lambda i: (i, 0, 0)),
                  pl.BlockSpec((None, c8, 1), lambda i: (i, 0, 0))],
        out_specs=pl.BlockSpec((None, 2, ppad), lambda i: (i, 0, 0)),
        compiler_params=_CPARAMS,
    )(x, alpha, beta)


def tail_call(x, alpha, beta, sa, identity):
    n, c8, ppad = x.shape
    return pl.pallas_call(
        _tail_kernel,
        out_shape=jax.ShapeDtypeStruct((n, c8, ppad), jnp.float32),
        grid=(n,),
        in_specs=[pl.BlockSpec((None, c8, ppad), lambda i: (i, 0, 0)),
                  pl.BlockSpec((None, c8, 1), lambda i: (i, 0, 0)),
                  pl.BlockSpec((None, c8, 1), lambda i: (i, 0, 0)),
                  pl.BlockSpec((None, 1, ppad), lambda i: (i, 0, 0)),
                  pl.BlockSpec((None, c8, ppad), lambda i: (i, 0, 0))],
        out_specs=pl.BlockSpec((None, c8, ppad), lambda i: (i, 0, 0)),
        compiler_params=_CPARAMS,
    )(x, alpha, beta, sa, identity)


# ----------------------------- small XLA glue -----------------------------

def _bn_scale_shift(stats, cnt, gamma, beta):
    """Training-mode BN scale/shift from per-batch partial (sum, sumsq)."""
    s = jnp.sum(stats[:, :, 0], axis=0)
    ss = jnp.sum(stats[:, :, 1], axis=0)
    mean = s / cnt
    var = jnp.maximum(ss / cnt - mean * mean, 0.0)
    scale = gamma * lax.rsqrt(var + EPS)
    shift = beta - mean * scale
    return scale, shift


# ----------------------------- BasicBlock branch -----------------------------

def branch_forward(x, prm):
    """One modality branch: conv-bn-relu-conv-bn, CA, SA, residual, relu."""
    n, inplanes = x.shape[:2]
    spatial = tuple(x.shape[2:])
    d = len(spatial)
    planes = prm['ca_w2'].shape[0]
    assert inplanes == planes, "residual add without downsample needs inplanes == planes"

    c8 = _round_up(planes, SUB)
    ci8 = _round_up(inplanes, SUB)
    sp = tuple(s + 2 for s in spatial)              # 1-ring zero-padded spatial dims
    pp = int(np.prod(sp))
    p_valid = int(np.prod(spatial))
    ppad = _round_up(pp, LANE)
    cnt = float(n * p_valid)

    # flat shifts of the 3^d taps in the padded-flattened (ring) domain
    strides_q = [int(np.prod(sp[j + 1:])) for j in range(d)]
    shifts3 = [sum((o[j] - 1) * strides_q[j] for j in range(d))
               for o in itertools.product(range(3), repeat=d)]
    halo3 = max(abs(s) for s in shifts3)

    # zero-padded channels-first input, flattened and lane-padded: (N, Ci8, Ppad)
    xq = jnp.pad(x, [(0, 0), (0, ci8 - inplanes)] + [(1, 1)] * d)
    xq = jnp.pad(xq.reshape(n, ci8, pp), [(0, 0), (0, 0), (0, ppad - pp)])

    # interior mask (1 at real spatial positions, 0 at ring / lane padding)
    m_np = np.zeros((1,) + sp, np.float32)
    m_np[(0,) + tuple(slice(1, -1) for _ in range(d))] = 1.0
    mask = jnp.pad(jnp.asarray(m_np.reshape(1, pp)), [(0, 0), (0, ppad - pp)])

    # ---- conv1 (+ fused per-batch stats) ----
    conv1_raw, st1 = conv3_call(xq, prm['w1'], mask, None, shifts3, halo3)
    scale1, shift1 = _bn_scale_shift(st1, cnt, prm['g1'], prm['b1'])

    # ---- conv2 with fused BN1 + ReLU + re-zeroed padding prologue ----
    conv2_raw, st2 = conv3_call(conv1_raw, prm['w2'], mask,
                                (scale1[:, None], shift1[:, None]), shifts3, halo3)
    scale2, shift2 = _bn_scale_shift(st2, cnt, prm['g2'], prm['b2'])

    # ---- ChannelAttention: pooled values derived exactly from conv2 stats ----
    sum_nc, max_nc, min_nc = st2[:, :, 0], st2[:, :, 2], st2[:, :, 3]     # (N, C8)
    avg_bn = (sum_nc / p_valid) * scale2 + shift2
    max_bn = jnp.where(scale2 >= 0.0, max_nc * scale2, min_nc * scale2) + shift2

    def _mlp(v):
        h = jnp.maximum(v[:, :planes] @ prm['ca_w1'].T, 0.0)
        return h @ prm['ca_w2'].T

    ca = jax.nn.sigmoid(_mlp(avg_bn) + _mlp(max_bn))                      # (N, planes)
    ca = jnp.pad(ca, [(0, 0), (0, c8 - planes)])
    alpha = (ca * scale2)[:, :, None]                                     # (N, C8, 1)
    beta = (ca * shift2)[:, :, None]

    # ---- SpatialAttention map (channel mean/max of o3, o3 recomputed in-kernel) ----
    samap = camap_call(conv2_raw, alpha, beta, planes)                    # (N, 2, Ppad)

    inner = (slice(None), slice(None)) + tuple(slice(1, -1) for _ in range(d))
    samap_v = samap[:, :, :pp].reshape((n, 2) + sp)[inner]                # (N, 2, *S)
    sa = lax.conv_general_dilated(samap_v, prm['sa_w'],
                                  window_strides=(1,) * d,
                                  padding=[(3, 3)] * d)                   # (N, 1, *S)
    sa_q = jnp.pad(sa, [(0, 0), (0, 0)] + [(1, 1)] * d).reshape(n, 1, pp)
    sa_q = jnp.pad(sa_q, [(0, 0), (0, 0), (0, ppad - pp)])

    # ---- fused tail: sigmoid(sa) * o3 + identity, ReLU ----
    out_q = tail_call(conv2_raw, alpha, beta, sa_q, xq)                   # (N, C8, Ppad)
    return out_q[:, :planes, :pp].reshape((n, planes) + sp)[inner]


def basic_block_forward(x, y, z, params):
    return (branch_forward(x, params['x']),
            branch_forward(y, params['y']),
            branch_forward(z, params['z']))


# ----------------------------- deterministic parameter init -----------------------------

def init_branch_params(key, inplanes, planes, d):
    ks = jax.random.split(key, 5)
    k3 = 3 ** d
    hidden = planes // 16 if planes // 16 > 1 else planes      # ChannelAttention hidden
    c8 = _round_up(planes, SUB)
    ci8 = _round_up(inplanes, SUB)
    s = 0.1

    w1 = s * jax.random.normal(ks[0], (planes, inplanes, k3), jnp.float32)  # conv1
    w2 = s * jax.random.normal(ks[1], (planes, planes, k3), jnp.float32)    # conv2
    ca1 = s * jax.random.normal(ks[2], (hidden, planes), jnp.float32)       # CA fc1
    ca2 = s * jax.random.normal(ks[3], (planes, hidden), jnp.float32)       # CA fc2
    saw = s * jax.random.normal(ks[4], (1, 2) + (7,) * d, jnp.float32)      # SA conv

    def pack(w, co, ci, co_p, ci_p):
        w = jnp.transpose(w, (2, 0, 1))                        # (3^d, out, in)
        return jnp.pad(w, ((0, 0), (0, co_p - co), (0, ci_p - ci)))

    gamma = jnp.zeros((c8,), jnp.float32).at[:planes].set(1.0)
    beta = jnp.zeros((c8,), jnp.float32)
    return dict(w1=pack(w1, planes, inplanes, c8, ci8),
                w2=pack(w2, planes, planes, c8, c8),
                g1=gamma, b1=beta, g2=gamma, b2=beta,
                ca_w1=ca1, ca_w2=ca2, sa_w=saw)


if __name__ == "__main__":
    key = jax.random.PRNGKey(0)
    kx, ky, kz, kpx, kpy, kpz = jax.random.split(key, 6)

    N, inplanes, planes = 2, 4, 4
    x = jax.random.normal(kx, (N, inplanes, 16), jnp.float32)          # 1D (N, C, L)
    y = jax.random.normal(ky, (N, inplanes, 16, 16), jnp.float32)      # 2D (N, C, H, W)
    z = jax.random.normal(kz, (N, inplanes, 8, 8, 8), jnp.float32)     # 3D (N, C, D, H, W)

    params = dict(
        x=init_branch_params(kpx, inplanes, planes, 1),
        y=init_branch_params(kpy, inplanes, planes, 2),
        z=init_branch_params(kpz, inplanes, planes, 3),
    )

    ox, oy, oz = jax.jit(basic_block_forward)(x, y, z, params)
    jax.block_until_ready((ox, oy, oz))
    assert ox.shape == x.shape and oy.shape == y.shape and oz.shape == z.shape
    assert ox.dtype == jnp.float32 and oy.dtype == jnp.float32 and oz.dtype == jnp.float32
    assert bool(jnp.all(jnp.isfinite(ox))) and bool(jnp.all(jnp.isfinite(oy))) \
        and bool(jnp.all(jnp.isfinite(oz)))
    print("KERNEL_OK")
</pallas_src>

<mosaic_0001>
module attributes {stable_mosaic.version = 11 : i64} {
  func.func @kernel(%arg0: i32, %arg1: memref<1x8x1024xf32, #tpu.memory_space<vmem>>, %arg2: memref<27x8x8xf32, #tpu.memory_space<vmem>>, %arg3: memref<1x1024xf32, #tpu.memory_space<vmem>>, %arg4: memref<1x8x1024xf32, #tpu.memory_space<vmem>>, %arg5: memref<1x8x8xf32, #tpu.memory_space<vmem>>) attributes {dimension_semantics = [#tpu.dimension_semantics<parallel>], iteration_bounds = array<i64: 2>, scalar_prefetch = 0 : i64, scratch_operands = 0 : i64, tpu.core_type = #tpu.core_type<tc>, window_params = [{transform_indices = @transform_0, window_bounds = array<i64: 1, 8, 1024>}, {pipeline_mode = #tpu.pipeline_mode<synchronous>, transform_indices = @transform_1, window_bounds = array<i64: 27, 8, 8>}, {pipeline_mode = #tpu.pipeline_mode<synchronous>, transform_indices = @transform_2, window_bounds = array<i64: 1, 1024>}, {transform_indices = @transform_3, window_bounds = array<i64: 1, 8, 1024>}, {transform_indices = @transform_4, window_bounds = array<i64: 1, 8, 8>}]} {
    %c0 = arith.constant 0 : index
    %c0_0 = arith.constant 0 : index
    %c0_1 = arith.constant 0 : index
    %0 = vector.load %arg1[%c0, %c0_0, %c0_1] : memref<1x8x1024xf32, #tpu.memory_space<vmem>>, vector<1x8x1024xf32>
    %1 = vector.shape_cast %0 : vector<1x8x1024xf32> to vector<8x1024xf32>
    %cst = arith.constant 0.000000e+00 : f32
    %2 = vector.broadcast %cst : f32 to vector<8x111xf32>
    %3 = tpu.concatenate %2, %1, %2 in 1 : vector<8x111xf32>, vector<8x1024xf32>, vector<8x111xf32> -> vector<8x1246xf32>
    %cst_2 = arith.constant 0.000000e+00 : f32
    %4 = vector.broadcast %cst_2 : f32 to vector<8x1024xf32>
    %c0_3 = arith.constant 0 : index
    %c0_4 = arith.constant 0 : index
    %c0_5 = arith.constant 0 : index
    %5 = vector.load %arg2[%c0_3, %c0_4, %c0_5] : memref<27x8x8xf32, #tpu.memory_space<vmem>>, vector<1x8x8xf32>
    %6 = vector.shape_cast %5 : vector<1x8x8xf32> to vector<8x8xf32>
    %7 = vector.extract_strided_slice %3 {offsets = [0, 0], sizes = [8, 1024], strides = [1, 1]} : vector<8x1246xf32> to vector<8x1024xf32>
    %cst_6 = arith.constant dense<0.000000e+00> : vector<8x1024xf32>
    %8 = tpu.matmul %6, %7, %cst_6 {dimension_numbers = #tpu.dot_dimension_numbers<[1], [0], [0], [1], [0, 0, 1, 1], [], []>} : vector<8x8xf32>, vector<8x1024xf32>, vector<8x1024xf32> -> vector<8x1024xf32>
    %9 = arith.addf %4, %8 : vector<8x1024xf32>
    %c1 = arith.constant 1 : index
    %c0_7 = arith.constant 0 : index
    %c0_8 = arith.constant 0 : index
    %10 = vector.load %arg2[%c1, %c0_7, %c0_8] : memref<27x8x8xf32, #tpu.memory_space<vmem>>, vector<1x8x8xf32>
    %11 = vector.shape_cast %10 : vector<1x8x8xf32> to vector<8x8xf32>
    %12 = vector.extract_strided_slice %3 {offsets = [0, 1], sizes = [8, 1024], strides = [1, 1]} : vector<8x1246xf32> to vector<8x1024xf32>
    %cst_9 = arith.constant dense<0.000000e+00> : vector<8x1024xf32>
    %13 = tpu.matmul %11, %12, %cst_9 {dimension_numbers = #tpu.dot_dimension_numbers<[1], [0], [0], [1], [0, 0, 1, 1], [], []>} : vector<8x8xf32>, vector<8x1024xf32>, vector<8x1024xf32> -> vector<8x1024xf32>
    %14 = arith.addf %9, %13 : vector<8x1024xf32>
    %c2 = arith.constant 2 : index
    %c0_10 = arith.constant 0 : index
    %c0_11 = arith.constant 0 : index
    %15 = vector.load %arg2[%c2, %c0_10, %c0_11] : memref<27x8x8xf32, #tpu.memory_space<vmem>>, vector<1x8x8xf32>
    %16 = vector.shape_cast %15 : vector<1x8x8xf32> to vector<8x8xf32>
    %17 = vector.extract_strided_slice %3 {offsets = [0, 2], sizes = [8, 1024], strides = [1, 1]} : vector<8x1246xf32> to vector<8x1024xf32>
    %cst_12 = arith.constant dense<0.000000e+00> : vector<8x1024xf32>
    %18 = tpu.matmul %16, %17, %cst_12 {dimension_numbers = #tpu.dot_dimension_numbers<[1], [0], [0], [1], [0, 0, 1, 1], [], []>} : vector<8x8xf32>, vector<8x1024xf32>, vector<8x1024xf32> -> vector<8x1024xf32>
    %19 = arith.addf %14, %18 : vector<8x1024xf32>
    %c3 = arith.constant 3 : index
    %c0_13 = arith.constant 0 : index
    %c0_14 = arith.constant 0 : index
    %20 = vector.load %arg2[%c3, %c0_13, %c0_14] : memref<27x8x8xf32, #tpu.memory_space<vmem>>, vector<1x8x8xf32>
    %21 = vector.shape_cast %20 : vector<1x8x8xf32> to vector<8x8xf32>
    %22 = vector.extract_strided_slice %3 {offsets = [0, 10], sizes = [8, 1024], strides = [1, 1]} : vector<8x1246xf32> to vector<8x1024xf32>
    %cst_15 = arith.constant dense<0.000000e+00> : vector<8x1024xf32>
    %23 = tpu.matmul %21, %22, %cst_15 {dimension_numbers = #tpu.dot_dimension_numbers<[1], [0], [0], [1], [0, 0, 1, 1], [], []>} : vector<8x8xf32>, vector<8x1024xf32>, vector<8x1024xf32> -> vector<8x1024xf32>
    %24 = arith.addf %19, %23 : vector<8x1024xf32>
    %c4 = arith.constant 4 : index
    %c0_16 = arith.constant 0 : index
    %c0_17 = arith.constant 0 : index
    %25 = vector.load %arg2[%c4, %c0_16, %c0_17] : memref<27x8x8xf32, #tpu.memory_space<vmem>>, vector<1x8x8xf32>
    %26 = vector.shape_cast %25 : vector<1x8x8xf32> to vector<8x8xf32>
    %27 = vector.extract_strided_slice %3 {offsets = [0, 11], sizes = [8, 1024], strides = [1, 1]} : vector<8x1246xf32> to vector<8x1024xf32>
    %cst_18 = arith.constant dense<0.000000e+00> : vector<8x1024xf32>
    %28 = tpu.matmul %26, %27, %cst_18 {dimension_numbers = #tpu.dot_dimension_numbers<[1], [0], [0], [1], [0, 0, 1, 1], [], []>} : vector<8x8xf32>, vector<8x1024xf32>, vector<8x1024xf32> -> vector<8x1024xf32>
    %29 = arith.addf %24, %28 : vector<8x1024xf32>
    %c5 = arith.constant 5 : index
    %c0_19 = arith.constant 0 : index
    %c0_20 = arith.constant 0 : index
    %30 = vector.load %arg2[%c5, %c0_19, %c0_20] : memref<27x8x8xf32, #tpu.memory_space<vmem>>, vector<1x8x8xf32>
    %31 = vector.shape_cast %30 : vector<1x8x8xf32> to vector<8x8xf32>
    %32 = vector.extract_strided_slice %3 {offsets = [0, 12], sizes = [8, 1024], strides = [1, 1]} : vector<8x1246xf32> to vector<8x1024xf32>
    %cst_21 = arith.constant dense<0.000000e+00> : vector<8x1024xf32>
    %33 = tpu.matmul %31, %32, %cst_21 {dimension_numbers = #tpu.dot_dimension_numbers<[1], [0], [0], [1], [0, 0, 1, 1], [], []>} : vector<8x8xf32>, vector<8x1024xf32>, vector<8x1024xf32> -> vector<8x1024xf32>
    %34 = arith.addf %29, %33 : vector<8x1024xf32>
    %c6 = arith.constant 6 : index
    %c0_22 = arith.constant 0 : index
    %c0_23 = arith.constant 0 : index
    %35 = vector.load %arg2[%c6, %c0_22, %c0_23] : memref<27x8x8xf32, #tpu.memory_space<vmem>>, vector<1x8x8xf32>
    %36 = vector.shape_cast %35 : vector<1x8x8xf32> to vector<8x8xf32>
    %37 = vector.extract_strided_slice %3 {offsets = [0, 20], sizes = [8, 1024], strides = [1, 1]} : vector<8x1246xf32> to vector<8x1024xf32>
    %cst_24 = arith.constant dense<0.000000e+00> : vector<8x1024xf32>
    %38 = tpu.matmul %36, %37, %cst_24 {dimension_numbers = #tpu.dot_dimension_numbers<[1], [0], [0], [1], [0, 0, 1, 1], [], []>} : vector<8x8xf32>, vector<8x1024xf32>, vector<8x1024xf32> -> vector<8x1024xf32>
    %39 = arith.addf %34, %38 : vector<8x1024xf32>
    %c7 = arith.constant 7 : index
    %c0_25 = arith.constant 0 : index
    %c0_26 = arith.constant 0 : index
    %40 = vector.load %arg2[%c7, %c0_25, %c0_26] : memref<27x8x8xf32, #tpu.memory_space<vmem>>, vector<1x8x8xf32>
    %41 = vector.shape_cast %40 : vector<1x8x8xf32> to vector<8x8xf32>
    %42 = vector.extract_strided_slice %3 {offsets = [0, 21], sizes = [8, 1024], strides = [1, 1]} : vector<8x1246xf32> to vector<8x1024xf32>
    %cst_27 = arith.constant dense<0.000000e+00> : vector<8x1024xf32>
    %43 = tpu.matmul %41, %42, %cst_27 {dimension_numbers = #tpu.dot_dimension_numbers<[1], [0], [0], [1], [0, 0, 1, 1], [], []>} : vector<8x8xf32>, vector<8x1024xf32>, vector<8x1024xf32> -> vector<8x1024xf32>
    %44 = arith.addf %39, %43 : vector<8x1024xf32>
    %c8 = arith.constant 8 : index
    %c0_28 = arith.constant 0 : index
    %c0_29 = arith.constant 0 : index
    %45 = vector.load %arg2[%c8, %c0_28, %c0_29] : memref<27x8x8xf32, #tpu.memory_space<vmem>>, vector<1x8x8xf32>
    %46 = vector.shape_cast %45 : vector<1x8x8xf32> to vector<8x8xf32>
    %47 = vector.extract_strided_slice %3 {offsets = [0, 22], sizes = [8, 1024], strides = [1, 1]} : vector<8x1246xf32> to vector<8x1024xf32>
    %cst_30 = arith.constant dense<0.000000e+00> : vector<8x1024xf32>
    %48 = tpu.matmul %46, %47, %cst_30 {dimension_numbers = #tpu.dot_dimension_numbers<[1], [0], [0], [1], [0, 0, 1, 1], [], []>} : vector<8x8xf32>, vector<8x1024xf32>, vector<8x1024xf32> -> vector<8x1024xf32>
    %49 = arith.addf %44, %48 : vector<8x1024xf32>
    %c9 = arith.constant 9 : index
    %c0_31 = arith.constant 0 : index
    %c0_32 = arith.constant 0 : index
    %50 = vector.load %arg2[%c9, %c0_31, %c0_32] : memref<27x8x8xf32, #tpu.memory_space<vmem>>, vector<1x8x8xf32>
    %51 = vector.shape_cast %50 : vector<1x8x8xf32> to vector<8x8xf32>
    %52 = vector.extract_strided_slice %3 {offsets = [0, 100], sizes = [8, 1024], strides = [1, 1]} : vector<8x1246xf32> to vector<8x1024xf32>
    %cst_33 = arith.constant dense<0.000000e+00> : vector<8x1024xf32>
    %53 = tpu.matmul %51, %52, %cst_33 {dimension_numbers = #tpu.dot_dimension_numbers<[1], [0], [0], [1], [0, 0, 1, 1], [], []>} : vector<8x8xf32>, vector<8x1024xf32>, vector<8x1024xf32> -> vector<8x1024xf32>
    %54 = arith.addf %49, %53 : vector<8x1024xf32>
    %c10 = arith.constant 10 : index
    %c0_34 = arith.constant 0 : index
    %c0_35 = arith.constant 0 : index
    %55 = vector.load %arg2[%c10, %c0_34, %c0_35] : memref<27x8x8xf32, #tpu.memory_space<vmem>>, vector<1x8x8xf32>
    %56 = vector.shape_cast %55 : vector<1x8x8xf32> to vector<8x8xf32>
    %57 = vector.extract_strided_slice %3 {offsets = [0, 101], sizes = [8, 1024], strides = [1, 1]} : vector<8x1246xf32> to vector<8x1024xf32>
    %cst_36 = arith.constant dense<0.000000e+00> : vector<8x1024xf32>
    %58 = tpu.matmul %56, %57, %cst_36 {dimension_numbers = #tpu.dot_dimension_numbers<[1], [0], [0], [1], [0, 0, 1, 1], [], []>} : vector<8x8xf32>, vector<8x1024xf32>, vector<8x1024xf32> -> vector<8x1024xf32>
    %59 = arith.addf %54, %58 : vector<8x1024xf32>
    %c11 = arith.constant 11 : index
    %c0_37 = arith.constant 0 : index
    %c0_38 = arith.constant 0 : index
    %60 = vector.load %arg2[%c11, %c0_37, %c0_38] : memref<27x8x8xf32, #tpu.memory_space<vmem>>, vector<1x8x8xf32>
    %61 = vector.shape_cast %60 : vector<1x8x8xf32> to vector<8x8xf32>
    %62 = vector.extract_strided_slice %3 {offsets = [0, 102], sizes = [8, 1024], strides = [1, 1]} : vector<8x1246xf32> to vector<8x1024xf32>
    %cst_39 = arith.constant dense<0.000000e+00> : vector<8x1024xf32>
    %63 = tpu.matmul %61, %62, %cst_39 {dimension_numbers = #tpu.dot_dimension_numbers<[1], [0], [0], [1], [0, 0, 1, 1], [], []>} : vector<8x8xf32>, vector<8x1024xf32>, vector<8x1024xf32> -> vector<8x1024xf32>
    %64 = arith.addf %59, %63 : vector<8x1024xf32>
    %c12 = arith.constant 12 : index
    %c0_40 = arith.constant 0 : index
    %c0_41 = arith.constant 0 : index
    %65 = vector.load %arg2[%c12, %c0_40, %c0_41] : memref<27x8x8xf32, #tpu.memory_space<vmem>>, vector<1x8x8xf32>
    %66 = vector.shape_cast %65 : vector<1x8x8xf32> to vector<8x8xf32>
    %67 = vector.extract_strided_slice %3 {offsets = [0, 110], sizes = [8, 1024], strides = [1, 1]} : vector<8x1246xf32> to vector<8x1024xf32>
    %cst_42 = arith.constant dense<0.000000e+00> : vector<8x1024xf32>
    %68 = tpu.matmul %66, %67, %cst_42 {dimension_numbers = #tpu.dot_dimension_numbers<[1], [0], [0], [1], [0, 0, 1, 1], [], []>} : vector<8x8xf32>, vector<8x1024xf32>, vector<8x1024xf32> -> vector<8x1024xf32>
    %69 = arith.addf %64, %68 : vector<8x1024xf32>
    %c13 = arith.constant 13 : index
    %c0_43 = arith.constant 0 : index
    %c0_44 = arith.constant 0 : index
    %70 = vector.load %arg2[%c13, %c0_43, %c0_44] : memref<27x8x8xf32, #tpu.memory_space<vmem>>, vector<1x8x8xf32>
    %71 = vector.shape_cast %70 : vector<1x8x8xf32> to vector<8x8xf32>
    %72 = vector.extract_strided_slice %3 {offsets = [0, 111], sizes = [8, 1024], strides = [1, 1]} : vector<8x1246xf32> to vector<8x1024xf32>
    %cst_45 = arith.constant dense<0.000000e+00> : vector<8x1024xf32>
    %73 = tpu.matmul %71, %72, %cst_45 {dimension_numbers = #tpu.dot_dimension_numbers<[1], [0], [0], [1], [0, 0, 1, 1], [], []>} : vector<8x8xf32>, vector<8x1024xf32>, vector<8x1024xf32> -> vector<8x1024xf32>
    %74 = arith.addf %69, %73 : vector<8x1024xf32>
    %c14 = arith.constant 14 : index
    %c0_46 = arith.constant 0 : index
    %c0_47 = arith.constant 0 : index
    %75 = vector.load %arg2[%c14, %c0_46, %c0_47] : memref<27x8x8xf32, #tpu.memory_space<vmem>>, vector<1x8x8xf32>
    %76 = vector.shape_cast %75 : vector<1x8x8xf32> to vector<8x8xf32>
    %77 = vector.extract_strided_slice %3 {offsets = [0, 112], sizes = [8, 1024], strides = [1, 1]} : vector<8x1246xf32> to vector<8x1024xf32>
    %cst_48 = arith.constant dense<0.000000e+00> : vector<8x1024xf32>
    %78 = tpu.matmul %76, %77, %cst_48 {dimension_numbers = #tpu.dot_dimension_numbers<[1], [0], [0], [1], [0, 0, 1, 1], [], []>} : vector<8x8xf32>, vector<8x1024xf32>, vector<8x1024xf32> -> vector<8x1024xf32>
    %79 = arith.addf %74, %78 : vector<8x1024xf32>
    %c15 = arith.constant 15 : index
    %c0_49 = arith.constant 0 : index
    %c0_50 = arith.constant 0 : index
    %80 = vector.load %arg2[%c15, %c0_49, %c0_50] : memref<27x8x8xf32, #tpu.memory_space<vmem>>, vector<1x8x8xf32>
    %81 = vector.shape_cast %80 : vector<1x8x8xf32> to vector<8x8xf32>
    %82 = vector.extract_strided_slice %3 {offsets = [0, 120], sizes = [8, 1024], strides = [1, 1]} : vector<8x1246xf32> to vector<8x1024xf32>
    %cst_51 = arith.constant dense<0.000000e+00> : vector<8x1024xf32>
    %83 = tpu.matmul %81, %82, %cst_51 {dimension_numbers = #tpu.dot_dimension_numbers<[1], [0], [0], [1], [0, 0, 1, 1], [], []>} : vector<8x8xf32>, vector<8x1024xf32>, vector<8x1024xf32> -> vector<8x1024xf32>
    %84 = arith.addf %79, %83 : vector<8x1024xf32>
    %c16 = arith.constant 16 : index
    %c0_52 = arith.constant 0 : index
    %c0_53 = arith.constant 0 : index
    %85 = vector.load %arg2[%c16, %c0_52, %c0_53] : memref<27x8x8xf32, #tpu.memory_space<vmem>>, vector<1x8x8xf32>
    %86 = vector.shape_cast %85 : vector<1x8x8xf32> to vector<8x8xf32>
    %87 = vector.extract_strided_slice %3 {offsets = [0, 121], sizes = [8, 1024], strides = [1, 1]} : vector<8x1246xf32> to vector<8x1024xf32>
    %cst_54 = arith.constant dense<0.000000e+00> : vector<8x1024xf32>
    %88 = tpu.matmul %86, %87, %cst_54 {dimension_numbers = #tpu.dot_dimension_numbers<[1], [0], [0], [1], [0, 0, 1, 1], [], []>} : vector<8x8xf32>, vector<8x1024xf32>, vector<8x1024xf32> -> vector<8x1024xf32>
    %89 = arith.addf %84, %88 : vector<8x1024xf32>
    %c17 = arith.constant 17 : index
    %c0_55 = arith.constant 0 : index
    %c0_56 = arith.constant 0 : index
    %90 = vector.load %arg2[%c17, %c0_55, %c0_56] : memref<27x8x8xf32, #tpu.memory_space<vmem>>, vector<1x8x8xf32>
    %91 = vector.shape_cast %90 : vector<1x8x8xf32> to vector<8x8xf32>
    %92 = vector.extract_strided_slice %3 {offsets = [0, 122], sizes = [8, 1024], strides = [1, 1]} : vector<8x1246xf32> to vector<8x1024xf32>
    %cst_57 = arith.constant dense<0.000000e+00> : vector<8x1024xf32>
    %93 = tpu.matmul %91, %92, %cst_57 {dimension_numbers = #tpu.dot_dimension_numbers<[1], [0], [0], [1], [0, 0, 1, 1], [], []>} : vector<8x8xf32>, vector<8x1024xf32>, vector<8x1024xf32> -> vector<8x1024xf32>
    %94 = arith.addf %89, %93 : vector<8x1024xf32>
    %c18 = arith.constant 18 : index
    %c0_58 = arith.constant 0 : index
    %c0_59 = arith.constant 0 : index
    %95 = vector.load %arg2[%c18, %c0_58, %c0_59] : memref<27x8x8xf32, #tpu.memory_space<vmem>>, vector<1x8x8xf32>
    %96 = vector.shape_cast %95 : vector<1x8x8xf32> to vector<8x8xf32>
    %97 = vector.extract_strided_slice %3 {offsets = [0, 200], sizes = [8, 1024], strides = [1, 1]} : vector<8x1246xf32> to vector<8x1024xf32>
    %cst_60 = arith.constant dense<0.000000e+00> : vector<8x1024xf32>
    %98 = tpu.matmul %96, %97, %cst_60 {dimension_numbers = #tpu.dot_dimension_numbers<[1], [0], [0], [1], [0, 0, 1, 1], [], []>} : vector<8x8xf32>, vector<8x1024xf32>, vector<8x1024xf32> -> vector<8x1024xf32>
    %99 = arith.addf %94, %98 : vector<8x1024xf32>
    %c19 = arith.constant 19 : index
    %c0_61 = arith.constant 0 : index
    %c0_62 = arith.constant 0 : index
    %100 = vector.load %arg2[%c19, %c0_61, %c0_62] : memref<27x8x8xf32, #tpu.memory_space<vmem>>, vector<1x8x8xf32>
    %101 = vector.shape_cast %100 : vector<1x8x8xf32> to vector<8x8xf32>
    %102 = vector.extract_strided_slice %3 {offsets = [0, 201], sizes = [8, 1024], strides = [1, 1]} : vector<8x1246xf32> to vector<8x1024xf32>
    %cst_63 = arith.constant dense<0.000000e+00> : vector<8x1024xf32>
    %103 = tpu.matmul %101, %102, %cst_63 {dimension_numbers = #tpu.dot_dimension_numbers<[1], [0], [0], [1], [0, 0, 1, 1], [], []>} : vector<8x8xf32>, vector<8x1024xf32>, vector<8x1024xf32> -> vector<8x1024xf32>
    %104 = arith.addf %99, %103 : vector<8x1024xf32>
    %c20 = arith.constant 20 : index
    %c0_64 = arith.constant 0 : index
    %c0_65 = arith.constant 0 : index
    %105 = vector.load %arg2[%c20, %c0_64, %c0_65] : memref<27x8x8xf32, #tpu.memory_space<vmem>>, vector<1x8x8xf32>
    %106 = vector.shape_cast %105 : vector<1x8x8xf32> to vector<8x8xf32>
    %107 = vector.extract_strided_slice %3 {offsets = [0, 202], sizes = [8, 1024], strides = [1, 1]} : vector<8x1246xf32> to vector<8x1024xf32>
    %cst_66 = arith.constant dense<0.000000e+00> : vector<8x1024xf32>
    %108 = tpu.matmul %106, %107, %cst_66 {dimension_numbers = #tpu.dot_dimension_numbers<[1], [0], [0], [1], [0, 0, 1, 1], [], []>} : vector<8x8xf32>, vector<8x1024xf32>, vector<8x1024xf32> -> vector<8x1024xf32>
    %109 = arith.addf %104, %108 : vector<8x1024xf32>
    %c21 = arith.constant 21 : index
    %c0_67 = arith.constant 0 : index
    %c0_68 = arith.constant 0 : index
    %110 = vector.load %arg2[%c21, %c0_67, %c0_68] : memref<27x8x8xf32, #tpu.memory_space<vmem>>, vector<1x8x8xf32>
    %111 = vector.shape_cast %110 : vector<1x8x8xf32> to vector<8x8xf32>
    %112 = vector.extract_strided_slice %3 {offsets = [0, 210], sizes = [8, 1024], strides = [1, 1]} : vector<8x1246xf32> to vector<8x1024xf32>
    %cst_69 = arith.constant dense<0.000000e+00> : vector<8x1024xf32>
    %113 = tpu.matmul %111, %112, %cst_69 {dimension_numbers = #tpu.dot_dimension_numbers<[1], [0], [0], [1], [0, 0, 1, 1], [], []>} : vector<8x8xf32>, vector<8x1024xf32>, vector<8x1024xf32> -> vector<8x1024xf32>
    %114 = arith.addf %109, %113 : vector<8x1024xf32>
    %c22 = arith.constant 22 : index
    %c0_70 = arith.constant 0 : index
    %c0_71 = arith.constant 0 : index
    %115 = vector.load %arg2[%c22, %c0_70, %c0_71] : memref<27x8x8xf32, #tpu.memory_space<vmem>>, vector<1x8x8xf32>
    %116 = vector.shape_cast %115 : vector<1x8x8xf32> to vector<8x8xf32>
    %117 = vector.extract_strided_slice %3 {offsets = [0, 211], sizes = [8, 1024], strides = [1, 1]} : vector<8x1246xf32> to vector<8x1024xf32>
    %cst_72 = arith.constant dense<0.000000e+00> : vector<8x1024xf32>
    %118 = tpu.matmul %116, %117, %cst_72 {dimension_numbers = #tpu.dot_dimension_numbers<[1], [0], [0], [1], [0, 0, 1, 1], [], []>} : vector<8x8xf32>, vector<8x1024xf32>, vector<8x1024xf32> -> vector<8x1024xf32>
    %119 = arith.addf %114, %118 : vector<8x1024xf32>
    %c23 = arith.constant 23 : index
    %c0_73 = arith.constant 0 : index
    %c0_74 = arith.constant 0 : index
    %120 = vector.load %arg2[%c23, %c0_73, %c0_74] : memref<27x8x8xf32, #tpu.memory_space<vmem>>, vector<1x8x8xf32>
    %121 = vector.shape_cast %120 : vector<1x8x8xf32> to vector<8x8xf32>
    %122 = vector.extract_strided_slice %3 {offsets = [0, 212], sizes = [8, 1024], strides = [1, 1]} : vector<8x1246xf32> to vector<8x1024xf32>
    %cst_75 = arith.constant dense<0.000000e+00> : vector<8x1024xf32>
    %123 = tpu.matmul %121, %122, %cst_75 {dimension_numbers = #tpu.dot_dimension_numbers<[1], [0], [0], [1], [0, 0, 1, 1], [], []>} : vector<8x8xf32>, vector<8x1024xf32>, vector<8x1024xf32> -> vector<8x1024xf32>
    %124 = arith.addf %119, %123 : vector<8x1024xf32>
    %c24 = arith.constant 24 : index
    %c0_76 = arith.constant 0 : index
    %c0_77 = arith.constant 0 : index
    %125 = vector.load %arg2[%c24, %c0_76, %c0_77] : memref<27x8x8xf32, #tpu.memory_space<vmem>>, vector<1x8x8xf32>
    %126 = vector.shape_cast %125 : vector<1x8x8xf32> to vector<8x8xf32>
    %127 = vector.extract_strided_slice %3 {offsets = [0, 220], sizes = [8, 1024], strides = [1, 1]} : vector<8x1246xf32> to vector<8x1024xf32>
    %cst_78 = arith.constant dense<0.000000e+00> : vector<8x1024xf32>
    %128 = tpu.matmul %126, %127, %cst_78 {dimension_numbers = #tpu.dot_dimension_numbers<[1], [0], [0], [1], [0, 0, 1, 1], [], []>} : vector<8x8xf32>, vector<8x1024xf32>, vector<8x1024xf32> -> vector<8x1024xf32>
    %129 = arith.addf %124, %128 : vector<8x1024xf32>
    %c25 = arith.constant 25 : index
    %c0_79 = arith.constant 0 : index
    %c0_80 = arith.constant 0 : index
    %130 = vector.load %arg2[%c25, %c0_79, %c0_80] : memref<27x8x8xf32, #tpu.memory_space<vmem>>, vector<1x8x8xf32>
    %131 = vector.shape_cast %130 : vector<1x8x8xf32> to vector<8x8xf32>
    %132 = vector.extract_strided_slice %3 {offsets = [0, 221], sizes = [8, 1024], strides = [1, 1]} : vector<8x1246xf32> to vector<8x1024xf32>
    %cst_81 = arith.constant dense<0.000000e+00> : vector<8x1024xf32>
    %133 = tpu.matmul %131, %132, %cst_81 {dimension_numbers = #tpu.dot_dimension_numbers<[1], [0], [0], [1], [0, 0, 1, 1], [], []>} : vector<8x8xf32>, vector<8x1024xf32>, vector<8x1024xf32> -> vector<8x1024xf32>
    %134 = arith.addf %129, %133 : vector<8x1024xf32>
    %c26 = arith.constant 26 : index
    %c0_82 = arith.constant 0 : index
    %c0_83 = arith.constant 0 : index
    %135 = vector.load %arg2[%c26, %c0_82, %c0_83] : memref<27x8x8xf32, #tpu.memory_space<vmem>>, vector<1x8x8xf32>
    %136 = vector.shape_cast %135 : vector<1x8x8xf32> to vector<8x8xf32>
    %137 = vector.extract_strided_slice %3 {offsets = [0, 222], sizes = [8, 1024], strides = [1, 1]} : vector<8x1246xf32> to vector<8x1024xf32>
    %cst_84 = arith.constant dense<0.000000e+00> : vector<8x1024xf32>
    %138 = tpu.matmul %136, %137, %cst_84 {dimension_numbers = #tpu.dot_dimension_numbers<[1], [0], [0], [1], [0, 0, 1, 1], [], []>} : vector<8x8xf32>, vector<8x1024xf32>, vector<8x1024xf32> -> vector<8x1024xf32>
    %139 = arith.addf %134, %138 : vector<8x1024xf32>
    %c0_85 = arith.constant 0 : index
    %c0_86 = arith.constant 0 : index
    %c0_87 = arith.constant 0 : index
    %140 = vector.load %arg4[%c0_85, %c0_86, %c0_87] : memref<1x8x1024xf32, #tpu.memory_space<vmem>>, vector<1x8x1024xf32>
    %141 = vector.shape_cast %140 : vector<1x8x1024xf32> to vector<8x1024xf32>
    %142 = vector.shape_cast %139 : vector<8x1024xf32> to vector<1x8x1024xf32>
    tpu.vector_store %arg4[%c0_85, %c0_86, %c0_87], %142 {strides = array<i32>} : memref<1x8x1024xf32, #tpu.memory_space<vmem>>, vector<1x8x1024xf32>,
    %c0_88 = arith.constant 0 : index
    %c0_89 = arith.constant 0 : index
    %143 = vector.load %arg3[%c0_88, %c0_89] : memref<1x1024xf32, #tpu.memory_space<vmem>>, vector<1x1024xf32>
    %144 = vector.broadcast %143 : vector<1x1024xf32> to vector<8x1024xf32>
    %145 = arith.mulf %139, %144 : vector<8x1024xf32>
    %cst_90 = arith.constant dense<0.000000e+00> : vector<8xf32>
    %146 = vector.multi_reduction <add>, %145, %cst_90 [1] : vector<8x1024xf32> to vector<8xf32>
    %147 = vector.shape_cast %146 : vector<8xf32> to vector<8x1xf32>
    %148 = arith.mulf %145, %139 : vector<8x1024xf32>
    %cst_91 = arith.constant dense<0.000000e+00> : vector<8xf32>
    %149 = vector.multi_reduction <add>, %148, %cst_91 [1] : vector<8x1024xf32> to vector<8xf32>
    %150 = vector.shape_cast %149 : vector<8xf32> to vector<8x1xf32>
    %cst_92 = arith.constant 0.000000e+00 : f32
    %151 = vector.broadcast %cst_92 : f32 to vector<1x1024xf32>
    %152 = arith.cmpf ogt, %143, %151 : vector<1x1024xf32>
    %cst_93 = arith.constant 0xFF800000 : f32
    %153 = vector.shape_cast %152 : vector<1x1024xi1> to vector<1x1024xi1>
    %154 = vector.broadcast %153 : vector<1x1024xi1> to vector<8x1024xi1>
    %155 = vector.broadcast %cst_93 : f32 to vector<8x1024xf32>
    %156 = arith.select %154, %139, %155 : vector<8x1024xi1>, vector<8x1024xf32>
    %cst_94 = arith.constant dense<0xFF800000> : vector<8xf32>
    %157 = vector.multi_reduction <maximumf>, %156, %cst_94 [1] : vector<8x1024xf32> to vector<8xf32>
    %158 = vector.shape_cast %157 : vector<8xf32> to vector<8x1xf32>
    %cst_95 = arith.constant 0.000000e+00 : f32
    %159 = vector.broadcast %cst_95 : f32 to vector<1x1024xf32>
    %160 = arith.cmpf ogt, %143, %159 : vector<1x1024xf32>
    %cst_96 = arith.constant 0x7F800000 : f32
    %161 = vector.shape_cast %160 : vector<1x1024xi1> to vector<1x1024xi1>
    %162 = vector.broadcast %161 : vector<1x1024xi1> to vector<8x1024xi1>
    %163 = vector.broadcast %cst_96 : f32 to vector<8x1024xf32>
    %164 = arith.select %162, %139, %163 : vector<8x1024xi1>, vector<8x1024xf32>
    %cst_97 = arith.constant dense<0x7F800000> : vector<8xf32>
    %165 = vector.multi_reduction <minimumf>, %164, %cst_97 [1] : vector<8x1024xf32> to vector<8xf32>
    %166 = vector.shape_cast %165 : vector<8xf32> to vector<8x1xf32>
    %cst_98 = arith.constant 0.000000e+00 : f32
    %167 = vector.broadcast %cst_98 : f32 to vector<8x4xf32>
    %168 = tpu.concatenate %147, %150, %158, %166, %167 in 1 : vector<8x1xf32>, vector<8x1xf32>, vector<8x1xf32>, vector<8x1xf32>, vector<8x4xf32> -> vector<8x8xf32>
    %c0_99 = arith.constant 0 : index
    %c0_100 = arith.constant 0 : index
    %c0_101 = arith.constant 0 : index
    %169 = vector.load %arg5[%c0_99, %c0_100, %c0_101] : memref<1x8x8xf32, #tpu.memory_space<vmem>>, vector<1x8x8xf32>
    %170 = vector.shape_cast %169 : vector<1x8x8xf32> to vector<8x8xf32>
    %171 = vector.shape_cast %168 : vector<8x8xf32> to vector<1x8x8xf32>
    tpu.vector_store %arg5[%c0_99, %c0_100, %c0_101], %171 {strides = array<i32>} : memref<1x8x8xf32, #tpu.memory_space<vmem>>, vector<1x8x8xf32>,
    return
  }
  func.func @transform_0(%arg0: i32) -> (i32, i32, i32) {
    %c0_i32 = arith.constant 0 : i32
    %c0_i32_0 = arith.constant 0 : i32
    %c0_i32_1 = arith.constant 0 : i32
    return %arg0, %c0_i32, %c0_i32_0 : i32, i32, i32
  }
  func.func @transform_1(%arg0: i32) -> (i32, i32, i32) {
    %c0_i32 = arith.constant 0 : i32
    %c0_i32_0 = arith.constant 0 : i32
    %c0_i32_1 = arith.constant 0 : i32
    %c0_i32_2 = arith.constant 0 : i32
    return %c0_i32, %c0_i32_0, %c0_i32_1 : i32, i32, i32
  }
  func.func @transform_2(%arg0: i32) -> (i32, i32) {
    %c0_i32 = arith.constant 0 : i32
    %c0_i32_0 = arith.constant 0 : i32
    %c0_i32_1 = arith.constant 0 : i32
    return %c0_i32, %c0_i32_0 : i32, i32
  }
  func.func @transform_3(%arg0: i32) -> (i32, i32, i32) {
    %c0_i32 = arith.constant 0 : i32
    %c0_i32_0 = arith.constant 0 : i32
    %c0_i32_1 = arith.constant 0 : i32
    return %arg0, %c0_i32, %c0_i32_0 : i32, i32, i32
  }
  func.func @transform_4(%arg0: i32) -> (i32, i32, i32) {
    %c0_i32 = arith.constant 0 : i32
    %c0_i32_0 = arith.constant 0 : i32
    %c0_i32_1 = arith.constant 0 : i32
    return %arg0, %c0_i32, %c0_i32_0 : i32, i32, i32
  }
}

module attributes {stable_mosaic.version = 11 : i64} {
  func.func @kernel(%arg0: i32, %arg1: memref<1x8x1024xf32, #tpu.memory_space<vmem>>, %arg2: memref<27x8x8xf32, #tpu.memory_space<vmem>>, %arg3: memref<1x1024xf32, #tpu.memory_space<vmem>>, %arg4: memref<8x1xf32, #tpu.memory_space<vmem>>, %arg5: memref<8x1xf32, #tpu.memory_space<vmem>>, %arg6: memref<1x8x1024xf32, #tpu.memory_space<vmem>>, %arg7: memref<1x8x8xf32, #tpu.memory_space<vmem>>) attributes {dimension_semantics = [#tpu.dimension_semantics<parallel>], iteration_bounds = array<i64: 2>, scalar_prefetch = 0 : i64, scratch_operands = 0 : i64, tpu.core_type = #tpu.core_type<tc>, window_params = [{transform_indices = @transform_0, window_bounds = array<i64: 1, 8, 1024>}, {pipeline_mode = #tpu.pipeline_mode<synchronous>, transform_indices = @transform_1, window_bounds = array<i64: 27, 8, 8>}, {pipeline_mode = #tpu.pipeline_mode<synchronous>, transform_indices = @transform_2, window_bounds = array<i64: 1, 1024>}, {pipeline_mode = #tpu.pipeline_mode<synchronous>, transform_indices = @transform_3, window_bounds = array<i64: 8, 1>}, {pipeline_mode = #tpu.pipeline_mode<synchronous>, transform_indices = @transform_4, window_bounds = array<i64: 8, 1>}, {transform_indices = @transform_5, window_bounds = array<i64: 1, 8, 1024>}, {transform_indices = @transform_6, window_bounds = array<i64: 1, 8, 8>}]} {
    %c0 = arith.constant 0 : index
    %c0_0 = arith.constant 0 : index
    %c0_1 = arith.constant 0 : index
    %0 = vector.load %arg1[%c0, %c0_0, %c0_1] : memref<1x8x1024xf32, #tpu.memory_space<vmem>>, vector<1x8x1024xf32>
    %1 = vector.shape_cast %0 : vector<1x8x1024xf32> to vector<8x1024xf32>
    %c0_2 = arith.constant 0 : index
    %c0_3 = arith.constant 0 : index
    %2 = vector.load %arg4[%c0_2, %c0_3] : memref<8x1xf32, #tpu.memory_space<vmem>>, vector<8x1xf32>
    %3 = vector.broadcast %2 : vector<8x1xf32> to vector<8x1024xf32>
    %4 = arith.mulf %1, %3 : vector<8x1024xf32>
    %c0_4 = arith.constant 0 : index
    %c0_5 = arith.constant 0 : index
    %5 = vector.load %arg5[%c0_4, %c0_5] : memref<8x1xf32, #tpu.memory_space<vmem>>, vector<8x1xf32>
    %6 = vector.broadcast %5 : vector<8x1xf32> to vector<8x1024xf32>
    %7 = arith.addf %4, %6 : vector<8x1024xf32>
    %cst = arith.constant 0.000000e+00 : f32
    %8 = vector.broadcast %cst : f32 to vector<8x1024xf32>
    %9 = arith.maximumf %7, %8 : vector<8x1024xf32>
    %c0_6 = arith.constant 0 : index
    %c0_7 = arith.constant 0 : index
    %10 = vector.load %arg3[%c0_6, %c0_7] : memref<1x1024xf32, #tpu.memory_space<vmem>>, vector<1x1024xf32>
    %11 = vector.broadcast %10 : vector<1x1024xf32> to vector<8x1024xf32>
    %12 = arith.mulf %9, %11 : vector<8x1024xf32>
    %cst_8 = arith.constant 0.000000e+00 : f32
    %13 = vector.broadcast %cst_8 : f32 to vector<8x111xf32>
    %14 = tpu.concatenate %13, %12, %13 in 1 : vector<8x111xf32>, vector<8x1024xf32>, vector<8x111xf32> -> vector<8x1246xf32>
    %cst_9 = arith.constant 0.000000e+00 : f32
    %15 = vector.broadcast %cst_9 : f32 to vector<8x1024xf32>
    %c0_10 = arith.constant 0 : index
    %c0_11 = arith.constant 0 : index
    %c0_12 = arith.constant 0 : index
    %16 = vector.load %arg2[%c0_10, %c0_11, %c0_12] : memref<27x8x8xf32, #tpu.memory_space<vmem>>, vector<1x8x8xf32>
    %17 = vector.shape_cast %16 : vector<1x8x8xf32> to vector<8x8xf32>
    %18 = vector.extract_strided_slice %14 {offsets = [0, 0], sizes = [8, 1024], strides = [1, 1]} : vector<8x1246xf32> to vector<8x1024xf32>
    %cst_13 = arith.constant dense<0.000000e+00> : vector<8x1024xf32>
    %19 = tpu.matmul %17, %18, %cst_13 {dimension_numbers = #tpu.dot_dimension_numbers<[1], [0], [0], [1], [0, 0, 1, 1], [], []>} : vector<8x8xf32>, vector<8x1024xf32>, vector<8x1024xf32> -> vector<8x1024xf32>
    %20 = arith.addf %15, %19 : vector<8x1024xf32>
    %c1 = arith.constant 1 : index
    %c0_14 = arith.constant 0 : index
    %c0_15 = arith.constant 0 : index
    %21 = vector.load %arg2[%c1, %c0_14, %c0_15] : memref<27x8x8xf32, #tpu.memory_space<vmem>>, vector<1x8x8xf32>
    %22 = vector.shape_cast %21 : vector<1x8x8xf32> to vector<8x8xf32>
    %23 = vector.extract_strided_slice %14 {offsets = [0, 1], sizes = [8, 1024], strides = [1, 1]} : vector<8x1246xf32> to vector<8x1024xf32>
    %cst_16 = arith.constant dense<0.000000e+00> : vector<8x1024xf32>
    %24 = tpu.matmul %22, %23, %cst_16 {dimension_numbers = #tpu.dot_dimension_numbers<[1], [0], [0], [1], [0, 0, 1, 1], [], []>} : vector<8x8xf32>, vector<8x1024xf32>, vector<8x1024xf32> -> vector<8x1024xf32>
    %25 = arith.addf %20, %24 : vector<8x1024xf32>
    %c2 = arith.constant 2 : index
    %c0_17 = arith.constant 0 : index
    %c0_18 = arith.constant 0 : index
    %26 = vector.load %arg2[%c2, %c0_17, %c0_18] : memref<27x8x8xf32, #tpu.memory_space<vmem>>, vector<1x8x8xf32>
    %27 = vector.shape_cast %26 : vector<1x8x8xf32> to vector<8x8xf32>
    %28 = vector.extract_strided_slice %14 {offsets = [0, 2], sizes = [8, 1024], strides = [1, 1]} : vector<8x1246xf32> to vector<8x1024xf32>
    %cst_19 = arith.constant dense<0.000000e+00> : vector<8x1024xf32>
    %29 = tpu.matmul %27, %28, %cst_19 {dimension_numbers = #tpu.dot_dimension_numbers<[1], [0], [0], [1], [0, 0, 1, 1], [], []>} : vector<8x8xf32>, vector<8x1024xf32>, vector<8x1024xf32> -> vector<8x1024xf32>
    %30 = arith.addf %25, %29 : vector<8x1024xf32>
    %c3 = arith.constant 3 : index
    %c0_20 = arith.constant 0 : index
    %c0_21 = arith.constant 0 : index
    %31 = vector.load %arg2[%c3, %c0_20, %c0_21] : memref<27x8x8xf32, #tpu.memory_space<vmem>>, vector<1x8x8xf32>
    %32 = vector.shape_cast %31 : vector<1x8x8xf32> to vector<8x8xf32>
    %33 = vector.extract_strided_slice %14 {offsets = [0, 10], sizes = [8, 1024], strides = [1, 1]} : vector<8x1246xf32> to vector<8x1024xf32>
    %cst_22 = arith.constant dense<0.000000e+00> : vector<8x1024xf32>
    %34 = tpu.matmul %32, %33, %cst_22 {dimension_numbers = #tpu.dot_dimension_numbers<[1], [0], [0], [1], [0, 0, 1, 1], [], []>} : vector<8x8xf32>, vector<8x1024xf32>, vector<8x1024xf32> -> vector<8x1024xf32>
    %35 = arith.addf %30, %34 : vector<8x1024xf32>
    %c4 = arith.constant 4 : index
    %c0_23 = arith.constant 0 : index
    %c0_24 = arith.constant 0 : index
    %36 = vector.load %arg2[%c4, %c0_23, %c0_24] : memref<27x8x8xf32, #tpu.memory_space<vmem>>, vector<1x8x8xf32>
    %37 = vector.shape_cast %36 : vector<1x8x8xf32> to vector<8x8xf32>
    %38 = vector.extract_strided_slice %14 {offsets = [0, 11], sizes = [8, 1024], strides = [1, 1]} : vector<8x1246xf32> to vector<8x1024xf32>
    %cst_25 = arith.constant dense<0.000000e+00> : vector<8x1024xf32>
    %39 = tpu.matmul %37, %38, %cst_25 {dimension_numbers = #tpu.dot_dimension_numbers<[1], [0], [0], [1], [0, 0, 1, 1], [], []>} : vector<8x8xf32>, vector<8x1024xf32>, vector<8x1024xf32> -> vector<8x1024xf32>
    %40 = arith.addf %35, %39 : vector<8x1024xf32>
    %c5 = arith.constant 5 : index
    %c0_26 = arith.constant 0 : index
    %c0_27 = arith.constant 0 : index
    %41 = vector.load %arg2[%c5, %c0_26, %c0_27] : memref<27x8x8xf32, #tpu.memory_space<vmem>>, vector<1x8x8xf32>
    %42 = vector.shape_cast %41 : vector<1x8x8xf32> to vector<8x8xf32>
    %43 = vector.extract_strided_slice %14 {offsets = [0, 12], sizes = [8, 1024], strides = [1, 1]} : vector<8x1246xf32> to vector<8x1024xf32>
    %cst_28 = arith.constant dense<0.000000e+00> : vector<8x1024xf32>
    %44 = tpu.matmul %42, %43, %cst_28 {dimension_numbers = #tpu.dot_dimension_numbers<[1], [0], [0], [1], [0, 0, 1, 1], [], []>} : vector<8x8xf32>, vector<8x1024xf32>, vector<8x1024xf32> -> vector<8x1024xf32>
    %45 = arith.addf %40, %44 : vector<8x1024xf32>
    %c6 = arith.constant 6 : index
    %c0_29 = arith.constant 0 : index
    %c0_30 = arith.constant 0 : index
    %46 = vector.load %arg2[%c6, %c0_29, %c0_30] : memref<27x8x8xf32, #tpu.memory_space<vmem>>, vector<1x8x8xf32>
    %47 = vector.shape_cast %46 : vector<1x8x8xf32> to vector<8x8xf32>
    %48 = vector.extract_strided_slice %14 {offsets = [0, 20], sizes = [8, 1024], strides = [1, 1]} : vector<8x1246xf32> to vector<8x1024xf32>
    %cst_31 = arith.constant dense<0.000000e+00> : vector<8x1024xf32>
    %49 = tpu.matmul %47, %48, %cst_31 {dimension_numbers = #tpu.dot_dimension_numbers<[1], [0], [0], [1], [0, 0, 1, 1], [], []>} : vector<8x8xf32>, vector<8x1024xf32>, vector<8x1024xf32> -> vector<8x1024xf32>
    %50 = arith.addf %45, %49 : vector<8x1024xf32>
    %c7 = arith.constant 7 : index
    %c0_32 = arith.constant 0 : index
    %c0_33 = arith.constant 0 : index
    %51 = vector.load %arg2[%c7, %c0_32, %c0_33] : memref<27x8x8xf32, #tpu.memory_space<vmem>>, vector<1x8x8xf32>
    %52 = vector.shape_cast %51 : vector<1x8x8xf32> to vector<8x8xf32>
    %53 = vector.extract_strided_slice %14 {offsets = [0, 21], sizes = [8, 1024], strides = [1, 1]} : vector<8x1246xf32> to vector<8x1024xf32>
    %cst_34 = arith.constant dense<0.000000e+00> : vector<8x1024xf32>
    %54 = tpu.matmul %52, %53, %cst_34 {dimension_numbers = #tpu.dot_dimension_numbers<[1], [0], [0], [1], [0, 0, 1, 1], [], []>} : vector<8x8xf32>, vector<8x1024xf32>, vector<8x1024xf32> -> vector<8x1024xf32>
    %55 = arith.addf %50, %54 : vector<8x1024xf32>
    %c8 = arith.constant 8 : index
    %c0_35 = arith.constant 0 : index
    %c0_36 = arith.constant 0 : index
    %56 = vector.load %arg2[%c8, %c0_35, %c0_36] : memref<27x8x8xf32, #tpu.memory_space<vmem>>, vector<1x8x8xf32>
    %57 = vector.shape_cast %56 : vector<1x8x8xf32> to vector<8x8xf32>
    %58 = vector.extract_strided_slice %14 {offsets = [0, 22], sizes = [8, 1024], strides = [1, 1]} : vector<8x1246xf32> to vector<8x1024xf32>
    %cst_37 = arith.constant dense<0.000000e+00> : vector<8x1024xf32>
    %59 = tpu.matmul %57, %58, %cst_37 {dimension_numbers = #tpu.dot_dimension_numbers<[1], [0], [0], [1], [0, 0, 1, 1], [], []>} : vector<8x8xf32>, vector<8x1024xf32>, vector<8x1024xf32> -> vector<8x1024xf32>
    %60 = arith.addf %55, %59 : vector<8x1024xf32>
    %c9 = arith.constant 9 : index
    %c0_38 = arith.constant 0 : index
    %c0_39 = arith.constant 0 : index
    %61 = vector.load %arg2[%c9, %c0_38, %c0_39] : memref<27x8x8xf32, #tpu.memory_space<vmem>>, vector<1x8x8xf32>
    %62 = vector.shape_cast %61 : vector<1x8x8xf32> to vector<8x8xf32>
    %63 = vector.extract_strided_slice %14 {offsets = [0, 100], sizes = [8, 1024], strides = [1, 1]} : vector<8x1246xf32> to vector<8x1024xf32>
    %cst_40 = arith.constant dense<0.000000e+00> : vector<8x1024xf32>
    %64 = tpu.matmul %62, %63, %cst_40 {dimension_numbers = #tpu.dot_dimension_numbers<[1], [0], [0], [1], [0, 0, 1, 1], [], []>} : vector<8x8xf32>, vector<8x1024xf32>, vector<8x1024xf32> -> vector<8x1024xf32>
    %65 = arith.addf %60, %64 : vector<8x1024xf32>
    %c10 = arith.constant 10 : index
    %c0_41 = arith.constant 0 : index
    %c0_42 = arith.constant 0 : index
    %66 = vector.load %arg2[%c10, %c0_41, %c0_42] : memref<27x8x8xf32, #tpu.memory_space<vmem>>, vector<1x8x8xf32>
    %67 = vector.shape_cast %66 : vector<1x8x8xf32> to vector<8x8xf32>
    %68 = vector.extract_strided_slice %14 {offsets = [0, 101], sizes = [8, 1024], strides = [1, 1]} : vector<8x1246xf32> to vector<8x1024xf32>
    %cst_43 = arith.constant dense<0.000000e+00> : vector<8x1024xf32>
    %69 = tpu.matmul %67, %68, %cst_43 {dimension_numbers = #tpu.dot_dimension_numbers<[1], [0], [0], [1], [0, 0, 1, 1], [], []>} : vector<8x8xf32>, vector<8x1024xf32>, vector<8x1024xf32> -> vector<8x1024xf32>
    %70 = arith.addf %65, %69 : vector<8x1024xf32>
    %c11 = arith.constant 11 : index
    %c0_44 = arith.constant 0 : index
    %c0_45 = arith.constant 0 : index
    %71 = vector.load %arg2[%c11, %c0_44, %c0_45] : memref<27x8x8xf32, #tpu.memory_space<vmem>>, vector<1x8x8xf32>
    %72 = vector.shape_cast %71 : vector<1x8x8xf32> to vector<8x8xf32>
    %73 = vector.extract_strided_slice %14 {offsets = [0, 102], sizes = [8, 1024], strides = [1, 1]} : vector<8x1246xf32> to vector<8x1024xf32>
    %cst_46 = arith.constant dense<0.000000e+00> : vector<8x1024xf32>
    %74 = tpu.matmul %72, %73, %cst_46 {dimension_numbers = #tpu.dot_dimension_numbers<[1], [0], [0], [1], [0, 0, 1, 1], [], []>} : vector<8x8xf32>, vector<8x1024xf32>, vector<8x1024xf32> -> vector<8x1024xf32>
    %75 = arith.addf %70, %74 : vector<8x1024xf32>
    %c12 = arith.constant 12 : index
    %c0_47 = arith.constant 0 : index
    %c0_48 = arith.constant 0 : index
    %76 = vector.load %arg2[%c12, %c0_47, %c0_48] : memref<27x8x8xf32, #tpu.memory_space<vmem>>, vector<1x8x8xf32>
    %77 = vector.shape_cast %76 : vector<1x8x8xf32> to vector<8x8xf32>
    %78 = vector.extract_strided_slice %14 {offsets = [0, 110], sizes = [8, 1024], strides = [1, 1]} : vector<8x1246xf32> to vector<8x1024xf32>
    %cst_49 = arith.constant dense<0.000000e+00> : vector<8x1024xf32>
    %79 = tpu.matmul %77, %78, %cst_49 {dimension_numbers = #tpu.dot_dimension_numbers<[1], [0], [0], [1], [0, 0, 1, 1], [], []>} : vector<8x8xf32>, vector<8x1024xf32>, vector<8x1024xf32> -> vector<8x1024xf32>
    %80 = arith.addf %75, %79 : vector<8x1024xf32>
    %c13 = arith.constant 13 : index
    %c0_50 = arith.constant 0 : index
    %c0_51 = arith.constant 0 : index
    %81 = vector.load %arg2[%c13, %c0_50, %c0_51] : memref<27x8x8xf32, #tpu.memory_space<vmem>>, vector<1x8x8xf32>
    %82 = vector.shape_cast %81 : vector<1x8x8xf32> to vector<8x8xf32>
    %83 = vector.extract_strided_slice %14 {offsets = [0, 111], sizes = [8, 1024], strides = [1, 1]} : vector<8x1246xf32> to vector<8x1024xf32>
    %cst_52 = arith.constant dense<0.000000e+00> : vector<8x1024xf32>
    %84 = tpu.matmul %82, %83, %cst_52 {dimension_numbers = #tpu.dot_dimension_numbers<[1], [0], [0], [1], [0, 0, 1, 1], [], []>} : vector<8x8xf32>, vector<8x1024xf32>, vector<8x1024xf32> -> vector<8x1024xf32>
    %85 = arith.addf %80, %84 : vector<8x1024xf32>
    %c14 = arith.constant 14 : index
    %c0_53 = arith.constant 0 : index
    %c0_54 = arith.constant 0 : index
    %86 = vector.load %arg2[%c14, %c0_53, %c0_54] : memref<27x8x8xf32, #tpu.memory_space<vmem>>, vector<1x8x8xf32>
    %87 = vector.shape_cast %86 : vector<1x8x8xf32> to vector<8x8xf32>
    %88 = vector.extract_strided_slice %14 {offsets = [0, 112], sizes = [8, 1024], strides = [1, 1]} : vector<8x1246xf32> to vector<8x1024xf32>
    %cst_55 = arith.constant dense<0.000000e+00> : vector<8x1024xf32>
    %89 = tpu.matmul %87, %88, %cst_55 {dimension_numbers = #tpu.dot_dimension_numbers<[1], [0], [0], [1], [0, 0, 1, 1], [], []>} : vector<8x8xf32>, vector<8x1024xf32>, vector<8x1024xf32> -> vector<8x1024xf32>
    %90 = arith.addf %85, %89 : vector<8x1024xf32>
    %c15 = arith.constant 15 : index
    %c0_56 = arith.constant 0 : index
    %c0_57 = arith.constant 0 : index
    %91 = vector.load %arg2[%c15, %c0_56, %c0_57] : memref<27x8x8xf32, #tpu.memory_space<vmem>>, vector<1x8x8xf32>
    %92 = vector.shape_cast %91 : vector<1x8x8xf32> to vector<8x8xf32>
    %93 = vector.extract_strided_slice %14 {offsets = [0, 120], sizes = [8, 1024], strides = [1, 1]} : vector<8x1246xf32> to vector<8x1024xf32>
    %cst_58 = arith.constant dense<0.000000e+00> : vector<8x1024xf32>
    %94 = tpu.matmul %92, %93, %cst_58 {dimension_numbers = #tpu.dot_dimension_numbers<[1], [0], [0], [1], [0, 0, 1, 1], [], []>} : vector<8x8xf32>, vector<8x1024xf32>, vector<8x1024xf32> -> vector<8x1024xf32>
    %95 = arith.addf %90, %94 : vector<8x1024xf32>
    %c16 = arith.constant 16 : index
    %c0_59 = arith.constant 0 : index
    %c0_60 = arith.constant 0 : index
    %96 = vector.load %arg2[%c16, %c0_59, %c0_60] : memref<27x8x8xf32, #tpu.memory_space<vmem>>, vector<1x8x8xf32>
    %97 = vector.shape_cast %96 : vector<1x8x8xf32> to vector<8x8xf32>
    %98 = vector.extract_strided_slice %14 {offsets = [0, 121], sizes = [8, 1024], strides = [1, 1]} : vector<8x1246xf32> to vector<8x1024xf32>
    %cst_61 = arith.constant dense<0.000000e+00> : vector<8x1024xf32>
    %99 = tpu.matmul %97, %98, %cst_61 {dimension_numbers = #tpu.dot_dimension_numbers<[1], [0], [0], [1], [0, 0, 1, 1], [], []>} : vector<8x8xf32>, vector<8x1024xf32>, vector<8x1024xf32> -> vector<8x1024xf32>
    %100 = arith.addf %95, %99 : vector<8x1024xf32>
    %c17 = arith.constant 17 : index
    %c0_62 = arith.constant 0 : index
    %c0_63 = arith.constant 0 : index
    %101 = vector.load %arg2[%c17, %c0_62, %c0_63] : memref<27x8x8xf32, #tpu.memory_space<vmem>>, vector<1x8x8xf32>
    %102 = vector.shape_cast %101 : vector<1x8x8xf32> to vector<8x8xf32>
    %103 = vector.extract_strided_slice %14 {offsets = [0, 122], sizes = [8, 1024], strides = [1, 1]} : vector<8x1246xf32> to vector<8x1024xf32>
    %cst_64 = arith.constant dense<0.000000e+00> : vector<8x1024xf32>
    %104 = tpu.matmul %102, %103, %cst_64 {dimension_numbers = #tpu.dot_dimension_numbers<[1], [0], [0], [1], [0, 0, 1, 1], [], []>} : vector<8x8xf32>, vector<8x1024xf32>, vector<8x1024xf32> -> vector<8x1024xf32>
    %105 = arith.addf %100, %104 : vector<8x1024xf32>
    %c18 = arith.constant 18 : index
    %c0_65 = arith.constant 0 : index
    %c0_66 = arith.constant 0 : index
    %106 = vector.load %arg2[%c18, %c0_65, %c0_66] : memref<27x8x8xf32, #tpu.memory_space<vmem>>, vector<1x8x8xf32>
    %107 = vector.shape_cast %106 : vector<1x8x8xf32> to vector<8x8xf32>
    %108 = vector.extract_strided_slice %14 {offsets = [0, 200], sizes = [8, 1024], strides = [1, 1]} : vector<8x1246xf32> to vector<8x1024xf32>
    %cst_67 = arith.constant dense<0.000000e+00> : vector<8x1024xf32>
    %109 = tpu.matmul %107, %108, %cst_67 {dimension_numbers = #tpu.dot_dimension_numbers<[1], [0], [0], [1], [0, 0, 1, 1], [], []>} : vector<8x8xf32>, vector<8x1024xf32>, vector<8x1024xf32> -> vector<8x1024xf32>
    %110 = arith.addf %105, %109 : vector<8x1024xf32>
    %c19 = arith.constant 19 : index
    %c0_68 = arith.constant 0 : index
    %c0_69 = arith.constant 0 : index
    %111 = vector.load %arg2[%c19, %c0_68, %c0_69] : memref<27x8x8xf32, #tpu.memory_space<vmem>>, vector<1x8x8xf32>
    %112 = vector.shape_cast %111 : vector<1x8x8xf32> to vector<8x8xf32>
    %113 = vector.extract_strided_slice %14 {offsets = [0, 201], sizes = [8, 1024], strides = [1, 1]} : vector<8x1246xf32> to vector<8x1024xf32>
    %cst_70 = arith.constant dense<0.000000e+00> : vector<8x1024xf32>
    %114 = tpu.matmul %112, %113, %cst_70 {dimension_numbers = #tpu.dot_dimension_numbers<[1], [0], [0], [1], [0, 0, 1, 1], [], []>} : vector<8x8xf32>, vector<8x1024xf32>, vector<8x1024xf32> -> vector<8x1024xf32>
    %115 = arith.addf %110, %114 : vector<8x1024xf32>
    %c20 = arith.constant 20 : index
    %c0_71 = arith.constant 0 : index
    %c0_72 = arith.constant 0 : index
    %116 = vector.load %arg2[%c20, %c0_71, %c0_72] : memref<27x8x8xf32, #tpu.memory_space<vmem>>, vector<1x8x8xf32>
    %117 = vector.shape_cast %116 : vector<1x8x8xf32> to vector<8x8xf32>
    %118 = vector.extract_strided_slice %14 {offsets = [0, 202], sizes = [8, 1024], strides = [1, 1]} : vector<8x1246xf32> to vector<8x1024xf32>
    %cst_73 = arith.constant dense<0.000000e+00> : vector<8x1024xf32>
    %119 = tpu.matmul %117, %118, %cst_73 {dimension_numbers = #tpu.dot_dimension_numbers<[1], [0], [0], [1], [0, 0, 1, 1], [], []>} : vector<8x8xf32>, vector<8x1024xf32>, vector<8x1024xf32> -> vector<8x1024xf32>
    %120 = arith.addf %115, %119 : vector<8x1024xf32>
    %c21 = arith.constant 21 : index
    %c0_74 = arith.constant 0 : index
    %c0_75 = arith.constant 0 : index
    %121 = vector.load %arg2[%c21, %c0_74, %c0_75] : memref<27x8x8xf32, #tpu.memory_space<vmem>>, vector<1x8x8xf32>
    %122 = vector.shape_cast %121 : vector<1x8x8xf32> to vector<8x8xf32>
    %123 = vector.extract_strided_slice %14 {offsets = [0, 210], sizes = [8, 1024], strides = [1, 1]} : vector<8x1246xf32> to vector<8x1024xf32>
    %cst_76 = arith.constant dense<0.000000e+00> : vector<8x1024xf32>
    %124 = tpu.matmul %122, %123, %cst_76 {dimension_numbers = #tpu.dot_dimension_numbers<[1], [0], [0], [1], [0, 0, 1, 1], [], []>} : vector<8x8xf32>, vector<8x1024xf32>, vector<8x1024xf32> -> vector<8x1024xf32>
    %125 = arith.addf %120, %124 : vector<8x1024xf32>
    %c22 = arith.constant 22 : index
    %c0_77 = arith.constant 0 : index
    %c0_78 = arith.constant 0 : index
    %126 = vector.load %arg2[%c22, %c0_77, %c0_78] : memref<27x8x8xf32, #tpu.memory_space<vmem>>, vector<1x8x8xf32>
    %127 = vector.shape_cast %126 : vector<1x8x8xf32> to vector<8x8xf32>
    %128 = vector.extract_strided_slice %14 {offsets = [0, 211], sizes = [8, 1024], strides = [1, 1]} : vector<8x1246xf32> to vector<8x1024xf32>
    %cst_79 = arith.constant dense<0.000000e+00> : vector<8x1024xf32>
    %129 = tpu.matmul %127, %128, %cst_79 {dimension_numbers = #tpu.dot_dimension_numbers<[1], [0], [0], [1], [0, 0, 1, 1], [], []>} : vector<8x8xf32>, vector<8x1024xf32>, vector<8x1024xf32> -> vector<8x1024xf32>
    %130 = arith.addf %125, %129 : vector<8x1024xf32>
    %c23 = arith.constant 23 : index
    %c0_80 = arith.constant 0 : index
    %c0_81 = arith.constant 0 : index
    %131 = vector.load %arg2[%c23, %c0_80, %c0_81] : memref<27x8x8xf32, #tpu.memory_space<vmem>>, vector<1x8x8xf32>
    %132 = vector.shape_cast %131 : vector<1x8x8xf32> to vector<8x8xf32>
    %133 = vector.extract_strided_slice %14 {offsets = [0, 212], sizes = [8, 1024], strides = [1, 1]} : vector<8x1246xf32> to vector<8x1024xf32>
    %cst_82 = arith.constant dense<0.000000e+00> : vector<8x1024xf32>
    %134 = tpu.matmul %132, %133, %cst_82 {dimension_numbers = #tpu.dot_dimension_numbers<[1], [0], [0], [1], [0, 0, 1, 1], [], []>} : vector<8x8xf32>, vector<8x1024xf32>, vector<8x1024xf32> -> vector<8x1024xf32>
    %135 = arith.addf %130, %134 : vector<8x1024xf32>
    %c24 = arith.constant 24 : index
    %c0_83 = arith.constant 0 : index
    %c0_84 = arith.constant 0 : index
    %136 = vector.load %arg2[%c24, %c0_83, %c0_84] : memref<27x8x8xf32, #tpu.memory_space<vmem>>, vector<1x8x8xf32>
    %137 = vector.shape_cast %136 : vector<1x8x8xf32> to vector<8x8xf32>
    %138 = vector.extract_strided_slice %14 {offsets = [0, 220], sizes = [8, 1024], strides = [1, 1]} : vector<8x1246xf32> to vector<8x1024xf32>
    %cst_85 = arith.constant dense<0.000000e+00> : vector<8x1024xf32>
    %139 = tpu.matmul %137, %138, %cst_85 {dimension_numbers = #tpu.dot_dimension_numbers<[1], [0], [0], [1], [0, 0, 1, 1], [], []>} : vector<8x8xf32>, vector<8x1024xf32>, vector<8x1024xf32> -> vector<8x1024xf32>
    %140 = arith.addf %135, %139 : vector<8x1024xf32>
    %c25 = arith.constant 25 : index
    %c0_86 = arith.constant 0 : index
    %c0_87 = arith.constant 0 : index
    %141 = vector.load %arg2[%c25, %c0_86, %c0_87] : memref<27x8x8xf32, #tpu.memory_space<vmem>>, vector<1x8x8xf32>
    %142 = vector.shape_cast %141 : vector<1x8x8xf32> to vector<8x8xf32>
    %143 = vector.extract_strided_slice %14 {offsets = [0, 221], sizes = [8, 1024], strides = [1, 1]} : vector<8x1246xf32> to vector<8x1024xf32>
    %cst_88 = arith.constant dense<0.000000e+00> : vector<8x1024xf32>
    %144 = tpu.matmul %142, %143, %cst_88 {dimension_numbers = #tpu.dot_dimension_numbers<[1], [0], [0], [1], [0, 0, 1, 1], [], []>} : vector<8x8xf32>, vector<8x1024xf32>, vector<8x1024xf32> -> vector<8x1024xf32>
    %145 = arith.addf %140, %144 : vector<8x1024xf32>
    %c26 = arith.constant 26 : index
    %c0_89 = arith.constant 0 : index
    %c0_90 = arith.constant 0 : index
    %146 = vector.load %arg2[%c26, %c0_89, %c0_90] : memref<27x8x8xf32, #tpu.memory_space<vmem>>, vector<1x8x8xf32>
    %147 = vector.shape_cast %146 : vector<1x8x8xf32> to vector<8x8xf32>
    %148 = vector.extract_strided_slice %14 {offsets = [0, 222], sizes = [8, 1024], strides = [1, 1]} : vector<8x1246xf32> to vector<8x1024xf32>
    %cst_91 = arith.constant dense<0.000000e+00> : vector<8x1024xf32>
    %149 = tpu.matmul %147, %148, %cst_91 {dimension_numbers = #tpu.dot_dimension_numbers<[1], [0], [0], [1], [0, 0, 1, 1], [], []>} : vector<8x8xf32>, vector<8x1024xf32>, vector<8x1024xf32> -> vector<8x1024xf32>
    %150 = arith.addf %145, %149 : vector<8x1024xf32>
    %c0_92 = arith.constant 0 : index
    %c0_93 = arith.constant 0 : index
    %c0_94 = arith.constant 0 : index
    %151 = vector.load %arg6[%c0_92, %c0_93, %c0_94] : memref<1x8x1024xf32, #tpu.memory_space<vmem>>, vector<1x8x1024xf32>
    %152 = vector.shape_cast %151 : vector<1x8x1024xf32> to vector<8x1024xf32>
    %153 = vector.shape_cast %150 : vector<8x1024xf32> to vector<1x8x1024xf32>
    tpu.vector_store %arg6[%c0_92, %c0_93, %c0_94], %153 {strides = array<i32>} : memref<1x8x1024xf32, #tpu.memory_space<vmem>>, vector<1x8x1024xf32>,
    %c0_95 = arith.constant 0 : index
    %c0_96 = arith.constant 0 : index
    %154 = vector.load %arg3[%c0_95, %c0_96] : memref<1x1024xf32, #tpu.memory_space<vmem>>, vector<1x1024xf32>
    %155 = vector.broadcast %154 : vector<1x1024xf32> to vector<8x1024xf32>
    %156 = arith.mulf %150, %155 : vector<8x1024xf32>
    %cst_97 = arith.constant dense<0.000000e+00> : vector<8xf32>
    %157 = vector.multi_reduction <add>, %156, %cst_97 [1] : vector<8x1024xf32> to vector<8xf32>
    %158 = vector.shape_cast %157 : vector<8xf32> to vector<8x1xf32>
    %159 = arith.mulf %156, %150 : vector<8x1024xf32>
    %cst_98 = arith.constant dense<0.000000e+00> : vector<8xf32>
    %160 = vector.multi_reduction <add>, %159, %cst_98 [1] : vector<8x1024xf32> to vector<8xf32>
    %161 = vector.shape_cast %160 : vector<8xf32> to vector<8x1xf32>
    %cst_99 = arith.constant 0.000000e+00 : f32
    %162 = vector.broadcast %cst_99 : f32 to vector<1x1024xf32>
    %163 = arith.cmpf ogt, %154, %162 : vector<1x1024xf32>
    %cst_100 = arith.constant 0xFF800000 : f32
    %164 = vector.shape_cast %163 : vector<1x1024xi1> to vector<1x1024xi1>
    %165 = vector.broadcast %164 : vector<1x1024xi1> to vector<8x1024xi1>
    %166 = vector.broadcast %cst_100 : f32 to vector<8x1024xf32>
    %167 = arith.select %165, %150, %166 : vector<8x1024xi1>, vector<8x1024xf32>
    %cst_101 = arith.constant dense<0xFF800000> : vector<8xf32>
    %168 = vector.multi_reduction <maximumf>, %167, %cst_101 [1] : vector<8x1024xf32> to vector<8xf32>
    %169 = vector.shape_cast %168 : vector<8xf32> to vector<8x1xf32>
    %cst_102 = arith.constant 0.000000e+00 : f32
    %170 = vector.broadcast %cst_102 : f32 to vector<1x1024xf32>
    %171 = arith.cmpf ogt, %154, %170 : vector<1x1024xf32>
    %cst_103 = arith.constant 0x7F800000 : f32
    %172 = vector.shape_cast %171 : vector<1x1024xi1> to vector<1x1024xi1>
    %173 = vector.broadcast %172 : vector<1x1024xi1> to vector<8x1024xi1>
    %174 = vector.broadcast %cst_103 : f32 to vector<8x1024xf32>
    %175 = arith.select %173, %150, %174 : vector<8x1024xi1>, vector<8x1024xf32>
    %cst_104 = arith.constant dense<0x7F800000> : vector<8xf32>
    %176 = vector.multi_reduction <minimumf>, %175, %cst_104 [1] : vector<8x1024xf32> to vector<8xf32>
    %177 = vector.shape_cast %176 : vector<8xf32> to vector<8x1xf32>
    %cst_105 = arith.constant 0.000000e+00 : f32
    %178 = vector.broadcast %cst_105 : f32 to vector<8x4xf32>
    %179 = tpu.concatenate %158, %161, %169, %177, %178 in 1 : vector<8x1xf32>, vector<8x1xf32>, vector<8x1xf32>, vector<8x1xf32>, vector<8x4xf32> -> vector<8x8xf32>
    %c0_106 = arith.constant 0 : index
    %c0_107 = arith.constant 0 : index
    %c0_108 = arith.constant 0 : index
    %180 = vector.load %arg7[%c0_106, %c0_107, %c0_108] : memref<1x8x8xf32, #tpu.memory_space<vmem>>, vector<1x8x8xf32>
    %181 = vector.shape_cast %180 : vector<1x8x8xf32> to vector<8x8xf32>
    %182 = vector.shape_cast %179 : vector<8x8xf32> to vector<1x8x8xf32>
    tpu.vector_store %arg7[%c0_106, %c0_107, %c0_108], %182 {strides = array<i32>} : memref<1x8x8xf32, #tpu.memory_space<vmem>>, vector<1x8x8xf32>,
    return
  }
  func.func @transform_0(%arg0: i32) -> (i32, i32, i32) {
    %c0_i32 = arith.constant 0 : i32
    %c0_i32_0 = arith.constant 0 : i32
    %c0_i32_1 = arith.constant 0 : i32
    return %arg0, %c0_i32, %c0_i32_0 : i32, i32, i32
  }
  func.func @transform_1(%arg0: i32) -> (i32, i32, i32) {
    %c0_i32 = arith.constant 0 : i32
    %c0_i32_0 = arith.constant 0 : i32
    %c0_i32_1 = arith.constant 0 : i32
    %c0_i32_2 = arith.constant 0 : i32
    return %c0_i32, %c0_i32_0, %c0_i32_1 : i32, i32, i32
  }
  func.func @transform_2(%arg0: i32) -> (i32, i32) {
    %c0_i32 = arith.constant 0 : i32
    %c0_i32_0 = arith.constant 0 : i32
    %c0_i32_1 = arith.constant 0 : i32
    return %c0_i32, %c0_i32_0 : i32, i32
  }
  func.func @transform_3(%arg0: i32) -> (i32, i32) {
    %c0_i32 = arith.constant 0 : i32
    %c0_i32_0 = arith.constant 0 : i32
    %c0_i32_1 = arith.constant 0 : i32
    return %c0_i32, %c0_i32_0 : i32, i32
  }
  func.func @transform_4(%arg0: i32) -> (i32, i32) {
    %c0_i32 = arith.constant 0 : i32
    %c0_i32_0 = arith.constant 0 : i32
    %c0_i32_1 = arith.constant 0 : i32
    return %c0_i32, %c0_i32_0 : i32, i32
  }
  func.func @transform_5(%arg0: i32) -> (i32, i32, i32) {
    %c0_i32 = arith.constant 0 : i32
    %c0_i32_0 = arith.constant 0 : i32
    %c0_i32_1 = arith.constant 0 : i32
    return %arg0, %c0_i32, %c0_i32_0 : i32, i32, i32
  }
  func.func @transform_6(%arg0: i32) -> (i32, i32, i32) {
    %c0_i32 = arith.constant 0 : i32
    %c0_i32_0 = arith.constant 0 : i32
    %c0_i32_1 = arith.constant 0 : i32
    return %arg0, %c0_i32, %c0_i32_0 : i32, i32, i32
  }
}

module attributes {stable_mosaic.version = 11 : i64} {
  func.func @kernel(%arg0: i32, %arg1: memref<1x8x1024xf32, #tpu.memory_space<vmem>>, %arg2: memref<1x8x1xf32, #tpu.memory_space<vmem>>, %arg3: memref<1x8x1xf32, #tpu.memory_space<vmem>>, %arg4: memref<1x2x1024xf32, #tpu.memory_space<vmem>>) attributes {dimension_semantics = [#tpu.dimension_semantics<parallel>], iteration_bounds = array<i64: 2>, scalar_prefetch = 0 : i64, scratch_operands = 0 : i64, tpu.core_type = #tpu.core_type<tc>, window_params = [{transform_indices = @transform_0, window_bounds = array<i64: 1, 8, 1024>}, {transform_indices = @transform_1, window_bounds = array<i64: 1, 8, 1>}, {transform_indices = @transform_2, window_bounds = array<i64: 1, 8, 1>}, {transform_indices = @transform_3, window_bounds = array<i64: 1, 2, 1024>}]} {
    %c0 = arith.constant 0 : index
    %c0_0 = arith.constant 0 : index
    %c0_1 = arith.constant 0 : index
    %0 = vector.load %arg1[%c0, %c0_0, %c0_1] : memref<1x8x1024xf32, #tpu.memory_space<vmem>>, vector<1x8x1024xf32>
    %1 = vector.shape_cast %0 : vector<1x8x1024xf32> to vector<8x1024xf32>
    %c0_2 = arith.constant 0 : index
    %c0_3 = arith.constant 0 : index
    %c0_4 = arith.constant 0 : index
    %2 = vector.load %arg2[%c0_2, %c0_3, %c0_4] : memref<1x8x1xf32, #tpu.memory_space<vmem>>, vector<1x8x1xf32>
    %3 = vector.shape_cast %2 : vector<1x8x1xf32> to vector<8x1xf32>
    %4 = vector.broadcast %3 : vector<8x1xf32> to vector<8x1024xf32>
    %5 = arith.mulf %1, %4 : vector<8x1024xf32>
    %c0_5 = arith.constant 0 : index
    %c0_6 = arith.constant 0 : index
    %c0_7 = arith.constant 0 : index
    %6 = vector.load %arg3[%c0_5, %c0_6, %c0_7] : memref<1x8x1xf32, #tpu.memory_space<vmem>>, vector<1x8x1xf32>
    %7 = vector.shape_cast %6 : vector<1x8x1xf32> to vector<8x1xf32>
    %8 = vector.broadcast %7 : vector<8x1xf32> to vector<8x1024xf32>
    %9 = arith.addf %5, %8 : vector<8x1024xf32>
    %10 = vector.extract_strided_slice %9 {offsets = [0, 0], sizes = [4, 1024], strides = [1, 1]} : vector<8x1024xf32> to vector<4x1024xf32>
    %cst = arith.constant dense<0.000000e+00> : vector<1024xf32>
    %11 = vector.multi_reduction <add>, %10, %cst [0] : vector<4x1024xf32> to vector<1024xf32>
    %12 = vector.shape_cast %11 : vector<1024xf32> to vector<1x1024xf32>
    %cst_8 = arith.constant 2.500000e-01 : f32
    %13 = vector.broadcast %cst_8 : f32 to vector<1x1024xf32>
    %14 = arith.mulf %12, %13 : vector<1x1024xf32>
    %cst_9 = arith.constant dense<0xFF800000> : vector<1024xf32>
    %15 = vector.multi_reduction <maximumf>, %10, %cst_9 [0] : vector<4x1024xf32> to vector<1024xf32>
    %16 = vector.shape_cast %15 : vector<1024xf32> to vector<1x1024xf32>
    %17 = tpu.concatenate %14, %16 in 0 : vector<1x1024xf32>, vector<1x1024xf32> -> vector<2x1024xf32>
    %c0_10 = arith.constant 0 : index
    %c0_11 = arith.constant 0 : index
    %c0_12 = arith.constant 0 : index
    %18 = vector.load %arg4[%c0_10, %c0_11, %c0_12] : memref<1x2x1024xf32, #tpu.memory_space<vmem>>, vector<1x2x1024xf32>
    %19 = vector.shape_cast %18 : vector<1x2x1024xf32> to vector<2x1024xf32>
    %20 = vector.shape_cast %17 : vector<2x1024xf32> to vector<1x2x1024xf32>
    tpu.vector_store %arg4[%c0_10, %c0_11, %c0_12], %20 {strides = array<i32>} : memref<1x2x1024xf32, #tpu.memory_space<vmem>>, vector<1x2x1024xf32>,
    return
  }
  func.func @transform_0(%arg0: i32) -> (i32, i32, i32) {
    %c0_i32 = arith.constant 0 : i32
    %c0_i32_0 = arith.constant 0 : i32
    %c0_i32_1 = arith.constant 0 : i32
    return %arg0, %c0_i32, %c0_i32_0 : i32, i32, i32
  }
  func.func @transform_1(%arg0: i32) -> (i32, i32, i32) {
    %c0_i32 = arith.constant 0 : i32
    %c0_i32_0 = arith.constant 0 : i32
    %c0_i32_1 = arith.constant 0 : i32
    return %arg0, %c0_i32, %c0_i32_0 : i32, i32, i32
  }
  func.func @transform_2(%arg0: i32) -> (i32, i32, i32) {
    %c0_i32 = arith.constant 0 : i32
    %c0_i32_0 = arith.constant 0 : i32
    %c0_i32_1 = arith.constant 0 : i32
    return %arg0, %c0_i32, %c0_i32_0 : i32, i32, i32
  }
  func.func @transform_3(%arg0: i32) -> (i32, i32, i32) {
    %c0_i32 = arith.constant 0 : i32
    %c0_i32_0 = arith.constant 0 : i32
    %c0_i32_1 = arith.constant 0 : i32
    return %arg0, %c0_i32, %c0_i32_0 : i32, i32, i32
  }
}

module attributes {stable_mosaic.version = 11 : i64} {
  func.func @_tail_kernel(%arg0: i32, %arg1: memref<1x8x1024xf32, #tpu.memory_space<vmem>>, %arg2: memref<1x8x1xf32, #tpu.memory_space<vmem>>, %arg3: memref<1x8x1xf32, #tpu.memory_space<vmem>>, %arg4: memref<1x1x1024xf32, #tpu.memory_space<vmem>>, %arg5: memref<1x8x1024xf32, #tpu.memory_space<vmem>>, %arg6: memref<1x8x1024xf32, #tpu.memory_space<vmem>>) attributes {dimension_semantics = [#tpu.dimension_semantics<parallel>], iteration_bounds = array<i64: 2>, scalar_prefetch = 0 : i64, scratch_operands = 0 : i64, tpu.core_type = #tpu.core_type<tc>, window_params = [{transform_indices = @transform_0, window_bounds = array<i64: 1, 8, 1024>}, {transform_indices = @transform_1, window_bounds = array<i64: 1, 8, 1>}, {transform_indices = @transform_2, window_bounds = array<i64: 1, 8, 1>}, {transform_indices = @transform_3, window_bounds = array<i64: 1, 1, 1024>}, {transform_indices = @transform_4, window_bounds = array<i64: 1, 8, 1024>}, {transform_indices = @transform_5, window_bounds = array<i64: 1, 8, 1024>}]} {
    %c0 = arith.constant 0 : index
    %c0_0 = arith.constant 0 : index
    %c0_1 = arith.constant 0 : index
    %0 = vector.load %arg1[%c0, %c0_0, %c0_1] : memref<1x8x1024xf32, #tpu.memory_space<vmem>>, vector<1x8x1024xf32>
    %1 = vector.shape_cast %0 : vector<1x8x1024xf32> to vector<8x1024xf32>
    %c0_2 = arith.constant 0 : index
    %c0_3 = arith.constant 0 : index
    %c0_4 = arith.constant 0 : index
    %2 = vector.load %arg2[%c0_2, %c0_3, %c0_4] : memref<1x8x1xf32, #tpu.memory_space<vmem>>, vector<1x8x1xf32>
    %3 = vector.shape_cast %2 : vector<1x8x1xf32> to vector<8x1xf32>
    %4 = vector.broadcast %3 : vector<8x1xf32> to vector<8x1024xf32>
    %5 = arith.mulf %1, %4 : vector<8x1024xf32>
    %c0_5 = arith.constant 0 : index
    %c0_6 = arith.constant 0 : index
    %c0_7 = arith.constant 0 : index
    %6 = vector.load %arg3[%c0_5, %c0_6, %c0_7] : memref<1x8x1xf32, #tpu.memory_space<vmem>>, vector<1x8x1xf32>
    %7 = vector.shape_cast %6 : vector<1x8x1xf32> to vector<8x1xf32>
    %8 = vector.broadcast %7 : vector<8x1xf32> to vector<8x1024xf32>
    %9 = arith.addf %5, %8 : vector<8x1024xf32>
    %c0_8 = arith.constant 0 : index
    %c0_9 = arith.constant 0 : index
    %c0_10 = arith.constant 0 : index
    %10 = vector.load %arg4[%c0_8, %c0_9, %c0_10] : memref<1x1x1024xf32, #tpu.memory_space<vmem>>, vector<1x1x1024xf32>
    %11 = vector.shape_cast %10 : vector<1x1x1024xf32> to vector<1x1024xf32>
    %cst = arith.constant 0.000000e+00 : f32
    %12 = vector.broadcast %cst : f32 to vector<1x1024xf32>
    %13 = arith.subf %12, %11 : vector<1x1024xf32>
    %14 = math.exp %13 : vector<1x1024xf32>
    %cst_11 = arith.constant 1.000000e+00 : f32
    %15 = vector.broadcast %cst_11 : f32 to vector<1x1024xf32>
    %16 = arith.addf %15, %14 : vector<1x1024xf32>
    %cst_12 = arith.constant 1.000000e+00 : f32
    %17 = vector.broadcast %cst_12 : f32 to vector<1x1024xf32>
    %18 = arith.divf %17, %16 : vector<1x1024xf32>
    %19 = vector.broadcast %18 : vector<1x1024xf32> to vector<8x1024xf32>
    %20 = arith.mulf %9, %19 : vector<8x1024xf32>
    %c0_13 = arith.constant 0 : index
    %c0_14 = arith.constant 0 : index
    %c0_15 = arith.constant 0 : index
    %21 = vector.load %arg5[%c0_13, %c0_14, %c0_15] : memref<1x8x1024xf32, #tpu.memory_space<vmem>>, vector<1x8x1024xf32>
    %22 = vector.shape_cast %21 : vector<1x8x1024xf32> to vector<8x1024xf32>
    %23 = arith.addf %20, %22 : vector<8x1024xf32>
    %cst_16 = arith.constant 0.000000e+00 : f32
    %24 = vector.broadcast %cst_16 : f32 to vector<8x1024xf32>
    %25 = arith.maximumf %23, %24 : vector<8x1024xf32>
    %c0_17 = arith.constant 0 : index
    %c0_18 = arith.constant 0 : index
    %c0_19 = arith.constant 0 : index
    %26 = vector.load %arg6[%c0_17, %c0_18, %c0_19] : memref<1x8x1024xf32, #tpu.memory_space<vmem>>, vector<1x8x1024xf32>
    %27 = vector.shape_cast %26 : vector<1x8x1024xf32> to vector<8x1024xf32>
    %28 = vector.shape_cast %25 : vector<8x1024xf32> to vector<1x8x1024xf32>
    tpu.vector_store %arg6[%c0_17, %c0_18, %c0_19], %28 {strides = array<i32>} : memref<1x8x1024xf32, #tpu.memory_space<vmem>>, vector<1x8x1024xf32>,
    return
  }
  func.func @transform_0(%arg0: i32) -> (i32, i32, i32) {
    %c0_i32 = arith.constant 0 : i32
    %c0_i32_0 = arith.constant 0 : i32
    %c0_i32_1 = arith.constant 0 : i32
    return %arg0, %c0_i32, %c0_i32_0 : i32, i32, i32
  }
  func.func @transform_1(%arg0: i32) -> (i32, i32, i32) {
    %c0_i32 = arith.constant 0 : i32
    %c0_i32_0 = arith.constant 0 : i32
    %c0_i32_1 = arith.constant 0 : i32
    return %arg0, %c0_i32, %c0_i32_0 : i32, i32, i32
  }
  func.func @transform_2(%arg0: i32) -> (i32, i32, i32) {
    %c0_i32 = arith.constant 0 : i32
    %c0_i32_0 = arith.constant 0 : i32
    %c0_i32_1 = arith.constant 0 : i32
    return %arg0, %c0_i32, %c0_i32_0 : i32, i32, i32
  }
  func.func @transform_3(%arg0: i32) -> (i32, i32, i32) {
    %c0_i32 = arith.constant 0 : i32
    %c0_i32_0 = arith.constant 0 : i32
    %c0_i32_1 = arith.constant 0 : i32
    return %arg0, %c0_i32, %c0_i32_0 : i32, i32, i32
  }
  func.func @transform_4(%arg0: i32) -> (i32, i32, i32) {
    %c0_i32 = arith.constant 0 : i32
    %c0_i32_0 = arith.constant 0 : i32
    %c0_i32_1 = arith.constant 0 : i32
    return %arg0, %c0_i32, %c0_i32_0 : i32, i32, i32
  }
  func.func @transform_5(%arg0: i32) -> (i32, i32, i32) {
    %c0_i32 = arith.constant 0 : i32
    %c0_i32_0 = arith.constant 0 : i32
    %c0_i32_1 = arith.constant 0 : i32
    return %arg0, %c0_i32, %c0_i32_0 : i32, i32, i32
  }
}

module attributes {stable_mosaic.version = 11 : i64} {
  func.func @kernel(%arg0: i32, %arg1: memref<1x8x384xf32, #tpu.memory_space<vmem>>, %arg2: memref<9x8x8xf32, #tpu.memory_space<vmem>>, %arg3: memref<1x384xf32, #tpu.memory_space<vmem>>, %arg4: memref<1x8x384xf32, #tpu.memory_space<vmem>>, %arg5: memref<1x8x8xf32, #tpu.memory_space<vmem>>) attributes {dimension_semantics = [#tpu.dimension_semantics<parallel>], iteration_bounds = array<i64: 2>, scalar_prefetch = 0 : i64, scratch_operands = 0 : i64, tpu.core_type = #tpu.core_type<tc>, window_params = [{transform_indices = @transform_0, window_bounds = array<i64: 1, 8, 384>}, {pipeline_mode = #tpu.pipeline_mode<synchronous>, transform_indices = @transform_1, window_bounds = array<i64: 9, 8, 8>}, {pipeline_mode = #tpu.pipeline_mode<synchronous>, transform_indices = @transform_2, window_bounds = array<i64: 1, 384>}, {transform_indices = @transform_3, window_bounds = array<i64: 1, 8, 384>}, {transform_indices = @transform_4, window_bounds = array<i64: 1, 8, 8>}]} {
    %c0 = arith.constant 0 : index
    %c0_0 = arith.constant 0 : index
    %c0_1 = arith.constant 0 : index
    %0 = vector.load %arg1[%c0, %c0_0, %c0_1] : memref<1x8x384xf32, #tpu.memory_space<vmem>>, vector<1x8x384xf32>
    %1 = vector.shape_cast %0 : vector<1x8x384xf32> to vector<8x384xf32>
    %cst = arith.constant 0.000000e+00 : f32
    %2 = vector.broadcast %cst : f32 to vector<8x19xf32>
    %3 = tpu.concatenate %2, %1, %2 in 1 : vector<8x19xf32>, vector<8x384xf32>, vector<8x19xf32> -> vector<8x422xf32>
    %cst_2 = arith.constant 0.000000e+00 : f32
    %4 = vector.broadcast %cst_2 : f32 to vector<8x384xf32>
    %c0_3 = arith.constant 0 : index
    %c0_4 = arith.constant 0 : index
    %c0_5 = arith.constant 0 : index
    %5 = vector.load %arg2[%c0_3, %c0_4, %c0_5] : memref<9x8x8xf32, #tpu.memory_space<vmem>>, vector<1x8x8xf32>
    %6 = vector.shape_cast %5 : vector<1x8x8xf32> to vector<8x8xf32>
    %7 = vector.extract_strided_slice %3 {offsets = [0, 0], sizes = [8, 384], strides = [1, 1]} : vector<8x422xf32> to vector<8x384xf32>
    %cst_6 = arith.constant dense<0.000000e+00> : vector<8x384xf32>
    %8 = tpu.matmul %6, %7, %cst_6 {dimension_numbers = #tpu.dot_dimension_numbers<[1], [0], [0], [1], [0, 0, 1, 1], [], []>} : vector<8x8xf32>, vector<8x384xf32>, vector<8x384xf32> -> vector<8x384xf32>
    %9 = arith.addf %4, %8 : vector<8x384xf32>
    %c1 = arith.constant 1 : index
    %c0_7 = arith.constant 0 : index
    %c0_8 = arith.constant 0 : index
    %10 = vector.load %arg2[%c1, %c0_7, %c0_8] : memref<9x8x8xf32, #tpu.memory_space<vmem>>, vector<1x8x8xf32>
    %11 = vector.shape_cast %10 : vector<1x8x8xf32> to vector<8x8xf32>
    %12 = vector.extract_strided_slice %3 {offsets = [0, 1], sizes = [8, 384], strides = [1, 1]} : vector<8x422xf32> to vector<8x384xf32>
    %cst_9 = arith.constant dense<0.000000e+00> : vector<8x384xf32>
    %13 = tpu.matmul %11, %12, %cst_9 {dimension_numbers = #tpu.dot_dimension_numbers<[1], [0], [0], [1], [0, 0, 1, 1], [], []>} : vector<8x8xf32>, vector<8x384xf32>, vector<8x384xf32> -> vector<8x384xf32>
    %14 = arith.addf %9, %13 : vector<8x384xf32>
    %c2 = arith.constant 2 : index
    %c0_10 = arith.constant 0 : index
    %c0_11 = arith.constant 0 : index
    %15 = vector.load %arg2[%c2, %c0_10, %c0_11] : memref<9x8x8xf32, #tpu.memory_space<vmem>>, vector<1x8x8xf32>
    %16 = vector.shape_cast %15 : vector<1x8x8xf32> to vector<8x8xf32>
    %17 = vector.extract_strided_slice %3 {offsets = [0, 2], sizes = [8, 384], strides = [1, 1]} : vector<8x422xf32> to vector<8x384xf32>
    %cst_12 = arith.constant dense<0.000000e+00> : vector<8x384xf32>
    %18 = tpu.matmul %16, %17, %cst_12 {dimension_numbers = #tpu.dot_dimension_numbers<[1], [0], [0], [1], [0, 0, 1, 1], [], []>} : vector<8x8xf32>, vector<8x384xf32>, vector<8x384xf32> -> vector<8x384xf32>
    %19 = arith.addf %14, %18 : vector<8x384xf32>
    %c3 = arith.constant 3 : index
    %c0_13 = arith.constant 0 : index
    %c0_14 = arith.constant 0 : index
    %20 = vector.load %arg2[%c3, %c0_13, %c0_14] : memref<9x8x8xf32, #tpu.memory_space<vmem>>, vector<1x8x8xf32>
    %21 = vector.shape_cast %20 : vector<1x8x8xf32> to vector<8x8xf32>
    %22 = vector.extract_strided_slice %3 {offsets = [0, 18], sizes = [8, 384], strides = [1, 1]} : vector<8x422xf32> to vector<8x384xf32>
    %cst_15 = arith.constant dense<0.000000e+00> : vector<8x384xf32>
    %23 = tpu.matmul %21, %22, %cst_15 {dimension_numbers = #tpu.dot_dimension_numbers<[1], [0], [0], [1], [0, 0, 1, 1], [], []>} : vector<8x8xf32>, vector<8x384xf32>, vector<8x384xf32> -> vector<8x384xf32>
    %24 = arith.addf %19, %23 : vector<8x384xf32>
    %c4 = arith.constant 4 : index
    %c0_16 = arith.constant 0 : index
    %c0_17 = arith.constant 0 : index
    %25 = vector.load %arg2[%c4, %c0_16, %c0_17] : memref<9x8x8xf32, #tpu.memory_space<vmem>>, vector<1x8x8xf32>
    %26 = vector.shape_cast %25 : vector<1x8x8xf32> to vector<8x8xf32>
    %27 = vector.extract_strided_slice %3 {offsets = [0, 19], sizes = [8, 384], strides = [1, 1]} : vector<8x422xf32> to vector<8x384xf32>
    %cst_18 = arith.constant dense<0.000000e+00> : vector<8x384xf32>
    %28 = tpu.matmul %26, %27, %cst_18 {dimension_numbers = #tpu.dot_dimension_numbers<[1], [0], [0], [1], [0, 0, 1, 1], [], []>} : vector<8x8xf32>, vector<8x384xf32>, vector<8x384xf32> -> vector<8x384xf32>
    %29 = arith.addf %24, %28 : vector<8x384xf32>
    %c5 = arith.constant 5 : index
    %c0_19 = arith.constant 0 : index
    %c0_20 = arith.constant 0 : index
    %30 = vector.load %arg2[%c5, %c0_19, %c0_20] : memref<9x8x8xf32, #tpu.memory_space<vmem>>, vector<1x8x8xf32>
    %31 = vector.shape_cast %30 : vector<1x8x8xf32> to vector<8x8xf32>
    %32 = vector.extract_strided_slice %3 {offsets = [0, 20], sizes = [8, 384], strides = [1, 1]} : vector<8x422xf32> to vector<8x384xf32>
    %cst_21 = arith.constant dense<0.000000e+00> : vector<8x384xf32>
    %33 = tpu.matmul %31, %32, %cst_21 {dimension_numbers = #tpu.dot_dimension_numbers<[1], [0], [0], [1], [0, 0, 1, 1], [], []>} : vector<8x8xf32>, vector<8x384xf32>, vector<8x384xf32> -> vector<8x384xf32>
    %34 = arith.addf %29, %33 : vector<8x384xf32>
    %c6 = arith.constant 6 : index
    %c0_22 = arith.constant 0 : index
    %c0_23 = arith.constant 0 : index
    %35 = vector.load %arg2[%c6, %c0_22, %c0_23] : memref<9x8x8xf32, #tpu.memory_space<vmem>>, vector<1x8x8xf32>
    %36 = vector.shape_cast %35 : vector<1x8x8xf32> to vector<8x8xf32>
    %37 = vector.extract_strided_slice %3 {offsets = [0, 36], sizes = [8, 384], strides = [1, 1]} : vector<8x422xf32> to vector<8x384xf32>
    %cst_24 = arith.constant dense<0.000000e+00> : vector<8x384xf32>
    %38 = tpu.matmul %36, %37, %cst_24 {dimension_numbers = #tpu.dot_dimension_numbers<[1], [0], [0], [1], [0, 0, 1, 1], [], []>} : vector<8x8xf32>, vector<8x384xf32>, vector<8x384xf32> -> vector<8x384xf32>
    %39 = arith.addf %34, %38 : vector<8x384xf32>
    %c7 = arith.constant 7 : index
    %c0_25 = arith.constant 0 : index
    %c0_26 = arith.constant 0 : index
    %40 = vector.load %arg2[%c7, %c0_25, %c0_26] : memref<9x8x8xf32, #tpu.memory_space<vmem>>, vector<1x8x8xf32>
    %41 = vector.shape_cast %40 : vector<1x8x8xf32> to vector<8x8xf32>
    %42 = vector.extract_strided_slice %3 {offsets = [0, 37], sizes = [8, 384], strides = [1, 1]} : vector<8x422xf32> to vector<8x384xf32>
    %cst_27 = arith.constant dense<0.000000e+00> : vector<8x384xf32>
    %43 = tpu.matmul %41, %42, %cst_27 {dimension_numbers = #tpu.dot_dimension_numbers<[1], [0], [0], [1], [0, 0, 1, 1], [], []>} : vector<8x8xf32>, vector<8x384xf32>, vector<8x384xf32> -> vector<8x384xf32>
    %44 = arith.addf %39, %43 : vector<8x384xf32>
    %c8 = arith.constant 8 : index
    %c0_28 = arith.constant 0 : index
    %c0_29 = arith.constant 0 : index
    %45 = vector.load %arg2[%c8, %c0_28, %c0_29] : memref<9x8x8xf32, #tpu.memory_space<vmem>>, vector<1x8x8xf32>
    %46 = vector.shape_cast %45 : vector<1x8x8xf32> to vector<8x8xf32>
    %47 = vector.extract_strided_slice %3 {offsets = [0, 38], sizes = [8, 384], strides = [1, 1]} : vector<8x422xf32> to vector<8x384xf32>
    %cst_30 = arith.constant dense<0.000000e+00> : vector<8x384xf32>
    %48 = tpu.matmul %46, %47, %cst_30 {dimension_numbers = #tpu.dot_dimension_numbers<[1], [0], [0], [1], [0, 0, 1, 1], [], []>} : vector<8x8xf32>, vector<8x384xf32>, vector<8x384xf32> -> vector<8x384xf32>
    %49 = arith.addf %44, %48 : vector<8x384xf32>
    %c0_31 = arith.constant 0 : index
    %c0_32 = arith.constant 0 : index
    %c0_33 = arith.constant 0 : index
    %50 = vector.load %arg4[%c0_31, %c0_32, %c0_33] : memref<1x8x384xf32, #tpu.memory_space<vmem>>, vector<1x8x384xf32>
    %51 = vector.shape_cast %50 : vector<1x8x384xf32> to vector<8x384xf32>
    %52 = vector.shape_cast %49 : vector<8x384xf32> to vector<1x8x384xf32>
    tpu.vector_store %arg4[%c0_31, %c0_32, %c0_33], %52 {strides = array<i32>} : memref<1x8x384xf32, #tpu.memory_space<vmem>>, vector<1x8x384xf32>,
    %c0_34 = arith.constant 0 : index
    %c0_35 = arith.constant 0 : index
    %53 = vector.load %arg3[%c0_34, %c0_35] : memref<1x384xf32, #tpu.memory_space<vmem>>, vector<1x384xf32>
    %54 = vector.broadcast %53 : vector<1x384xf32> to vector<8x384xf32>
    %55 = arith.mulf %49, %54 : vector<8x384xf32>
    %cst_36 = arith.constant dense<0.000000e+00> : vector<8xf32>
    %56 = vector.multi_reduction <add>, %55, %cst_36 [1] : vector<8x384xf32> to vector<8xf32>
    %57 = vector.shape_cast %56 : vector<8xf32> to vector<8x1xf32>
    %58 = arith.mulf %55, %49 : vector<8x384xf32>
    %cst_37 = arith.constant dense<0.000000e+00> : vector<8xf32>
    %59 = vector.multi_reduction <add>, %58, %cst_37 [1] : vector<8x384xf32> to vector<8xf32>
    %60 = vector.shape_cast %59 : vector<8xf32> to vector<8x1xf32>
    %cst_38 = arith.constant 0.000000e+00 : f32
    %61 = vector.broadcast %cst_38 : f32 to vector<1x384xf32>
    %62 = arith.cmpf ogt, %53, %61 : vector<1x384xf32>
    %cst_39 = arith.constant 0xFF800000 : f32
    %63 = vector.shape_cast %62 : vector<1x384xi1> to vector<1x384xi1>
    %64 = vector.broadcast %63 : vector<1x384xi1> to vector<8x384xi1>
    %65 = vector.broadcast %cst_39 : f32 to vector<8x384xf32>
    %66 = arith.select %64, %49, %65 : vector<8x384xi1>, vector<8x384xf32>
    %cst_40 = arith.constant dense<0xFF800000> : vector<8xf32>
    %67 = vector.multi_reduction <maximumf>, %66, %cst_40 [1] : vector<8x384xf32> to vector<8xf32>
    %68 = vector.shape_cast %67 : vector<8xf32> to vector<8x1xf32>
    %cst_41 = arith.constant 0.000000e+00 : f32
    %69 = vector.broadcast %cst_41 : f32 to vector<1x384xf32>
    %70 = arith.cmpf ogt, %53, %69 : vector<1x384xf32>
    %cst_42 = arith.constant 0x7F800000 : f32
    %71 = vector.shape_cast %70 : vector<1x384xi1> to vector<1x384xi1>
    %72 = vector.broadcast %71 : vector<1x384xi1> to vector<8x384xi1>
    %73 = vector.broadcast %cst_42 : f32 to vector<8x384xf32>
    %74 = arith.select %72, %49, %73 : vector<8x384xi1>, vector<8x384xf32>
    %cst_43 = arith.constant dense<0x7F800000> : vector<8xf32>
    %75 = vector.multi_reduction <minimumf>, %74, %cst_43 [1] : vector<8x384xf32> to vector<8xf32>
    %76 = vector.shape_cast %75 : vector<8xf32> to vector<8x1xf32>
    %cst_44 = arith.constant 0.000000e+00 : f32
    %77 = vector.broadcast %cst_44 : f32 to vector<8x4xf32>
    %78 = tpu.concatenate %57, %60, %68, %76, %77 in 1 : vector<8x1xf32>, vector<8x1xf32>, vector<8x1xf32>, vector<8x1xf32>, vector<8x4xf32> -> vector<8x8xf32>
    %c0_45 = arith.constant 0 : index
    %c0_46 = arith.constant 0 : index
    %c0_47 = arith.constant 0 : index
    %79 = vector.load %arg5[%c0_45, %c0_46, %c0_47] : memref<1x8x8xf32, #tpu.memory_space<vmem>>, vector<1x8x8xf32>
    %80 = vector.shape_cast %79 : vector<1x8x8xf32> to vector<8x8xf32>
    %81 = vector.shape_cast %78 : vector<8x8xf32> to vector<1x8x8xf32>
    tpu.vector_store %arg5[%c0_45, %c0_46, %c0_47], %81 {strides = array<i32>} : memref<1x8x8xf32, #tpu.memory_space<vmem>>, vector<1x8x8xf32>,
    return
  }
  func.func @transform_0(%arg0: i32) -> (i32, i32, i32) {
    %c0_i32 = arith.constant 0 : i32
    %c0_i32_0 = arith.constant 0 : i32
    %c0_i32_1 = arith.constant 0 : i32
    return %arg0, %c0_i32, %c0_i32_0 : i32, i32, i32
  }
  func.func @transform_1(%arg0: i32) -> (i32, i32, i32) {
    %c0_i32 = arith.constant 0 : i32
    %c0_i32_0 = arith.constant 0 : i32
    %c0_i32_1 = arith.constant 0 : i32
    %c0_i32_2 = arith.constant 0 : i32
    return %c0_i32, %c0_i32_0, %c0_i32_1 : i32, i32, i32
  }
  func.func @transform_2(%arg0: i32) -> (i32, i32) {
    %c0_i32 = arith.constant 0 : i32
    %c0_i32_0 = arith.constant 0 : i32
    %c0_i32_1 = arith.constant 0 : i32
    return %c0_i32, %c0_i32_0 : i32, i32
  }
  func.func @transform_3(%arg0: i32) -> (i32, i32, i32) {
    %c0_i32 = arith.constant 0 : i32
    %c0_i32_0 = arith.constant 0 : i32
    %c0_i32_1 = arith.constant 0 : i32
    return %arg0, %c0_i32, %c0_i32_0 : i32, i32, i32
  }
  func.func @transform_4(%arg0: i32) -> (i32, i32, i32) {
    %c0_i32 = arith.constant 0 : i32
    %c0_i32_0 = arith.constant 0 : i32
    %c0_i32_1 = arith.constant 0 : i32
    return %arg0, %c0_i32, %c0_i32_0 : i32, i32, i32
  }
}

module attributes {stable_mosaic.version = 11 : i64} {
  func.func @kernel(%arg0: i32, %arg1: memref<1x8x384xf32, #tpu.memory_space<vmem>>, %arg2: memref<9x8x8xf32, #tpu.memory_space<vmem>>, %arg3: memref<1x384xf32, #tpu.memory_space<vmem>>, %arg4: memref<8x1xf32, #tpu.memory_space<vmem>>, %arg5: memref<8x1xf32, #tpu.memory_space<vmem>>, %arg6: memref<1x8x384xf32, #tpu.memory_space<vmem>>, %arg7: memref<1x8x8xf32, #tpu.memory_space<vmem>>) attributes {dimension_semantics = [#tpu.dimension_semantics<parallel>], iteration_bounds = array<i64: 2>, scalar_prefetch = 0 : i64, scratch_operands = 0 : i64, tpu.core_type = #tpu.core_type<tc>, window_params = [{transform_indices = @transform_0, window_bounds = array<i64: 1, 8, 384>}, {pipeline_mode = #tpu.pipeline_mode<synchronous>, transform_indices = @transform_1, window_bounds = array<i64: 9, 8, 8>}, {pipeline_mode = #tpu.pipeline_mode<synchronous>, transform_indices = @transform_2, window_bounds = array<i64: 1, 384>}, {pipeline_mode = #tpu.pipeline_mode<synchronous>, transform_indices = @transform_3, window_bounds = array<i64: 8, 1>}, {pipeline_mode = #tpu.pipeline_mode<synchronous>, transform_indices = @transform_4, window_bounds = array<i64: 8, 1>}, {transform_indices = @transform_5, window_bounds = array<i64: 1, 8, 384>}, {transform_indices = @transform_6, window_bounds = array<i64: 1, 8, 8>}]} {
    %c0 = arith.constant 0 : index
    %c0_0 = arith.constant 0 : index
    %c0_1 = arith.constant 0 : index
    %0 = vector.load %arg1[%c0, %c0_0, %c0_1] : memref<1x8x384xf32, #tpu.memory_space<vmem>>, vector<1x8x384xf32>
    %1 = vector.shape_cast %0 : vector<1x8x384xf32> to vector<8x384xf32>
    %c0_2 = arith.constant 0 : index
    %c0_3 = arith.constant 0 : index
    %2 = vector.load %arg4[%c0_2, %c0_3] : memref<8x1xf32, #tpu.memory_space<vmem>>, vector<8x1xf32>
    %3 = vector.broadcast %2 : vector<8x1xf32> to vector<8x384xf32>
    %4 = arith.mulf %1, %3 : vector<8x384xf32>
    %c0_4 = arith.constant 0 : index
    %c0_5 = arith.constant 0 : index
    %5 = vector.load %arg5[%c0_4, %c0_5] : memref<8x1xf32, #tpu.memory_space<vmem>>, vector<8x1xf32>
    %6 = vector.broadcast %5 : vector<8x1xf32> to vector<8x384xf32>
    %7 = arith.addf %4, %6 : vector<8x384xf32>
    %cst = arith.constant 0.000000e+00 : f32
    %8 = vector.broadcast %cst : f32 to vector<8x384xf32>
    %9 = arith.maximumf %7, %8 : vector<8x384xf32>
    %c0_6 = arith.constant 0 : index
    %c0_7 = arith.constant 0 : index
    %10 = vector.load %arg3[%c0_6, %c0_7] : memref<1x384xf32, #tpu.memory_space<vmem>>, vector<1x384xf32>
    %11 = vector.broadcast %10 : vector<1x384xf32> to vector<8x384xf32>
    %12 = arith.mulf %9, %11 : vector<8x384xf32>
    %cst_8 = arith.constant 0.000000e+00 : f32
    %13 = vector.broadcast %cst_8 : f32 to vector<8x19xf32>
    %14 = tpu.concatenate %13, %12, %13 in 1 : vector<8x19xf32>, vector<8x384xf32>, vector<8x19xf32> -> vector<8x422xf32>
    %cst_9 = arith.constant 0.000000e+00 : f32
    %15 = vector.broadcast %cst_9 : f32 to vector<8x384xf32>
    %c0_10 = arith.constant 0 : index
    %c0_11 = arith.constant 0 : index
    %c0_12 = arith.constant 0 : index
    %16 = vector.load %arg2[%c0_10, %c0_11, %c0_12] : memref<9x8x8xf32, #tpu.memory_space<vmem>>, vector<1x8x8xf32>
    %17 = vector.shape_cast %16 : vector<1x8x8xf32> to vector<8x8xf32>
    %18 = vector.extract_strided_slice %14 {offsets = [0, 0], sizes = [8, 384], strides = [1, 1]} : vector<8x422xf32> to vector<8x384xf32>
    %cst_13 = arith.constant dense<0.000000e+00> : vector<8x384xf32>
    %19 = tpu.matmul %17, %18, %cst_13 {dimension_numbers = #tpu.dot_dimension_numbers<[1], [0], [0], [1], [0, 0, 1, 1], [], []>} : vector<8x8xf32>, vector<8x384xf32>, vector<8x384xf32> -> vector<8x384xf32>
    %20 = arith.addf %15, %19 : vector<8x384xf32>
    %c1 = arith.constant 1 : index
    %c0_14 = arith.constant 0 : index
    %c0_15 = arith.constant 0 : index
    %21 = vector.load %arg2[%c1, %c0_14, %c0_15] : memref<9x8x8xf32, #tpu.memory_space<vmem>>, vector<1x8x8xf32>
    %22 = vector.shape_cast %21 : vector<1x8x8xf32> to vector<8x8xf32>
    %23 = vector.extract_strided_slice %14 {offsets = [0, 1], sizes = [8, 384], strides = [1, 1]} : vector<8x422xf32> to vector<8x384xf32>
    %cst_16 = arith.constant dense<0.000000e+00> : vector<8x384xf32>
    %24 = tpu.matmul %22, %23, %cst_16 {dimension_numbers = #tpu.dot_dimension_numbers<[1], [0], [0], [1], [0, 0, 1, 1], [], []>} : vector<8x8xf32>, vector<8x384xf32>, vector<8x384xf32> -> vector<8x384xf32>
    %25 = arith.addf %20, %24 : vector<8x384xf32>
    %c2 = arith.constant 2 : index
    %c0_17 = arith.constant 0 : index
    %c0_18 = arith.constant 0 : index
    %26 = vector.load %arg2[%c2, %c0_17, %c0_18] : memref<9x8x8xf32, #tpu.memory_space<vmem>>, vector<1x8x8xf32>
    %27 = vector.shape_cast %26 : vector<1x8x8xf32> to vector<8x8xf32>
    %28 = vector.extract_strided_slice %14 {offsets = [0, 2], sizes = [8, 384], strides = [1, 1]} : vector<8x422xf32> to vector<8x384xf32>
    %cst_19 = arith.constant dense<0.000000e+00> : vector<8x384xf32>
    %29 = tpu.matmul %27, %28, %cst_19 {dimension_numbers = #tpu.dot_dimension_numbers<[1], [0], [0], [1], [0, 0, 1, 1], [], []>} : vector<8x8xf32>, vector<8x384xf32>, vector<8x384xf32> -> vector<8x384xf32>
    %30 = arith.addf %25, %29 : vector<8x384xf32>
    %c3 = arith.constant 3 : index
    %c0_20 = arith.constant 0 : index
    %c0_21 = arith.constant 0 : index
    %31 = vector.load %arg2[%c3, %c0_20, %c0_21] : memref<9x8x8xf32, #tpu.memory_space<vmem>>, vector<1x8x8xf32>
    %32 = vector.shape_cast %31 : vector<1x8x8xf32> to vector<8x8xf32>
    %33 = vector.extract_strided_slice %14 {offsets = [0, 18], sizes = [8, 384], strides = [1, 1]} : vector<8x422xf32> to vector<8x384xf32>
    %cst_22 = arith.constant dense<0.000000e+00> : vector<8x384xf32>
    %34 = tpu.matmul %32, %33, %cst_22 {dimension_numbers = #tpu.dot_dimension_numbers<[1], [0], [0], [1], [0, 0, 1, 1], [], []>} : vector<8x8xf32>, vector<8x384xf32>, vector<8x384xf32> -> vector<8x384xf32>
    %35 = arith.addf %30, %34 : vector<8x384xf32>
    %c4 = arith.constant 4 : index
    %c0_23 = arith.constant 0 : index
    %c0_24 = arith.constant 0 : index
    %36 = vector.load %arg2[%c4, %c0_23, %c0_24] : memref<9x8x8xf32, #tpu.memory_space<vmem>>, vector<1x8x8xf32>
    %37 = vector.shape_cast %36 : vector<1x8x8xf32> to vector<8x8xf32>
    %38 = vector.extract_strided_slice %14 {offsets = [0, 19], sizes = [8, 384], strides = [1, 1]} : vector<8x422xf32> to vector<8x384xf32>
    %cst_25 = arith.constant dense<0.000000e+00> : vector<8x384xf32>
    %39 = tpu.matmul %37, %38, %cst_25 {dimension_numbers = #tpu.dot_dimension_numbers<[1], [0], [0], [1], [0, 0, 1, 1], [], []>} : vector<8x8xf32>, vector<8x384xf32>, vector<8x384xf32> -> vector<8x384xf32>
    %40 = arith.addf %35, %39 : vector<8x384xf32>
    %c5 = arith.constant 5 : index
    %c0_26 = arith.constant 0 : index
    %c0_27 = arith.constant 0 : index
    %41 = vector.load %arg2[%c5, %c0_26, %c0_27] : memref<9x8x8xf32, #tpu.memory_space<vmem>>, vector<1x8x8xf32>
    %42 = vector.shape_cast %41 : vector<1x8x8xf32> to vector<8x8xf32>
    %43 = vector.extract_strided_slice %14 {offsets = [0, 20], sizes = [8, 384], strides = [1, 1]} : vector<8x422xf32> to vector<8x384xf32>
    %cst_28 = arith.constant dense<0.000000e+00> : vector<8x384xf32>
    %44 = tpu.matmul %42, %43, %cst_28 {dimension_numbers = #tpu.dot_dimension_numbers<[1], [0], [0], [1], [0, 0, 1, 1], [], []>} : vector<8x8xf32>, vector<8x384xf32>, vector<8x384xf32> -> vector<8x384xf32>
    %45 = arith.addf %40, %44 : vector<8x384xf32>
    %c6 = arith.constant 6 : index
    %c0_29 = arith.constant 0 : index
    %c0_30 = arith.constant 0 : index
    %46 = vector.load %arg2[%c6, %c0_29, %c0_30] : memref<9x8x8xf32, #tpu.memory_space<vmem>>, vector<1x8x8xf32>
    %47 = vector.shape_cast %46 : vector<1x8x8xf32> to vector<8x8xf32>
    %48 = vector.extract_strided_slice %14 {offsets = [0, 36], sizes = [8, 384], strides = [1, 1]} : vector<8x422xf32> to vector<8x384xf32>
    %cst_31 = arith.constant dense<0.000000e+00> : vector<8x384xf32>
    %49 = tpu.matmul %47, %48, %cst_31 {dimension_numbers = #tpu.dot_dimension_numbers<[1], [0], [0], [1], [0, 0, 1, 1], [], []>} : vector<8x8xf32>, vector<8x384xf32>, vector<8x384xf32> -> vector<8x384xf32>
    %50 = arith.addf %45, %49 : vector<8x384xf32>
    %c7 = arith.constant 7 : index
    %c0_32 = arith.constant 0 : index
    %c0_33 = arith.constant 0 : index
    %51 = vector.load %arg2[%c7, %c0_32, %c0_33] : memref<9x8x8xf32, #tpu.memory_space<vmem>>, vector<1x8x8xf32>
    %52 = vector.shape_cast %51 : vector<1x8x8xf32> to vector<8x8xf32>
    %53 = vector.extract_strided_slice %14 {offsets = [0, 37], sizes = [8, 384], strides = [1, 1]} : vector<8x422xf32> to vector<8x384xf32>
    %cst_34 = arith.constant dense<0.000000e+00> : vector<8x384xf32>
    %54 = tpu.matmul %52, %53, %cst_34 {dimension_numbers = #tpu.dot_dimension_numbers<[1], [0], [0], [1], [0, 0, 1, 1], [], []>} : vector<8x8xf32>, vector<8x384xf32>, vector<8x384xf32> -> vector<8x384xf32>
    %55 = arith.addf %50, %54 : vector<8x384xf32>
    %c8 = arith.constant 8 : index
    %c0_35 = arith.constant 0 : index
    %c0_36 = arith.constant 0 : index
    %56 = vector.load %arg2[%c8, %c0_35, %c0_36] : memref<9x8x8xf32, #tpu.memory_space<vmem>>, vector<1x8x8xf32>
    %57 = vector.shape_cast %56 : vector<1x8x8xf32> to vector<8x8xf32>
    %58 = vector.extract_strided_slice %14 {offsets = [0, 38], sizes = [8, 384], strides = [1, 1]} : vector<8x422xf32> to vector<8x384xf32>
    %cst_37 = arith.constant dense<0.000000e+00> : vector<8x384xf32>
    %59 = tpu.matmul %57, %58, %cst_37 {dimension_numbers = #tpu.dot_dimension_numbers<[1], [0], [0], [1], [0, 0, 1, 1], [], []>} : vector<8x8xf32>, vector<8x384xf32>, vector<8x384xf32> -> vector<8x384xf32>
    %60 = arith.addf %55, %59 : vector<8x384xf32>
    %c0_38 = arith.constant 0 : index
    %c0_39 = arith.constant 0 : index
    %c0_40 = arith.constant 0 : index
    %61 = vector.load %arg6[%c0_38, %c0_39, %c0_40] : memref<1x8x384xf32, #tpu.memory_space<vmem>>, vector<1x8x384xf32>
    %62 = vector.shape_cast %61 : vector<1x8x384xf32> to vector<8x384xf32>
    %63 = vector.shape_cast %60 : vector<8x384xf32> to vector<1x8x384xf32>
    tpu.vector_store %arg6[%c0_38, %c0_39, %c0_40], %63 {strides = array<i32>} : memref<1x8x384xf32, #tpu.memory_space<vmem>>, vector<1x8x384xf32>,
    %c0_41 = arith.constant 0 : index
    %c0_42 = arith.constant 0 : index
    %64 = vector.load %arg3[%c0_41, %c0_42] : memref<1x384xf32, #tpu.memory_space<vmem>>, vector<1x384xf32>
    %65 = vector.broadcast %64 : vector<1x384xf32> to vector<8x384xf32>
    %66 = arith.mulf %60, %65 : vector<8x384xf32>
    %cst_43 = arith.constant dense<0.000000e+00> : vector<8xf32>
    %67 = vector.multi_reduction <add>, %66, %cst_43 [1] : vector<8x384xf32> to vector<8xf32>
    %68 = vector.shape_cast %67 : vector<8xf32> to vector<8x1xf32>
    %69 = arith.mulf %66, %60 : vector<8x384xf32>
    %cst_44 = arith.constant dense<0.000000e+00> : vector<8xf32>
    %70 = vector.multi_reduction <add>, %69, %cst_44 [1] : vector<8x384xf32> to vector<8xf32>
    %71 = vector.shape_cast %70 : vector<8xf32> to vector<8x1xf32>
    %cst_45 = arith.constant 0.000000e+00 : f32
    %72 = vector.broadcast %cst_45 : f32 to vector<1x384xf32>
    %73 = arith.cmpf ogt, %64, %72 : vector<1x384xf32>
    %cst_46 = arith.constant 0xFF800000 : f32
    %74 = vector.shape_cast %73 : vector<1x384xi1> to vector<1x384xi1>
    %75 = vector.broadcast %74 : vector<1x384xi1> to vector<8x384xi1>
    %76 = vector.broadcast %cst_46 : f32 to vector<8x384xf32>
    %77 = arith.select %75, %60, %76 : vector<8x384xi1>, vector<8x384xf32>
    %cst_47 = arith.constant dense<0xFF800000> : vector<8xf32>
    %78 = vector.multi_reduction <maximumf>, %77, %cst_47 [1] : vector<8x384xf32> to vector<8xf32>
    %79 = vector.shape_cast %78 : vector<8xf32> to vector<8x1xf32>
    %cst_48 = arith.constant 0.000000e+00 : f32
    %80 = vector.broadcast %cst_48 : f32 to vector<1x384xf32>
    %81 = arith.cmpf ogt, %64, %80 : vector<1x384xf32>
    %cst_49 = arith.constant 0x7F800000 : f32
    %82 = vector.shape_cast %81 : vector<1x384xi1> to vector<1x384xi1>
    %83 = vector.broadcast %82 : vector<1x384xi1> to vector<8x384xi1>
    %84 = vector.broadcast %cst_49 : f32 to vector<8x384xf32>
    %85 = arith.select %83, %60, %84 : vector<8x384xi1>, vector<8x384xf32>
    %cst_50 = arith.constant dense<0x7F800000> : vector<8xf32>
    %86 = vector.multi_reduction <minimumf>, %85, %cst_50 [1] : vector<8x384xf32> to vector<8xf32>
    %87 = vector.shape_cast %86 : vector<8xf32> to vector<8x1xf32>
    %cst_51 = arith.constant 0.000000e+00 : f32
    %88 = vector.broadcast %cst_51 : f32 to vector<8x4xf32>
    %89 = tpu.concatenate %68, %71, %79, %87, %88 in 1 : vector<8x1xf32>, vector<8x1xf32>, vector<8x1xf32>, vector<8x1xf32>, vector<8x4xf32> -> vector<8x8xf32>
    %c0_52 = arith.constant 0 : index
    %c0_53 = arith.constant 0 : index
    %c0_54 = arith.constant 0 : index
    %90 = vector.load %arg7[%c0_52, %c0_53, %c0_54] : memref<1x8x8xf32, #tpu.memory_space<vmem>>, vector<1x8x8xf32>
    %91 = vector.shape_cast %90 : vector<1x8x8xf32> to vector<8x8xf32>
    %92 = vector.shape_cast %89 : vector<8x8xf32> to vector<1x8x8xf32>
    tpu.vector_store %arg7[%c0_52, %c0_53, %c0_54], %92 {strides = array<i32>} : memref<1x8x8xf32, #tpu.memory_space<vmem>>, vector<1x8x8xf32>,
    return
  }
  func.func @transform_0(%arg0: i32) -> (i32, i32, i32) {
    %c0_i32 = arith.constant 0 : i32
    %c0_i32_0 = arith.constant 0 : i32
    %c0_i32_1 = arith.constant 0 : i32
    return %arg0, %c0_i32, %c0_i32_0 : i32, i32, i32
  }
  func.func @transform_1(%arg0: i32) -> (i32, i32, i32) {
    %c0_i32 = arith.constant 0 : i32
    %c0_i32_0 = arith.constant 0 : i32
    %c0_i32_1 = arith.constant 0 : i32
    %c0_i32_2 = arith.constant 0 : i32
    return %c0_i32, %c0_i32_0, %c0_i32_1 : i32, i32, i32
  }
  func.func @transform_2(%arg0: i32) -> (i32, i32) {
    %c0_i32 = arith.constant 0 : i32
    %c0_i32_0 = arith.constant 0 : i32
    %c0_i32_1 = arith.constant 0 : i32
    return %c0_i32, %c0_i32_0 : i32, i32
  }
  func.func @transform_3(%arg0: i32) -> (i32, i32) {
    %c0_i32 = arith.constant 0 : i32
    %c0_i32_0 = arith.constant 0 : i32
    %c0_i32_1 = arith.constant 0 : i32
    return %c0_i32, %c0_i32_0 : i32, i32
  }
  func.func @transform_4(%arg0: i32) -> (i32, i32) {
    %c0_i32 = arith.constant 0 : i32
    %c0_i32_0 = arith.constant 0 : i32
    %c0_i32_1 = arith.constant 0 : i32
    return %c0_i32, %c0_i32_0 : i32, i32
  }
  func.func @transform_5(%arg0: i32) -> (i32, i32, i32) {
    %c0_i32 = arith.constant 0 : i32
    %c0_i32_0 = arith.constant 0 : i32
    %c0_i32_1 = arith.constant 0 : i32
    return %arg0, %c0_i32, %c0_i32_0 : i32, i32, i32
  }
  func.func @transform_6(%arg0: i32) -> (i32, i32, i32) {
    %c0_i32 = arith.constant 0 : i32
    %c0_i32_0 = arith.constant 0 : i32
    %c0_i32_1 = arith.constant 0 : i32
    return %arg0, %c0_i32, %c0_i32_0 : i32, i32, i32
  }
}

module attributes {stable_mosaic.version = 11 : i64} {
  func.func @kernel(%arg0: i32, %arg1: memref<1x8x384xf32, #tpu.memory_space<vmem>>, %arg2: memref<1x8x1xf32, #tpu.memory_space<vmem>>, %arg3: memref<1x8x1xf32, #tpu.memory_space<vmem>>, %arg4: memref<1x2x384xf32, #tpu.memory_space<vmem>>) attributes {dimension_semantics = [#tpu.dimension_semantics<parallel>], iteration_bounds = array<i64: 2>, scalar_prefetch = 0 : i64, scratch_operands = 0 : i64, tpu.core_type = #tpu.core_type<tc>, window_params = [{transform_indices = @transform_0, window_bounds = array<i64: 1, 8, 384>}, {transform_indices = @transform_1, window_bounds = array<i64: 1, 8, 1>}, {transform_indices = @transform_2, window_bounds = array<i64: 1, 8, 1>}, {transform_indices = @transform_3, window_bounds = array<i64: 1, 2, 384>}]} {
    %c0 = arith.constant 0 : index
    %c0_0 = arith.constant 0 : index
    %c0_1 = arith.constant 0 : index
    %0 = vector.load %arg1[%c0, %c0_0, %c0_1] : memref<1x8x384xf32, #tpu.memory_space<vmem>>, vector<1x8x384xf32>
    %1 = vector.shape_cast %0 : vector<1x8x384xf32> to vector<8x384xf32>
    %c0_2 = arith.constant 0 : index
    %c0_3 = arith.constant 0 : index
    %c0_4 = arith.constant 0 : index
    %2 = vector.load %arg2[%c0_2, %c0_3, %c0_4] : memref<1x8x1xf32, #tpu.memory_space<vmem>>, vector<1x8x1xf32>
    %3 = vector.shape_cast %2 : vector<1x8x1xf32> to vector<8x1xf32>
    %4 = vector.broadcast %3 : vector<8x1xf32> to vector<8x384xf32>
    %5 = arith.mulf %1, %4 : vector<8x384xf32>
    %c0_5 = arith.constant 0 : index
    %c0_6 = arith.constant 0 : index
    %c0_7 = arith.constant 0 : index
    %6 = vector.load %arg3[%c0_5, %c0_6, %c0_7] : memref<1x8x1xf32, #tpu.memory_space<vmem>>, vector<1x8x1xf32>
    %7 = vector.shape_cast %6 : vector<1x8x1xf32> to vector<8x1xf32>
    %8 = vector.broadcast %7 : vector<8x1xf32> to vector<8x384xf32>
    %9 = arith.addf %5, %8 : vector<8x384xf32>
    %10 = vector.extract_strided_slice %9 {offsets = [0, 0], sizes = [4, 384], strides = [1, 1]} : vector<8x384xf32> to vector<4x384xf32>
    %cst = arith.constant dense<0.000000e+00> : vector<384xf32>
    %11 = vector.multi_reduction <add>, %10, %cst [0] : vector<4x384xf32> to vector<384xf32>
    %12 = vector.shape_cast %11 : vector<384xf32> to vector<1x384xf32>
    %cst_8 = arith.constant 2.500000e-01 : f32
    %13 = vector.broadcast %cst_8 : f32 to vector<1x384xf32>
    %14 = arith.mulf %12, %13 : vector<1x384xf32>
    %cst_9 = arith.constant dense<0xFF800000> : vector<384xf32>
    %15 = vector.multi_reduction <maximumf>, %10, %cst_9 [0] : vector<4x384xf32> to vector<384xf32>
    %16 = vector.shape_cast %15 : vector<384xf32> to vector<1x384xf32>
    %17 = tpu.concatenate %14, %16 in 0 : vector<1x384xf32>, vector<1x384xf32> -> vector<2x384xf32>
    %c0_10 = arith.constant 0 : index
    %c0_11 = arith.constant 0 : index
    %c0_12 = arith.constant 0 : index
    %18 = vector.load %arg4[%c0_10, %c0_11, %c0_12] : memref<1x2x384xf32, #tpu.memory_space<vmem>>, vector<1x2x384xf32>
    %19 = vector.shape_cast %18 : vector<1x2x384xf32> to vector<2x384xf32>
    %20 = vector.shape_cast %17 : vector<2x384xf32> to vector<1x2x384xf32>
    tpu.vector_store %arg4[%c0_10, %c0_11, %c0_12], %20 {strides = array<i32>} : memref<1x2x384xf32, #tpu.memory_space<vmem>>, vector<1x2x384xf32>,
    return
  }
  func.func @transform_0(%arg0: i32) -> (i32, i32, i32) {
    %c0_i32 = arith.constant 0 : i32
    %c0_i32_0 = arith.constant 0 : i32
    %c0_i32_1 = arith.constant 0 : i32
    return %arg0, %c0_i32, %c0_i32_0 : i32, i32, i32
  }
  func.func @transform_1(%arg0: i32) -> (i32, i32, i32) {
    %c0_i32 = arith.constant 0 : i32
    %c0_i32_0 = arith.constant 0 : i32
    %c0_i32_1 = arith.constant 0 : i32
    return %arg0, %c0_i32, %c0_i32_0 : i32, i32, i32
  }
  func.func @transform_2(%arg0: i32) -> (i32, i32, i32) {
    %c0_i32 = arith.constant 0 : i32
    %c0_i32_0 = arith.constant 0 : i32
    %c0_i32_1 = arith.constant 0 : i32
    return %arg0, %c0_i32, %c0_i32_0 : i32, i32, i32
  }
  func.func @transform_3(%arg0: i32) -> (i32, i32, i32) {
    %c0_i32 = arith.constant 0 : i32
    %c0_i32_0 = arith.constant 0 : i32
    %c0_i32_1 = arith.constant 0 : i32
    return %arg0, %c0_i32, %c0_i32_0 : i32, i32, i32
  }
}

module attributes {stable_mosaic.version = 11 : i64} {
  func.func @_tail_kernel(%arg0: i32, %arg1: memref<1x8x384xf32, #tpu.memory_space<vmem>>, %arg2: memref<1x8x1xf32, #tpu.memory_space<vmem>>, %arg3: memref<1x8x1xf32, #tpu.memory_space<vmem>>, %arg4: memref<1x1x384xf32, #tpu.memory_space<vmem>>, %arg5: memref<1x8x384xf32, #tpu.memory_space<vmem>>, %arg6: memref<1x8x384xf32, #tpu.memory_space<vmem>>) attributes {dimension_semantics = [#tpu.dimension_semantics<parallel>], iteration_bounds = array<i64: 2>, scalar_prefetch = 0 : i64, scratch_operands = 0 : i64, tpu.core_type = #tpu.core_type<tc>, window_params = [{transform_indices = @transform_0, window_bounds = array<i64: 1, 8, 384>}, {transform_indices = @transform_1, window_bounds = array<i64: 1, 8, 1>}, {transform_indices = @transform_2, window_bounds = array<i64: 1, 8, 1>}, {transform_indices = @transform_3, window_bounds = array<i64: 1, 1, 384>}, {transform_indices = @transform_4, window_bounds = array<i64: 1, 8, 384>}, {transform_indices = @transform_5, window_bounds = array<i64: 1, 8, 384>}]} {
    %c0 = arith.constant 0 : index
    %c0_0 = arith.constant 0 : index
    %c0_1 = arith.constant 0 : index
    %0 = vector.load %arg1[%c0, %c0_0, %c0_1] : memref<1x8x384xf32, #tpu.memory_space<vmem>>, vector<1x8x384xf32>
    %1 = vector.shape_cast %0 : vector<1x8x384xf32> to vector<8x384xf32>
    %c0_2 = arith.constant 0 : index
    %c0_3 = arith.constant 0 : index
    %c0_4 = arith.constant 0 : index
    %2 = vector.load %arg2[%c0_2, %c0_3, %c0_4] : memref<1x8x1xf32, #tpu.memory_space<vmem>>, vector<1x8x1xf32>
    %3 = vector.shape_cast %2 : vector<1x8x1xf32> to vector<8x1xf32>
    %4 = vector.broadcast %3 : vector<8x1xf32> to vector<8x384xf32>
    %5 = arith.mulf %1, %4 : vector<8x384xf32>
    %c0_5 = arith.constant 0 : index
    %c0_6 = arith.constant 0 : index
    %c0_7 = arith.constant 0 : index
    %6 = vector.load %arg3[%c0_5, %c0_6, %c0_7] : memref<1x8x1xf32, #tpu.memory_space<vmem>>, vector<1x8x1xf32>
    %7 = vector.shape_cast %6 : vector<1x8x1xf32> to vector<8x1xf32>
    %8 = vector.broadcast %7 : vector<8x1xf32> to vector<8x384xf32>
    %9 = arith.addf %5, %8 : vector<8x384xf32>
    %c0_8 = arith.constant 0 : index
    %c0_9 = arith.constant 0 : index
    %c0_10 = arith.constant 0 : index
    %10 = vector.load %arg4[%c0_8, %c0_9, %c0_10] : memref<1x1x384xf32, #tpu.memory_space<vmem>>, vector<1x1x384xf32>
    %11 = vector.shape_cast %10 : vector<1x1x384xf32> to vector<1x384xf32>
    %cst = arith.constant 0.000000e+00 : f32
    %12 = vector.broadcast %cst : f32 to vector<1x384xf32>
    %13 = arith.subf %12, %11 : vector<1x384xf32>
    %14 = math.exp %13 : vector<1x384xf32>
    %cst_11 = arith.constant 1.000000e+00 : f32
    %15 = vector.broadcast %cst_11 : f32 to vector<1x384xf32>
    %16 = arith.addf %15, %14 : vector<1x384xf32>
    %cst_12 = arith.constant 1.000000e+00 : f32
    %17 = vector.broadcast %cst_12 : f32 to vector<1x384xf32>
    %18 = arith.divf %17, %16 : vector<1x384xf32>
    %19 = vector.broadcast %18 : vector<1x384xf32> to vector<8x384xf32>
    %20 = arith.mulf %9, %19 : vector<8x384xf32>
    %c0_13 = arith.constant 0 : index
    %c0_14 = arith.constant 0 : index
    %c0_15 = arith.constant 0 : index
    %21 = vector.load %arg5[%c0_13, %c0_14, %c0_15] : memref<1x8x384xf32, #tpu.memory_space<vmem>>, vector<1x8x384xf32>
    %22 = vector.shape_cast %21 : vector<1x8x384xf32> to vector<8x384xf32>
    %23 = arith.addf %20, %22 : vector<8x384xf32>
    %cst_16 = arith.constant 0.000000e+00 : f32
    %24 = vector.broadcast %cst_16 : f32 to vector<8x384xf32>
    %25 = arith.maximumf %23, %24 : vector<8x384xf32>
    %c0_17 = arith.constant 0 : index
    %c0_18 = arith.constant 0 : index
    %c0_19 = arith.constant 0 : index
    %26 = vector.load %arg6[%c0_17, %c0_18, %c0_19] : memref<1x8x384xf32, #tpu.memory_space<vmem>>, vector<1x8x384xf32>
    %27 = vector.shape_cast %26 : vector<1x8x384xf32> to vector<8x384xf32>
    %28 = vector.shape_cast %25 : vector<8x384xf32> to vector<1x8x384xf32>
    tpu.vector_store %arg6[%c0_17, %c0_18, %c0_19], %28 {strides = array<i32>} : memref<1x8x384xf32, #tpu.memory_space<vmem>>, vector<1x8x384xf32>,
    return
  }
  func.func @transform_0(%arg0: i32) -> (i32, i32, i32) {
    %c0_i32 = arith.constant 0 : i32
    %c0_i32_0 = arith.constant 0 : i32
    %c0_i32_1 = arith.constant 0 : i32
    return %arg0, %c0_i32, %c0_i32_0 : i32, i32, i32
  }
  func.func @transform_1(%arg0: i32) -> (i32, i32, i32) {
    %c0_i32 = arith.constant 0 : i32
    %c0_i32_0 = arith.constant 0 : i32
    %c0_i32_1 = arith.constant 0 : i32
    return %arg0, %c0_i32, %c0_i32_0 : i32, i32, i32
  }
  func.func @transform_2(%arg0: i32) -> (i32, i32, i32) {
    %c0_i32 = arith.constant 0 : i32
    %c0_i32_0 = arith.constant 0 : i32
    %c0_i32_1 = arith.constant 0 : i32
    return %arg0, %c0_i32, %c0_i32_0 : i32, i32, i32
  }
  func.func @transform_3(%arg0: i32) -> (i32, i32, i32) {
    %c0_i32 = arith.constant 0 : i32
    %c0_i32_0 = arith.constant 0 : i32
    %c0_i32_1 = arith.constant 0 : i32
    return %arg0, %c0_i32, %c0_i32_0 : i32, i32, i32
  }
  func.func @transform_4(%arg0: i32) -> (i32, i32, i32) {
    %c0_i32 = arith.constant 0 : i32
    %c0_i32_0 = arith.constant 0 : i32
    %c0_i32_1 = arith.constant 0 : i32
    return %arg0, %c0_i32, %c0_i32_0 : i32, i32, i32
  }
  func.func @transform_5(%arg0: i32) -> (i32, i32, i32) {
    %c0_i32 = arith.constant 0 : i32
    %c0_i32_0 = arith.constant 0 : i32
    %c0_i32_1 = arith.constant 0 : i32
    return %arg0, %c0_i32, %c0_i32_0 : i32, i32, i32
  }
}

module attributes {stable_mosaic.version = 11 : i64} {
  func.func @kernel(%arg0: i32, %arg1: memref<1x8x128xf32, #tpu.memory_space<vmem>>, %arg2: memref<3x8x8xf32, #tpu.memory_space<vmem>>, %arg3: memref<1x128xf32, #tpu.memory_space<vmem>>, %arg4: memref<1x8x128xf32, #tpu.memory_space<vmem>>, %arg5: memref<1x8x8xf32, #tpu.memory_space<vmem>>) attributes {dimension_semantics = [#tpu.dimension_semantics<parallel>], iteration_bounds = array<i64: 2>, scalar_prefetch = 0 : i64, scratch_operands = 0 : i64, tpu.core_type = #tpu.core_type<tc>, window_params = [{transform_indices = @transform_0, window_bounds = array<i64: 1, 8, 128>}, {pipeline_mode = #tpu.pipeline_mode<synchronous>, transform_indices = @transform_1, window_bounds = array<i64: 3, 8, 8>}, {pipeline_mode = #tpu.pipeline_mode<synchronous>, transform_indices = @transform_2, window_bounds = array<i64: 1, 128>}, {transform_indices = @transform_3, window_bounds = array<i64: 1, 8, 128>}, {transform_indices = @transform_4, window_bounds = array<i64: 1, 8, 8>}]} {
    %c0 = arith.constant 0 : index
    %c0_0 = arith.constant 0 : index
    %c0_1 = arith.constant 0 : index
    %0 = vector.load %arg1[%c0, %c0_0, %c0_1] : memref<1x8x128xf32, #tpu.memory_space<vmem>>, vector<1x8x128xf32>
    %1 = vector.shape_cast %0 : vector<1x8x128xf32> to vector<8x128xf32>
    %cst = arith.constant 0.000000e+00 : f32
    %2 = vector.broadcast %cst : f32 to vector<8x1xf32>
    %3 = tpu.concatenate %2, %1, %2 in 1 : vector<8x1xf32>, vector<8x128xf32>, vector<8x1xf32> -> vector<8x130xf32>
    %cst_2 = arith.constant 0.000000e+00 : f32
    %4 = vector.broadcast %cst_2 : f32 to vector<8x128xf32>
    %c0_3 = arith.constant 0 : index
    %c0_4 = arith.constant 0 : index
    %c0_5 = arith.constant 0 : index
    %5 = vector.load %arg2[%c0_3, %c0_4, %c0_5] : memref<3x8x8xf32, #tpu.memory_space<vmem>>, vector<1x8x8xf32>
    %6 = vector.shape_cast %5 : vector<1x8x8xf32> to vector<8x8xf32>
    %7 = vector.extract_strided_slice %3 {offsets = [0, 0], sizes = [8, 128], strides = [1, 1]} : vector<8x130xf32> to vector<8x128xf32>
    %cst_6 = arith.constant dense<0.000000e+00> : vector<8x128xf32>
    %8 = tpu.matmul %6, %7, %cst_6 {dimension_numbers = #tpu.dot_dimension_numbers<[1], [0], [0], [1], [0, 0, 1, 1], [], []>} : vector<8x8xf32>, vector<8x128xf32>, vector<8x128xf32> -> vector<8x128xf32>
    %9 = arith.addf %4, %8 : vector<8x128xf32>
    %c1 = arith.constant 1 : index
    %c0_7 = arith.constant 0 : index
    %c0_8 = arith.constant 0 : index
    %10 = vector.load %arg2[%c1, %c0_7, %c0_8] : memref<3x8x8xf32, #tpu.memory_space<vmem>>, vector<1x8x8xf32>
    %11 = vector.shape_cast %10 : vector<1x8x8xf32> to vector<8x8xf32>
    %12 = vector.extract_strided_slice %3 {offsets = [0, 1], sizes = [8, 128], strides = [1, 1]} : vector<8x130xf32> to vector<8x128xf32>
    %cst_9 = arith.constant dense<0.000000e+00> : vector<8x128xf32>
    %13 = tpu.matmul %11, %12, %cst_9 {dimension_numbers = #tpu.dot_dimension_numbers<[1], [0], [0], [1], [0, 0, 1, 1], [], []>} : vector<8x8xf32>, vector<8x128xf32>, vector<8x128xf32> -> vector<8x128xf32>
    %14 = arith.addf %9, %13 : vector<8x128xf32>
    %c2 = arith.constant 2 : index
    %c0_10 = arith.constant 0 : index
    %c0_11 = arith.constant 0 : index
    %15 = vector.load %arg2[%c2, %c0_10, %c0_11] : memref<3x8x8xf32, #tpu.memory_space<vmem>>, vector<1x8x8xf32>
    %16 = vector.shape_cast %15 : vector<1x8x8xf32> to vector<8x8xf32>
    %17 = vector.extract_strided_slice %3 {offsets = [0, 2], sizes = [8, 128], strides = [1, 1]} : vector<8x130xf32> to vector<8x128xf32>
    %cst_12 = arith.constant dense<0.000000e+00> : vector<8x128xf32>
    %18 = tpu.matmul %16, %17, %cst_12 {dimension_numbers = #tpu.dot_dimension_numbers<[1], [0], [0], [1], [0, 0, 1, 1], [], []>} : vector<8x8xf32>, vector<8x128xf32>, vector<8x128xf32> -> vector<8x128xf32>
    %19 = arith.addf %14, %18 : vector<8x128xf32>
    %c0_13 = arith.constant 0 : index
    %c0_14 = arith.constant 0 : index
    %c0_15 = arith.constant 0 : index
    %20 = vector.load %arg4[%c0_13, %c0_14, %c0_15] : memref<1x8x128xf32, #tpu.memory_space<vmem>>, vector<1x8x128xf32>
    %21 = vector.shape_cast %20 : vector<1x8x128xf32> to vector<8x128xf32>
    %22 = vector.shape_cast %19 : vector<8x128xf32> to vector<1x8x128xf32>
    tpu.vector_store %arg4[%c0_13, %c0_14, %c0_15], %22 {strides = array<i32>} : memref<1x8x128xf32, #tpu.memory_space<vmem>>, vector<1x8x128xf32>,
    %c0_16 = arith.constant 0 : index
    %c0_17 = arith.constant 0 : index
    %23 = vector.load %arg3[%c0_16, %c0_17] : memref<1x128xf32, #tpu.memory_space<vmem>>, vector<1x128xf32>
    %24 = vector.broadcast %23 : vector<1x128xf32> to vector<8x128xf32>
    %25 = arith.mulf %19, %24 : vector<8x128xf32>
    %cst_18 = arith.constant dense<0.000000e+00> : vector<8xf32>
    %26 = vector.multi_reduction <add>, %25, %cst_18 [1] : vector<8x128xf32> to vector<8xf32>
    %27 = vector.shape_cast %26 : vector<8xf32> to vector<8x1xf32>
    %28 = arith.mulf %25, %19 : vector<8x128xf32>
    %cst_19 = arith.constant dense<0.000000e+00> : vector<8xf32>
    %29 = vector.multi_reduction <add>, %28, %cst_19 [1] : vector<8x128xf32> to vector<8xf32>
    %30 = vector.shape_cast %29 : vector<8xf32> to vector<8x1xf32>
    %cst_20 = arith.constant 0.000000e+00 : f32
    %31 = vector.broadcast %cst_20 : f32 to vector<1x128xf32>
    %32 = arith.cmpf ogt, %23, %31 : vector<1x128xf32>
    %cst_21 = arith.constant 0xFF800000 : f32
    %33 = vector.shape_cast %32 : vector<1x128xi1> to vector<1x128xi1>
    %34 = vector.broadcast %33 : vector<1x128xi1> to vector<8x128xi1>
    %35 = vector.broadcast %cst_21 : f32 to vector<8x128xf32>
    %36 = arith.select %34, %19, %35 : vector<8x128xi1>, vector<8x128xf32>
    %cst_22 = arith.constant dense<0xFF800000> : vector<8xf32>
    %37 = vector.multi_reduction <maximumf>, %36, %cst_22 [1] : vector<8x128xf32> to vector<8xf32>
    %38 = vector.shape_cast %37 : vector<8xf32> to vector<8x1xf32>
    %cst_23 = arith.constant 0.000000e+00 : f32
    %39 = vector.broadcast %cst_23 : f32 to vector<1x128xf32>
    %40 = arith.cmpf ogt, %23, %39 : vector<1x128xf32>
    %cst_24 = arith.constant 0x7F800000 : f32
    %41 = vector.shape_cast %40 : vector<1x128xi1> to vector<1x128xi1>
    %42 = vector.broadcast %41 : vector<1x128xi1> to vector<8x128xi1>
    %43 = vector.broadcast %cst_24 : f32 to vector<8x128xf32>
    %44 = arith.select %42, %19, %43 : vector<8x128xi1>, vector<8x128xf32>
    %cst_25 = arith.constant dense<0x7F800000> : vector<8xf32>
    %45 = vector.multi_reduction <minimumf>, %44, %cst_25 [1] : vector<8x128xf32> to vector<8xf32>
    %46 = vector.shape_cast %45 : vector<8xf32> to vector<8x1xf32>
    %cst_26 = arith.constant 0.000000e+00 : f32
    %47 = vector.broadcast %cst_26 : f32 to vector<8x4xf32>
    %48 = tpu.concatenate %27, %30, %38, %46, %47 in 1 : vector<8x1xf32>, vector<8x1xf32>, vector<8x1xf32>, vector<8x1xf32>, vector<8x4xf32> -> vector<8x8xf32>
    %c0_27 = arith.constant 0 : index
    %c0_28 = arith.constant 0 : index
    %c0_29 = arith.constant 0 : index
    %49 = vector.load %arg5[%c0_27, %c0_28, %c0_29] : memref<1x8x8xf32, #tpu.memory_space<vmem>>, vector<1x8x8xf32>
    %50 = vector.shape_cast %49 : vector<1x8x8xf32> to vector<8x8xf32>
    %51 = vector.shape_cast %48 : vector<8x8xf32> to vector<1x8x8xf32>
    tpu.vector_store %arg5[%c0_27, %c0_28, %c0_29], %51 {strides = array<i32>} : memref<1x8x8xf32, #tpu.memory_space<vmem>>, vector<1x8x8xf32>,
    return
  }
  func.func @transform_0(%arg0: i32) -> (i32, i32, i32) {
    %c0_i32 = arith.constant 0 : i32
    %c0_i32_0 = arith.constant 0 : i32
    %c0_i32_1 = arith.constant 0 : i32
    return %arg0, %c0_i32, %c0_i32_0 : i32, i32, i32
  }
  func.func @transform_1(%arg0: i32) -> (i32, i32, i32) {
    %c0_i32 = arith.constant 0 : i32
    %c0_i32_0 = arith.constant 0 : i32
    %c0_i32_1 = arith.constant 0 : i32
    %c0_i32_2 = arith.constant 0 : i32
    return %c0_i32, %c0_i32_0, %c0_i32_1 : i32, i32, i32
  }
  func.func @transform_2(%arg0: i32) -> (i32, i32) {
    %c0_i32 = arith.constant 0 : i32
    %c0_i32_0 = arith.constant 0 : i32
    %c0_i32_1 = arith.constant 0 : i32
    return %c0_i32, %c0_i32_0 : i32, i32
  }
  func.func @transform_3(%arg0: i32) -> (i32, i32, i32) {
    %c0_i32 = arith.constant 0 : i32
    %c0_i32_0 = arith.constant 0 : i32
    %c0_i32_1 = arith.constant 0 : i32
    return %arg0, %c0_i32, %c0_i32_0 : i32, i32, i32
  }
  func.func @transform_4(%arg0: i32) -> (i32, i32, i32) {
    %c0_i32 = arith.constant 0 : i32
    %c0_i32_0 = arith.constant 0 : i32
    %c0_i32_1 = arith.constant 0 : i32
    return %arg0, %c0_i32, %c0_i32_0 : i32, i32, i32
  }
}

module attributes {stable_mosaic.version = 11 : i64} {
  func.func @kernel(%arg0: i32, %arg1: memref<1x8x128xf32, #tpu.memory_space<vmem>>, %arg2: memref<3x8x8xf32, #tpu.memory_space<vmem>>, %arg3: memref<1x128xf32, #tpu.memory_space<vmem>>, %arg4: memref<8x1xf32, #tpu.memory_space<vmem>>, %arg5: memref<8x1xf32, #tpu.memory_space<vmem>>, %arg6: memref<1x8x128xf32, #tpu.memory_space<vmem>>, %arg7: memref<1x8x8xf32, #tpu.memory_space<vmem>>) attributes {dimension_semantics = [#tpu.dimension_semantics<parallel>], iteration_bounds = array<i64: 2>, scalar_prefetch = 0 : i64, scratch_operands = 0 : i64, tpu.core_type = #tpu.core_type<tc>, window_params = [{transform_indices = @transform_0, window_bounds = array<i64: 1, 8, 128>}, {pipeline_mode = #tpu.pipeline_mode<synchronous>, transform_indices = @transform_1, window_bounds = array<i64: 3, 8, 8>}, {pipeline_mode = #tpu.pipeline_mode<synchronous>, transform_indices = @transform_2, window_bounds = array<i64: 1, 128>}, {pipeline_mode = #tpu.pipeline_mode<synchronous>, transform_indices = @transform_3, window_bounds = array<i64: 8, 1>}, {pipeline_mode = #tpu.pipeline_mode<synchronous>, transform_indices = @transform_4, window_bounds = array<i64: 8, 1>}, {transform_indices = @transform_5, window_bounds = array<i64: 1, 8, 128>}, {transform_indices = @transform_6, window_bounds = array<i64: 1, 8, 8>}]} {
    %c0 = arith.constant 0 : index
    %c0_0 = arith.constant 0 : index
    %c0_1 = arith.constant 0 : index
    %0 = vector.load %arg1[%c0, %c0_0, %c0_1] : memref<1x8x128xf32, #tpu.memory_space<vmem>>, vector<1x8x128xf32>
    %1 = vector.shape_cast %0 : vector<1x8x128xf32> to vector<8x128xf32>
    %c0_2 = arith.constant 0 : index
    %c0_3 = arith.constant 0 : index
    %2 = vector.load %arg4[%c0_2, %c0_3] : memref<8x1xf32, #tpu.memory_space<vmem>>, vector<8x1xf32>
    %3 = vector.broadcast %2 : vector<8x1xf32> to vector<8x128xf32>
    %4 = arith.mulf %1, %3 : vector<8x128xf32>
    %c0_4 = arith.constant 0 : index
    %c0_5 = arith.constant 0 : index
    %5 = vector.load %arg5[%c0_4, %c0_5] : memref<8x1xf32, #tpu.memory_space<vmem>>, vector<8x1xf32>
    %6 = vector.broadcast %5 : vector<8x1xf32> to vector<8x128xf32>
    %7 = arith.addf %4, %6 : vector<8x128xf32>
    %cst = arith.constant 0.000000e+00 : f32
    %8 = vector.broadcast %cst : f32 to vector<8x128xf32>
    %9 = arith.maximumf %7, %8 : vector<8x128xf32>
    %c0_6 = arith.constant 0 : index
    %c0_7 = arith.constant 0 : index
    %10 = vector.load %arg3[%c0_6, %c0_7] : memref<1x128xf32, #tpu.memory_space<vmem>>, vector<1x128xf32>
    %11 = vector.broadcast %10 : vector<1x128xf32> to vector<8x128xf32>
    %12 = arith.mulf %9, %11 : vector<8x128xf32>
    %cst_8 = arith.constant 0.000000e+00 : f32
    %13 = vector.broadcast %cst_8 : f32 to vector<8x1xf32>
    %14 = tpu.concatenate %13, %12, %13 in 1 : vector<8x1xf32>, vector<8x128xf32>, vector<8x1xf32> -> vector<8x130xf32>
    %cst_9 = arith.constant 0.000000e+00 : f32
    %15 = vector.broadcast %cst_9 : f32 to vector<8x128xf32>
    %c0_10 = arith.constant 0 : index
    %c0_11 = arith.constant 0 : index
    %c0_12 = arith.constant 0 : index
    %16 = vector.load %arg2[%c0_10, %c0_11, %c0_12] : memref<3x8x8xf32, #tpu.memory_space<vmem>>, vector<1x8x8xf32>
    %17 = vector.shape_cast %16 : vector<1x8x8xf32> to vector<8x8xf32>
    %18 = vector.extract_strided_slice %14 {offsets = [0, 0], sizes = [8, 128], strides = [1, 1]} : vector<8x130xf32> to vector<8x128xf32>
    %cst_13 = arith.constant dense<0.000000e+00> : vector<8x128xf32>
    %19 = tpu.matmul %17, %18, %cst_13 {dimension_numbers = #tpu.dot_dimension_numbers<[1], [0], [0], [1], [0, 0, 1, 1], [], []>} : vector<8x8xf32>, vector<8x128xf32>, vector<8x128xf32> -> vector<8x128xf32>
    %20 = arith.addf %15, %19 : vector<8x128xf32>
    %c1 = arith.constant 1 : index
    %c0_14 = arith.constant 0 : index
    %c0_15 = arith.constant 0 : index
    %21 = vector.load %arg2[%c1, %c0_14, %c0_15] : memref<3x8x8xf32, #tpu.memory_space<vmem>>, vector<1x8x8xf32>
    %22 = vector.shape_cast %21 : vector<1x8x8xf32> to vector<8x8xf32>
    %23 = vector.extract_strided_slice %14 {offsets = [0, 1], sizes = [8, 128], strides = [1, 1]} : vector<8x130xf32> to vector<8x128xf32>
    %cst_16 = arith.constant dense<0.000000e+00> : vector<8x128xf32>
    %24 = tpu.matmul %22, %23, %cst_16 {dimension_numbers = #tpu.dot_dimension_numbers<[1], [0], [0], [1], [0, 0, 1, 1], [], []>} : vector<8x8xf32>, vector<8x128xf32>, vector<8x128xf32> -> vector<8x128xf32>
    %25 = arith.addf %20, %24 : vector<8x128xf32>
    %c2 = arith.constant 2 : index
    %c0_17 = arith.constant 0 : index
    %c0_18 = arith.constant 0 : index
    %26 = vector.load %arg2[%c2, %c0_17, %c0_18] : memref<3x8x8xf32, #tpu.memory_space<vmem>>, vector<1x8x8xf32>
    %27 = vector.shape_cast %26 : vector<1x8x8xf32> to vector<8x8xf32>
    %28 = vector.extract_strided_slice %14 {offsets = [0, 2], sizes = [8, 128], strides = [1, 1]} : vector<8x130xf32> to vector<8x128xf32>
    %cst_19 = arith.constant dense<0.000000e+00> : vector<8x128xf32>
    %29 = tpu.matmul %27, %28, %cst_19 {dimension_numbers = #tpu.dot_dimension_numbers<[1], [0], [0], [1], [0, 0, 1, 1], [], []>} : vector<8x8xf32>, vector<8x128xf32>, vector<8x128xf32> -> vector<8x128xf32>
    %30 = arith.addf %25, %29 : vector<8x128xf32>
    %c0_20 = arith.constant 0 : index
    %c0_21 = arith.constant 0 : index
    %c0_22 = arith.constant 0 : index
    %31 = vector.load %arg6[%c0_20, %c0_21, %c0_22] : memref<1x8x128xf32, #tpu.memory_space<vmem>>, vector<1x8x128xf32>
    %32 = vector.shape_cast %31 : vector<1x8x128xf32> to vector<8x128xf32>
    %33 = vector.shape_cast %30 : vector<8x128xf32> to vector<1x8x128xf32>
    tpu.vector_store %arg6[%c0_20, %c0_21, %c0_22], %33 {strides = array<i32>} : memref<1x8x128xf32, #tpu.memory_space<vmem>>, vector<1x8x128xf32>,
    %c0_23 = arith.constant 0 : index
    %c0_24 = arith.constant 0 : index
    %34 = vector.load %arg3[%c0_23, %c0_24] : memref<1x128xf32, #tpu.memory_space<vmem>>, vector<1x128xf32>
    %35 = vector.broadcast %34 : vector<1x128xf32> to vector<8x128xf32>
    %36 = arith.mulf %30, %35 : vector<8x128xf32>
    %cst_25 = arith.constant dense<0.000000e+00> : vector<8xf32>
    %37 = vector.multi_reduction <add>, %36, %cst_25 [1] : vector<8x128xf32> to vector<8xf32>
    %38 = vector.shape_cast %37 : vector<8xf32> to vector<8x1xf32>
    %39 = arith.mulf %36, %30 : vector<8x128xf32>
    %cst_26 = arith.constant dense<0.000000e+00> : vector<8xf32>
    %40 = vector.multi_reduction <add>, %39, %cst_26 [1] : vector<8x128xf32> to vector<8xf32>
    %41 = vector.shape_cast %40 : vector<8xf32> to vector<8x1xf32>
    %cst_27 = arith.constant 0.000000e+00 : f32
    %42 = vector.broadcast %cst_27 : f32 to vector<1x128xf32>
    %43 = arith.cmpf ogt, %34, %42 : vector<1x128xf32>
    %cst_28 = arith.constant 0xFF800000 : f32
    %44 = vector.shape_cast %43 : vector<1x128xi1> to vector<1x128xi1>
    %45 = vector.broadcast %44 : vector<1x128xi1> to vector<8x128xi1>
    %46 = vector.broadcast %cst_28 : f32 to vector<8x128xf32>
    %47 = arith.select %45, %30, %46 : vector<8x128xi1>, vector<8x128xf32>
    %cst_29 = arith.constant dense<0xFF800000> : vector<8xf32>
    %48 = vector.multi_reduction <maximumf>, %47, %cst_29 [1] : vector<8x128xf32> to vector<8xf32>
    %49 = vector.shape_cast %48 : vector<8xf32> to vector<8x1xf32>
    %cst_30 = arith.constant 0.000000e+00 : f32
    %50 = vector.broadcast %cst_30 : f32 to vector<1x128xf32>
    %51 = arith.cmpf ogt, %34, %50 : vector<1x128xf32>
    %cst_31 = arith.constant 0x7F800000 : f32
    %52 = vector.shape_cast %51 : vector<1x128xi1> to vector<1x128xi1>
    %53 = vector.broadcast %52 : vector<1x128xi1> to vector<8x128xi1>
    %54 = vector.broadcast %cst_31 : f32 to vector<8x128xf32>
    %55 = arith.select %53, %30, %54 : vector<8x128xi1>, vector<8x128xf32>
    %cst_32 = arith.constant dense<0x7F800000> : vector<8xf32>
    %56 = vector.multi_reduction <minimumf>, %55, %cst_32 [1] : vector<8x128xf32> to vector<8xf32>
    %57 = vector.shape_cast %56 : vector<8xf32> to vector<8x1xf32>
    %cst_33 = arith.constant 0.000000e+00 : f32
    %58 = vector.broadcast %cst_33 : f32 to vector<8x4xf32>
    %59 = tpu.concatenate %38, %41, %49, %57, %58 in 1 : vector<8x1xf32>, vector<8x1xf32>, vector<8x1xf32>, vector<8x1xf32>, vector<8x4xf32> -> vector<8x8xf32>
    %c0_34 = arith.constant 0 : index
    %c0_35 = arith.constant 0 : index
    %c0_36 = arith.constant 0 : index
    %60 = vector.load %arg7[%c0_34, %c0_35, %c0_36] : memref<1x8x8xf32, #tpu.memory_space<vmem>>, vector<1x8x8xf32>
    %61 = vector.shape_cast %60 : vector<1x8x8xf32> to vector<8x8xf32>
    %62 = vector.shape_cast %59 : vector<8x8xf32> to vector<1x8x8xf32>
    tpu.vector_store %arg7[%c0_34, %c0_35, %c0_36], %62 {strides = array<i32>} : memref<1x8x8xf32, #tpu.memory_space<vmem>>, vector<1x8x8xf32>,
    return
  }
  func.func @transform_0(%arg0: i32) -> (i32, i32, i32) {
    %c0_i32 = arith.constant 0 : i32
    %c0_i32_0 = arith.constant 0 : i32
    %c0_i32_1 = arith.constant 0 : i32
    return %arg0, %c0_i32, %c0_i32_0 : i32, i32, i32
  }
  func.func @transform_1(%arg0: i32) -> (i32, i32, i32) {
    %c0_i32 = arith.constant 0 : i32
    %c0_i32_0 = arith.constant 0 : i32
    %c0_i32_1 = arith.constant 0 : i32
    %c0_i32_2 = arith.constant 0 : i32
    return %c0_i32, %c0_i32_0, %c0_i32_1 : i32, i32, i32
  }
  func.func @transform_2(%arg0: i32) -> (i32, i32) {
    %c0_i32 = arith.constant 0 : i32
    %c0_i32_0 = arith.constant 0 : i32
    %c0_i32_1 = arith.constant 0 : i32
    return %c0_i32, %c0_i32_0 : i32, i32
  }
  func.func @transform_3(%arg0: i32) -> (i32, i32) {
    %c0_i32 = arith.constant 0 : i32
    %c0_i32_0 = arith.constant 0 : i32
    %c0_i32_1 = arith.constant 0 : i32
    return %c0_i32, %c0_i32_0 : i32, i32
  }
  func.func @transform_4(%arg0: i32) -> (i32, i32) {
    %c0_i32 = arith.constant 0 : i32
    %c0_i32_0 = arith.constant 0 : i32
    %c0_i32_1 = arith.constant 0 : i32
    return %c0_i32, %c0_i32_0 : i32, i32
  }
  func.func @transform_5(%arg0: i32) -> (i32, i32, i32) {
    %c0_i32 = arith.constant 0 : i32
    %c0_i32_0 = arith.constant 0 : i32
    %c0_i32_1 = arith.constant 0 : i32
    return %arg0, %c0_i32, %c0_i32_0 : i32, i32, i32
  }
  func.func @transform_6(%arg0: i32) -> (i32, i32, i32) {
    %c0_i32 = arith.constant 0 : i32
    %c0_i32_0 = arith.constant 0 : i32
    %c0_i32_1 = arith.constant 0 : i32
    return %arg0, %c0_i32, %c0_i32_0 : i32, i32, i32
  }
}

module attributes {stable_mosaic.version = 11 : i64} {
  func.func @kernel(%arg0: i32, %arg1: memref<1x8x128xf32, #tpu.memory_space<vmem>>, %arg2: memref<1x8x1xf32, #tpu.memory_space<vmem>>, %arg3: memref<1x8x1xf32, #tpu.memory_space<vmem>>, %arg4: memref<1x2x128xf32, #tpu.memory_space<vmem>>) attributes {dimension_semantics = [#tpu.dimension_semantics<parallel>], iteration_bounds = array<i64: 2>, scalar_prefetch = 0 : i64, scratch_operands = 0 : i64, tpu.core_type = #tpu.core_type<tc>, window_params = [{transform_indices = @transform_0, window_bounds = array<i64: 1, 8, 128>}, {transform_indices = @transform_1, window_bounds = array<i64: 1, 8, 1>}, {transform_indices = @transform_2, window_bounds = array<i64: 1, 8, 1>}, {transform_indices = @transform_3, window_bounds = array<i64: 1, 2, 128>}]} {
    %c0 = arith.constant 0 : index
    %c0_0 = arith.constant 0 : index
    %c0_1 = arith.constant 0 : index
    %0 = vector.load %arg1[%c0, %c0_0, %c0_1] : memref<1x8x128xf32, #tpu.memory_space<vmem>>, vector<1x8x128xf32>
    %1 = vector.shape_cast %0 : vector<1x8x128xf32> to vector<8x128xf32>
    %c0_2 = arith.constant 0 : index
    %c0_3 = arith.constant 0 : index
    %c0_4 = arith.constant 0 : index
    %2 = vector.load %arg2[%c0_2, %c0_3, %c0_4] : memref<1x8x1xf32, #tpu.memory_space<vmem>>, vector<1x8x1xf32>
    %3 = vector.shape_cast %2 : vector<1x8x1xf32> to vector<8x1xf32>
    %4 = vector.broadcast %3 : vector<8x1xf32> to vector<8x128xf32>
    %5 = arith.mulf %1, %4 : vector<8x128xf32>
    %c0_5 = arith.constant 0 : index
    %c0_6 = arith.constant 0 : index
    %c0_7 = arith.constant 0 : index
    %6 = vector.load %arg3[%c0_5, %c0_6, %c0_7] : memref<1x8x1xf32, #tpu.memory_space<vmem>>, vector<1x8x1xf32>
    %7 = vector.shape_cast %6 : vector<1x8x1xf32> to vector<8x1xf32>
    %8 = vector.broadcast %7 : vector<8x1xf32> to vector<8x128xf32>
    %9 = arith.addf %5, %8 : vector<8x128xf32>
    %10 = vector.extract_strided_slice %9 {offsets = [0, 0], sizes = [4, 128], strides = [1, 1]} : vector<8x128xf32> to vector<4x128xf32>
    %cst = arith.constant dense<0.000000e+00> : vector<128xf32>
    %11 = vector.multi_reduction <add>, %10, %cst [0] : vector<4x128xf32> to vector<128xf32>
    %12 = vector.shape_cast %11 : vector<128xf32> to vector<1x128xf32>
    %cst_8 = arith.constant 2.500000e-01 : f32
    %13 = vector.broadcast %cst_8 : f32 to vector<1x128xf32>
    %14 = arith.mulf %12, %13 : vector<1x128xf32>
    %cst_9 = arith.constant dense<0xFF800000> : vector<128xf32>
    %15 = vector.multi_reduction <maximumf>, %10, %cst_9 [0] : vector<4x128xf32> to vector<128xf32>
    %16 = vector.shape_cast %15 : vector<128xf32> to vector<1x128xf32>
    %17 = tpu.concatenate %14, %16 in 0 : vector<1x128xf32>, vector<1x128xf32> -> vector<2x128xf32>
    %c0_10 = arith.constant 0 : index
    %c0_11 = arith.constant 0 : index
    %c0_12 = arith.constant 0 : index
    %18 = vector.load %arg4[%c0_10, %c0_11, %c0_12] : memref<1x2x128xf32, #tpu.memory_space<vmem>>, vector<1x2x128xf32>
    %19 = vector.shape_cast %18 : vector<1x2x128xf32> to vector<2x128xf32>
    %20 = vector.shape_cast %17 : vector<2x128xf32> to vector<1x2x128xf32>
    tpu.vector_store %arg4[%c0_10, %c0_11, %c0_12], %20 {strides = array<i32>} : memref<1x2x128xf32, #tpu.memory_space<vmem>>, vector<1x2x128xf32>,
    return
  }
  func.func @transform_0(%arg0: i32) -> (i32, i32, i32) {
    %c0_i32 = arith.constant 0 : i32
    %c0_i32_0 = arith.constant 0 : i32
    %c0_i32_1 = arith.constant 0 : i32
    return %arg0, %c0_i32, %c0_i32_0 : i32, i32, i32
  }
  func.func @transform_1(%arg0: i32) -> (i32, i32, i32) {
    %c0_i32 = arith.constant 0 : i32
    %c0_i32_0 = arith.constant 0 : i32
    %c0_i32_1 = arith.constant 0 : i32
    return %arg0, %c0_i32, %c0_i32_0 : i32, i32, i32
  }
  func.func @transform_2(%arg0: i32) -> (i32, i32, i32) {
    %c0_i32 = arith.constant 0 : i32
    %c0_i32_0 = arith.constant 0 : i32
    %c0_i32_1 = arith.constant 0 : i32
    return %arg0, %c0_i32, %c0_i32_0 : i32, i32, i32
  }
  func.func @transform_3(%arg0: i32) -> (i32, i32, i32) {
    %c0_i32 = arith.constant 0 : i32
    %c0_i32_0 = arith.constant 0 : i32
    %c0_i32_1 = arith.constant 0 : i32
    return %arg0, %c0_i32, %c0_i32_0 : i32, i32, i32
  }
}

module attributes {stable_mosaic.version = 11 : i64} {
  func.func @_tail_kernel(%arg0: i32, %arg1: memref<1x8x128xf32, #tpu.memory_space<vmem>>, %arg2: memref<1x8x1xf32, #tpu.memory_space<vmem>>, %arg3: memref<1x8x1xf32, #tpu.memory_space<vmem>>, %arg4: memref<1x1x128xf32, #tpu.memory_space<vmem>>, %arg5: memref<1x8x128xf32, #tpu.memory_space<vmem>>, %arg6: memref<1x8x128xf32, #tpu.memory_space<vmem>>) attributes {dimension_semantics = [#tpu.dimension_semantics<parallel>], iteration_bounds = array<i64: 2>, scalar_prefetch = 0 : i64, scratch_operands = 0 : i64, tpu.core_type = #tpu.core_type<tc>, window_params = [{transform_indices = @transform_0, window_bounds = array<i64: 1, 8, 128>}, {transform_indices = @transform_1, window_bounds = array<i64: 1, 8, 1>}, {transform_indices = @transform_2, window_bounds = array<i64: 1, 8, 1>}, {transform_indices = @transform_3, window_bounds = array<i64: 1, 1, 128>}, {transform_indices = @transform_4, window_bounds = array<i64: 1, 8, 128>}, {transform_indices = @transform_5, window_bounds = array<i64: 1, 8, 128>}]} {
    %c0 = arith.constant 0 : index
    %c0_0 = arith.constant 0 : index
    %c0_1 = arith.constant 0 : index
    %0 = vector.load %arg1[%c0, %c0_0, %c0_1] : memref<1x8x128xf32, #tpu.memory_space<vmem>>, vector<1x8x128xf32>
    %1 = vector.shape_cast %0 : vector<1x8x128xf32> to vector<8x128xf32>
    %c0_2 = arith.constant 0 : index
    %c0_3 = arith.constant 0 : index
    %c0_4 = arith.constant 0 : index
    %2 = vector.load %arg2[%c0_2, %c0_3, %c0_4] : memref<1x8x1xf32, #tpu.memory_space<vmem>>, vector<1x8x1xf32>
    %3 = vector.shape_cast %2 : vector<1x8x1xf32> to vector<8x1xf32>
    %4 = vector.broadcast %3 : vector<8x1xf32> to vector<8x128xf32>
    %5 = arith.mulf %1, %4 : vector<8x128xf32>
    %c0_5 = arith.constant 0 : index
    %c0_6 = arith.constant 0 : index
    %c0_7 = arith.constant 0 : index
    %6 = vector.load %arg3[%c0_5, %c0_6, %c0_7] : memref<1x8x1xf32, #tpu.memory_space<vmem>>, vector<1x8x1xf32>
    %7 = vector.shape_cast %6 : vector<1x8x1xf32> to vector<8x1xf32>
    %8 = vector.broadcast %7 : vector<8x1xf32> to vector<8x128xf32>
    %9 = arith.addf %5, %8 : vector<8x128xf32>
    %c0_8 = arith.constant 0 : index
    %c0_9 = arith.constant 0 : index
    %c0_10 = arith.constant 0 : index
    %10 = vector.load %arg4[%c0_8, %c0_9, %c0_10] : memref<1x1x128xf32, #tpu.memory_space<vmem>>, vector<1x1x128xf32>
    %11 = vector.shape_cast %10 : vector<1x1x128xf32> to vector<1x128xf32>
    %cst = arith.constant 0.000000e+00 : f32
    %12 = vector.broadcast %cst : f32 to vector<1x128xf32>
    %13 = arith.subf %12, %11 : vector<1x128xf32>
    %14 = math.exp %13 : vector<1x128xf32>
    %cst_11 = arith.constant 1.000000e+00 : f32
    %15 = vector.broadcast %cst_11 : f32 to vector<1x128xf32>
    %16 = arith.addf %15, %14 : vector<1x128xf32>
    %cst_12 = arith.constant 1.000000e+00 : f32
    %17 = vector.broadcast %cst_12 : f32 to vector<1x128xf32>
    %18 = arith.divf %17, %16 : vector<1x128xf32>
    %19 = vector.broadcast %18 : vector<1x128xf32> to vector<8x128xf32>
    %20 = arith.mulf %9, %19 : vector<8x128xf32>
    %c0_13 = arith.constant 0 : index
    %c0_14 = arith.constant 0 : index
    %c0_15 = arith.constant 0 : index
    %21 = vector.load %arg5[%c0_13, %c0_14, %c0_15] : memref<1x8x128xf32, #tpu.memory_space<vmem>>, vector<1x8x128xf32>
    %22 = vector.shape_cast %21 : vector<1x8x128xf32> to vector<8x128xf32>
    %23 = arith.addf %20, %22 : vector<8x128xf32>
    %cst_16 = arith.constant 0.000000e+00 : f32
    %24 = vector.broadcast %cst_16 : f32 to vector<8x128xf32>
    %25 = arith.maximumf %23, %24 : vector<8x128xf32>
    %c0_17 = arith.constant 0 : index
    %c0_18 = arith.constant 0 : index
    %c0_19 = arith.constant 0 : index
    %26 = vector.load %arg6[%c0_17, %c0_18, %c0_19] : memref<1x8x128xf32, #tpu.memory_space<vmem>>, vector<1x8x128xf32>
    %27 = vector.shape_cast %26 : vector<1x8x128xf32> to vector<8x128xf32>
    %28 = vector.shape_cast %25 : vector<8x128xf32> to vector<1x8x128xf32>
    tpu.vector_store %arg6[%c0_17, %c0_18, %c0_19], %28 {strides = array<i32>} : memref<1x8x128xf32, #tpu.memory_space<vmem>>, vector<1x8x128xf32>,
    return
  }
  func.func @transform_0(%arg0: i32) -> (i32, i32, i32) {
    %c0_i32 = arith.constant 0 : i32
    %c0_i32_0 = arith.constant 0 : i32
    %c0_i32_1 = arith.constant 0 : i32
    return %arg0, %c0_i32, %c0_i32_0 : i32, i32, i32
  }
  func.func @transform_1(%arg0: i32) -> (i32, i32, i32) {
    %c0_i32 = arith.constant 0 : i32
    %c0_i32_0 = arith.constant 0 : i32
    %c0_i32_1 = arith.constant 0 : i32
    return %arg0, %c0_i32, %c0_i32_0 : i32, i32, i32
  }
  func.func @transform_2(%arg0: i32) -> (i32, i32, i32) {
    %c0_i32 = arith.constant 0 : i32
    %c0_i32_0 = arith.constant 0 : i32
    %c0_i32_1 = arith.constant 0 : i32
    return %arg0, %c0_i32, %c0_i32_0 : i32, i32, i32
  }
  func.func @transform_3(%arg0: i32) -> (i32, i32, i32) {
    %c0_i32 = arith.constant 0 : i32
    %c0_i32_0 = arith.constant 0 : i32
    %c0_i32_1 = arith.constant 0 : i32
    return %arg0, %c0_i32, %c0_i32_0 : i32, i32, i32
  }
  func.func @transform_4(%arg0: i32) -> (i32, i32, i32) {
    %c0_i32 = arith.constant 0 : i32
    %c0_i32_0 = arith.constant 0 : i32
    %c0_i32_1 = arith.constant 0 : i32
    return %arg0, %c0_i32, %c0_i32_0 : i32, i32, i32
  }
  func.func @transform_5(%arg0: i32) -> (i32, i32, i32) {
    %c0_i32 = arith.constant 0 : i32
    %c0_i32_0 = arith.constant 0 : i32
    %c0_i32_1 = arith.constant 0 : i32
    return %arg0, %c0_i32, %c0_i32_0 : i32, i32, i32
  }
}

</mosaic_0001>

<bundles_post_ra>
// kernel: basic_block_forward.22
= control target key start
LH: loop header
LB: loop body
LE: loop exit
PB: predicated region body
PF: predicated region fallthrough
CT: control target
= control target key end

     0   :  { %s552_s12 = smov 0   ;;  %s666_s0 = inlined_call_operand.vmem [shape: f32[2,8,1024], index: 0, kind: input, shape index: {}]   ;;  %s667_s1 = inlined_call_operand.vmem [shape: f32[2,8,1], index: 1, kind: input, shape index: {}]   ;;  %s668_s2 = inlined_call_operand.vmem [shape: f32[2,8,1], index: 2, kind: input, shape index: {}]   ;;  %s669_s3 = inlined_call_operand.vmem [shape: f32[2,2,1024], index: 3, kind: output, shape index: {}]  }
   0x1 LB: > { %s496_s13 = sadd.s32 4294967295, %s528_s12   ;;  %p500_p0 = scmp.ge.s32.totalorder %s528_s12, 1  ;;  %s528_s12 = sphi %s552_s12, %s13_s12  }
   0x2   : > { %p155_p1 = scmp.lt.s32.totalorder %s528_s12, 3 }
   0x4   : > { %p156_p2 = pnand %p500_p0, %p155_p1 }
   0x5   : > { %p187_p3 = scmp.lt.s32.totalorder (!%p156_p2), %s496_s13, 1 }
   0x6   : > { %159 = sbr.rel (%p156_p2) target bundleno = 185 (0xb9), region = 32 }
   0xb   : > { %v530_v0 = vmov 0   ;;  %s671_s13 = smov (!%p187_p3, %s496_s13), 1  ;;  %v531_v3 = vmov 1983009808   ;;  %v384_v5 = vlaneseq  ;;  %vm241_vm0 = vcmask 1043456  }
   0xc   : > { %521 = vset.pattern.permute.xlu0 %v530_v0  ;;  %s503_s14 = sshll.u32 %s671_s13, 3  ;;  %s509_s21 = sshll.u32 %s671_s13, 6  ;;  %v382_v4 = vunpack.c.l.s4 %v531_v3  ;;  %vm362_vm1 = vcmask 1040384  }
   0xd   : > { %s195_s17 = scalar_lea.vmem %s667_s1, %s503_s14  ;;  %s199_s20 = scalar_lea.vmem %s668_s2, %s503_s14  ;;  %v385_v7 = vshrl.u32 %v384_v5, 7 }
   0xe   : > { %v213_v1 = vld [vmem:[%s195_s17] sm:$0xff]  ;;  %s191_s24 = scalar_lea.vmem %s666_s0, %s509_s21  ;;  %v383_v6 = vunpack.c.0.s8 %v382_v4  ;;  %s510_s25 = sshll.u32 %s671_s13, 4 }
   0xf   : > { %216 = vperm.xlu0 %521, %v213_v1   ;;  %v227_v2 = vld [vmem:[%s199_s20] sm:$0xff]  ;;  %v206_v9 = vld [vmem:[%s191_s24 + $0x8] sm:$0xff]  ;;  %v207_v11 = vld [vmem:[%s191_s24 + $0x10] sm:$0xff]  ;;  %s204_s28 = scalar_lea.vmem %s669_s3, %s510_s25 }
  0x10   : > { %v205_v8 = vld [vmem:[%s191_s24] sm:$0xff]  ;;  %v208_v12 = vld [vmem:[%s191_s24 + $0x18] sm:$0xff]  ;;  %v210_v14 = vld [vmem:[%s191_s24 + $0x28] sm:$0xff]  ;;  %v573_v17 = vsub.s32 %v383_v6, %v385_v7 }
  0x11   : > { %v209_v13 = vld [vmem:[%s191_s24 + $0x20] sm:$0xff]  ;;  %v211_v15 = vld [vmem:[%s191_s24 + $0x30] sm:$0xff]  ;;  %v212_v16 = vld [vmem:[%s191_s24 + $0x38] sm:$0xff] }
  0x13   : > { %230 = vperm.xlu0 %521, %v227_v2  }
  0x8a   : > { %v217_v10 = vpop.permute.xlu0 %216 }
  0x8b   : > { %v219_v18 = vmul.f32 %v217_v10, %v205_v8  ;;  %v220_v19 = vmul.f32 %v217_v10, %v206_v9  ;;  %v221_v20 = vmul.f32 %v217_v10, %v207_v11  ;;  %v222_v21 = vmul.f32 %v217_v10, %v208_v12 }
  0x8c   : > { %v223_v23 = vmul.f32 %v217_v10, %v209_v13  ;;  %v224_v24 = vmul.f32 %v217_v10, %v210_v14  ;;  %v225_v25 = vmul.f32 %v217_v10, %v211_v15  ;;  %v226_v26 = vmul.f32 %v217_v10, %v212_v16 }
  0x8e   : > { %v231_v22 = vpop.permute.xlu0 %230 }
  0x8f   : > { %v575_v27 = vadd.f32 %v231_v22, %v219_v18  ;;  %v577_v28 = vadd.f32 %v231_v22, %v220_v19  ;;  %v579_v29 = vadd.f32 %v231_v22, %v221_v20  ;;  %v581_v30 = vadd.f32 %v231_v22, %v222_v21 }
  0x90   : > { %v583_v31 = vadd.f32 %v231_v22, %v223_v23  ;;  %v585_v32 = vadd.f32 %v231_v22, %v224_v24  ;;  %v587_v33 = vadd.f32 %v231_v22, %v225_v25  ;;  %v589_v34 = vadd.f32 %v231_v22, %v226_v26 }
  0x91   : > { %v242_v35 = vsel %vm241_vm0, %v575_v27, 0.0  ;;  %v249_v36 = vsel %vm241_vm0, %v577_v28, 0.0  ;;  %v256_v37 = vsel %vm241_vm0, %v579_v29, 0.0  ;;  %v263_v38 = vsel %vm241_vm0, %v581_v30, 0.0 }
  0x92   : > { %v243_v39 = vrot.slane %v242_v35, 4  ;;  %v250_v40 = vrot.slane %v249_v36, 4  ;;  %v257_v41 = vrot.slane %v256_v37, 4  ;;  %v264_v42 = vrot.slane %v263_v38, 4 }
  0x93   : > { %v270_v43 = vsel %vm241_vm0, %v583_v31, 0.0  ;;  %v277_v44 = vsel %vm241_vm0, %v585_v32, 0.0  ;;  %v284_v45 = vsel %vm241_vm0, %v587_v33, 0.0  ;;  %v291_v46 = vsel %vm241_vm0, %v589_v34, 0.0 }
  0x94   : > { %v244_v47 = vadd.f32 %v243_v39, %v242_v35  ;;  %v251_v48 = vadd.f32 %v250_v40, %v249_v36  ;;  %v258_v49 = vadd.f32 %v257_v41, %v256_v37  ;;  %v265_v50 = vadd.f32 %v264_v42, %v263_v38 }
  0x95   : > { %v271_v51 = vrot.slane %v270_v43, 4  ;;  %v278_v52 = vrot.slane %v277_v44, 4  ;;  %v285_v53 = vrot.slane %v284_v45, 4  ;;  %v292_v54 = vrot.slane %v291_v46, 4 }
  0x96   : > { %v245_v55 = vrot.slane %v244_v47, 2  ;;  %v252_v56 = vrot.slane %v251_v48, 2  ;;  %v259_v57 = vrot.slane %v258_v49, 2  ;;  %v266_v58 = vrot.slane %v265_v50, 2 }
  0x97   : > { %v272_v59 = vadd.f32 %v271_v51, %v270_v43  ;;  %v279_v60 = vadd.f32 %v278_v52, %v277_v44  ;;  %v286_v61 = vadd.f32 %v285_v53, %v284_v45  ;;  %v293_v62 = vadd.f32 %v292_v54, %v291_v46 }
  0x98   : > { %v246_v63 = vadd.f32 %v245_v55, %v244_v47  ;;  %v253_v0 = vadd.f32 %v252_v56, %v251_v48  ;;  %v260_v1 = vadd.f32 %v259_v57, %v258_v49  ;;  %v267_v2 = vadd.f32 %v266_v58, %v265_v50 }
  0x99   : > { %v273_v3 = vrot.slane %v272_v59, 2  ;;  %v280_v4 = vrot.slane %v279_v60, 2  ;;  %v287_v5 = vrot.slane %v286_v61, 2  ;;  %v294_v6 = vrot.slane %v293_v62, 2 }
  0x9a   : > { %v247_v7 = vrot.slane %v246_v63, 1  ;;  %v254_v8 = vrot.slane %v253_v0, 1  ;;  %v261_v9 = vrot.slane %v260_v1, 1  ;;  %v268_v10 = vrot.slane %v267_v2, 1 }
  0x9b   : > { %v274_v11 = vadd.f32 %v273_v3, %v272_v59  ;;  %v281_v12 = vadd.f32 %v280_v4, %v279_v60  ;;  %v288_v13 = vadd.f32 %v287_v5, %v286_v61  ;;  %v295_v14 = vadd.f32 %v294_v6, %v293_v62 }
  0x9c   : > { %v248_v15 = vadd.f32 %v247_v7, %v246_v63  ;;  %v255_v16 = vadd.f32 %v254_v8, %v253_v0  ;;  %v262_v18 = vadd.f32 %v261_v9, %v260_v1  ;;  %v269_v19 = vadd.f32 %v268_v10, %v267_v2 }
  0x9d   : > { %v275_v20 = vrot.slane %v274_v11, 1  ;;  %v282_v21 = vrot.slane %v281_v12, 1  ;;  %v289_v22 = vrot.slane %v288_v13, 1  ;;  %v296_v23 = vrot.slane %v295_v14, 1 }
  0x9e   : > { %v607_v24 = vmul.f32 0.25, %v248_v15  ;;  %v609_v25 = vmul.f32 0.25, %v255_v16  ;;  %v611_v26 = vmul.f32 0.25, %v262_v18  ;;  %v613_v35 = vmul.f32 0.25, %v269_v19 }
  0x9f   : > { %v276_v36 = vadd.f32 %v275_v20, %v274_v11  ;;  %v283_v37 = vadd.f32 %v282_v21, %v281_v12  ;;  %v290_v38 = vadd.f32 %v289_v22, %v288_v13  ;;  %v297_v39 = vadd.f32 %v296_v23, %v295_v14 }
  0xa0   : > { %v306_v40 = vsel %vm241_vm0, %v575_v27, -inf  ;;  %v313_v41 = vsel %vm241_vm0, %v577_v28, -inf  ;;  %v320_v42 = vsel %vm241_vm0, %v579_v29, -inf  ;;  %v327_v43 = vsel %vm241_vm0, %v581_v30, -inf }
  0xa1   : > { %v623_v44 = vmul.f32 0.25, %v276_v36  ;;  %v625_v45 = vmul.f32 0.25, %v283_v37  ;;  %v627_v46 = vmul.f32 0.25, %v290_v38  ;;  %v629_v47 = vmul.f32 0.25, %v297_v39 }
  0xa2   : > { %v307_v48 = vrot.slane %v306_v40, 4  ;;  %v314_v49 = vrot.slane %v313_v41, 4  ;;  %v321_v27 = vrot.slane %v320_v42, 4  ;;  %v328_v50 = vrot.slane %v327_v43, 4 }
  0xa3   : > { %v334_v28 = vsel %vm241_vm0, %v583_v31, -inf  ;;  %v341_v29 = vsel %vm241_vm0, %v585_v32, -inf  ;;  %v348_v30 = vsel %vm241_vm0, %v587_v33, -inf  ;;  %v355_v51 = vsel %vm241_vm0, %v589_v34, -inf }
  0xa4   : > { %v308_v52 = vmax.f32 %v306_v40, %v307_v48  ;;  %v315_v53 = vmax.f32 %v313_v41, %v314_v49  ;;  %v322_v54 = vmax.f32 %v320_v42, %v321_v27  ;;  %v329_v55 = vmax.f32 %v327_v43, %v328_v50 }
  0xa5   : > { %v335_v56 = vrot.slane %v334_v28, 4  ;;  %v342_v57 = vrot.slane %v341_v29, 4  ;;  %v349_v58 = vrot.slane %v348_v30, 4  ;;  %v356_v59 = vrot.slane %v355_v51, 4 }
  0xa6   : > { %v309_v60 = vrot.slane %v308_v52, 2  ;;  %v316_v61 = vrot.slane %v315_v53, 2  ;;  %v323_v31 = vrot.slane %v322_v54, 2  ;;  %v330_v62 = vrot.slane %v329_v55, 2 }
  0xa7   : > { %v336_v63 = vmax.f32 %v334_v28, %v335_v56  ;;  %v343_v32 = vmax.f32 %v341_v29, %v342_v57  ;;  %v350_v0 = vmax.f32 %v348_v30, %v349_v58  ;;  %v357_v1 = vmax.f32 %v355_v51, %v356_v59 }
  0xa8   : > { %v310_v33 = vmax.f32 %v308_v52, %v309_v60  ;;  %v317_v2 = vmax.f32 %v315_v53, %v316_v61  ;;  %v324_v3 = vmax.f32 %v322_v54, %v323_v31  ;;  %v331_v34 = vmax.f32 %v329_v55, %v330_v62 }
  0xa9   : > { %v337_v4 = vrot.slane %v336_v63, 2  ;;  %v344_v5 = vrot.slane %v343_v32, 2  ;;  %v351_v6 = vrot.slane %v350_v0, 2  ;;  %v358_v7 = vrot.slane %v357_v1, 2 }
  0xaa   : > { %v311_v8 = vrot.slane %v310_v33, 1  ;;  %v318_v9 = vrot.slane %v317_v2, 1  ;;  %v325_v10 = vrot.slane %v324_v3, 1  ;;  %v332_v11 = vrot.slane %v331_v34, 1 }
  0xab   : > { %v338_v12 = vmax.f32 %v336_v63, %v337_v4  ;;  %v345_v13 = vmax.f32 %v343_v32, %v344_v5  ;;  %v352_v14 = vmax.f32 %v350_v0, %v351_v6  ;;  %v359_v15 = vmax.f32 %v357_v1, %v358_v7 }
  0xac   : > { %v312_v16 = vmax.f32 %v310_v33, %v311_v8  ;;  %v319_v18 = vmax.f32 %v317_v2, %v318_v9  ;;  %v326_v19 = vmax.f32 %v324_v3, %v325_v10  ;;  %v333_v20 = vmax.f32 %v331_v34, %v332_v11 }
  0xad   : > { %v339_v21 = vrot.slane %v338_v12, 1  ;;  %v346_v22 = vrot.slane %v345_v13, 1  ;;  %v353_v23 = vrot.slane %v352_v14, 1  ;;  %v360_v36 = vrot.slane %v359_v15, 1 }
  0xae   : > { %v363_v37 = vsel %vm362_vm1, %v607_v24, %v312_v16  ;;  %v364_v38 = vsel %vm362_vm1, %v609_v25, %v319_v18  ;;  %v365_v39 = vsel %vm362_vm1, %v611_v26, %v326_v19  ;;  %v366_v40 = vsel %vm362_vm1, %v613_v35, %v333_v20 }
  0xaf   : > { %v340_v41 = vmax.f32 %v338_v12, %v339_v21  ;;  %v347_v42 = vmax.f32 %v345_v13, %v346_v22  ;;  %v354_v43 = vmax.f32 %v352_v14, %v353_v23  ;;  %v361_v48 = vmax.f32 %v359_v15, %v360_v36 }
  0xb0   : > { %v379_v49 = vcombine.low %v363_v37, %v364_v38  ;;  %v380_v27 = vcombine.low %v365_v39, %v366_v40 }
  0xb1   : > { %v367_v50 = vsel %vm362_vm1, %v623_v44, %v340_v41  ;;  %v368_v24 = vsel %vm362_vm1, %v625_v45, %v347_v42  ;;  %v369_v25 = vsel %vm362_vm1, %v627_v46, %v354_v43  ;;  %v370_v26 = vsel %vm362_vm1, %v629_v47, %v361_v48 }
  0xb2   : > { %v387_v35 = vrot.slane %v379_v49, %v573_v17  ;;  %v394_v28 = vrot.slane %v380_v27, %v573_v17  ;;  %v396_v29 = vcombine.low %v367_v50, %v368_v24  ;;  %v397_v30 = vcombine.low %v369_v25, %v370_v26 }
  0xb4   : > { %v395_v44 = vcombine.low %v387_v35, %v394_v28  ;;  %v404_v51 = vrot.slane %v396_v29, %v573_v17  ;;  %v411_v45 = vrot.slane %v397_v30, %v573_v17 }
  0xb6   : > { %v412_v52 = vcombine.low %v404_v51, %v411_v45  ;;  %415 = vst [vmem:[%s204_s28] sm:$0xff] %v395_v44 }
  0xb8   : > { %416 = vst [vmem:[%s204_s28 + $0x8] sm:$0xff] %v412_v52 }
  0xb9 PF: > { %s13_s12 = sadd.s32 1, %s528_s12  }
  0xba   : > { %p10_p4 = scmp.ge.s32.totalorder %s13_s12, 4  }
  0xbc   :  { %12 = sbr.rel (!%p10_p4) target bundleno = 1 (0x1), region = 68 }

// kernel: basic_block_forward.21
= control target key start
LH: loop header
LB: loop body
LE: loop exit
PB: predicated region body
PF: predicated region fallthrough
CT: control target
= control target key end

     0   :  { %s9831_s21 = smov 0   ;;  %s11350_s0 = inlined_call_operand.vmem [shape: f32[2,8,1024], index: 0, kind: input, shape index: {}]   ;;  %s11351_s1 = inlined_call_operand.vmem [shape: f32[27,8,8], index: 1, kind: input, shape index: {}]   ;;  %s11352_s2 = inlined_call_operand.vmem [shape: f32[1,1024], index: 2, kind: input, shape index: {}]   ;;  %s11353_s3 = inlined_call_operand.vmem [shape: f32[8,1], index: 3, kind: input, shape index: {}]   ;;  %s11354_s4 = inlined_call_operand.vmem [shape: f32[8,1], index: 4, kind: input, shape index: {}]   ;;  %s11355_s5 = inlined_call_operand.vmem [shape: f32[2,8,1024], index: 5, kind: output, shape index: {0}]   ;;  %s11356_s6 = inlined_call_operand.vmem [shape: f32[2,8,8], index: 6, kind: output, shape index: {1}]  }
   0x1 LB: > { %s9570_s22 = sadd.s32 4294967295, %s9765_s21   ;;  %p9574_p0 = scmp.ge.s32.totalorder %s9765_s21, 1  ;;  %s9765_s21 = sphi %s9831_s21, %s17_s21  }
   0x2   : > { %p215_p1 = scmp.lt.s32.totalorder %s9765_s21, 3 }
   0x4   : > { %p216_p2 = pnand %p9574_p0, %p215_p1 }
   0x6   : > { %219 = sbr.rel (%p216_p2) target bundleno = 1203 (0x4b3), region = 40 }
   0xb   : > { %v271_v0 = vld [vmem:[%s11353_s3] sm:$0xff]  ;;  %v11358_v1 = vmov 0   ;;  %p249_p3 = scmp.lt.s32.totalorder %s9570_s22, 1  ;;  %v309_v3 = vlaneseq  ;;  %s9768_s9 = smov 111   ;;  %vm381_vm0 = vcmask 908288   ;;  %vm423_vm1 = vcmask 1039360  }
   0xc   : > { %9757 = vset.pattern.permute.xlu0 %v11358_v1  ;;  %v285_v2 = vld [vmem:[%s11354_s4] sm:$0xff]  ;;  %s9770_s10 = smov 127   ;;  %s9771_s11 = smov 126   ;;  %vm440_vm2 = vcmask 64512   ;;  %vm9585_vm3 = vmneg %vm381_vm0  ;;  %vm1035_vm4 = vcmask 1031168   ;;  %vm1367_vm5 = vcmask 965632  }
   0xd   : > { %274 = vperm.xlu0 %9757, %v271_v0   ;;  %s11429_s22 = smov (!%p249_p3, %s9570_s22), 1  ;;  %v9856_v4 = vshrl.u32 %v309_v3, 7  ;;  %v9323_v12 = vld [vmem:[%s11352_s2] sm:$0xff]  ;;  %s9772_s12 = smov 118   ;;  %vm1699_vm6 = vcmask 957440   ;;  %vm2031_vm7 = vcmask 949248  }
   0xe   : > { %s9718_s27 = sshll.u32 %s11429_s22, 6  ;;  %s9773_s13 = smov 117   ;;  %vm2363_vm8 = vcmask 883712   ;;  %vm2695_vm9 = vcmask 875520   ;;  %vm3027_vm10 = vcmask 867328   ;;  %vm3359_vm11 = vcmask 228352  }
   0xf   : > { %s9854_s30 = scalar_lea.vmem %s11350_s0, %s9718_s27  ;;  %v9860_v7 = vsub.s32 2, %v9856_v4  ;;  %v11357_v9 = vsub.s32 0, %v9856_v4  ;;  %v9877_v22 = vsub.s32 4, %v9856_v4  ;;  %v9880_v23 = vsub.s32 1, %v9856_v4  ;;  %s9774_s14 = smov 116  }
  0x10   : > { %v265_v5 = vld [vmem:[%s9854_s30 + $0x10] sm:$0xff]  ;;  %v263_v8 = vld [vmem:[%s9854_s30] sm:$0xff]  ;;  %v264_v11 = vld [vmem:[%s9854_s30 + $0x8] sm:$0xff]  ;;  %v9883_v32 = vsub.s32 6, %v9856_v4  ;;  %v9886_v33 = vsub.s32 3, %v9856_v4  ;;  %v9895_v47 = vsub.s32 5, %v9856_v4 }
  0x11   : > { %288 = vperm.xlu0 %9757, %v285_v2   ;;  %v267_v10 = vld [vmem:[%s9854_s30 + $0x20] sm:$0xff]  ;;  %v269_v17 = vld [vmem:[%s9854_s30 + $0x30] sm:$0xff]  ;;  %v266_v18 = vld [vmem:[%s9854_s30 + $0x18] sm:$0xff]  ;;  %v320_v20 = vrot.slane %v9323_v12, %v9860_v7  ;;  %v9874_v21 = vrot.slane %v9323_v12, %v11357_v9  ;;  %v328_v35 = vrot.slane %v9323_v12, %v9877_v22  ;;  %v316_v36 = vrot.slane %v9323_v12, %v9880_v23  ;;  %s9775_s15 = smov 108   ;;  %s9776_s16 = smov 107  }
  0x12   : > { %v268_v34 = vld [vmem:[%s9854_s30 + $0x28] sm:$0xff]  ;;  %v336_v44 = vrot.slane %v9323_v12, %v9883_v32  ;;  %v324_v45 = vrot.slane %v9323_v12, %v9886_v33  ;;  %v270_v48 = vld [vmem:[%s9854_s30 + $0x38] sm:$0xff]  ;;  %v332_v54 = vrot.slane %v9323_v12, %v9895_v47  ;;  %v9900_v55 = vsub.s32 7, %v9856_v4  ;;  %s9777_s19 = smov 106   ;;  %s9778_s26 = smov 28  }
  0x13   : > { %11360 = vst [vmem:[#allocation2_spill] sm:$0xff] %v9874_v21  ;;  %s9779_s30 = smov 27   ;;  %s9783_s18 = smov 16   ;;  %vm3691_vm12 = vcmask 220160   ;;  %vm4023_vm13 = vcmask 211968   ;;  %vm4355_vm14 = vcmask 146432  }
  0x14   : > { %v340_v62 = vrot.slane %v9323_v12, %v9900_v55  ;;  %s9784_s23 = smov 8   ;;  %vm4687_vm15 = vcmask 138240  }
  0x88   : > { %v275_v6 = vpop.permute.xlu0 %274 }
  0x89   : > { %v279_v13 = vmul.f32 %v275_v6, %v265_v5  ;;  %v277_v14 = vmul.f32 %v275_v6, %v263_v8  ;;  %v281_v15 = vmul.f32 %v275_v6, %v267_v10  ;;  %v278_v16 = vmul.f32 %v275_v6, %v264_v11 }
  0x8a   : > { %v283_v28 = vmul.f32 %v275_v6, %v269_v17  ;;  %v280_v29 = vmul.f32 %v275_v6, %v266_v18  ;;  %v282_v43 = vmul.f32 %v275_v6, %v268_v34  ;;  %v284_v53 = vmul.f32 %v275_v6, %v270_v48 }
  0x8b   : > { %v9769_v5 = vmov 0.0  }
  0x8c   : > { %v289_v19 = vpop.permute.xlu0 %288  ;;  %508 = vmatprep.mubr.f32.mxu0 %v9769_v5  ;;  %579 = vmatprep.mubr.f32.mxu1 %v9769_v5 }
  0x8d   : > { %v293_v24 = vadd.f32 %v289_v19, %v279_v13  ;;  %v291_v25 = vadd.f32 %v289_v19, %v277_v14  ;;  %v295_v26 = vadd.f32 %v289_v19, %v281_v15  ;;  %v292_v27 = vadd.f32 %v289_v19, %v278_v16 }
  0x8e   : > { %v297_v37 = vadd.f32 %v289_v19, %v283_v28  ;;  %v294_v38 = vadd.f32 %v289_v19, %v280_v29  ;;  %v296_v46 = vadd.f32 %v289_v19, %v282_v43  ;;  %v298_v59 = vadd.f32 %v289_v19, %v284_v53 }
  0x8f   : > { %v301_v30 = vmax.f32 %v293_v24, 0.0  ;;  %v299_v31 = vmax.f32 %v291_v25, 0.0  ;;  %v303_v41 = vmax.f32 %v295_v26, 0.0  ;;  %v300_v42 = vmax.f32 %v292_v27, 0.0 }
  0x90   : > { %v305_v51 = vmax.f32 %v297_v37, 0.0  ;;  %v302_v52 = vmax.f32 %v294_v38, 0.0  ;;  %v304_v58 = vmax.f32 %v296_v46, 0.0  ;;  %v306_v61 = vmax.f32 %v298_v59, 0.0  ;;  %v400_v46 = vld [vmem:[%s11351_s1] sm:$0xff] }
  0x91   : > { %v351_v39 = vmul.f32 %v320_v20, %v301_v30  ;;  %v349_v40 = vmul.f32 %v9874_v21, %v299_v31  ;;  %v353_v49 = vmul.f32 %v328_v35, %v303_v41  ;;  %v350_v50 = vmul.f32 %v316_v36, %v300_v42  ;;  %v9580_v31 = vld [vmem:[%s11351_s1 + $0x8] sm:$0xff] }
  0x92   : > { %v355_v56 = vmul.f32 %v336_v44, %v305_v51  ;;  %v352_v57 = vmul.f32 %v324_v45, %v302_v52  ;;  %v354_v60 = vmul.f32 %v332_v54, %v304_v58  ;;  %v356_v63 = vmul.f32 %v340_v62, %v306_v61 }
  0x93   : > { %369 = vrot.lane.b32.xlu0 %v351_v39, %s9768_s9  ;;  %365 = vrot.lane.b32.xlu1 %v349_v40, %s9768_s9 }
  0x97   : > { %373 = vrot.lane.b32.xlu0 %v353_v49, %s9768_s9  ;;  %367 = vrot.lane.b32.xlu1 %v350_v50, %s9768_s9 }
  0x9b   : > { %377 = vrot.lane.b32.xlu0 %v355_v56, %s9768_s9  ;;  %371 = vrot.lane.b32.xlu1 %v352_v57, %s9768_s9 }
  0x9f   : > { %375 = vrot.lane.b32.xlu1 %v354_v60, %s9768_s9  ;;  %v9591_v60 = vld [vmem:[%s11351_s1 + $0x10] sm:$0xff] }
  0xa3   : > { %379 = vrot.lane.b32.xlu1 %v356_v63, %s9768_s9  ;;  %s9780_s9 = smov 26  }
 0x105   : > { %v9903_v0 = vpop.permute.xlu1 %365  ;;  %v370_v2 = vpop.permute.xlu0 %369 }
 0x106   : > { %v9918_v11 = vsel %vm381_vm0, 0.0, %v9903_v0 }
 0x109   : > { %v368_v3 = vpop.permute.xlu1 %367  ;;  %v374_v13 = vpop.permute.xlu0 %373 }
 0x10a   : > { %v9909_v6 = vsel %vm381_vm0, %v9903_v0, %v368_v3  ;;  %v9912_v8 = vsel %vm381_vm0, %v368_v3, %v370_v2 }
 0x10b   : > { %409 = vrot.lane.b32.xlu1 %v9912_v8, %s9770_s10  ;;  %407 = vrot.lane.b32.xlu0 %v9909_v6, %s9770_s10 }
 0x10d   : > { %v372_v10 = vpop.permute.xlu1 %371  ;;  %v378_v17 = vpop.permute.xlu0 %377 }
 0x10e   : > { %v9921_v12 = vsel %vm381_vm0, %v370_v2, %v372_v10  ;;  %v9926_v15 = vsel %vm381_vm0, %v372_v10, %v374_v13 }
 0x10f   : > { %405 = vrot.lane.b32.xlu0 %v9918_v11, %s9770_s10  ;;  %411 = vrot.lane.b32.xlu1 %v9921_v12, %s9770_s10 }
 0x111   : > { %v376_v14 = vpop.permute.xlu1 %375 }
 0x112   : > { %v9929_v16 = vsel %vm381_vm0, %v374_v13, %v376_v14  ;;  %v9934_v19 = vsel %vm381_vm0, %v376_v14, %v378_v17 }
 0x113   : > { %413 = vrot.lane.b32.xlu0 %v9926_v15, %s9770_s10  ;;  %415 = vrot.lane.b32.xlu1 %v9929_v16, %s9770_s10 }
 0x115   : > { %v380_v18 = vpop.permute.xlu1 %379 }
 0x116   : > { %v9937_v20 = vsel %vm381_vm0, %v378_v17, %v380_v18  ;;  %v9942_v24 = vsel %vm381_vm0, %v380_v18, 0.0  ;;  %v9596_v18 = vld [vmem:[%s11351_s1 + $0x18] sm:$0xff]  ;;  %vm5019_vm0 = vcmask 130048  }
 0x117   : > { %417 = vrot.lane.b32.xlu0 %v9934_v19, %s9770_s10  ;;  %419 = vrot.lane.b32.xlu1 %v9937_v20, %s9770_s10 }
 0x11b   : > { %421 = vrot.lane.b32.xlu0 %v9942_v24, %s9770_s10  ;;  %1019 = vrot.lane.b32.xlu1 %v9909_v6, %s9771_s11  ;;  %s11209_s10 = scalar_lea.vmem %s11355_s5, %s9718_s27  ;;  %s9579_s27 = sshll.u32 %s11429_s22, 3 }
 0x11f   : > { %1021 = vrot.lane.b32.xlu0 %v9912_v8, %s9771_s11  ;;  %1017 = vrot.lane.b32.xlu1 %v9918_v11, %s9771_s11 }
 0x123   : > { %1023 = vrot.lane.b32.xlu0 %v9921_v12, %s9771_s11  ;;  %1025 = vrot.lane.b32.xlu1 %v9926_v15, %s9771_s11 }
 0x127   : > { %1027 = vrot.lane.b32.xlu0 %v9929_v16, %s9771_s11  ;;  %1029 = vrot.lane.b32.xlu1 %v9934_v19, %s9771_s11 }
 0x12b   : > { %1031 = vrot.lane.b32.xlu0 %v9937_v20, %s9771_s11  ;;  %1033 = vrot.lane.b32.xlu1 %v9942_v24, %s9771_s11 }
 0x12f   : > { %1351 = vrot.lane.b32.xlu0 %v9909_v6, %s9772_s12  ;;  %1353 = vrot.lane.b32.xlu1 %v9912_v8, %s9772_s12 }
 0x133   : > { %1349 = vrot.lane.b32.xlu0 %v9918_v11, %s9772_s12  ;;  %1355 = vrot.lane.b32.xlu1 %v9921_v12, %s9772_s12 }
 0x137   : > { %1357 = vrot.lane.b32.xlu0 %v9926_v15, %s9772_s12  ;;  %1359 = vrot.lane.b32.xlu1 %v9929_v16, %s9772_s12 }
 0x13b   : > { %1361 = vrot.lane.b32.xlu0 %v9934_v19, %s9772_s12  ;;  %1363 = vrot.lane.b32.xlu1 %v9937_v20, %s9772_s12 }
 0x13f   : > { %1365 = vrot.lane.b32.xlu0 %v9942_v24, %s9772_s12  ;;  %1683 = vrot.lane.b32.xlu1 %v9909_v6, %s9773_s13  ;;  %s9781_s12 = smov 18  }
 0x143   : > { %1685 = vrot.lane.b32.xlu0 %v9912_v8, %s9773_s13  ;;  %1681 = vrot.lane.b32.xlu1 %v9918_v11, %s9773_s13 }
 0x147   : > { %1687 = vrot.lane.b32.xlu0 %v9921_v12, %s9773_s13  ;;  %1689 = vrot.lane.b32.xlu1 %v9926_v15, %s9773_s13 }
 0x14b   : > { %1691 = vrot.lane.b32.xlu0 %v9929_v16, %s9773_s13  ;;  %1693 = vrot.lane.b32.xlu1 %v9934_v19, %s9773_s13 }
 0x14f   : > { %1695 = vrot.lane.b32.xlu0 %v9937_v20, %s9773_s13  ;;  %1697 = vrot.lane.b32.xlu1 %v9942_v24, %s9773_s13  ;;  %s262_s13 = scalar_lea.vmem %s11356_s6, %s9579_s27 }
 0x153   : > { %2015 = vrot.lane.b32.xlu0 %v9909_v6, %s9774_s14  ;;  %2017 = vrot.lane.b32.xlu1 %v9912_v8, %s9774_s14 }
 0x157   : > { %2013 = vrot.lane.b32.xlu0 %v9918_v11, %s9774_s14  ;;  %2019 = vrot.lane.b32.xlu1 %v9921_v12, %s9774_s14 }
 0x15b   : > { %2021 = vrot.lane.b32.xlu0 %v9926_v15, %s9774_s14  ;;  %2023 = vrot.lane.b32.xlu1 %v9929_v16, %s9774_s14 }
 0x15f   : > { %2025 = vrot.lane.b32.xlu0 %v9934_v19, %s9774_s14  ;;  %2027 = vrot.lane.b32.xlu1 %v9937_v20, %s9774_s14 }
 0x163   : > { %2029 = vrot.lane.b32.xlu0 %v9942_v24, %s9774_s14  ;;  %2347 = vrot.lane.b32.xlu1 %v9909_v6, %s9775_s15 }
 0x167   : > { %2349 = vrot.lane.b32.xlu0 %v9912_v8, %s9775_s15  ;;  %2345 = vrot.lane.b32.xlu1 %v9918_v11, %s9775_s15 }
 0x16b   : > { %2351 = vrot.lane.b32.xlu0 %v9921_v12, %s9775_s15  ;;  %2353 = vrot.lane.b32.xlu1 %v9926_v15, %s9775_s15 }
 0x16f   : > { %2355 = vrot.lane.b32.xlu0 %v9929_v16, %s9775_s15  ;;  %2357 = vrot.lane.b32.xlu1 %v9934_v19, %s9775_s15 }
 0x173   : > { %2359 = vrot.lane.b32.xlu0 %v9937_v20, %s9775_s15  ;;  %2361 = vrot.lane.b32.xlu1 %v9942_v24, %s9775_s15  ;;  %s9782_s15 = smov 17  }
 0x177   : > { %2679 = vrot.lane.b32.xlu0 %v9909_v6, %s9776_s16  ;;  %2681 = vrot.lane.b32.xlu1 %v9912_v8, %s9776_s16 }
 0x17b   : > { %2677 = vrot.lane.b32.xlu0 %v9918_v11, %s9776_s16  ;;  %2683 = vrot.lane.b32.xlu1 %v9921_v12, %s9776_s16 }
 0x17d   : > { %v408_v25 = vpop.permute.xlu0 %407  ;;  %v410_v26 = vpop.permute.xlu1 %409 }
 0x17e   : > { %v425_v27 = vsel %vm423_vm1, %v408_v25, %v410_v26 }
 0x17f   : > { %2685 = vrot.lane.b32.xlu0 %v9926_v15, %s9776_s16  ;;  %2687 = vrot.lane.b32.xlu1 %v9929_v16, %s9776_s16 }
 0x180   : > { %474 = vmatprep.subr.mxu0 %v425_v27 }
 0x181   : > { %v406_v28 = vpop.permute.xlu0 %405  ;;  %v412_v29 = vpop.permute.xlu1 %411 }
 0x182   : > { %v424_v30 = vsel %vm423_vm1, %v406_v28, %v408_v25  ;;  %v426_v37 = vsel %vm423_vm1, %v410_v26, %v412_v29 }
 0x183   : > { %2689 = vrot.lane.b32.xlu0 %v9934_v19, %s9776_s16  ;;  %2691 = vrot.lane.b32.xlu1 %v9937_v20, %s9776_s16 }
 0x184   : > { %475 = vmatpush1.msra.mxu0 %v424_v30 }
 0x185   : > { %v414_v34 = vpop.permute.xlu0 %413  ;;  %v416_v35 = vpop.permute.xlu1 %415  ;;  %9581 = vmatmul.mubr.msk.f32.vlgmr.msra.gmra.mxu0 %vm440_vm2, %v9580_v31 }
 0x186   : > { %v427_v36 = vsel %vm423_vm1, %v412_v29, %v414_v34  ;;  %650 = vmatprep.mubr.f32.mxu0 %v9769_v5  ;;  %v428_v41 = vsel %vm423_vm1, %v414_v34, %v416_v35 }
 0x187   : > { %2693 = vrot.lane.b32.xlu0 %v9942_v24, %s9776_s16  ;;  %3011 = vrot.lane.b32.xlu1 %v9909_v6, %s9777_s19 }
 0x188   : > { %545 = vmatprep.subr.mxu1 %v427_v36 }
 0x189   : > { %546 = vmatpush1.msra.mxu1 %v426_v37  ;;  %v418_v38 = vpop.permute.xlu0 %417  ;;  %v420_v39 = vpop.permute.xlu1 %419 }
 0x18a   : > { %v429_v40 = vsel %vm423_vm1, %v416_v35, %v418_v38  ;;  %9582 = vmatmul.mubr.msk.f32.vlgmr.msra.gmra.mxu1 %vm440_vm2, %v9580_v31  ;;  %v430_v45 = vsel %vm423_vm1, %v418_v38, %v420_v39 }
 0x18b   : > { %3013 = vrot.lane.b32.xlu0 %v9912_v8, %s9777_s19  ;;  %3009 = vrot.lane.b32.xlu1 %v9918_v11, %s9777_s19 }
 0x18c   : > { %616 = vmatprep.subr.mxu0 %v429_v40  ;;  %721 = vmatprep.mubr.f32.mxu1 %v9769_v5 }
 0x18d   : > { %617 = vmatpush1.msra.mxu0 %v428_v41  ;;  %v422_v42 = vpop.permute.xlu0 %421  ;;  %v1020_v43 = vpop.permute.xlu1 %1019 }
 0x18e   : > { %9583 = vmatmul.mubr.msk.f32.vlgmr.msra.gmra.mxu0 %vm440_vm2, %v9580_v31  ;;  %761 = vmatprep.subr.mxu0 %v9909_v6  ;;  %v431_v44 = vsel %vm423_vm1, %v420_v39, %v422_v42  ;;  %vm5682_vm1 = vcmask 56320  }
 0x18f   : > { %9586 = vmatpush1.msk.msra.mxu0 %vm9585_vm3, %v9903_v0  ;;  %3015 = vrot.lane.b32.xlu0 %v9921_v12, %s9777_s19  ;;  %vm6014_vm3 = vcmask 48128  }
 0x190   : > { %3017 = vrot.lane.b32.xlu1 %v9926_v15, %s9777_s19  ;;  %687 = vmatprep.subr.mxu1 %v431_v44  ;;  %v9601_v44 = vld [vmem:[%s11351_s1 + $0x20] sm:$0xff] }
 0x191   : > { %903 = vmatprep.subr.mxu0 %v9929_v16  ;;  %688 = vmatpush1.msra.mxu1 %v430_v45  ;;  %v1022_v48 = vpop.permute.xlu0 %1021  ;;  %v1018_v49 = vpop.permute.xlu1 %1017 }
 0x192   : > { %795 = vmatprep.mubr.f32.mxu0 %v9769_v5  ;;  %9584 = vmatmul.mubr.msk.f32.vlgmr.msra.gmra.mxu1 %vm440_vm2, %v9580_v31  ;;  %v1037_v50 = vsel %vm1035_vm4, %v1020_v43, %v1022_v48  ;;  %v1036_v53 = vsel %vm1035_vm4, %v1018_v49, %v1020_v43 }
 0x193   : > { %9587 = vmatmul.mubr.msk.f32.vlgmr.msra.gmra.mxu0 %vm440_vm2, %v400_v46  ;;  %832 = vmatprep.subr.mxu1 %v9921_v12 }
 0x194   : > { %904 = vmatpush1.msra.mxu0 %v9926_v15  ;;  %833 = vmatpush1.msra.mxu1 %v9912_v8 }
 0x195   : > { %3019 = vrot.lane.b32.xlu0 %v9929_v16, %s9777_s19  ;;  %3021 = vrot.lane.b32.xlu1 %v9934_v19, %s9777_s19  ;;  %v1024_v51 = vpop.permute.xlu0 %1023  ;;  %v1026_v52 = vpop.permute.xlu1 %1025 }
 0x196   : > { %974 = vmatprep.subr.mxu1 %v9937_v20  ;;  %1085 = vmatprep.subr.mxu0 %v1037_v50  ;;  %v1039_v54 = vsel %vm1035_vm4, %v1024_v51, %v1026_v52  ;;  %v1038_v59 = vsel %vm1035_vm4, %v1022_v48, %v1024_v51 }
 0x197   : > { %866 = vmatprep.mubr.f32.mxu1 %v9769_v5  ;;  %937 = vmatprep.mubr.f32.mxu0 %v9769_v5 }
 0x198   : > { %9588 = vmatmul.mubr.msk.f32.vlgmr.msra.gmra.mxu1 %vm440_vm2, %v400_v46  ;;  %9589 = vmatmul.mubr.msk.f32.vlgmr.msra.gmra.mxu0 %vm440_vm2, %v400_v46 }
 0x199   : > { %975 = vmatpush1.msra.mxu1 %v9934_v19  ;;  %1086 = vmatpush1.msra.mxu0 %v1036_v53  ;;  %v1028_v56 = vpop.permute.xlu0 %1027  ;;  %v1030_v57 = vpop.permute.xlu1 %1029 }
 0x19a   : > { %3023 = vrot.lane.b32.xlu0 %v9937_v20, %s9777_s19  ;;  %3025 = vrot.lane.b32.xlu1 %v9942_v24, %s9777_s19  ;;  %v1041_v58 = vsel %vm1035_vm4, %v1028_v56, %v1030_v57  ;;  %v1040_v61 = vsel %vm1035_vm4, %v1026_v52, %v1028_v56 }
 0x19b   : > { %1156 = vmatprep.subr.mxu1 %v1039_v54  ;;  %1008 = vmatprep.mubr.f32.mxu1 %v9769_v5 }
 0x19c   : > { %9590 = vmatmul.mubr.msk.f32.vlgmr.msra.gmra.mxu1 %vm440_vm2, %v400_v46  ;;  %1119 = vmatprep.mubr.f32.mxu0 %v9769_v5 }
 0x19d   : > { %1157 = vmatpush1.msra.mxu1 %v1038_v59  ;;  %1227 = vmatprep.subr.mxu0 %v1041_v58  ;;  %v1032_v62 = vpop.permute.xlu0 %1031  ;;  %v1034_v63 = vpop.permute.xlu1 %1033 }
 0x19e   : > { %3343 = vrot.lane.b32.xlu0 %v9909_v6, %s9778_s26  ;;  %3345 = vrot.lane.b32.xlu1 %v9912_v8, %s9778_s26  ;;  %v1043_v0 = vsel %vm1035_vm4, %v1032_v62, %v1034_v63  ;;  %v1042_v2 = vsel %vm1035_vm4, %v1030_v57, %v1032_v62  ;;  %vm6347_vm4 = vcmask 457728  }
 0x19f   : > { %9592 = vmatmul.mubr.msk.f32.vlgmr.msra.gmra.mxu0 %vm440_vm2, %v9591_v60  ;;  %1190 = vmatprep.mubr.f32.mxu1 %v9769_v5 }
 0x1a0   : > { %1228 = vmatpush1.msra.mxu0 %v1040_v61  ;;  %1298 = vmatprep.subr.mxu1 %v1043_v0  ;;  %v9606_v0 = vld [vmem:[%s11351_s1 + $0x28] sm:$0xff] }
 0x1a1   : > { %9593 = vmatmul.mubr.msk.f32.vlgmr.msra.gmra.mxu1 %vm440_vm2, %v9591_v60  ;;  %v1352_v3 = vpop.permute.xlu0 %1351  ;;  %v1354_v10 = vpop.permute.xlu1 %1353  ;;  %1261 = vmatprep.mubr.f32.mxu0 %v9769_v5 }
 0x1a2   : > { %3341 = vrot.lane.b32.xlu0 %v9918_v11, %s9778_s26  ;;  %3347 = vrot.lane.b32.xlu1 %v9921_v12, %s9778_s26  ;;  %v1369_v13 = vsel %vm1367_vm5, %v1352_v3, %v1354_v10 }
 0x1a3   : > { %1299 = vmatpush1.msra.mxu1 %v1042_v2  ;;  %1417 = vmatprep.subr.mxu0 %v1369_v13 }
 0x1a4   : > { %9594 = vmatmul.mubr.msk.f32.vlgmr.msra.gmra.mxu0 %vm440_vm2, %v9591_v60  ;;  %1332 = vmatprep.mubr.f32.mxu1 %v9769_v5 }
 0x1a5   : > { %v1350_v14 = vpop.permute.xlu0 %1349  ;;  %v1356_v17 = vpop.permute.xlu1 %1355  ;;  %9595 = vmatmul.mubr.msk.f32.vlgmr.msra.gmra.mxu1 %vm440_vm2, %v9591_v60  ;;  %1451 = vmatprep.mubr.f32.mxu0 %v9769_v5 }
 0x1a6   : > { %3349 = vrot.lane.b32.xlu0 %v9926_v15, %s9778_s26  ;;  %3351 = vrot.lane.b32.xlu1 %v9929_v16, %s9778_s26  ;;  %v1368_v25 = vsel %vm1367_vm5, %v1350_v14, %v1352_v3  ;;  %v1370_v29 = vsel %vm1367_vm5, %v1354_v10, %v1356_v17 }
 0x1a7   : > { %1418 = vmatpush1.msra.mxu0 %v1368_v25  ;;  %1522 = vmatprep.mubr.f32.mxu1 %v9769_v5 }
 0x1a8   : > { %9597 = vmatmul.mubr.msk.f32.vlgmr.msra.gmra.mxu0 %vm440_vm2, %v9596_v18 }
 0x1a9   : > { %v1358_v26 = vpop.permute.xlu0 %1357  ;;  %v1360_v27 = vpop.permute.xlu1 %1359  ;;  %1593 = vmatprep.mubr.f32.mxu0 %v9769_v5 }
 0x1aa   : > { %3353 = vrot.lane.b32.xlu0 %v9934_v19, %s9778_s26  ;;  %3355 = vrot.lane.b32.xlu1 %v9937_v20, %s9778_s26  ;;  %v1371_v28 = vsel %vm1367_vm5, %v1356_v17, %v1358_v26  ;;  %v1372_v35 = vsel %vm1367_vm5, %v1358_v26, %v1360_v27 }
 0x1ab   : > { %1488 = vmatprep.subr.mxu1 %v1371_v28 }
 0x1ac   : > { %1489 = vmatpush1.msra.mxu1 %v1370_v29 }
 0x1ad   : > { %v1362_v30 = vpop.permute.xlu0 %1361  ;;  %v1364_v31 = vpop.permute.xlu1 %1363  ;;  %9598 = vmatmul.mubr.msk.f32.vlgmr.msra.gmra.mxu1 %vm440_vm2, %v9596_v18 }
 0x1ae   : > { %3357 = vrot.lane.b32.xlu0 %v9942_v24, %s9778_s26  ;;  %3675 = vrot.lane.b32.xlu1 %v9909_v6, %s9779_s30  ;;  %v1373_v34 = vsel %vm1367_vm5, %v1360_v27, %v1362_v30  ;;  %v1374_v39 = vsel %vm1367_vm5, %v1362_v30, %v1364_v31  ;;  %s9785_s26 = smov 7  }
 0x1af   : > { %1559 = vmatprep.subr.mxu0 %v1373_v34  ;;  %1664 = vmatprep.mubr.f32.mxu1 %v9769_v5 }
 0x1b0   : > { %1560 = vmatpush1.msra.mxu0 %v1372_v35 }
 0x1b1   : > { %v1366_v36 = vpop.permute.xlu0 %1365  ;;  %v1684_v37 = vpop.permute.xlu1 %1683  ;;  %9599 = vmatmul.mubr.msk.f32.vlgmr.msra.gmra.mxu0 %vm440_vm2, %v9596_v18 }
 0x1b2   : > { %3677 = vrot.lane.b32.xlu0 %v9912_v8, %s9779_s30  ;;  %3673 = vrot.lane.b32.xlu1 %v9918_v11, %s9779_s30  ;;  %v1375_v38 = vsel %vm1367_vm5, %v1364_v31, %v1366_v36  ;;  %vm6679_vm5 = vcmask 449536  }
 0x1b3   : > { %1630 = vmatprep.subr.mxu1 %v1375_v38  ;;  %1783 = vmatprep.mubr.f32.mxu0 %v9769_v5 }
 0x1b4   : > { %1631 = vmatpush1.msra.mxu1 %v1374_v39 }
 0x1b5   : > { %v1686_v40 = vpop.permute.xlu0 %1685  ;;  %v1682_v41 = vpop.permute.xlu1 %1681  ;;  %9600 = vmatmul.mubr.msk.f32.vlgmr.msra.gmra.mxu1 %vm440_vm2, %v9596_v18 }
 0x1b6   : > { %3679 = vrot.lane.b32.xlu0 %v9921_v12, %s9779_s30  ;;  %3681 = vrot.lane.b32.xlu1 %v9926_v15, %s9779_s30  ;;  %v1700_v42 = vsel %vm1699_vm6, %v1682_v41, %v1684_v37  ;;  %v1701_v43 = vsel %vm1699_vm6, %v1684_v37, %v1686_v40  ;;  %v9611_v37 = vld [vmem:[%s11351_s1 + $0x30] sm:$0xff] }
 0x1b7   : > { %1749 = vmatprep.subr.mxu0 %v1701_v43  ;;  %1854 = vmatprep.mubr.f32.mxu1 %v9769_v5 }
 0x1b8   : > { %1750 = vmatpush1.msra.mxu0 %v1700_v42 }
 0x1b9   : > { %v1688_v45 = vpop.permute.xlu0 %1687  ;;  %v1690_v46 = vpop.permute.xlu1 %1689  ;;  %9602 = vmatmul.mubr.msk.f32.vlgmr.msra.gmra.mxu0 %vm440_vm2, %v9601_v44 }
 0x1ba   : > { %3683 = vrot.lane.b32.xlu0 %v9929_v16, %s9779_s30  ;;  %3685 = vrot.lane.b32.xlu1 %v9934_v19, %s9779_s30  ;;  %v1703_v48 = vsel %vm1699_vm6, %v1688_v45, %v1690_v46  ;;  %v1702_v49 = vsel %vm1699_vm6, %v1686_v40, %v1688_v45 }
 0x1bb   : > { %1820 = vmatprep.subr.mxu1 %v1703_v48  ;;  %1925 = vmatprep.mubr.f32.mxu0 %v9769_v5 }
 0x1bc   : > { %1821 = vmatpush1.msra.mxu1 %v1702_v49 }
 0x1bd   : > { %v1692_v50 = vpop.permute.xlu0 %1691  ;;  %v1694_v51 = vpop.permute.xlu1 %1693  ;;  %9603 = vmatmul.mubr.msk.f32.vlgmr.msra.gmra.mxu1 %vm440_vm2, %v9601_v44 }
 0x1be   : > { %3687 = vrot.lane.b32.xlu0 %v9937_v20, %s9779_s30  ;;  %3689 = vrot.lane.b32.xlu1 %v9942_v24, %s9779_s30  ;;  %v1705_v52 = vsel %vm1699_vm6, %v1692_v50, %v1694_v51  ;;  %v1704_v53 = vsel %vm1699_vm6, %v1690_v46, %v1692_v50  ;;  %s9786_s30 = smov 6  }
 0x1bf   : > { %1891 = vmatprep.subr.mxu0 %v1705_v52  ;;  %1996 = vmatprep.mubr.f32.mxu1 %v9769_v5 }
 0x1c0   : > { %1892 = vmatpush1.msra.mxu0 %v1704_v53 }
 0x1c1   : > { %v1696_v54 = vpop.permute.xlu0 %1695  ;;  %v1698_v56 = vpop.permute.xlu1 %1697  ;;  %9604 = vmatmul.mubr.msk.f32.vlgmr.msra.gmra.mxu0 %vm440_vm2, %v9601_v44 }
 0x1c2   : > { %4007 = vrot.lane.b32.xlu0 %v9909_v6, %s9780_s9  ;;  %4009 = vrot.lane.b32.xlu1 %v9912_v8, %s9780_s9  ;;  %v1707_v57 = vsel %vm1699_vm6, %v1696_v54, %v1698_v56  ;;  %v1706_v58 = vsel %vm1699_vm6, %v1694_v51, %v1696_v54  ;;  %vm7011_vm6 = vcmask 441344  }
 0x1c3   : > { %1962 = vmatprep.subr.mxu1 %v1707_v57  ;;  %2115 = vmatprep.mubr.f32.mxu0 %v9769_v5  ;;  %v9616_v57 = vld [vmem:[%s11351_s1 + $0x38] sm:$0xff] }
 0x1c4   : > { %1963 = vmatpush1.msra.mxu1 %v1706_v58 }
 0x1c5   : > { %v2016_v59 = vpop.permute.xlu0 %2015  ;;  %v2018_v60 = vpop.permute.xlu1 %2017  ;;  %9605 = vmatmul.mubr.msk.f32.vlgmr.msra.gmra.mxu1 %vm440_vm2, %v9601_v44 }
 0x1c6   : > { %4005 = vrot.lane.b32.xlu0 %v9918_v11, %s9780_s9  ;;  %4011 = vrot.lane.b32.xlu1 %v9921_v12, %s9780_s9  ;;  %v2033_v61 = vsel %vm2031_vm7, %v2016_v59, %v2018_v60 }
 0x1c7   : > { %2081 = vmatprep.subr.mxu0 %v2033_v61  ;;  %2186 = vmatprep.mubr.f32.mxu1 %v9769_v5 }
 0x1c9   : > { %v2014_v62 = vpop.permute.xlu0 %2013  ;;  %v2020_v63 = vpop.permute.xlu1 %2019 }
 0x1ca   : > { %4013 = vrot.lane.b32.xlu0 %v9926_v15, %s9780_s9  ;;  %4015 = vrot.lane.b32.xlu1 %v9929_v16, %s9780_s9  ;;  %v2032_v2 = vsel %vm2031_vm7, %v2014_v62, %v2016_v59  ;;  %v2034_v14 = vsel %vm2031_vm7, %v2018_v60, %v2020_v63 }
 0x1cb   : > { %2082 = vmatpush1.msra.mxu0 %v2032_v2 }
 0x1cc   : > { %9607 = vmatmul.mubr.msk.f32.vlgmr.msra.gmra.mxu0 %vm440_vm2, %v9606_v0 }
 0x1cd   : > { %v2022_v3 = vpop.permute.xlu0 %2021  ;;  %v2024_v10 = vpop.permute.xlu1 %2023  ;;  %2257 = vmatprep.mubr.f32.mxu0 %v9769_v5 }
 0x1ce   : > { %4017 = vrot.lane.b32.xlu0 %v9934_v19, %s9780_s9  ;;  %4019 = vrot.lane.b32.xlu1 %v9937_v20, %s9780_s9  ;;  %v2035_v13 = vsel %vm2031_vm7, %v2020_v63, %v2022_v3  ;;  %v2036_v26 = vsel %vm2031_vm7, %v2022_v3, %v2024_v10 }
 0x1cf   : > { %2152 = vmatprep.subr.mxu1 %v2035_v13 }
 0x1d0   : > { %2153 = vmatpush1.msra.mxu1 %v2034_v14 }
 0x1d1   : > { %v2026_v17 = vpop.permute.xlu0 %2025  ;;  %v2028_v18 = vpop.permute.xlu1 %2027  ;;  %9608 = vmatmul.mubr.msk.f32.vlgmr.msra.gmra.mxu1 %vm440_vm2, %v9606_v0 }
 0x1d2   : > { %4021 = vrot.lane.b32.xlu0 %v9942_v24, %s9780_s9  ;;  %4339 = vrot.lane.b32.xlu1 %v9909_v6, %s9781_s12  ;;  %v2037_v25 = vsel %vm2031_vm7, %v2024_v10, %v2026_v17  ;;  %v2038_v30 = vsel %vm2031_vm7, %v2026_v17, %v2028_v18  ;;  %s9787_s9 = smov 56  }
 0x1d3   : > { %2223 = vmatprep.subr.mxu0 %v2037_v25  ;;  %2328 = vmatprep.mubr.f32.mxu1 %v9769_v5 }
 0x1d4   : > { %2224 = vmatpush1.msra.mxu0 %v2036_v26 }
 0x1d5   : > { %v2030_v27 = vpop.permute.xlu0 %2029  ;;  %v2348_v28 = vpop.permute.xlu1 %2347  ;;  %9609 = vmatmul.mubr.msk.f32.vlgmr.msra.gmra.mxu0 %vm440_vm2, %v9606_v0 }
 0x1d6   : > { %4341 = vrot.lane.b32.xlu0 %v9912_v8, %s9781_s12  ;;  %4337 = vrot.lane.b32.xlu1 %v9918_v11, %s9781_s12  ;;  %v2039_v29 = vsel %vm2031_vm7, %v2028_v18, %v2030_v27  ;;  %vm7343_vm7 = vcmask 375808  }
 0x1d7   : > { %2294 = vmatprep.subr.mxu1 %v2039_v29  ;;  %2447 = vmatprep.mubr.f32.mxu0 %v9769_v5 }
 0x1d8   : > { %2295 = vmatpush1.msra.mxu1 %v2038_v30 }
 0x1d9   : > { %v2350_v31 = vpop.permute.xlu0 %2349  ;;  %v2346_v34 = vpop.permute.xlu1 %2345  ;;  %9610 = vmatmul.mubr.msk.f32.vlgmr.msra.gmra.mxu1 %vm440_vm2, %v9606_v0 }
 0x1da   : > { %4343 = vrot.lane.b32.xlu0 %v9921_v12, %s9781_s12  ;;  %4345 = vrot.lane.b32.xlu1 %v9926_v15, %s9781_s12  ;;  %v2364_v35 = vsel %vm2363_vm8, %v2346_v34, %v2348_v28  ;;  %v2365_v36 = vsel %vm2363_vm8, %v2348_v28, %v2350_v31  ;;  %v9621_v28 = vld [vmem:[%s11351_s1 + $0x40] sm:$0xff] }
 0x1db   : > { %2413 = vmatprep.subr.mxu0 %v2365_v36  ;;  %2518 = vmatprep.mubr.f32.mxu1 %v9769_v5 }
 0x1dc   : > { %2414 = vmatpush1.msra.mxu0 %v2364_v35 }
 0x1dd   : > { %v2352_v38 = vpop.permute.xlu0 %2351  ;;  %v2354_v39 = vpop.permute.xlu1 %2353  ;;  %9612 = vmatmul.mubr.msk.f32.vlgmr.msra.gmra.mxu0 %vm440_vm2, %v9611_v37 }
 0x1de   : > { %4347 = vrot.lane.b32.xlu0 %v9929_v16, %s9781_s12  ;;  %4349 = vrot.lane.b32.xlu1 %v9934_v19, %s9781_s12  ;;  %v2367_v40 = vsel %vm2363_vm8, %v2352_v38, %v2354_v39  ;;  %v2366_v41 = vsel %vm2363_vm8, %v2350_v31, %v2352_v38 }
 0x1df   : > { %2484 = vmatprep.subr.mxu1 %v2367_v40  ;;  %2589 = vmatprep.mubr.f32.mxu0 %v9769_v5 }
 0x1e0   : > { %2485 = vmatpush1.msra.mxu1 %v2366_v41 }
 0x1e1   : > { %v2356_v42 = vpop.permute.xlu0 %2355  ;;  %v2358_v43 = vpop.permute.xlu1 %2357  ;;  %9613 = vmatmul.mubr.msk.f32.vlgmr.msra.gmra.mxu1 %vm440_vm2, %v9611_v37 }
 0x1e2   : > { %4351 = vrot.lane.b32.xlu0 %v9937_v20, %s9781_s12  ;;  %4353 = vrot.lane.b32.xlu1 %v9942_v24, %s9781_s12  ;;  %v2369_v44 = vsel %vm2363_vm8, %v2356_v42, %v2358_v43  ;;  %v2368_v45 = vsel %vm2363_vm8, %v2354_v39, %v2356_v42  ;;  %s9788_s12 = smov 55  }
 0x1e3   : > { %2555 = vmatprep.subr.mxu0 %v2369_v44  ;;  %2660 = vmatprep.mubr.f32.mxu1 %v9769_v5 }
 0x1e4   : > { %2556 = vmatpush1.msra.mxu0 %v2368_v45 }
 0x1e5   : > { %v2360_v46 = vpop.permute.xlu0 %2359  ;;  %v2362_v48 = vpop.permute.xlu1 %2361  ;;  %9614 = vmatmul.mubr.msk.f32.vlgmr.msra.gmra.mxu0 %vm440_vm2, %v9611_v37 }
 0x1e6   : > { %4671 = vrot.lane.b32.xlu0 %v9909_v6, %s9782_s15  ;;  %4673 = vrot.lane.b32.xlu1 %v9912_v8, %s9782_s15  ;;  %v2371_v49 = vsel %vm2363_vm8, %v2360_v46, %v2362_v48  ;;  %v2370_v50 = vsel %vm2363_vm8, %v2358_v43, %v2360_v46  ;;  %vm7675_vm8 = vcmask 367616  }
 0x1e7   : > { %2626 = vmatprep.subr.mxu1 %v2371_v49  ;;  %2779 = vmatprep.mubr.f32.mxu0 %v9769_v5 }
 0x1e8   : > { %2627 = vmatpush1.msra.mxu1 %v2370_v50  ;;  %v9626_v50 = vld [vmem:[%s11351_s1 + $0x48] sm:$0xff] }
 0x1e9   : > { %v2680_v51 = vpop.permute.xlu0 %2679  ;;  %v2682_v52 = vpop.permute.xlu1 %2681  ;;  %9615 = vmatmul.mubr.msk.f32.vlgmr.msra.gmra.mxu1 %vm440_vm2, %v9611_v37 }
 0x1ea   : > { %4669 = vrot.lane.b32.xlu0 %v9918_v11, %s9782_s15  ;;  %4675 = vrot.lane.b32.xlu1 %v9921_v12, %s9782_s15  ;;  %v2697_v53 = vsel %vm2695_vm9, %v2680_v51, %v2682_v52 }
 0x1eb   : > { %2745 = vmatprep.subr.mxu0 %v2697_v53  ;;  %2850 = vmatprep.mubr.f32.mxu1 %v9769_v5 }
 0x1ed   : > { %v2678_v54 = vpop.permute.xlu0 %2677  ;;  %v2684_v56 = vpop.permute.xlu1 %2683 }
 0x1ee   : > { %4677 = vrot.lane.b32.xlu0 %v9926_v15, %s9782_s15  ;;  %4679 = vrot.lane.b32.xlu1 %v9929_v16, %s9782_s15  ;;  %v2696_v58 = vsel %vm2695_vm9, %v2678_v54, %v2680_v51  ;;  %v2698_v62 = vsel %vm2695_vm9, %v2682_v52, %v2684_v56 }
 0x1ef   : > { %2746 = vmatpush1.msra.mxu0 %v2696_v58 }
 0x1f0   : > { %9617 = vmatmul.mubr.msk.f32.vlgmr.msra.gmra.mxu0 %vm440_vm2, %v9616_v57 }
 0x1f1   : > { %v2686_v59 = vpop.permute.xlu0 %2685  ;;  %v2688_v60 = vpop.permute.xlu1 %2687  ;;  %2921 = vmatprep.mubr.f32.mxu0 %v9769_v5 }
 0x1f2   : > { %4681 = vrot.lane.b32.xlu0 %v9934_v19, %s9782_s15  ;;  %4683 = vrot.lane.b32.xlu1 %v9937_v20, %s9782_s15  ;;  %v2699_v61 = vsel %vm2695_vm9, %v2684_v56, %v2686_v59  ;;  %v2700_v3 = vsel %vm2695_vm9, %v2686_v59, %v2688_v60 }
 0x1f3   : > { %2816 = vmatprep.subr.mxu1 %v2699_v61 }
 0x1f4   : > { %2817 = vmatpush1.msra.mxu1 %v2698_v62 }
 0x1f5   : > { %v2690_v63 = vpop.permute.xlu0 %2689  ;;  %v2692_v0 = vpop.permute.xlu1 %2691  ;;  %9618 = vmatmul.mubr.msk.f32.vlgmr.msra.gmra.mxu1 %vm440_vm2, %v9616_v57 }
 0x1f6   : > { %4685 = vrot.lane.b32.xlu0 %v9942_v24, %s9782_s15  ;;  %5003 = vrot.lane.b32.xlu1 %v9909_v6, %s9783_s18  ;;  %v2701_v2 = vsel %vm2695_vm9, %v2688_v60, %v2690_v63  ;;  %v2702_v17 = vsel %vm2695_vm9, %v2690_v63, %v2692_v0  ;;  %s9789_s15 = smov 54  }
 0x1f7   : > { %2887 = vmatprep.subr.mxu0 %v2701_v2  ;;  %2992 = vmatprep.mubr.f32.mxu1 %v9769_v5 }
 0x1f8   : > { %2888 = vmatpush1.msra.mxu0 %v2700_v3 }
 0x1f9   : > { %v2694_v10 = vpop.permute.xlu0 %2693  ;;  %v3012_v13 = vpop.permute.xlu1 %3011  ;;  %9619 = vmatmul.mubr.msk.f32.vlgmr.msra.gmra.mxu0 %vm440_vm2, %v9616_v57 }
 0x1fa   : > { %5005 = vrot.lane.b32.xlu0 %v9912_v8, %s9783_s18  ;;  %5001 = vrot.lane.b32.xlu1 %v9918_v11, %s9783_s18  ;;  %v2703_v14 = vsel %vm2695_vm9, %v2692_v0, %v2694_v10  ;;  %vm8007_vm9 = vcmask 359424  }
 0x1fb   : > { %2958 = vmatprep.subr.mxu1 %v2703_v14  ;;  %3111 = vmatprep.mubr.f32.mxu0 %v9769_v5 }
 0x1fc   : > { %2959 = vmatpush1.msra.mxu1 %v2702_v17 }
 0x1fd   : > { %v3014_v18 = vpop.permute.xlu0 %3013  ;;  %v3010_v25 = vpop.permute.xlu1 %3009  ;;  %9620 = vmatmul.mubr.msk.f32.vlgmr.msra.gmra.mxu1 %vm440_vm2, %v9616_v57 }
 0x1fe   : > { %5007 = vrot.lane.b32.xlu0 %v9921_v12, %s9783_s18  ;;  %5009 = vrot.lane.b32.xlu1 %v9926_v15, %s9783_s18  ;;  %v3028_v26 = vsel %vm3027_vm10, %v3010_v25, %v3012_v13  ;;  %v3029_v27 = vsel %vm3027_vm10, %v3012_v13, %v3014_v18  ;;  %v9631_v13 = vld [vmem:[%s11351_s1 + $0x50] sm:$0xff] }
 0x1ff   : > { %3077 = vmatprep.subr.mxu0 %v3029_v27  ;;  %3182 = vmatprep.mubr.f32.mxu1 %v9769_v5 }
 0x200   : > { %3078 = vmatpush1.msra.mxu0 %v3028_v26 }
 0x201   : > { %v3016_v29 = vpop.permute.xlu0 %3015  ;;  %9622 = vmatmul.mubr.msk.f32.vlgmr.msra.gmra.mxu0 %vm440_vm2, %v9621_v28 }
 0x202   : > { %5011 = vrot.lane.b32.xlu0 %v9929_v16, %s9783_s18  ;;  %5013 = vrot.lane.b32.xlu1 %v9934_v19, %s9783_s18  ;;  %v3018_v30 = vpop.permute.xlu1 %3017  ;;  %v3030_v31 = vsel %vm3027_vm10, %v3014_v18, %v3016_v29 }
 0x203   : > { %v3031_v34 = vsel %vm3027_vm10, %v3016_v29, %v3018_v30  ;;  %3253 = vmatprep.mubr.f32.mxu0 %v9769_v5 }
 0x204   : > { %3148 = vmatprep.subr.mxu1 %v3031_v34 }
 0x205   : > { %3149 = vmatpush1.msra.mxu1 %v3030_v31 }
 0x206   : > { %5015 = vrot.lane.b32.xlu0 %v9937_v20, %s9783_s18  ;;  %5017 = vrot.lane.b32.xlu1 %v9942_v24, %s9783_s18  ;;  %s9790_s18 = smov 46  }
 0x207   : > { %v3020_v35 = vpop.permute.xlu0 %3019  ;;  %v3022_v36 = vpop.permute.xlu1 %3021  ;;  %9623 = vmatmul.mubr.msk.f32.vlgmr.msra.gmra.mxu1 %vm440_vm2, %v9621_v28 }
 0x208   : > { %v3033_v37 = vsel %vm3027_vm10, %v3020_v35, %v3022_v36  ;;  %v3032_v38 = vsel %vm3027_vm10, %v3018_v30, %v3020_v35  ;;  %3324 = vmatprep.mubr.f32.mxu1 %v9769_v5 }
 0x209   : > { %3219 = vmatprep.subr.mxu0 %v3033_v37 }
 0x20a   : > { %5335 = vrot.lane.b32.xlu0 %v9909_v6, %s9784_s23  ;;  %5337 = vrot.lane.b32.xlu1 %v9912_v8, %s9784_s23 }
 0x20b   : > { %3220 = vmatpush1.msra.mxu0 %v3032_v38 }
 0x20c   : > { %v3024_v39 = vpop.permute.xlu0 %3023  ;;  %v3026_v40 = vpop.permute.xlu1 %3025  ;;  %9624 = vmatmul.mubr.msk.f32.vlgmr.msra.gmra.mxu0 %vm440_vm2, %v9621_v28 }
 0x20d   : > { %v3035_v41 = vsel %vm3027_vm10, %v3024_v39, %v3026_v40  ;;  %v3034_v42 = vsel %vm3027_vm10, %v3022_v36, %v3024_v39  ;;  %3443 = vmatprep.mubr.f32.mxu0 %v9769_v5  ;;  %vm8339_vm10 = vcmask 293888  }
 0x20e   : > { %5333 = vrot.lane.b32.xlu0 %v9918_v11, %s9784_s23  ;;  %5339 = vrot.lane.b32.xlu1 %v9921_v12, %s9784_s23 }
 0x20f   : > { %3290 = vmatprep.subr.mxu1 %v3035_v41  ;;  %v9636_v41 = vld [vmem:[%s11351_s1 + $0x58] sm:$0xff] }
 0x210   : > { %3291 = vmatpush1.msra.mxu1 %v3034_v42  ;;  %v3344_v43 = vpop.permute.xlu0 %3343  ;;  %v3346_v44 = vpop.permute.xlu1 %3345 }
 0x211   : > { %v3361_v45 = vsel %vm3359_vm11, %v3344_v43, %v3346_v44  ;;  %9625 = vmatmul.mubr.msk.f32.vlgmr.msra.gmra.mxu1 %vm440_vm2, %v9621_v28 }
 0x212   : > { %5341 = vrot.lane.b32.xlu0 %v9926_v15, %s9784_s23  ;;  %5343 = vrot.lane.b32.xlu1 %v9929_v16, %s9784_s23 }
 0x213   : > { %3409 = vmatprep.subr.mxu0 %v3361_v45  ;;  %3514 = vmatprep.mubr.f32.mxu1 %v9769_v5 }
 0x214   : > { %v3342_v46 = vpop.permute.xlu0 %3341  ;;  %v3348_v48 = vpop.permute.xlu1 %3347 }
 0x215   : > { %v3360_v49 = vsel %vm3359_vm11, %v3342_v46, %v3344_v43  ;;  %v3362_v54 = vsel %vm3359_vm11, %v3346_v44, %v3348_v48 }
 0x216   : > { %5345 = vrot.lane.b32.xlu0 %v9934_v19, %s9784_s23  ;;  %5347 = vrot.lane.b32.xlu1 %v9937_v20, %s9784_s23 }
 0x217   : > { %3410 = vmatpush1.msra.mxu0 %v3360_v49 }
 0x218   : > { %v3350_v51 = vpop.permute.xlu0 %3349  ;;  %v3352_v52 = vpop.permute.xlu1 %3351  ;;  %9627 = vmatmul.mubr.msk.f32.vlgmr.msra.gmra.mxu0 %vm440_vm2, %v9626_v50 }
 0x219   : > { %v3363_v53 = vsel %vm3359_vm11, %v3348_v48, %v3350_v51  ;;  %3585 = vmatprep.mubr.f32.mxu0 %v9769_v5  ;;  %v3364_v59 = vsel %vm3359_vm11, %v3350_v51, %v3352_v52 }
 0x21a   : > { %5349 = vrot.lane.b32.xlu0 %v9942_v24, %s9784_s23  ;;  %5666 = vrot.lane.b32.xlu1 %v9909_v6, %s9785_s26  ;;  %s9791_s23 = smov 45  }
 0x21b   : > { %3480 = vmatprep.subr.mxu1 %v3363_v53 }
 0x21c   : > { %3481 = vmatpush1.msra.mxu1 %v3362_v54  ;;  %v3354_v56 = vpop.permute.xlu0 %3353  ;;  %v3356_v57 = vpop.permute.xlu1 %3355 }
 0x21d   : > { %v3365_v58 = vsel %vm3359_vm11, %v3352_v52, %v3354_v56  ;;  %9628 = vmatmul.mubr.msk.f32.vlgmr.msra.gmra.mxu1 %vm440_vm2, %v9626_v50  ;;  %v3366_v63 = vsel %vm3359_vm11, %v3354_v56, %v3356_v57 }
 0x21e   : > { %5668 = vrot.lane.b32.xlu0 %v9912_v8, %s9785_s26  ;;  %5664 = vrot.lane.b32.xlu1 %v9918_v11, %s9785_s26 }
 0x21f   : > { %3551 = vmatprep.subr.mxu0 %v3365_v58  ;;  %3656 = vmatprep.mubr.f32.mxu1 %v9769_v5 }
 0x220   : > { %3552 = vmatpush1.msra.mxu0 %v3364_v59  ;;  %v3358_v60 = vpop.permute.xlu0 %3357  ;;  %v3676_v61 = vpop.permute.xlu1 %3675 }
 0x221   : > { %v3367_v62 = vsel %vm3359_vm11, %v3356_v57, %v3358_v60  ;;  %9629 = vmatmul.mubr.msk.f32.vlgmr.msra.gmra.mxu0 %vm440_vm2, %v9626_v50  ;;  %v9641_v60 = vld [vmem:[%s11351_s1 + $0x60] sm:$0xff]  ;;  %vm8671_vm11 = vcmask 285696  }
 0x222   : > { %5670 = vrot.lane.b32.xlu0 %v9921_v12, %s9785_s26  ;;  %5672 = vrot.lane.b32.xlu1 %v9926_v15, %s9785_s26 }
 0x223   : > { %3622 = vmatprep.subr.mxu1 %v3367_v62  ;;  %3775 = vmatprep.mubr.f32.mxu0 %v9769_v5 }
 0x224   : > { %3623 = vmatpush1.msra.mxu1 %v3366_v63  ;;  %v3678_v0 = vpop.permute.xlu0 %3677  ;;  %v3674_v2 = vpop.permute.xlu1 %3673 }
 0x225   : > { %v3692_v3 = vsel %vm3691_vm12, %v3674_v2, %v3676_v61  ;;  %v3693_v10 = vsel %vm3691_vm12, %v3676_v61, %v3678_v0  ;;  %9630 = vmatmul.mubr.msk.f32.vlgmr.msra.gmra.mxu1 %vm440_vm2, %v9626_v50 }
 0x226   : > { %5674 = vrot.lane.b32.xlu0 %v9929_v16, %s9785_s26  ;;  %5676 = vrot.lane.b32.xlu1 %v9934_v19, %s9785_s26 }
 0x227   : > { %3741 = vmatprep.subr.mxu0 %v3693_v10  ;;  %3846 = vmatprep.mubr.f32.mxu1 %v9769_v5 }
 0x228   : > { %3742 = vmatpush1.msra.mxu0 %v3692_v3  ;;  %v3680_v14 = vpop.permute.xlu0 %3679  ;;  %v3682_v17 = vpop.permute.xlu1 %3681 }
 0x229   : > { %v3695_v18 = vsel %vm3691_vm12, %v3680_v14, %v3682_v17  ;;  %v3694_v25 = vsel %vm3691_vm12, %v3678_v0, %v3680_v14  ;;  %9632 = vmatmul.mubr.msk.f32.vlgmr.msra.gmra.mxu0 %vm440_vm2, %v9631_v13 }
 0x22a   : > { %5678 = vrot.lane.b32.xlu0 %v9937_v20, %s9785_s26  ;;  %5680 = vrot.lane.b32.xlu1 %v9942_v24, %s9785_s26  ;;  %s9792_s26 = smov 44  }
 0x22b   : > { %3812 = vmatprep.subr.mxu1 %v3695_v18  ;;  %3917 = vmatprep.mubr.f32.mxu0 %v9769_v5 }
 0x22c   : > { %3813 = vmatpush1.msra.mxu1 %v3694_v25  ;;  %v3684_v26 = vpop.permute.xlu0 %3683  ;;  %v3686_v27 = vpop.permute.xlu1 %3685 }
 0x22d   : > { %v3697_v28 = vsel %vm3691_vm12, %v3684_v26, %v3686_v27  ;;  %v3696_v29 = vsel %vm3691_vm12, %v3682_v17, %v3684_v26  ;;  %9633 = vmatmul.mubr.msk.f32.vlgmr.msra.gmra.mxu1 %vm440_vm2, %v9631_v13 }
 0x22e   : > { %5998 = vrot.lane.b32.xlu0 %v9909_v6, %s9786_s30  ;;  %6000 = vrot.lane.b32.xlu1 %v9912_v8, %s9786_s30 }
 0x22f   : > { %3883 = vmatprep.subr.mxu0 %v3697_v28  ;;  %3988 = vmatprep.mubr.f32.mxu1 %v9769_v5 }
 0x230   : > { %3884 = vmatpush1.msra.mxu0 %v3696_v29  ;;  %v3688_v30 = vpop.permute.xlu0 %3687  ;;  %v3690_v31 = vpop.permute.xlu1 %3689 }
 0x231   : > { %v3699_v34 = vsel %vm3691_vm12, %v3688_v30, %v3690_v31  ;;  %v3698_v35 = vsel %vm3691_vm12, %v3686_v27, %v3688_v30  ;;  %9634 = vmatmul.mubr.msk.f32.vlgmr.msra.gmra.mxu0 %vm440_vm2, %v9631_v13  ;;  %vm9003_vm12 = vcmask 277504  }
 0x232   : > { %5996 = vrot.lane.b32.xlu0 %v9918_v11, %s9786_s30  ;;  %6002 = vrot.lane.b32.xlu1 %v9921_v12, %s9786_s30 }
 0x233   : > { %3954 = vmatprep.subr.mxu1 %v3699_v34  ;;  %4107 = vmatprep.mubr.f32.mxu0 %v9769_v5 }
 0x234   : > { %3955 = vmatpush1.msra.mxu1 %v3698_v35  ;;  %v4008_v36 = vpop.permute.xlu0 %4007  ;;  %v4010_v37 = vpop.permute.xlu1 %4009 }
 0x235   : > { %v4025_v38 = vsel %vm4023_vm13, %v4008_v36, %v4010_v37  ;;  %9635 = vmatmul.mubr.msk.f32.vlgmr.msra.gmra.mxu1 %vm440_vm2, %v9631_v13 }
 0x236   : > { %6004 = vrot.lane.b32.xlu0 %v9926_v15, %s9786_s30  ;;  %6006 = vrot.lane.b32.xlu1 %v9929_v16, %s9786_s30 }
 0x237   : > { %4073 = vmatprep.subr.mxu0 %v4025_v38  ;;  %4178 = vmatprep.mubr.f32.mxu1 %v9769_v5 }
 0x238   : > { %v4006_v11 = vpop.permute.xlu0 %4005  ;;  %v4012_v39 = vpop.permute.xlu1 %4011 }
 0x239   : > { %v4024_v40 = vsel %vm4023_vm13, %v4006_v11, %v4008_v36  ;;  %v4026_v45 = vsel %vm4023_vm13, %v4010_v37, %v4012_v39 }
 0x23a   : > { %6008 = vrot.lane.b32.xlu0 %v9934_v19, %s9786_s30  ;;  %6010 = vrot.lane.b32.xlu1 %v9937_v20, %s9786_s30 }
 0x23b   : > { %4074 = vmatpush1.msra.mxu0 %v4024_v40 }
 0x23c   : > { %v4014_v42 = vpop.permute.xlu0 %4013  ;;  %v4016_v43 = vpop.permute.xlu1 %4015  ;;  %9637 = vmatmul.mubr.msk.f32.vlgmr.msra.gmra.mxu0 %vm440_vm2, %v9636_v41 }
 0x23d   : > { %v4027_v44 = vsel %vm4023_vm13, %v4012_v39, %v4014_v42  ;;  %4249 = vmatprep.mubr.f32.mxu0 %v9769_v5  ;;  %v4028_v50 = vsel %vm4023_vm13, %v4014_v42, %v4016_v43  ;;  %v10462_v39 = vld [vmem:[%s11351_s1 + $0x68] sm:$0xff] }
 0x23e   : > { %6012 = vrot.lane.b32.xlu0 %v9942_v24, %s9786_s30  ;;  %6331 = vrot.lane.b32.xlu1 %v9912_v8, %s9787_s9  ;;  %s9793_s30 = smov 36  }
 0x23f   : > { %4144 = vmatprep.subr.mxu1 %v4027_v44 }
 0x240   : > { %4145 = vmatpush1.msra.mxu1 %v4026_v45  ;;  %v4018_v46 = vpop.permute.xlu0 %4017  ;;  %v4020_v48 = vpop.permute.xlu1 %4019 }
 0x241   : > { %v4029_v49 = vsel %vm4023_vm13, %v4016_v43, %v4018_v46  ;;  %9638 = vmatmul.mubr.msk.f32.vlgmr.msra.gmra.mxu1 %vm440_vm2, %v9636_v41  ;;  %v4030_v54 = vsel %vm4023_vm13, %v4018_v46, %v4020_v48 }
 0x242   : > { %6333 = vrot.lane.b32.xlu0 %v9921_v12, %s9787_s9  ;;  %6329 = vrot.lane.b32.xlu1 %v9909_v6, %s9787_s9 }
 0x243   : > { %4215 = vmatprep.subr.mxu0 %v4029_v49  ;;  %4320 = vmatprep.mubr.f32.mxu1 %v9769_v5 }
 0x244   : > { %4216 = vmatpush1.msra.mxu0 %v4028_v50  ;;  %v4022_v51 = vpop.permute.xlu0 %4021  ;;  %v4340_v52 = vpop.permute.xlu1 %4339 }
 0x245   : > { %v4031_v53 = vsel %vm4023_vm13, %v4020_v48, %v4022_v51  ;;  %9639 = vmatmul.mubr.msk.f32.vlgmr.msra.gmra.mxu0 %vm440_vm2, %v9636_v41  ;;  %v510_v26 = vpop.f32.mrf.mxu0 }
 0x246   : > { %6335 = vrot.lane.b32.xlu0 %v9926_v15, %s9787_s9  ;;  %6337 = vrot.lane.b32.xlu1 %v9929_v16, %s9787_s9 }
 0x247   : > { %4286 = vmatprep.subr.mxu1 %v4031_v53  ;;  %4439 = vmatprep.mubr.f32.mxu0 %v9769_v5  ;;  %v512_v27 = vpop.f32.mrf.mxu0 }
 0x248   : > { %4287 = vmatpush1.msra.mxu1 %v4030_v54  ;;  %v4342_v56 = vpop.permute.xlu0 %4341  ;;  %v4338_v57 = vpop.permute.xlu1 %4337 }
 0x249   : > { %v4356_v58 = vsel %vm4355_vm14, %v4338_v57, %v4340_v52  ;;  %v4357_v59 = vsel %vm4355_vm14, %v4340_v52, %v4342_v56  ;;  %9640 = vmatmul.mubr.msk.f32.vlgmr.msra.gmra.mxu1 %vm440_vm2, %v9636_v41 }
 0x24a   : > { %6339 = vrot.lane.b32.xlu0 %v9934_v19, %s9787_s9  ;;  %6341 = vrot.lane.b32.xlu1 %v9937_v20, %s9787_s9  ;;  %v581_v31 = vpop.f32.mrf.mxu1 }
 0x24b   : > { %4405 = vmatprep.subr.mxu0 %v4357_v59  ;;  %4510 = vmatprep.mubr.f32.mxu1 %v9769_v5 }
 0x24c   : > { %4406 = vmatpush1.msra.mxu0 %v4356_v58  ;;  %v4344_v61 = vpop.permute.xlu0 %4343  ;;  %v4346_v62 = vpop.permute.xlu1 %4345 }
 0x24d   : > { %v4359_v63 = vsel %vm4355_vm14, %v4344_v61, %v4346_v62  ;;  %v4358_v0 = vsel %vm4355_vm14, %v4342_v56, %v4344_v61  ;;  %9642 = vmatmul.mubr.msk.f32.vlgmr.msra.gmra.mxu0 %vm440_vm2, %v9641_v60  ;;  %v583_v35 = vpop.f32.mrf.mxu1 }
 0x24e   : > { %6343 = vrot.lane.b32.xlu0 %v9942_v24, %s9787_s9  ;;  %6345 = vrot.lane.b32.xlu1 %v9769_v5, %s9787_s9  ;;  %v652_v34 = vpop.f32.mrf.mxu0  ;;  %s9794_s9 = smov 35  }
 0x24f   : > { %4476 = vmatprep.subr.mxu1 %v4359_v63  ;;  %4581 = vmatprep.mubr.f32.mxu0 %v9769_v5 }
 0x250   : > { %4477 = vmatpush1.msra.mxu1 %v4358_v0  ;;  %v4348_v2 = vpop.permute.xlu0 %4347  ;;  %v4350_v3 = vpop.permute.xlu1 %4349 }
 0x251   : > { %v4361_v10 = vsel %vm4355_vm14, %v4348_v2, %v4350_v3  ;;  %v4360_v13 = vsel %vm4355_vm14, %v4346_v62, %v4348_v2  ;;  %9643 = vmatmul.mubr.msk.f32.vlgmr.msra.gmra.mxu1 %vm440_vm2, %v9641_v60  ;;  %v654_v36 = vpop.f32.mrf.mxu0 }
 0x252   : > { %6663 = vrot.lane.b32.xlu0 %v9912_v8, %s9788_s12  ;;  %6665 = vrot.lane.b32.xlu1 %v9921_v12, %s9788_s12  ;;  %v723_v40 = vpop.f32.mrf.mxu1 }
 0x253   : > { %4547 = vmatprep.subr.mxu0 %v4361_v10  ;;  %4652 = vmatprep.mubr.f32.mxu1 %v9769_v5  ;;  %v797_v41 = vpop.f32.mrf.mxu0 }
 0x254   : > { %4548 = vmatpush1.msra.mxu0 %v4360_v13  ;;  %v4352_v14 = vpop.permute.xlu0 %4351  ;;  %v4354_v17 = vpop.permute.xlu1 %4353  ;;  %v798_v42 = vadd.f32 %v797_v41, %v510_v26 }
 0x255   : > { %v4363_v18 = vsel %vm4355_vm14, %v4352_v14, %v4354_v17  ;;  %v4362_v25 = vsel %vm4355_vm14, %v4350_v3, %v4352_v14  ;;  %9644 = vmatmul.mubr.msk.f32.vlgmr.msra.gmra.mxu0 %vm440_vm2, %v9641_v60  ;;  %v725_v43 = vpop.f32.mrf.mxu1  ;;  %v799_v44 = vpop.f32.mrf.mxu0 }
 0x256   : > { %6661 = vrot.lane.b32.xlu0 %v9909_v6, %s9788_s12  ;;  %6667 = vrot.lane.b32.xlu1 %v9926_v15, %s9788_s12  ;;  %v800_v49 = vadd.f32 %v799_v44, %v512_v27 }
 0x257   : > { %4618 = vmatprep.subr.mxu1 %v4363_v18  ;;  %4771 = vmatprep.mubr.f32.mxu0 %v9769_v5 }
 0x258   : > { %4619 = vmatpush1.msra.mxu1 %v4362_v25  ;;  %v4672_v28 = vpop.permute.xlu0 %4671  ;;  %v4674_v29 = vpop.permute.xlu1 %4673 }
 0x259   : > { %v4689_v30 = vsel %vm4687_vm15, %v4672_v28, %v4674_v29  ;;  %9645 = vmatmul.mubr.msk.f32.vlgmr.msra.gmra.mxu1 %vm440_vm2, %v9641_v60  ;;  %v868_v50 = vpop.f32.mrf.mxu1  ;;  %v939_v51 = vpop.f32.mrf.mxu0 }
 0x25a   : > { %6669 = vrot.lane.b32.xlu0 %v9929_v16, %s9788_s12  ;;  %6671 = vrot.lane.b32.xlu1 %v9934_v19, %s9788_s12  ;;  %v869_v52 = vadd.f32 %v868_v50, %v581_v31  ;;  %v940_v53 = vadd.f32 %v939_v51, %v652_v34 }
 0x25b   : > { %4737 = vmatprep.subr.mxu0 %v4689_v30  ;;  %4842 = vmatprep.mubr.f32.mxu1 %v9769_v5  ;;  %v870_v56 = vpop.f32.mrf.mxu1  ;;  %v941_v57 = vpop.f32.mrf.mxu0 }
 0x25c   : > { %v4670_v37 = vpop.permute.xlu0 %4669  ;;  %v4676_v38 = vpop.permute.xlu1 %4675  ;;  %v871_v61 = vadd.f32 %v870_v56, %v583_v35  ;;  %v942_v62 = vadd.f32 %v941_v57, %v654_v36 }
 0x25d   : > { %v4688_v11 = vsel %vm4687_vm15, %v4670_v37, %v4672_v28  ;;  %v4690_v54 = vsel %vm4687_vm15, %v4674_v29, %v4676_v38  ;;  %v1010_v63 = vpop.f32.mrf.mxu1 }
 0x25e   : > { %6673 = vrot.lane.b32.xlu0 %v9937_v20, %s9788_s12  ;;  %6675 = vrot.lane.b32.xlu1 %v9942_v24, %s9788_s12  ;;  %v1011_v2 = vadd.f32 %v1010_v63, %v723_v40 }
 0x25f   : > { %4738 = vmatpush1.msra.mxu0 %v4688_v11  ;;  %v1121_v0 = vpop.f32.mrf.mxu0  ;;  %v1012_v13 = vpop.f32.mrf.mxu1 }
 0x260   : > { %v4678_v45 = vpop.permute.xlu0 %4677  ;;  %v4680_v46 = vpop.permute.xlu1 %4679  ;;  %9647 = vmatmul.mubr.msk.f32.vlgmr.msra.gmra.mxu0 %vm440_vm2, %v10462_v39  ;;  %v1339_v3 = vadd.f32 %v1121_v0, %v798_v42  ;;  %v1013_v25 = vadd.f32 %v1012_v13, %v725_v43 }
 0x261   : > { %v4691_v48 = vsel %vm4687_vm15, %v4676_v38, %v4678_v45  ;;  %4913 = vmatprep.mubr.f32.mxu0 %v9769_v5  ;;  %v4692_v10 = vsel %vm4687_vm15, %v4678_v45, %v4680_v46  ;;  %v1123_v14 = vpop.f32.mrf.mxu0  ;;  %v1192_v28 = vpop.f32.mrf.mxu1  ;;  %v9651_v45 = vld [vmem:[%s11351_s1 + $0x70] sm:$0xff] }
 0x262   : > { %6677 = vrot.lane.b32.xlu0 %v9769_v5, %s9788_s12  ;;  %6995 = vrot.lane.b32.xlu1 %v9912_v8, %s9789_s15  ;;  %v1340_v26 = vadd.f32 %v1123_v14, %v800_v49  ;;  %v1341_v30 = vadd.f32 %v1192_v28, %v869_v52  ;;  %s9795_s12 = smov 34  }
 0x263   : > { %4808 = vmatprep.subr.mxu1 %v4691_v48  ;;  %v1194_v35 = vpop.f32.mrf.mxu1 }
 0x264   : > { %4809 = vmatpush1.msra.mxu1 %v4690_v54  ;;  %v4682_v58 = vpop.permute.xlu0 %4681  ;;  %v4684_v59 = vpop.permute.xlu1 %4683  ;;  %v1342_v41 = vadd.f32 %v1194_v35, %v871_v61 }
 0x265   : > { %v4693_v60 = vsel %vm4687_vm15, %v4680_v46, %v4682_v58  ;;  %9648 = vmatmul.mubr.msk.f32.vlgmr.msra.gmra.mxu1 %vm440_vm2, %v10462_v39  ;;  %v1263_v29 = vpop.f32.mrf.mxu0  ;;  %v4694_v34 = vsel %vm4687_vm15, %v4682_v58, %v4684_v59  ;;  %v1334_v43 = vpop.f32.mrf.mxu1 }
 0x266   : > { %6997 = vrot.lane.b32.xlu0 %v9921_v12, %s9789_s15  ;;  %6993 = vrot.lane.b32.xlu1 %v9909_v6, %s9789_s15  ;;  %v1343_v31 = vadd.f32 %v1263_v29, %v940_v53  ;;  %v1345_v46 = vadd.f32 %v1334_v43, %v1011_v2 }
 0x267   : > { %4879 = vmatprep.subr.mxu0 %v4693_v60  ;;  %4984 = vmatprep.mubr.f32.mxu1 %v9769_v5  ;;  %v1265_v36 = vpop.f32.mrf.mxu0 }
 0x268   : > { %4880 = vmatpush1.msra.mxu0 %v4692_v10  ;;  %v4686_v17 = vpop.permute.xlu0 %4685  ;;  %v5004_v18 = vpop.permute.xlu1 %5003  ;;  %v1344_v42 = vadd.f32 %v1265_v36, %v942_v62 }
 0x269   : > { %v4695_v27 = vsel %vm4687_vm15, %v4684_v59, %v4686_v17  ;;  %9649 = vmatmul.mubr.msk.f32.vlgmr.msra.gmra.mxu0 %vm440_vm2, %v10462_v39  ;;  %v1453_v44 = vpop.f32.mrf.mxu0 }
 0x26a   : > { %6999 = vrot.lane.b32.xlu0 %v9926_v15, %s9789_s15  ;;  %7001 = vrot.lane.b32.xlu1 %v9929_v16, %s9789_s15  ;;  %v1671_v48 = vadd.f32 %v1453_v44, %v1339_v3 }
 0x26b   : > { %4950 = vmatprep.subr.mxu1 %v4695_v27  ;;  %5103 = vmatprep.mubr.f32.mxu0 %v9769_v5  ;;  %v1455_v49 = vpop.f32.mrf.mxu0 }
 0x26c   : > { %4951 = vmatpush1.msra.mxu1 %v4694_v34  ;;  %v5006_v37 = vpop.permute.xlu0 %5005  ;;  %v5002_v38 = vpop.permute.xlu1 %5001  ;;  %v1672_v56 = vadd.f32 %v1455_v49, %v1340_v26 }
 0x26d   : > { %v5020_v11 = vsel %vm5019_vm0, %v5002_v38, %v5004_v18  ;;  %v5021_v40 = vsel %vm5019_vm0, %v5004_v18, %v5006_v37  ;;  %9650 = vmatmul.mubr.msk.f32.vlgmr.msra.gmra.mxu1 %vm440_vm2, %v10462_v39  ;;  %v1336_v39 = vpop.f32.mrf.mxu1 }
 0x26e   : > { %7003 = vrot.lane.b32.xlu0 %v9934_v19, %s9789_s15  ;;  %7005 = vrot.lane.b32.xlu1 %v9937_v20, %s9789_s15  ;;  %v1346_v54 = vadd.f32 %v1336_v39, %v1013_v25 }
 0x26f   : > { %5069 = vmatprep.subr.mxu0 %v5021_v40  ;;  %5174 = vmatprep.mubr.f32.mxu1 %v9769_v5  ;;  %v1524_v57 = vpop.f32.mrf.mxu1 }
 0x270   : > { %5070 = vmatpush1.msra.mxu0 %v5020_v11  ;;  %v5008_v50 = vpop.permute.xlu0 %5007  ;;  %v5010_v51 = vpop.permute.xlu1 %5009  ;;  %v1673_v59 = vadd.f32 %v1524_v57, %v1341_v30 }
 0x271   : > { %v5023_v52 = vsel %vm5019_vm0, %v5008_v50, %v5010_v51  ;;  %v5022_v53 = vsel %vm5019_vm0, %v5006_v37, %v5008_v50  ;;  %9652 = vmatmul.mubr.msk.f32.vlgmr.msra.gmra.mxu0 %vm440_vm2, %v9651_v45  ;;  %v1595_v58 = vpop.f32.mrf.mxu0  ;;  %v1526_v61 = vpop.f32.mrf.mxu1 }
 0x272   : > { %7007 = vrot.lane.b32.xlu0 %v9942_v24, %s9789_s15  ;;  %7009 = vrot.lane.b32.xlu1 %v9769_v5, %s9789_s15  ;;  %v1675_v60 = vadd.f32 %v1595_v58, %v1343_v31  ;;  %v1674_v10 = vadd.f32 %v1526_v61, %v1342_v41 }
 0x273   : > { %5140 = vmatprep.subr.mxu1 %v5023_v52  ;;  %5245 = vmatprep.mubr.f32.mxu0 %v9769_v5  ;;  %v1597_v62 = vpop.f32.mrf.mxu0 }
 0x274   : > { %5141 = vmatpush1.msra.mxu1 %v5022_v53  ;;  %v5012_v63 = vpop.permute.xlu0 %5011  ;;  %v5014_v0 = vpop.permute.xlu1 %5013  ;;  %v1676_v13 = vadd.f32 %v1597_v62, %v1344_v42 }
 0x275   : > { %v5025_v2 = vsel %vm5019_vm0, %v5012_v63, %v5014_v0  ;;  %v5024_v3 = vsel %vm5019_vm0, %v5010_v51, %v5012_v63  ;;  %9653 = vmatmul.mubr.msk.f32.vlgmr.msra.gmra.mxu1 %vm440_vm2, %v9651_v45  ;;  %v1666_v14 = vpop.f32.mrf.mxu1 }
 0x276   : > { %7327 = vrot.lane.b32.xlu0 %v9912_v8, %s9790_s18  ;;  %7329 = vrot.lane.b32.xlu1 %v9921_v12, %s9790_s18  ;;  %v1677_v17 = vadd.f32 %v1666_v14, %v1345_v46 }
 0x277   : > { %5211 = vmatprep.subr.mxu0 %v5025_v2  ;;  %5316 = vmatprep.mubr.f32.mxu1 %v9769_v5  ;;  %v1668_v18 = vpop.f32.mrf.mxu1 }
 0x278   : > { %5212 = vmatpush1.msra.mxu0 %v5024_v3  ;;  %v5016_v25 = vpop.permute.xlu0 %5015  ;;  %v5018_v26 = vpop.permute.xlu1 %5017  ;;  %v1678_v27 = vadd.f32 %v1668_v18, %v1346_v54 }
 0x279   : > { %v5027_v28 = vsel %vm5019_vm0, %v5016_v25, %v5018_v26  ;;  %v5026_v29 = vsel %vm5019_vm0, %v5014_v0, %v5016_v25  ;;  %9654 = vmatmul.mubr.msk.f32.vlgmr.msra.gmra.mxu0 %vm440_vm2, %v9651_v45  ;;  %v1785_v30 = vpop.f32.mrf.mxu0 }
 0x27a   : > { %7325 = vrot.lane.b32.xlu0 %v9909_v6, %s9790_s18  ;;  %7331 = vrot.lane.b32.xlu1 %v9926_v15, %s9790_s18  ;;  %v2003_v31 = vadd.f32 %v1785_v30, %v1671_v48  ;;  %v9661_v30 = vld [vmem:[%s11351_s1 + $0x80] sm:$0xff] }
 0x27b   : > { %5282 = vmatprep.subr.mxu1 %v5027_v28  ;;  %5434 = vmatprep.mubr.f32.mxu0 %v9769_v5  ;;  %v1787_v34 = vpop.f32.mrf.mxu0 }
 0x27c   : > { %5283 = vmatpush1.msra.mxu1 %v5026_v29  ;;  %v5336_v35 = vpop.permute.xlu0 %5335  ;;  %v5338_v36 = vpop.permute.xlu1 %5337  ;;  %v10531_v37 = vadd.f32 %v1787_v34, %v1672_v56 }
 0x27d   : > { %v5352_v38 = vsel %vm440_vm2, %v5336_v35, %v5338_v36  ;;  %9655 = vmatmul.mubr.msk.f32.vlgmr.msra.gmra.mxu1 %vm440_vm2, %v9651_v45  ;;  %v1856_v11 = vpop.f32.mrf.mxu1  ;;  %v9656_v45 = vld [vmem:[%s11351_s1 + $0x78] sm:$0xff] }
 0x27e   : > { %7333 = vrot.lane.b32.xlu0 %v9929_v16, %s9790_s18  ;;  %7335 = vrot.lane.b32.xlu1 %v9934_v19, %s9790_s18  ;;  %v10539_v40 = vadd.f32 %v1856_v11, %v1673_v59 }
 0x27f   : > { %5400 = vmatprep.subr.mxu0 %v5352_v38  ;;  %5505 = vmatprep.mubr.f32.mxu1 %v9769_v5  ;;  %v1858_v41 = vpop.f32.mrf.mxu1 }
 0x280   : > { %v5334_v42 = vpop.permute.xlu0 %5333  ;;  %v5340_v43 = vpop.permute.xlu1 %5339  ;;  %v10542_v44 = vadd.f32 %v1858_v41, %v1674_v10 }
 0x281   : > { %v5351_v46 = vsel %vm440_vm2, %v5334_v42, %v5336_v35  ;;  %v1927_v48 = vpop.f32.mrf.mxu0  ;;  %v5353_v57 = vsel %vm440_vm2, %v5338_v36, %v5340_v43 }
 0x282   : > { %7337 = vrot.lane.b32.xlu0 %v9937_v20, %s9790_s18  ;;  %7339 = vrot.lane.b32.xlu1 %v9942_v24, %s9790_s18  ;;  %v10552_v39 = vadd.f32 %v1927_v48, %v1675_v60 }
 0x283   : > { %5401 = vmatpush1.msra.mxu0 %v5351_v46  ;;  %v1929_v49 = vpop.f32.mrf.mxu0 }
 0x284   : > { %v5342_v50 = vpop.permute.xlu0 %5341  ;;  %v5344_v51 = vpop.permute.xlu1 %5343  ;;  %9657 = vmatmul.mubr.msk.f32.vlgmr.msra.gmra.mxu0 %vm440_vm2, %v9656_v45  ;;  %v10555_v52 = vadd.f32 %v1929_v49, %v1676_v13 }
 0x285   : > { %v5354_v53 = vsel %vm440_vm2, %v5340_v43, %v5342_v50  ;;  %5576 = vmatprep.mubr.f32.mxu0 %v9769_v5  ;;  %v1998_v54 = vpop.f32.mrf.mxu1  ;;  %v5355_v63 = vsel %vm440_vm2, %v5342_v50, %v5344_v51 }
 0x286   : > { %7341 = vrot.lane.b32.xlu0 %v9769_v5, %s9790_s18  ;;  %7659 = vrot.lane.b32.xlu1 %v9912_v8, %s9791_s23  ;;  %v10563_v56 = vadd.f32 %v1998_v54, %v1677_v17 }
 0x287   : > { %5471 = vmatprep.subr.mxu1 %v5354_v53  ;;  %v2000_v58 = vpop.f32.mrf.mxu1 }
 0x288   : > { %5472 = vmatpush1.msra.mxu1 %v5353_v57  ;;  %v5346_v59 = vpop.permute.xlu0 %5345  ;;  %v5348_v60 = vpop.permute.xlu1 %5347  ;;  %v10566_v61 = vadd.f32 %v2000_v58, %v1678_v27 }
 0x289   : > { %v5356_v62 = vsel %vm440_vm2, %v5344_v51, %v5346_v59  ;;  %9658 = vmatmul.mubr.msk.f32.vlgmr.msra.gmra.mxu1 %vm440_vm2, %v9656_v45  ;;  %v5357_v14 = vsel %vm440_vm2, %v5346_v59, %v5348_v60 }
 0x28a   : > { %7661 = vrot.lane.b32.xlu0 %v9921_v12, %s9791_s23  ;;  %7657 = vrot.lane.b32.xlu1 %v9909_v6, %s9791_s23 }
 0x28b   : > { %5542 = vmatprep.subr.mxu0 %v5356_v62  ;;  %5647 = vmatprep.mubr.f32.mxu1 %v9769_v5 }
 0x28c   : > { %5543 = vmatpush1.msra.mxu0 %v5355_v63  ;;  %v5350_v0 = vpop.permute.xlu0 %5349  ;;  %v5667_v2 = vpop.permute.xlu1 %5666 }
 0x28d   : > { %v5358_v3 = vsel %vm440_vm2, %v5348_v60, %v5350_v0  ;;  %9659 = vmatmul.mubr.msk.f32.vlgmr.msra.gmra.mxu0 %vm440_vm2, %v9656_v45  ;;  %v2117_v10 = vpop.f32.mrf.mxu0 }
 0x28e   : > { %7663 = vrot.lane.b32.xlu0 %v9926_v15, %s9791_s23  ;;  %7665 = vrot.lane.b32.xlu1 %v9929_v16, %s9791_s23  ;;  %v2335_v13 = vadd.f32 %v2117_v10, %v2003_v31 }
 0x28f   : > { %5613 = vmatprep.subr.mxu1 %v5358_v3  ;;  %5766 = vmatprep.mubr.f32.mxu0 %v9769_v5  ;;  %v2119_v17 = vpop.f32.mrf.mxu0 }
 0x290   : > { %5614 = vmatpush1.msra.mxu1 %v5357_v14  ;;  %v5669_v18 = vpop.permute.xlu0 %5668  ;;  %v5665_v25 = vpop.permute.xlu1 %5664  ;;  %v2336_v26 = vadd.f32 %v2119_v17, %v10531_v37 }
 0x291   : > { %v5683_v27 = vsel %vm5682_vm1, %v5665_v25, %v5667_v2  ;;  %v5684_v28 = vsel %vm5682_vm1, %v5667_v2, %v5669_v18  ;;  %9660 = vmatmul.mubr.msk.f32.vlgmr.msra.gmra.mxu1 %vm440_vm2, %v9656_v45  ;;  %v2188_v29 = vpop.f32.mrf.mxu1 }
 0x292   : > { %7667 = vrot.lane.b32.xlu0 %v9934_v19, %s9791_s23  ;;  %7669 = vrot.lane.b32.xlu1 %v9937_v20, %s9791_s23  ;;  %v2337_v31 = vadd.f32 %v2188_v29, %v10539_v40 }
 0x293   : > { %5732 = vmatprep.subr.mxu0 %v5684_v28  ;;  %5837 = vmatprep.mubr.f32.mxu1 %v9769_v5  ;;  %v2190_v34 = vpop.f32.mrf.mxu1 }
 0x294   : > { %5733 = vmatpush1.msra.mxu0 %v5683_v27  ;;  %v5671_v35 = vpop.permute.xlu0 %5670  ;;  %v5673_v36 = vpop.permute.xlu1 %5672  ;;  %v2338_v37 = vadd.f32 %v2190_v34, %v10542_v44 }
 0x295   : > { %v5686_v38 = vsel %vm5682_vm1, %v5671_v35, %v5673_v36  ;;  %9662 = vmatmul.mubr.msk.f32.vlgmr.msra.gmra.mxu0 %vm440_vm2, %v9661_v30  ;;  %v5685_v11 = vsel %vm5682_vm1, %v5669_v18, %v5671_v35  ;;  %v2259_v41 = vpop.f32.mrf.mxu0  ;;  %v9666_v18 = vld [vmem:[%s11351_s1 + $0x88] sm:$0xff] }
 0x296   : > { %7671 = vrot.lane.b32.xlu0 %v9942_v24, %s9791_s23  ;;  %7673 = vrot.lane.b32.xlu1 %v9769_v5, %s9791_s23  ;;  %v2339_v40 = vadd.f32 %v2259_v41, %v10552_v39 }
 0x297   : > { %5803 = vmatprep.subr.mxu1 %v5686_v38  ;;  %5908 = vmatprep.mubr.f32.mxu0 %v9769_v5  ;;  %v2261_v42 = vpop.f32.mrf.mxu0 }
 0x298   : > { %5804 = vmatpush1.msra.mxu1 %v5685_v11  ;;  %v5675_v43 = vpop.permute.xlu0 %5674  ;;  %v5677_v44 = vpop.permute.xlu1 %5676  ;;  %v2340_v46 = vadd.f32 %v2261_v42, %v10555_v52 }
 0x299   : > { %v5688_v45 = vsel %vm5682_vm1, %v5675_v43, %v5677_v44  ;;  %9663 = vmatmul.mubr.msk.f32.vlgmr.msra.gmra.mxu1 %vm440_vm2, %v9661_v30  ;;  %v5687_v48 = vsel %vm5682_vm1, %v5673_v36, %v5675_v43  ;;  %v2330_v49 = vpop.f32.mrf.mxu1 }
 0x29a   : > { %7991 = vrot.lane.b32.xlu0 %v9912_v8, %s9792_s26  ;;  %7993 = vrot.lane.b32.xlu1 %v9921_v12, %s9792_s26  ;;  %v2341_v39 = vadd.f32 %v2330_v49, %v10563_v56 }
 0x29b   : > { %5874 = vmatprep.subr.mxu0 %v5688_v45  ;;  %5979 = vmatprep.mubr.f32.mxu1 %v9769_v5  ;;  %v2332_v50 = vpop.f32.mrf.mxu1 }
 0x29c   : > { %5875 = vmatpush1.msra.mxu0 %v5687_v48  ;;  %v5679_v51 = vpop.permute.xlu0 %5678  ;;  %v5681_v52 = vpop.permute.xlu1 %5680  ;;  %v2342_v53 = vadd.f32 %v2332_v50, %v10566_v61 }
 0x29d   : > { %v5689_v54 = vsel %vm5682_vm1, %v5677_v44, %v5679_v51  ;;  %9664 = vmatmul.mubr.msk.f32.vlgmr.msra.gmra.mxu0 %vm440_vm2, %v9661_v30  ;;  %v5690_v57 = vsel %vm5682_vm1, %v5679_v51, %v5681_v52  ;;  %v2449_v58 = vpop.f32.mrf.mxu0 }
 0x29e   : > { %7989 = vrot.lane.b32.xlu0 %v9909_v6, %s9792_s26  ;;  %7995 = vrot.lane.b32.xlu1 %v9926_v15, %s9792_s26  ;;  %v2667_v56 = vadd.f32 %v2449_v58, %v2335_v13  ;;  %v9671_v58 = vld [vmem:[%s11351_s1 + $0x90] sm:$0xff] }
 0x29f   : > { %5945 = vmatprep.subr.mxu1 %v5690_v57  ;;  %6098 = vmatprep.mubr.f32.mxu0 %v9769_v5  ;;  %v2451_v59 = vpop.f32.mrf.mxu0 }
 0x2a0   : > { %5946 = vmatpush1.msra.mxu1 %v5689_v54  ;;  %v5999_v60 = vpop.permute.xlu0 %5998  ;;  %v6001_v61 = vpop.permute.xlu1 %6000  ;;  %v10626_v62 = vadd.f32 %v2451_v59, %v2336_v26 }
 0x2a1   : > { %9665 = vmatmul.mubr.msk.f32.vlgmr.msra.gmra.mxu1 %vm440_vm2, %v9661_v30  ;;  %v6016_v63 = vsel %vm6014_vm3, %v5999_v60, %v6001_v61  ;;  %v2520_v0 = vpop.f32.mrf.mxu1 }
 0x2a2   : > { %7997 = vrot.lane.b32.xlu0 %v9929_v16, %s9792_s26  ;;  %7999 = vrot.lane.b32.xlu1 %v9934_v19, %s9792_s26  ;;  %v10634_v2 = vadd.f32 %v2520_v0, %v2337_v31 }
 0x2a3   : > { %6064 = vmatprep.subr.mxu0 %v6016_v63  ;;  %6169 = vmatprep.mubr.f32.mxu1 %v9769_v5  ;;  %v2522_v3 = vpop.f32.mrf.mxu1 }
 0x2a4   : > { %v5997_v10 = vpop.permute.xlu0 %5996  ;;  %v6003_v13 = vpop.permute.xlu1 %6002  ;;  %v10637_v14 = vadd.f32 %v2522_v3, %v2338_v37 }
 0x2a5   : > { %v6015_v17 = vsel %vm6014_vm3, %v5997_v10, %v5999_v60  ;;  %v2591_v25 = vpop.f32.mrf.mxu0  ;;  %v6017_v36 = vsel %vm6014_vm3, %v6001_v61, %v6003_v13 }
 0x2a6   : > { %8001 = vrot.lane.b32.xlu0 %v9937_v20, %s9792_s26  ;;  %8003 = vrot.lane.b32.xlu1 %v9942_v24, %s9792_s26  ;;  %v10647_v26 = vadd.f32 %v2591_v25, %v2339_v40 }
 0x2a7   : > { %6065 = vmatpush1.msra.mxu0 %v6015_v17  ;;  %v2593_v27 = vpop.f32.mrf.mxu0 }
 0x2a8   : > { %9667 = vmatmul.mubr.msk.f32.vlgmr.msra.gmra.mxu0 %vm440_vm2, %v9666_v18  ;;  %v6005_v28 = vpop.permute.xlu0 %6004  ;;  %v6007_v29 = vpop.permute.xlu1 %6006  ;;  %v10650_v30 = vadd.f32 %v2593_v27, %v2340_v46 }
 0x2a9   : > { %v6018_v31 = vsel %vm6014_vm3, %v6003_v13, %v6005_v28  ;;  %6240 = vmatprep.mubr.f32.mxu0 %v9769_v5  ;;  %v2662_v34 = vpop.f32.mrf.mxu1  ;;  %v6019_v42 = vsel %vm6014_vm3, %v6005_v28, %v6007_v29 }
 0x2aa   : > { %8005 = vrot.lane.b32.xlu0 %v9769_v5, %s9792_s26  ;;  %8323 = vrot.lane.b32.xlu1 %v9912_v8, %s9793_s30  ;;  %v10658_v35 = vadd.f32 %v2662_v34, %v2341_v39 }
 0x2ab   : > { %6135 = vmatprep.subr.mxu1 %v6018_v31  ;;  %v2664_v37 = vpop.f32.mrf.mxu1 }
 0x2ac   : > { %6136 = vmatpush1.msra.mxu1 %v6017_v36  ;;  %v6009_v38 = vpop.permute.xlu0 %6008  ;;  %v6011_v11 = vpop.permute.xlu1 %6010  ;;  %v10661_v41 = vadd.f32 %v2664_v37, %v2342_v53 }
 0x2ad   : > { %9668 = vmatmul.mubr.msk.f32.vlgmr.msra.gmra.mxu1 %vm440_vm2, %v9666_v18  ;;  %v6020_v40 = vsel %vm6014_vm3, %v6007_v29, %v6009_v38  ;;  %v6021_v49 = vsel %vm6014_vm3, %v6009_v38, %v6011_v11 }
 0x2ae   : > { %8325 = vrot.lane.b32.xlu0 %v9921_v12, %s9793_s30  ;;  %8321 = vrot.lane.b32.xlu1 %v9909_v6, %s9793_s30 }
 0x2af   : > { %6206 = vmatprep.subr.mxu0 %v6020_v40  ;;  %6311 = vmatprep.mubr.f32.mxu1 %v9769_v5 }
 0x2b0   : > { %6207 = vmatpush1.msra.mxu0 %v6019_v42  ;;  %v6013_v43 = vpop.permute.xlu0 %6012  ;;  %v6332_v44 = vpop.permute.xlu1 %6331 }
 0x2b1   : > { %9669 = vmatmul.mubr.msk.f32.vlgmr.msra.gmra.mxu0 %vm440_vm2, %v9666_v18  ;;  %v6022_v46 = vsel %vm6014_vm3, %v6011_v11, %v6013_v43  ;;  %v2781_v45 = vpop.f32.mrf.mxu0 }
 0x2b2   : > { %8327 = vrot.lane.b32.xlu0 %v9926_v15, %s9793_s30  ;;  %8329 = vrot.lane.b32.xlu1 %v9929_v16, %s9793_s30  ;;  %v2999_v48 = vadd.f32 %v2781_v45, %v2667_v56 }
 0x2b3   : > { %6277 = vmatprep.subr.mxu1 %v6022_v46  ;;  %6431 = vmatprep.mubr.f32.mxu0 %v9769_v5  ;;  %v2783_v39 = vpop.f32.mrf.mxu0 }
 0x2b4   : > { %6278 = vmatpush1.msra.mxu1 %v6021_v49  ;;  %v6334_v50 = vpop.permute.xlu0 %6333  ;;  %v6330_v51 = vpop.permute.xlu1 %6329  ;;  %v3000_v52 = vadd.f32 %v2783_v39, %v10626_v62  ;;  %v9676_v49 = vld [vmem:[%s11351_s1 + $0x98] sm:$0xff] }
 0x2b5   : > { %9670 = vmatmul.mubr.msk.f32.vlgmr.msra.gmra.mxu1 %vm440_vm2, %v9666_v18  ;;  %v6348_v53 = vsel %vm6347_vm4, %v6330_v51, %v6332_v44  ;;  %v6349_v54 = vsel %vm6347_vm4, %v6332_v44, %v6334_v50  ;;  %v2852_v57 = vpop.f32.mrf.mxu1 }
 0x2b6   : > { %8331 = vrot.lane.b32.xlu0 %v9934_v19, %s9793_s30  ;;  %8333 = vrot.lane.b32.xlu1 %v9937_v20, %s9793_s30  ;;  %v3001_v56 = vadd.f32 %v2852_v57, %v10634_v2 }
 0x2b7   : > { %6397 = vmatprep.subr.mxu0 %v6349_v54  ;;  %6502 = vmatprep.mubr.f32.mxu1 %v9769_v5  ;;  %v2854_v59 = vpop.f32.mrf.mxu1 }
 0x2b8   : > { %6398 = vmatpush1.msra.mxu0 %v6348_v53  ;;  %v6336_v60 = vpop.permute.xlu0 %6335  ;;  %v6338_v61 = vpop.permute.xlu1 %6337  ;;  %v3002_v62 = vadd.f32 %v2854_v59, %v10637_v14 }
 0x2b9   : > { %v6350_v63 = vsel %vm6347_vm4, %v6334_v50, %v6336_v60  ;;  %9672 = vmatmul.mubr.msk.f32.vlgmr.msra.gmra.mxu0 %vm440_vm2, %v9671_v58  ;;  %v6351_v0 = vsel %vm6347_vm4, %v6336_v60, %v6338_v61  ;;  %v2923_v3 = vpop.f32.mrf.mxu0 }
 0x2ba   : > { %8335 = vrot.lane.b32.xlu0 %v9942_v24, %s9793_s30  ;;  %8337 = vrot.lane.b32.xlu1 %v9769_v5, %s9793_s30  ;;  %v10701_v2 = vadd.f32 %v2923_v3, %v10647_v26 }
 0x2bb   : > { %6468 = vmatprep.subr.mxu1 %v6351_v0  ;;  %6573 = vmatprep.mubr.f32.mxu0 %v9769_v5  ;;  %v2925_v10 = vpop.f32.mrf.mxu0 }
 0x2bc   : > { %6469 = vmatpush1.msra.mxu1 %v6350_v63  ;;  %v6340_v13 = vpop.permute.xlu0 %6339  ;;  %v6342_v14 = vpop.permute.xlu1 %6341  ;;  %v10705_v17 = vadd.f32 %v2925_v10, %v10650_v30 }
 0x2bd   : > { %v6352_v18 = vsel %vm6347_vm4, %v6338_v61, %v6340_v13  ;;  %9673 = vmatmul.mubr.msk.f32.vlgmr.msra.gmra.mxu1 %vm440_vm2, %v9671_v58  ;;  %v6353_v25 = vsel %vm6347_vm4, %v6340_v13, %v6342_v14  ;;  %v2994_v27 = vpop.f32.mrf.mxu1 }
 0x2be   : > { %8655 = vrot.lane.b32.xlu0 %v9912_v8, %s9794_s9  ;;  %8657 = vrot.lane.b32.xlu1 %v9921_v12, %s9794_s9  ;;  %v3005_v26 = vadd.f32 %v2994_v27, %v10658_v35 }
 0x2bf   : > { %6539 = vmatprep.subr.mxu0 %v6353_v25  ;;  %6644 = vmatprep.mubr.f32.mxu1 %v9769_v5  ;;  %v2996_v28 = vpop.f32.mrf.mxu1 }
 0x2c0   : > { %6540 = vmatpush1.msra.mxu0 %v6352_v18  ;;  %v6344_v29 = vpop.permute.xlu0 %6343  ;;  %v6346_v30 = vpop.permute.xlu1 %6345  ;;  %v10717_v31 = vadd.f32 %v2996_v28, %v10661_v41 }
 0x2c1   : > { %v6354_v34 = vsel %vm6347_vm4, %v6342_v14, %v6344_v29  ;;  %9674 = vmatmul.mubr.msk.f32.vlgmr.msra.gmra.mxu0 %vm440_vm2, %v9671_v58  ;;  %v6355_v36 = vsel %vm6347_vm4, %v6344_v29, %v6346_v30  ;;  %v3113_v37 = vpop.f32.mrf.mxu0 }
 0x2c2   : > { %8653 = vrot.lane.b32.xlu0 %v9909_v6, %s9794_s9  ;;  %8659 = vrot.lane.b32.xlu1 %v9926_v15, %s9794_s9  ;;  %v10726_v35 = vadd.f32 %v3113_v37, %v2999_v48 }
 0x2c3   : > { %6610 = vmatprep.subr.mxu1 %v6355_v36  ;;  %6763 = vmatprep.mubr.f32.mxu0 %v9769_v5  ;;  %v3115_v38 = vpop.f32.mrf.mxu0 }
 0x2c4   : > { %6611 = vmatpush1.msra.mxu1 %v6354_v34  ;;  %v6664_v11 = vpop.permute.xlu0 %6663  ;;  %v6666_v41 = vpop.permute.xlu1 %6665  ;;  %v10729_v40 = vadd.f32 %v3115_v38, %v3000_v52 }
 0x2c5   : > { %9675 = vmatmul.mubr.msk.f32.vlgmr.msra.gmra.mxu1 %vm440_vm2, %v9671_v58  ;;  %v6681_v42 = vsel %vm6679_vm5, %v6664_v11, %v6666_v41 }
 0x2c6   : > { %8661 = vrot.lane.b32.xlu0 %v9929_v16, %s9794_s9  ;;  %8663 = vrot.lane.b32.xlu1 %v9934_v19, %s9794_s9 }
 0x2c7   : > { %6729 = vmatprep.subr.mxu0 %v6681_v42  ;;  %6834 = vmatprep.mubr.f32.mxu1 %v9769_v5  ;;  %v3184_v43 = vpop.f32.mrf.mxu1 }
 0x2c8   : > { %v6662_v44 = vpop.permute.xlu0 %6661  ;;  %v6668_v46 = vpop.permute.xlu1 %6667  ;;  %v10738_v45 = vadd.f32 %v3184_v43, %v3001_v56 }
 0x2c9   : > { %v6680_v48 = vsel %vm6679_vm5, %v6662_v44, %v6664_v11  ;;  %v3186_v39 = vpop.f32.mrf.mxu1  ;;  %v6682_v58 = vsel %vm6679_vm5, %v6666_v41, %v6668_v46 }
 0x2ca   : > { %8665 = vrot.lane.b32.xlu0 %v9937_v20, %s9794_s9  ;;  %8667 = vrot.lane.b32.xlu1 %v9942_v24, %s9794_s9  ;;  %v10748_v50 = vadd.f32 %v3186_v39, %v3002_v62 }
 0x2cb   : > { %6730 = vmatpush1.msra.mxu0 %v6680_v48 }
 0x2cc   : > { %9677 = vmatmul.mubr.msk.f32.vlgmr.msra.gmra.mxu0 %vm440_vm2, %v9676_v49  ;;  %v6670_v51 = vpop.permute.xlu0 %6669  ;;  %v6672_v52 = vpop.permute.xlu1 %6671 }
 0x2cd   : > { %v6683_v53 = vsel %vm6679_vm5, %v6668_v46, %v6670_v51  ;;  %6905 = vmatprep.mubr.f32.mxu0 %v9769_v5  ;;  %v3255_v54 = vpop.f32.mrf.mxu0  ;;  %v6684_v0 = vsel %vm6679_vm5, %v6670_v51, %v6672_v52 }
 0x2ce   : > { %8669 = vrot.lane.b32.xlu0 %v9769_v5, %s9794_s9  ;;  %8987 = vrot.lane.b32.xlu1 %v9912_v8, %s9795_s12  ;;  %v10758_v57 = vadd.f32 %v3255_v54, %v10701_v2 }
 0x2cf   : > { %6800 = vmatprep.subr.mxu1 %v6683_v53  ;;  %v3257_v56 = vpop.f32.mrf.mxu0 }
 0x2d0   : > { %6801 = vmatpush1.msra.mxu1 %v6682_v58  ;;  %v6674_v59 = vpop.permute.xlu0 %6673  ;;  %v6676_v60 = vpop.permute.xlu1 %6675  ;;  %v10762_v61 = vadd.f32 %v3257_v56, %v10705_v17 }
 0x2d1   : > { %9678 = vmatmul.mubr.msk.f32.vlgmr.msra.gmra.mxu1 %vm440_vm2, %v9676_v49  ;;  %v6685_v62 = vsel %vm6679_vm5, %v6672_v52, %v6674_v59  ;;  %v3326_v63 = vpop.f32.mrf.mxu1 }
 0x2d2   : > { %8989 = vrot.lane.b32.xlu0 %v9921_v12, %s9795_s12  ;;  %8985 = vrot.lane.b32.xlu1 %v9909_v6, %s9795_s12  ;;  %v10770_v8 = vadd.f32 %v3326_v63, %v3005_v26  ;;  %v6686_v6 = vsel %vm6679_vm5, %v6674_v59, %v6676_v60 }
 0x2d3   : > { %6871 = vmatprep.subr.mxu0 %v6685_v62  ;;  %6976 = vmatprep.mubr.f32.mxu1 %v9769_v5  ;;  %v3328_v3 = vpop.f32.mrf.mxu1 }
 0x2d4   : > { %6872 = vmatpush1.msra.mxu0 %v6684_v0  ;;  %v6678_v2 = vpop.permute.xlu0 %6677  ;;  %v6996_v10 = vpop.permute.xlu1 %6995  ;;  %v10775_v13 = vadd.f32 %v3328_v3, %v10717_v31 }
 0x2d5   : > { %9679 = vmatmul.mubr.msk.f32.vlgmr.msra.gmra.mxu0 %vm440_vm2, %v9676_v49  ;;  %v6687_v12 = vsel %vm6679_vm5, %v6676_v60, %v6678_v2 }
 0x2d6   : > { %8991 = vrot.lane.b32.xlu0 %v9926_v15, %s9795_s12  ;;  %8993 = vrot.lane.b32.xlu1 %v9929_v16, %s9795_s12  ;;  %v9681_v15 = vld [vmem:[%s11351_s1 + $0xa0] sm:$0xff] }
 0x2d7   : > { %6942 = vmatprep.subr.mxu1 %v6687_v12  ;;  %7095 = vmatprep.mubr.f32.mxu0 %v9769_v5 }
 0x2d8   : > { %6943 = vmatpush1.msra.mxu1 %v6686_v6  ;;  %v6998_v14 = vpop.permute.xlu0 %6997  ;;  %v6994_v17 = vpop.permute.xlu1 %6993 }
 0x2d9   : > { %9680 = vmatmul.mubr.msk.f32.vlgmr.msra.gmra.mxu1 %vm440_vm2, %v9676_v49  ;;  %v7012_v18 = vsel %vm7011_vm6, %v6994_v17, %v6996_v10  ;;  %v7013_v25 = vsel %vm7011_vm6, %v6996_v10, %v6998_v14  ;;  %v3445_v27 = vpop.f32.mrf.mxu0 }
 0x2da   : > { %8995 = vrot.lane.b32.xlu0 %v9934_v19, %s9795_s12  ;;  %8997 = vrot.lane.b32.xlu1 %v9937_v20, %s9795_s12  ;;  %v3663_v16 = vadd.f32 %v3445_v27, %v10726_v35 }
 0x2db   : > { %7061 = vmatprep.subr.mxu0 %v7013_v25  ;;  %7166 = vmatprep.mubr.f32.mxu1 %v9769_v5  ;;  %v3447_v26 = vpop.f32.mrf.mxu0 }
 0x2dc   : > { %7062 = vmatpush1.msra.mxu0 %v7012_v18  ;;  %v7000_v28 = vpop.permute.xlu0 %6999  ;;  %v7002_v29 = vpop.permute.xlu1 %7001  ;;  %v3664_v30 = vadd.f32 %v3447_v26, %v10729_v40 }
 0x2dd   : > { %v7014_v19 = vsel %vm7011_vm6, %v6998_v14, %v7000_v28  ;;  %9682 = vmatmul.mubr.msk.f32.vlgmr.msra.gmra.mxu0 %vm440_vm2, %v9681_v15  ;;  %v7015_v20 = vsel %vm7011_vm6, %v7000_v28, %v7002_v29  ;;  %v3516_v31 = vpop.f32.mrf.mxu1 }
 0x2de   : > { %8999 = vrot.lane.b32.xlu0 %v9942_v24, %s9795_s12  ;;  %9001 = vrot.lane.b32.xlu1 %v9769_v5, %s9795_s12  ;;  %v3665_v34 = vadd.f32 %v3516_v31, %v10738_v45 }
 0x2df   : > { %7132 = vmatprep.subr.mxu1 %v7015_v20  ;;  %7237 = vmatprep.mubr.f32.mxu0 %v9769_v5  ;;  %v3518_v36 = vpop.f32.mrf.mxu1 }
 0x2e0   : > { %7133 = vmatpush1.msra.mxu1 %v7014_v19  ;;  %v7004_v37 = vpop.permute.xlu0 %7003  ;;  %v7006_v35 = vpop.permute.xlu1 %7005  ;;  %v3666_v38 = vadd.f32 %v3518_v36, %v10748_v50 }
 0x2e1   : > { %v7016_v11 = vsel %vm7011_vm6, %v7002_v29, %v7004_v37  ;;  %9683 = vmatmul.mubr.msk.f32.vlgmr.msra.gmra.mxu1 %vm440_vm2, %v9681_v15  ;;  %v7017_v24 = vsel %vm7011_vm6, %v7004_v37, %v7006_v35  ;;  %v3587_v41 = vpop.f32.mrf.mxu0 }
 0x2e2   : > { %7203 = vmatprep.subr.mxu0 %v7017_v24  ;;  %7308 = vmatprep.mubr.f32.mxu1 %v9769_v5  ;;  %v3667_v40 = vadd.f32 %v3587_v41, %v10758_v57  ;;  %v9691_v24 = vld [vmem:[%s11351_s1 + $0xb0] sm:$0xff] }
 0x2e3   : > { %7204 = vmatpush1.msra.mxu0 %v7016_v11  ;;  %v3589_v42 = vpop.f32.mrf.mxu0 }
 0x2e4   : > { %v7008_v43 = vpop.permute.xlu0 %7007  ;;  %9684 = vmatmul.mubr.msk.f32.vlgmr.msra.gmra.mxu0 %vm440_vm2, %v9681_v15  ;;  %v7010_v44 = vpop.permute.xlu1 %7009  ;;  %v3668_v46 = vadd.f32 %v3589_v42, %v10762_v61  ;;  %v9686_v61 = vld [vmem:[%s11351_s1 + $0xa8] sm:$0xff] }
 0x2e5   : > { %v7018_v45 = vsel %vm7011_vm6, %v7006_v35, %v7008_v43  ;;  %v7019_v48 = vsel %vm7011_vm6, %v7008_v43, %v7010_v44  ;;  %7427 = vmatprep.mubr.f32.mxu0 %v9769_v5  ;;  %v3658_v49 = vpop.f32.mrf.mxu1 }
 0x2e6   : > { %7274 = vmatprep.subr.mxu1 %v7019_v48  ;;  %v3669_v39 = vadd.f32 %v3658_v49, %v10770_v8 }
 0x2e7   : > { %7275 = vmatpush1.msra.mxu1 %v7018_v45  ;;  %v3660_v50 = vpop.f32.mrf.mxu1 }
 0x2e8   : > { %v7328_v51 = vpop.permute.xlu0 %7327  ;;  %9685 = vmatmul.mubr.msk.f32.vlgmr.msra.gmra.mxu1 %vm440_vm2, %v9681_v15  ;;  %v7330_v52 = vpop.permute.xlu1 %7329  ;;  %v3670_v53 = vadd.f32 %v3660_v50, %v10775_v13 }
 0x2e9   : > { %v7345_v54 = vsel %vm7343_vm7, %v7328_v51, %v7330_v52  ;;  %7498 = vmatprep.mubr.f32.mxu1 %v9769_v5  ;;  %v3777_v57 = vpop.f32.mrf.mxu0 }
 0x2ea   : > { %7393 = vmatprep.subr.mxu0 %v7345_v54  ;;  %v3995_v58 = vadd.f32 %v3777_v57, %v3663_v16 }
 0x2eb   : > { %v3779_v56 = vpop.f32.mrf.mxu0 }
 0x2ec   : > { %v7326_v59 = vpop.permute.xlu0 %7325  ;;  %v7332_v60 = vpop.permute.xlu1 %7331  ;;  %v3996_v62 = vadd.f32 %v3779_v56, %v3664_v30 }
 0x2ed   : > { %v7344_v63 = vsel %vm7343_vm7, %v7326_v59, %v7328_v51  ;;  %v3848_v8 = vpop.f32.mrf.mxu1  ;;  %v7346_v14 = vsel %vm7343_vm7, %v7330_v52, %v7332_v60 }
 0x2ee   : > { %7394 = vmatpush1.msra.mxu0 %v7344_v63  ;;  %v3997_v0 = vadd.f32 %v3848_v8, %v3665_v34 }
 0x2ef   : > { %9687 = vmatmul.mubr.msk.f32.vlgmr.msra.gmra.mxu0 %vm440_vm2, %v9686_v61  ;;  %v3850_v3 = vpop.f32.mrf.mxu1 }
 0x2f0   : > { %v7334_v2 = vpop.permute.xlu0 %7333  ;;  %v7336_v10 = vpop.permute.xlu1 %7335  ;;  %7569 = vmatprep.mubr.f32.mxu0 %v9769_v5  ;;  %v3998_v13 = vadd.f32 %v3850_v3, %v3666_v38 }
 0x2f1   : > { %v7347_v12 = vsel %vm7343_vm7, %v7332_v60, %v7334_v2  ;;  %v3919_v6 = vpop.f32.mrf.mxu0  ;;  %v7348_v28 = vsel %vm7343_vm7, %v7334_v2, %v7336_v10 }
 0x2f2   : > { %7464 = vmatprep.subr.mxu1 %v7347_v12  ;;  %v3999_v17 = vadd.f32 %v3919_v6, %v3667_v40 }
 0x2f3   : > { %7465 = vmatpush1.msra.mxu1 %v7346_v14  ;;  %v3921_v18 = vpop.f32.mrf.mxu0 }
 0x2f4   : > { %v7338_v25 = vpop.permute.xlu0 %7337  ;;  %9688 = vmatmul.mubr.msk.f32.vlgmr.msra.gmra.mxu1 %vm440_vm2, %v9686_v61  ;;  %v7340_v27 = vpop.permute.xlu1 %7339  ;;  %v4000_v15 = vadd.f32 %v3921_v18, %v3668_v46 }
 0x2f5   : > { %v7349_v16 = vsel %vm7343_vm7, %v7336_v10, %v7338_v25  ;;  %7640 = vmatprep.mubr.f32.mxu1 %v9769_v5  ;;  %v3990_v26 = vpop.f32.mrf.mxu1  ;;  %v7350_v36 = vsel %vm7343_vm7, %v7338_v25, %v7340_v27 }
 0x2f6   : > { %7535 = vmatprep.subr.mxu0 %v7349_v16  ;;  %v4001_v29 = vadd.f32 %v3990_v26, %v3669_v39 }
 0x2f7   : > { %7536 = vmatpush1.msra.mxu0 %v7348_v28  ;;  %v3992_v30 = vpop.f32.mrf.mxu1 }
 0x2f8   : > { %v7342_v19 = vpop.permute.xlu0 %7341  ;;  %9689 = vmatmul.mubr.msk.f32.vlgmr.msra.gmra.mxu0 %vm440_vm2, %v9686_v61  ;;  %v7660_v20 = vpop.permute.xlu1 %7659  ;;  %v4002_v31 = vadd.f32 %v3992_v30, %v3670_v53 }
 0x2f9   : > { %v7351_v34 = vsel %vm7343_vm7, %v7340_v27, %v7342_v19  ;;  %7759 = vmatprep.mubr.f32.mxu0 %v9769_v5  ;;  %vm9475_vm7 = vcmask 7168  }
 0x2fa   : > { %7606 = vmatprep.subr.mxu1 %v7351_v34 }
 0x2fb   : > { %7607 = vmatpush1.msra.mxu1 %v7350_v36 }
 0x2fc   : > { %v7662_v37 = vpop.permute.xlu0 %7661  ;;  %9690 = vmatmul.mubr.msk.f32.vlgmr.msra.gmra.mxu1 %vm440_vm2, %v9686_v61  ;;  %v7658_v35 = vpop.permute.xlu1 %7657 }
 0x2fd   : > { %v7676_v38 = vsel %vm7675_vm8, %v7658_v35, %v7660_v20  ;;  %v7677_v11 = vsel %vm7675_vm8, %v7660_v20, %v7662_v37  ;;  %7830 = vmatprep.mubr.f32.mxu1 %v9769_v5  ;;  %v4109_v41 = vpop.f32.mrf.mxu0 }
 0x2fe   : > { %7725 = vmatprep.subr.mxu0 %v7677_v11  ;;  %v4327_v40 = vadd.f32 %v4109_v41, %v3995_v58 }
 0x2ff   : > { %7726 = vmatpush1.msra.mxu0 %v7676_v38  ;;  %v4111_v42 = vpop.f32.mrf.mxu0 }
 0x300   : > { %v7664_v43 = vpop.permute.xlu0 %7663  ;;  %9692 = vmatmul.mubr.msk.f32.vlgmr.msra.gmra.mxu0 %vm440_vm2, %v9691_v24  ;;  %v7666_v44 = vpop.permute.xlu1 %7665  ;;  %v4328_v46 = vadd.f32 %v4111_v42, %v3996_v62 }
 0x301   : > { %v7678_v45 = vsel %vm7675_vm8, %v7662_v37, %v7664_v43  ;;  %v7679_v48 = vsel %vm7675_vm8, %v7664_v43, %v7666_v44  ;;  %7901 = vmatprep.mubr.f32.mxu0 %v9769_v5  ;;  %v4180_v49 = vpop.f32.mrf.mxu1 }
 0x302   : > { %7796 = vmatprep.subr.mxu1 %v7679_v48  ;;  %v4329_v39 = vadd.f32 %v4180_v49, %v3997_v0 }
 0x303   : > { %7797 = vmatpush1.msra.mxu1 %v7678_v45  ;;  %v4182_v50 = vpop.f32.mrf.mxu1 }
 0x304   : > { %v7668_v51 = vpop.permute.xlu0 %7667  ;;  %9693 = vmatmul.mubr.msk.f32.vlgmr.msra.gmra.mxu1 %vm440_vm2, %v9691_v24  ;;  %v7670_v52 = vpop.permute.xlu1 %7669  ;;  %v4330_v53 = vadd.f32 %v4182_v50, %v3998_v13 }
 0x305   : > { %v7680_v54 = vsel %vm7675_vm8, %v7666_v44, %v7668_v51  ;;  %v7681_v57 = vsel %vm7675_vm8, %v7668_v51, %v7670_v52  ;;  %7972 = vmatprep.mubr.f32.mxu1 %v9769_v5  ;;  %v4251_v58 = vpop.f32.mrf.mxu0 }
 0x306   : > { %7867 = vmatprep.subr.mxu0 %v7681_v57  ;;  %v4331_v56 = vadd.f32 %v4251_v58, %v3999_v17  ;;  %v9701_v57 = vld [vmem:[%s11351_s1 + $0xc0] sm:$0xff] }
 0x307   : > { %7868 = vmatpush1.msra.mxu0 %v7680_v54  ;;  %v4253_v59 = vpop.f32.mrf.mxu0 }
 0x308   : > { %v7672_v60 = vpop.permute.xlu0 %7671  ;;  %9694 = vmatmul.mubr.msk.f32.vlgmr.msra.gmra.mxu0 %vm440_vm2, %v9691_v24  ;;  %v7674_v61 = vpop.permute.xlu1 %7673  ;;  %v4332_v62 = vadd.f32 %v4253_v59, %v4000_v15  ;;  %v9696_v15 = vld [vmem:[%s11351_s1 + $0xb8] sm:$0xff] }
 0x309   : > { %v7682_v63 = vsel %vm7675_vm8, %v7670_v52, %v7672_v60  ;;  %v7683_v8 = vsel %vm7675_vm8, %v7672_v60, %v7674_v61  ;;  %8091 = vmatprep.mubr.f32.mxu0 %v9769_v5  ;;  %v4322_v0 = vpop.f32.mrf.mxu1  ;;  %vm9477_vm8 = vcmask 15360  }
 0x30a   : > { %7938 = vmatprep.subr.mxu1 %v7683_v8  ;;  %v4333_v3 = vadd.f32 %v4322_v0, %v4001_v29 }
 0x30b   : > { %7939 = vmatpush1.msra.mxu1 %v7682_v63  ;;  %v4324_v2 = vpop.f32.mrf.mxu1 }
 0x30c   : > { %v7992_v10 = vpop.permute.xlu0 %7991  ;;  %9695 = vmatmul.mubr.msk.f32.vlgmr.msra.gmra.mxu1 %vm440_vm2, %v9691_v24  ;;  %v7994_v13 = vpop.permute.xlu1 %7993  ;;  %v4334_v12 = vadd.f32 %v4324_v2, %v4002_v31 }
 0x30d   : > { %v8009_v6 = vsel %vm8007_vm9, %v7992_v10, %v7994_v13  ;;  %8162 = vmatprep.mubr.f32.mxu1 %v9769_v5  ;;  %v4441_v14 = vpop.f32.mrf.mxu0 }
 0x30e   : > { %8057 = vmatprep.subr.mxu0 %v8009_v6  ;;  %v4659_v17 = vadd.f32 %v4441_v14, %v4327_v40 }
 0x30f   : > { %v4443_v18 = vpop.f32.mrf.mxu0 }
 0x310   : > { %v7990_v25 = vpop.permute.xlu0 %7989  ;;  %v7996_v27 = vpop.permute.xlu1 %7995  ;;  %v4660_v16 = vadd.f32 %v4443_v18, %v4328_v46 }
 0x311   : > { %v8008_v26 = vsel %vm8007_vm9, %v7990_v25, %v7992_v10  ;;  %v4512_v28 = vpop.f32.mrf.mxu1  ;;  %v8010_v37 = vsel %vm8007_vm9, %v7994_v13, %v7996_v27 }
 0x312   : > { %8058 = vmatpush1.msra.mxu0 %v8008_v26  ;;  %v4661_v29 = vadd.f32 %v4512_v28, %v4329_v39 }
 0x313   : > { %9697 = vmatmul.mubr.msk.f32.vlgmr.msra.gmra.mxu0 %vm440_vm2, %v9696_v15  ;;  %v4514_v30 = vpop.f32.mrf.mxu1 }
 0x314   : > { %v7998_v19 = vpop.permute.xlu0 %7997  ;;  %v8000_v20 = vpop.permute.xlu1 %7999  ;;  %8233 = vmatprep.mubr.f32.mxu0 %v9769_v5  ;;  %v4662_v31 = vadd.f32 %v4514_v30, %v4330_v53 }
 0x315   : > { %v8011_v34 = vsel %vm8007_vm9, %v7996_v27, %v7998_v19  ;;  %v4583_v36 = vpop.f32.mrf.mxu0  ;;  %v8012_v43 = vsel %vm8007_vm9, %v7998_v19, %v8000_v20 }
 0x316   : > { %8128 = vmatprep.subr.mxu1 %v8011_v34  ;;  %v4663_v35 = vadd.f32 %v4583_v36, %v4331_v56 }
 0x317   : > { %8129 = vmatpush1.msra.mxu1 %v8010_v37  ;;  %v4585_v38 = vpop.f32.mrf.mxu0 }
 0x318   : > { %v8002_v11 = vpop.permute.xlu0 %8001  ;;  %9698 = vmatmul.mubr.msk.f32.vlgmr.msra.gmra.mxu1 %vm440_vm2, %v9696_v15  ;;  %v8004_v24 = vpop.permute.xlu1 %8003  ;;  %v4664_v41 = vadd.f32 %v4585_v38, %v4332_v62 }
 0x319   : > { %v8013_v40 = vsel %vm8007_vm9, %v8000_v20, %v8002_v11  ;;  %8304 = vmatprep.mubr.f32.mxu1 %v9769_v5  ;;  %v4654_v42 = vpop.f32.mrf.mxu1  ;;  %v8014_v50 = vsel %vm8007_vm9, %v8002_v11, %v8004_v24 }
 0x31a   : > { %8199 = vmatprep.subr.mxu0 %v8013_v40  ;;  %v4665_v44 = vadd.f32 %v4654_v42, %v4333_v3 }
 0x31b   : > { %8200 = vmatpush1.msra.mxu0 %v8012_v43  ;;  %v4656_v46 = vpop.f32.mrf.mxu1 }
 0x31c   : > { %v8006_v45 = vpop.permute.xlu0 %8005  ;;  %9699 = vmatmul.mubr.msk.f32.vlgmr.msra.gmra.mxu0 %vm440_vm2, %v9696_v15  ;;  %v8324_v48 = vpop.permute.xlu1 %8323  ;;  %v4666_v49 = vadd.f32 %v4656_v46, %v4334_v12 }
 0x31d   : > { %v8015_v39 = vsel %vm8007_vm9, %v8004_v24, %v8006_v45  ;;  %8423 = vmatprep.mubr.f32.mxu0 %v9769_v5  ;;  %vm9479_vm9 = vcmask 23552  }
 0x31e   : > { %8270 = vmatprep.subr.mxu1 %v8015_v39 }
 0x31f   : > { %8271 = vmatpush1.msra.mxu1 %v8014_v50 }
 0x320   : > { %v8326_v51 = vpop.permute.xlu0 %8325  ;;  %9700 = vmatmul.mubr.msk.f32.vlgmr.msra.gmra.mxu1 %vm440_vm2, %v9696_v15  ;;  %v8322_v52 = vpop.permute.xlu1 %8321 }
 0x321   : > { %v8340_v53 = vsel %vm8339_vm10, %v8322_v52, %v8324_v48  ;;  %v8341_v54 = vsel %vm8339_vm10, %v8324_v48, %v8326_v51  ;;  %8494 = vmatprep.mubr.f32.mxu1 %v9769_v5  ;;  %v4773_v58 = vpop.f32.mrf.mxu0 }
 0x322   : > { %8389 = vmatprep.subr.mxu0 %v8341_v54  ;;  %v4991_v56 = vadd.f32 %v4773_v58, %v4659_v17 }
 0x323   : > { %8390 = vmatpush1.msra.mxu0 %v8340_v53  ;;  %v4775_v59 = vpop.f32.mrf.mxu0 }
 0x324   : > { %v8328_v60 = vpop.permute.xlu0 %8327  ;;  %9702 = vmatmul.mubr.msk.f32.vlgmr.msra.gmra.mxu0 %vm440_vm2, %v9701_v57  ;;  %v8330_v61 = vpop.permute.xlu1 %8329  ;;  %v4992_v62 = vadd.f32 %v4775_v59, %v4660_v16 }
 0x325   : > { %v8342_v63 = vsel %vm8339_vm10, %v8326_v51, %v8328_v60  ;;  %v8343_v8 = vsel %vm8339_vm10, %v8328_v60, %v8330_v61  ;;  %8565 = vmatprep.mubr.f32.mxu0 %v9769_v5  ;;  %v4844_v0 = vpop.f32.mrf.mxu1 }
 0x326   : > { %8460 = vmatprep.subr.mxu1 %v8343_v8  ;;  %v4993_v3 = vadd.f32 %v4844_v0, %v4661_v29 }
 0x327   : > { %8461 = vmatpush1.msra.mxu1 %v8342_v63  ;;  %v4846_v2 = vpop.f32.mrf.mxu1 }
 0x328   : > { %v8332_v10 = vpop.permute.xlu0 %8331  ;;  %9703 = vmatmul.mubr.msk.f32.vlgmr.msra.gmra.mxu1 %vm440_vm2, %v9701_v57  ;;  %v8334_v13 = vpop.permute.xlu1 %8333  ;;  %v4994_v12 = vadd.f32 %v4846_v2, %v4662_v31 }
 0x329   : > { %v8344_v6 = vsel %vm8339_vm10, %v8330_v61, %v8332_v10  ;;  %v8345_v14 = vsel %vm8339_vm10, %v8332_v10, %v8334_v13  ;;  %8636 = vmatprep.mubr.f32.mxu1 %v9769_v5  ;;  %v4915_v17 = vpop.f32.mrf.mxu0 }
 0x32a   : > { %8531 = vmatprep.subr.mxu0 %v8345_v14  ;;  %v4995_v18 = vadd.f32 %v4915_v17, %v4663_v35  ;;  %v9711_v14 = vld [vmem:[%s11351_s1 + $0xd0] sm:$0xff] }
 0x32b   : > { %8532 = vmatpush1.msra.mxu0 %v8344_v6  ;;  %v4917_v25 = vpop.f32.mrf.mxu0 }
 0x32c   : > { %v8336_v27 = vpop.permute.xlu0 %8335  ;;  %9704 = vmatmul.mubr.msk.f32.vlgmr.msra.gmra.mxu0 %vm440_vm2, %v9701_v57  ;;  %v8338_v15 = vpop.permute.xlu1 %8337  ;;  %v4996_v16 = vadd.f32 %v4917_v25, %v4664_v41  ;;  %v9706_v41 = vld [vmem:[%s11351_s1 + $0xc8] sm:$0xff] }
 0x32d   : > { %v8346_v26 = vsel %vm8339_vm10, %v8334_v13, %v8336_v27  ;;  %v8347_v28 = vsel %vm8339_vm10, %v8336_v27, %v8338_v15  ;;  %8755 = vmatprep.mubr.f32.mxu0 %v9769_v5  ;;  %v4986_v29 = vpop.f32.mrf.mxu1  ;;  %vm9481_vm10 = vcmask 31744  }
 0x32e   : > { %8602 = vmatprep.subr.mxu1 %v8347_v28  ;;  %v4997_v30 = vadd.f32 %v4986_v29, %v4665_v44 }
 0x32f   : > { %8603 = vmatpush1.msra.mxu1 %v8346_v26  ;;  %v4988_v19 = vpop.f32.mrf.mxu1 }
 0x330   : > { %v8656_v20 = vpop.permute.xlu0 %8655  ;;  %9705 = vmatmul.mubr.msk.f32.vlgmr.msra.gmra.mxu1 %vm440_vm2, %v9701_v57  ;;  %v8658_v31 = vpop.permute.xlu1 %8657  ;;  %v4998_v34 = vadd.f32 %v4988_v19, %v4666_v49 }
 0x331   : > { %v8673_v36 = vsel %vm8671_vm11, %v8656_v20, %v8658_v31  ;;  %8826 = vmatprep.mubr.f32.mxu1 %v9769_v5  ;;  %v5105_v37 = vpop.f32.mrf.mxu0 }
 0x332   : > { %8721 = vmatprep.subr.mxu0 %v8673_v36  ;;  %v5323_v35 = vadd.f32 %v5105_v37, %v4991_v56 }
 0x333   : > { %v5107_v38 = vpop.f32.mrf.mxu0 }
 0x334   : > { %v8654_v11 = vpop.permute.xlu0 %8653  ;;  %v8660_v24 = vpop.permute.xlu1 %8659  ;;  %v5324_v40 = vadd.f32 %v5107_v38, %v4992_v62 }
 0x335   : > { %v8672_v42 = vsel %vm8671_vm11, %v8654_v11, %v8656_v20  ;;  %v5176_v43 = vpop.f32.mrf.mxu1  ;;  %v8674_v51 = vsel %vm8671_vm11, %v8658_v31, %v8660_v24 }
 0x336   : > { %8722 = vmatpush1.msra.mxu0 %v8672_v42  ;;  %v5325_v44 = vadd.f32 %v5176_v43, %v4993_v3 }
 0x337   : > { %9707 = vmatmul.mubr.msk.f32.vlgmr.msra.gmra.mxu0 %vm440_vm2, %v9706_v41  ;;  %v5178_v46 = vpop.f32.mrf.mxu1 }
 0x338   : > { %v8662_v45 = vpop.permute.xlu0 %8661  ;;  %v8664_v48 = vpop.permute.xlu1 %8663  ;;  %8897 = vmatprep.mubr.f32.mxu0 %v9769_v5  ;;  %v5326_v49 = vadd.f32 %v5178_v46, %v4994_v12 }
 0x339   : > { %v8675_v39 = vsel %vm8671_vm11, %v8660_v24, %v8662_v45  ;;  %v5247_v50 = vpop.f32.mrf.mxu0  ;;  %v8676_v60 = vsel %vm8671_vm11, %v8662_v45, %v8664_v48 }
 0x33a   : > { %8792 = vmatprep.subr.mxu1 %v8675_v39  ;;  %v5327_v52 = vadd.f32 %v5247_v50, %v4995_v18 }
 0x33b   : > { %8793 = vmatpush1.msra.mxu1 %v8674_v51  ;;  %v5249_v53 = vpop.f32.mrf.mxu0 }
 0x33c   : > { %v8666_v54 = vpop.permute.xlu0 %8665  ;;  %9708 = vmatmul.mubr.msk.f32.vlgmr.msra.gmra.mxu1 %vm440_vm2, %v9706_v41  ;;  %v8668_v57 = vpop.permute.xlu1 %8667  ;;  %v5328_v58 = vadd.f32 %v5249_v53, %v4996_v16 }
 0x33d   : > { %v8677_v56 = vsel %vm8671_vm11, %v8664_v48, %v8666_v54  ;;  %8968 = vmatprep.mubr.f32.mxu1 %v9769_v5  ;;  %v5318_v59 = vpop.f32.mrf.mxu1  ;;  %v8678_v2 = vsel %vm8671_vm11, %v8666_v54, %v8668_v57 }
 0x33e   : > { %8863 = vmatprep.subr.mxu0 %v8677_v56  ;;  %v5329_v61 = vadd.f32 %v5318_v59, %v4997_v30 }
 0x33f   : > { %8864 = vmatpush1.msra.mxu0 %v8676_v60  ;;  %v5320_v62 = vpop.f32.mrf.mxu1 }
 0x340   : > { %v8670_v63 = vpop.permute.xlu0 %8669  ;;  %9709 = vmatmul.mubr.msk.f32.vlgmr.msra.gmra.mxu0 %vm440_vm2, %v9706_v41  ;;  %v8988_v8 = vpop.permute.xlu1 %8987  ;;  %v5330_v0 = vadd.f32 %v5320_v62, %v4998_v34 }
 0x341   : > { %v8679_v3 = vsel %vm8671_vm11, %v8668_v57, %v8670_v63  ;;  %9087 = vmatprep.mubr.f32.mxu0 %v9769_v5 }
 0x342   : > { %8934 = vmatprep.subr.mxu1 %v8679_v3 }
 0x343   : > { %8935 = vmatpush1.msra.mxu1 %v8678_v2 }
 0x344   : > { %v8990_v10 = vpop.permute.xlu0 %8989  ;;  %9710 = vmatmul.mubr.msk.f32.vlgmr.msra.gmra.mxu1 %vm440_vm2, %v9706_v41  ;;  %v8986_v13 = vpop.permute.xlu1 %8985 }
 0x345   : > { %v9004_v12 = vsel %vm9003_vm12, %v8986_v13, %v8988_v8  ;;  %v9005_v6 = vsel %vm9003_vm12, %v8988_v8, %v8990_v10  ;;  %9158 = vmatprep.mubr.f32.mxu1 %v9769_v5  ;;  %v5436_v17 = vpop.f32.mrf.mxu0 }
 0x346   : > { %9053 = vmatprep.subr.mxu0 %v9005_v6  ;;  %v10922_v18 = vadd.f32 %v5436_v17, %v5323_v35 }
 0x347   : > { %9054 = vmatpush1.msra.mxu0 %v9004_v12  ;;  %v5438_v25 = vpop.f32.mrf.mxu0 }
 0x348   : > { %v8992_v27 = vpop.permute.xlu0 %8991  ;;  %9712 = vmatmul.mubr.msk.f32.vlgmr.msra.gmra.mxu0 %vm440_vm2, %v9711_v14  ;;  %v8994_v15 = vpop.permute.xlu1 %8993  ;;  %v10925_v16 = vadd.f32 %v5438_v25, %v5324_v40 }
 0x349   : > { %v9006_v26 = vsel %vm9003_vm12, %v8990_v10, %v8992_v27  ;;  %v9007_v28 = vsel %vm9003_vm12, %v8992_v27, %v8994_v15  ;;  %9229 = vmatprep.mubr.f32.mxu0 %v9769_v5  ;;  %v5507_v29 = vpop.f32.mrf.mxu1 }
 0x34a   : > { %9124 = vmatprep.subr.mxu1 %v9007_v28  ;;  %v10930_v30 = vadd.f32 %v5507_v29, %v5325_v44 }
 0x34b   : > { %9125 = vmatpush1.msra.mxu1 %v9006_v26  ;;  %v5509_v19 = vpop.f32.mrf.mxu1 }
 0x34c   : > { %v8996_v20 = vpop.permute.xlu0 %8995  ;;  %9713 = vmatmul.mubr.msk.f32.vlgmr.msra.gmra.mxu1 %vm440_vm2, %v9711_v14  ;;  %v8998_v31 = vpop.permute.xlu1 %8997  ;;  %v10933_v34 = vadd.f32 %v5509_v19, %v5326_v49 }
 0x34d   : > { %v9008_v36 = vsel %vm9003_vm12, %v8994_v15, %v8996_v20  ;;  %v9009_v37 = vsel %vm9003_vm12, %v8996_v20, %v8998_v31  ;;  %v5578_v35 = vpop.f32.mrf.mxu0  ;;  %9300 = vmatprep.mubr.f32.mxu1 %v9769_v5 }
 0x34e   : > { %9195 = vmatprep.subr.mxu0 %v9009_v37  ;;  %v5658_v38 = vadd.f32 %v5578_v35, %v5327_v52 }
 0x34f   : > { %9196 = vmatpush1.msra.mxu0 %v9008_v36  ;;  %v5580_v11 = vpop.f32.mrf.mxu0 }
 0x350   : > { %v9000_v24 = vpop.permute.xlu0 %8999  ;;  %9714 = vmatmul.mubr.msk.f32.vlgmr.msra.gmra.mxu0 %vm440_vm2, %v9711_v14  ;;  %v9002_v41 = vpop.permute.xlu1 %9001  ;;  %v5659_v40 = vadd.f32 %v5580_v11, %v5328_v58 }
 0x351   : > { %v9010_v42 = vsel %vm9003_vm12, %v8998_v31, %v9000_v24  ;;  %v9011_v43 = vsel %vm9003_vm12, %v9000_v24, %v9002_v41  ;;  %v5649_v44 = vpop.f32.mrf.mxu1 }
 0x352   : > { %9266 = vmatprep.subr.mxu1 %v9011_v43  ;;  %v5660_v46 = vadd.f32 %v5649_v44, %v5329_v61 }
 0x353   : > { %9267 = vmatpush1.msra.mxu1 %v9010_v42  ;;  %v5651_v45 = vpop.f32.mrf.mxu1 }
 0x354   : > { %9715 = vmatmul.mubr.msk.f32.vlgmr.msra.gmra.mxu1 %vm440_vm2, %v9711_v14  ;;  %v5661_v5 = vadd.f32 %v5651_v45, %v5330_v0 }
 0x355   : > { %v10942_v48 = vpop.f32.mrf.mxu0 }
 0x357   : > { %v10944_v49 = vpop.f32.mrf.mxu0 }
 0x359   : > { %v10946_v39 = vpop.f32.mrf.mxu1 }
 0x35b   : > { %v10950_v52 = vpop.f32.mrf.mxu1 }
 0x35d   : > { %v5910_v50 = vpop.f32.mrf.mxu0 }
 0x35e   : > { %v10948_v51 = vadd.f32 %v5910_v50, %v5658_v38 }
 0x35f   : > { %v5912_v53 = vpop.f32.mrf.mxu0 }
 0x360   : > { %v10952_v54 = vadd.f32 %v5912_v53, %v5659_v40 }
 0x361   : > { %v5981_v57 = vpop.f32.mrf.mxu1 }
 0x362   : > { %v10954_v58 = vadd.f32 %v5981_v57, %v5660_v46 }
 0x363   : > { %v5983_v56 = vpop.f32.mrf.mxu1 }
 0x364   : > { %v10956_v59 = vadd.f32 %v5983_v56, %v5661_v5 }
 0x368   : > { %v10958_v60 = vpop.f32.mrf.mxu0 }
 0x36a   : > { %v10960_v61 = vpop.f32.mrf.mxu0 }
 0x36d   : > { %v10962_v62 = vpop.f32.mrf.mxu1 }
 0x36f   : > { %v10966_v8 = vpop.f32.mrf.mxu1 }
 0x371   : > { %v10964_v63 = vpop.f32.mrf.mxu0 }
 0x373   : > { %v10968_v0 = vpop.f32.mrf.mxu0 }
 0x375   : > { %v10970_v3 = vpop.f32.mrf.mxu1 }
 0x377   : > { %v10974_v10 = vpop.f32.mrf.mxu1 }
 0x379   : > { %v10972_v2 = vpop.f32.mrf.mxu0 }
 0x37b   : > { %v10976_v13 = vpop.f32.mrf.mxu0 }
 0x37d   : > { %v10978_v12 = vpop.f32.mrf.mxu1 }
 0x37f   : > { %v10982_v14 = vpop.f32.mrf.mxu1 }
 0x381   : > { %v10980_v6 = vpop.f32.mrf.mxu0 }
 0x383   : > { %v10984_v17 = vpop.f32.mrf.mxu0 }
 0x385   : > { %v10986_v25 = vpop.f32.mrf.mxu1 }
 0x387   : > { %v10990_v15 = vpop.f32.mrf.mxu1 }
 0x38c   : > { %v10988_v27 = vpop.f32.mrf.mxu0 }
 0x38e   : > { %v10992_v26 = vpop.f32.mrf.mxu0 }
 0x391   : > { %v10994_v28 = vpop.f32.mrf.mxu1 }
 0x393   : > { %v10998_v19 = vpop.f32.mrf.mxu1 }
 0x395   : > { %v10996_v29 = vpop.f32.mrf.mxu0 }
 0x397   : > { %v11000_v20 = vpop.f32.mrf.mxu0 }
 0x399   : > { %v11002_v31 = vpop.f32.mrf.mxu1 }
 0x39b   : > { %v11006_v37 = vpop.f32.mrf.mxu1 }
 0x39d   : > { %v11004_v36 = vpop.f32.mrf.mxu0 }
 0x39f   : > { %v11008_v35 = vpop.f32.mrf.mxu0 }
 0x3a1   : > { %v11010_v38 = vpop.f32.mrf.mxu1 }
 0x3a3   : > { %v11014_v24 = vpop.f32.mrf.mxu1 }
 0x3a4   : > { %v11012_v11 = vpop.f32.mrf.mxu0 }
 0x3a5   : > { %11361 = vst [vmem:[#allocation3_spill] sm:$0xff] %v11012_v11 }
 0x3a6   : > { %v11016_v41 = vpop.f32.mrf.mxu0 }
 0x3a7   : > { %11362 = vst [vmem:[#allocation4_spill] sm:$0xff] %v11016_v41 }
 0x3a8   : > { %v11018_v40 = vpop.f32.mrf.mxu1 }
 0x3a9   : > { %11363 = vst [vmem:[#allocation5_spill] sm:$0xff] %v11018_v40 }
 0x3aa   : > { %v11022_v43 = vpop.f32.mrf.mxu1 }
 0x3ab   : > { %11364 = vst [vmem:[#allocation6_spill] sm:$0xff] %v11022_v43 }
 0x3af   : > { %v11020_v42 = vpop.f32.mrf.mxu0 }
 0x3b1   : > { %v11024_v44 = vpop.f32.mrf.mxu0 }
 0x3b4   : > { %v11026_v46 = vpop.f32.mrf.mxu1 }
 0x3b6   : > { %v11030_v5 = vpop.f32.mrf.mxu1 }
 0x3b7   : > { %11366 = vst [vmem:[#allocation8_spill] sm:$0xff] %v11030_v5 }
 0x3b8   : > { %v11028_v45 = vpop.f32.mrf.mxu0 }
 0x3b9   : > { %11365 = vst [vmem:[#allocation7_spill] sm:$0xff] %v11028_v45 }
 0x3ba   : > { %v11032_v50 = vpop.f32.mrf.mxu0 }
 0x3bb   : > { %11367 = vst [vmem:[#allocation9_spill] sm:$0xff] %v11032_v50 }
 0x3bc   : > { %v11034_v53 = vpop.f32.mrf.mxu1 }
 0x3bd   : > { %11368 = vst [vmem:[#allocation10_spill] sm:$0xff] %v11034_v53 }
 0x3be   : > { %v11038_v56 = vpop.f32.mrf.mxu1 }
 0x3bf   : > { %11369 = vst [vmem:[#allocation11_spill] sm:$0xff] %v11038_v56 }
 0x3c0   : > { %v11036_v57 = vpop.f32.mrf.mxu0 }
 0x3c2   : > { %v11040_v9 = vpop.f32.mrf.mxu0 }
 0x3c4   : > { %v11042_v1 = vpop.f32.mrf.mxu1 }
 0x3c5   : > { %11370 = vst [vmem:[#allocation12_spill] sm:$0xff] %v11042_v1 }
 0x3c6   : > { %v11046_v43 = vpop.f32.mrf.mxu1 }
 0x3c7   : > { %11372 = vst [vmem:[#allocation14_spill] sm:$0xff] %v11046_v43 }
 0x3c8   : > { %v11044_v21 = vpop.f32.mrf.mxu0 }
 0x3c9   : > { %11371 = vst [vmem:[#allocation13_spill] sm:$0xff] %v11044_v21 }
 0x3ca   : > { %v11048_v40 = vpop.f32.mrf.mxu0 }
 0x3cb   : > { %11373 = vst [vmem:[#allocation15_spill] sm:$0xff] %v11048_v40 }
 0x3cc   : > { %v11050_v45 = vpop.f32.mrf.mxu1 }
 0x3cd   : > { %11374 = vst [vmem:[#allocation16_spill] sm:$0xff] %v11050_v45 }
 0x3ce   : > { %v11054_v50 = vpop.f32.mrf.mxu1 }
 0x3cf   : > { %11375 = vst [vmem:[#allocation17_spill] sm:$0xff] %v11054_v50  ;;  %v11075_v50 = vld [vmem:[%s11352_s2] sm:$0xff] }
 0x3d0   : > { %vm9399_vm13 = vcmp.gt.f32.partialorder %v11075_v50, 0.0 }
 0x3d3   : > { %v11052_v5 = vpop.f32.mrf.mxu0 }
 0x3d5   : > { %v11056_v53 = vpop.f32.mrf.mxu0 }
 0x3d6   : > { %11376 = vst [vmem:[#allocation18_spill] sm:$0xff] %v11056_v53 }
 0x3d8   : > { %v11058_v41 = vpop.f32.mrf.mxu1 }
 0x3d9   : > { %11377 = vst [vmem:[#allocation19_spill] sm:$0xff] %v11058_v41 }
 0x3da   : > { %v11062_v11 = vpop.f32.mrf.mxu1 }
 0x3db   : > { %11379 = vst [vmem:[#allocation21_spill] sm:$0xff] %v11062_v11  ;;  %v5989_v11 = vadd.f32 %v10950_v52, %v10933_v34  ;;  %v6323_v34 = vadd.f32 %v10968_v0, %v10952_v54  ;;  %v9332_v0 = vrot.slane %v11075_v50, %v9880_v23 }
 0x3dc   : > { %v11060_v56 = vpop.f32.mrf.mxu0 }
 0x3dd   : > { %11378 = vst [vmem:[#allocation20_spill] sm:$0xff] %v11060_v56  ;;  %v6656_v54 = vadd.f32 %v10984_v17, %v6323_v34 }
 0x3de   : > { %v11064_v1 = vpop.f32.mrf.mxu0 }
 0x3df   : > { %11380 = vst [vmem:[#allocation22_spill] sm:$0xff] %v11064_v1  ;;  %v5986_v1 = vadd.f32 %v10942_v48, %v10922_v18  ;;  %v6321_v48 = vadd.f32 %v10966_v8, %v5989_v11 }
 0x3e0   : > { %v11066_v21 = vpop.f32.mrf.mxu1 }
 0x3e1   : > { %11381 = vst [vmem:[#allocation23_spill] sm:$0xff] %v11066_v21  ;;  %v5987_v21 = vadd.f32 %v10944_v49, %v10925_v16  ;;  %v6322_v16 = vadd.f32 %v10964_v63, %v10948_v51  ;;  %v6324_v49 = vadd.f32 %v10970_v3, %v10954_v58  ;;  %v11387_v3 = vsub.s32 0, %v9856_v4 }
 0x3e2   : > { %v11070_v40 = vpop.f32.mrf.mxu1 }
 0x3e3   : > { %11383 = vst [vmem:[#allocation25_spill] sm:$0xff] %v11070_v40  ;;  %v5988_v40 = vadd.f32 %v10946_v39, %v10930_v30  ;;  %v6655_v51 = vadd.f32 %v10980_v6, %v6322_v16  ;;  %v6657_v58 = vadd.f32 %v10986_v25, %v6324_v49 }
 0x3e4   : > { %v11068_v43 = vpop.f32.mrf.mxu0 }
 0x3e5   : > { %11382 = vst [vmem:[#allocation24_spill] sm:$0xff] %v11068_v43  ;;  %v11386_v43 = vmov 0   ;;  %v6320_v18 = vadd.f32 %v10962_v62, %v5988_v40 }
 0x3e6   : > { %v11078_v45 = vpop.f32.mrf.mxu0  ;;  %v11093_v53 = vsel %vm9399_vm13, 1, %v11386_v43  ;;  %v6987_v43 = vadd.f32 %v10996_v29, %v6655_v51 }
 0x3e7   : > { %11384 = vst [vmem:[#allocation26_spill] sm:$0xff] %v11078_v45  ;;  %v6318_v45 = vadd.f32 %v10958_v60, %v5986_v1  ;;  %v6325_v1 = vadd.f32 %v10974_v10, %v10956_v59  ;;  %v6653_v52 = vadd.f32 %v10978_v12, %v6320_v18  ;;  %v6654_v60 = vadd.f32 %v10982_v14, %v6321_v48 }
 0x3e8   : > { %v11080_v56 = vpop.f32.mrf.mxu1  ;;  %v9408_v10 = vrot.slane %v11093_v53, %v9880_v23  ;;  %v9336_v14 = vrot.slane %v11075_v50, %v9860_v7  ;;  %v9416_v17 = vrot.slane %v11093_v53, %v9886_v33  ;;  %v9348_v48 = vrot.slane %v11075_v50, %v9895_v47 }
 0x3e9   : > { %11385 = vst [vmem:[#allocation27_spill] sm:$0xff] %v11080_v56  ;;  %v6319_v56 = vadd.f32 %v10960_v61, %v5987_v21  ;;  %v6651_v21 = vadd.f32 %v10972_v2, %v6318_v45  ;;  %v6658_v59 = vadd.f32 %v10990_v15, %v6325_v1  ;;  %v11127_v2 = vrot.slane %v11093_v53, %v11387_v3  ;;  %v11393_v3 = vld [vmem:[#allocation12_spill] sm:$0xff] }
 0x3ea   : > { %v11101_v30 = vpop.f32.mrf.mxu1  ;;  %v6985_v4 = vadd.f32 %v10994_v28, %v6653_v52  ;;  %v9344_v15 = vrot.slane %v11075_v50, %v9877_v22  ;;  %v9424_v28 = vrot.slane %v11093_v53, %v9895_v47  ;;  %v9428_v16 = vrot.slane %v11093_v53, %v9883_v32 }
 0x3eb   : > { %v6652_v39 = vadd.f32 %v10976_v13, %v6319_v56  ;;  %v6983_v63 = vadd.f32 %v10988_v27, %v6651_v21  ;;  %v9412_v13 = vrot.slane %v11093_v53, %v9860_v7  ;;  %v9340_v27 = vrot.slane %v11075_v50, %v9886_v33 }
 0x3ec   : > { %v11090_v41 = vpop.f32.mrf.mxu0  ;;  %v7317_v45 = vadd.f32 %v11010_v38, %v6985_v4  ;;  %vm9433_vm14 = vcmp.eq.s32.totalorder %v11127_v2, 1  ;;  %v9432_v29 = vrot.slane %v11093_v53, %v9900_v55  ;;  %v6988_v38 = vadd.f32 %v11000_v20, %v6656_v54  ;;  %v11392_v54 = vld [vmem:[#allocation8_spill] sm:$0xff] }
 0x3ed   : > { %v6984_v12 = vadd.f32 %v10992_v26, %v6652_v39  ;;  %v7315_v6 = vadd.f32 %v11004_v36, %v6983_v63  ;;  %v9420_v26 = vrot.slane %v11093_v53, %v9877_v22  ;;  %v6986_v36 = vadd.f32 %v10998_v19, %v6654_v60 }
 0x3ee   : > { %v11114_v61 = vpop.f32.mrf.mxu0  ;;  %v7649_v49 = vadd.f32 %v11026_v46, %v7317_v45  ;;  %v9356_v21 = vrot.slane %v11075_v50, %v9900_v55  ;;  %vm11173_vm15 = vcmp.eq.s32.totalorder %v9408_v10, 1  ;;  %v6990_v39 = vadd.f32 %v11006_v37, %v6658_v59  ;;  %v11391_v46 = vld [vmem:[#allocation4_spill] sm:$0xff] }
 0x3ef   : > { %v7316_v11 = vadd.f32 %v11008_v35, %v6984_v12  ;;  %v7647_v40 = vadd.f32 %v11020_v42, %v7315_v6  ;;  %v9352_v42 = vrot.slane %v11075_v50, %v9883_v32  ;;  %v7318_v34 = vadd.f32 %v11014_v24, %v6986_v36  ;;  %v11390_v24 = vld [vmem:[#allocation3_spill] sm:$0xff]  ;;  %v11394_v6 = vld [vmem:[#allocation5_spill] sm:$0xff]  ;;  %v11395_v36 = vld [vmem:[#allocation6_spill] sm:$0xff] }
 0x3f0   : > { %v11116_v62 = vpop.f32.mrf.mxu1  ;;  %v7319_v60 = vadd.f32 %v11390_v24, %v6987_v43  ;;  %v7320_v51 = vadd.f32 %v11391_v46, %v6988_v38  ;;  %v7981_v12 = vadd.f32 %v11393_v3, %v7649_v49  ;;  %v11397_v59 = vld [vmem:[#allocation24_spill] sm:$0xff]  ;;  %vm11189_vm0 = vcmp.eq.s32.totalorder %v9412_v13, 1  ;;  %v11401_v43 = vld [vmem:[#allocation9_spill] sm:$0xff]  ;;  %v11403_v38 = vld [vmem:[#allocation19_spill] sm:$0xff] }
 0x3f1   : > { %v7648_v19 = vadd.f32 %v11024_v44, %v7316_v11  ;;  %v7979_v35 = vadd.f32 %v11036_v57, %v7647_v40  ;;  %v6989_v57 = vadd.f32 %v11002_v31, %v6657_v58  ;;  %v7650_v63 = vadd.f32 %v11392_v54, %v7318_v34  ;;  %v11396_v58 = vld [vmem:[#allocation18_spill] sm:$0xff]  ;;  %v11400_v11 = vld [vmem:[#allocation7_spill] sm:$0xff] }
 0x3f2   : > { %v11140_v25 = vpop.f32.mrf.mxu1  ;;  %v7322_v31 = vadd.f32 %v11395_v36, %v6990_v39  ;;  %v7651_v40 = vadd.f32 %v11400_v11, %v7319_v60  ;;  %v7652_v45 = vadd.f32 %v11401_v43, %v7320_v51  ;;  %v8313_v34 = vadd.f32 %v11403_v38, %v7981_v12  ;;  %v11404_v24 = vld [vmem:[#allocation10_spill] sm:$0xff]  ;;  %v11405_v46 = vld [vmem:[#allocation11_spill] sm:$0xff]  ;;  %v11409_v60 = vld [vmem:[#allocation13_spill] sm:$0xff] }
 0x3f3   : > { %v7980_v52 = vadd.f32 %v11040_v9, %v7648_v19  ;;  %v8311_v20 = vadd.f32 %v11052_v5, %v7979_v35  ;;  %v7321_v4 = vadd.f32 %v11394_v6, %v6989_v57  ;;  %v11402_v19 = vld [vmem:[#allocation14_spill] sm:$0xff]  ;;  %vm11200_vm1 = vcmp.eq.s32.totalorder %v9416_v17, 1  ;;  %v11411_v6 = vld [vmem:[#allocation21_spill] sm:$0xff]  ;;  %v11412_v36 = vld [vmem:[#allocation27_spill] sm:$0xff] }
 0x3f4   : > { %v7982_v35 = vadd.f32 %v11402_v19, %v7650_v63  ;;  %v11406_v54 = vld [vmem:[#allocation26_spill] sm:$0xff]  ;;  %v7983_v51 = vadd.f32 %v11409_v60, %v7651_v40  ;;  %v11410_v63 = vld [vmem:[#allocation15_spill] sm:$0xff]  ;;  %v11413_v17 = vld [vmem:[#allocation16_spill] sm:$0xff]  ;;  %vm11217_vm3 = vcmp.eq.s32.totalorder %v9420_v26, 1  ;;  %vm11231_vm4 = vcmp.eq.s32.totalorder %v9424_v28, 1 }
 0x3f5   : > { %v8312_v37 = vadd.f32 %v11396_v58, %v7980_v52  ;;  %v8643_v9 = vadd.f32 %v11397_v59, %v8311_v20  ;;  %v7653_v39 = vadd.f32 %v11404_v24, %v7321_v4  ;;  %v7654_v52 = vadd.f32 %v11405_v46, %v7322_v31  ;;  %v11417_v19 = vld [vmem:[#allocation20_spill] sm:$0xff]  ;;  %v11418_v38 = vld [vmem:[#allocation22_spill] sm:$0xff] }
 0x3f6   : > { %v7984_v12 = vadd.f32 %v11410_v63, %v7652_v45  ;;  %v8314_v4 = vadd.f32 %v11411_v6, %v7982_v35  ;;  %v8645_v31 = vadd.f32 %v11412_v36, %v8313_v34  ;;  %v8315_v40 = vadd.f32 %v11417_v19, %v7983_v51 }
 0x3f7   : > { %v8757_v8 = vpop.f32.mrf.mxu0  ;;  %v8644_v20 = vadd.f32 %v11406_v54, %v8312_v37  ;;  %v7985_v58 = vadd.f32 %v11413_v17, %v7653_v39  ;;  %v11414_v37 = vld [vmem:[#allocation17_spill] sm:$0xff]  ;;  %v11419_v39 = vld [vmem:[#allocation2_spill] sm:$0xff]  ;;  %vm11256_vm5 = vcmp.eq.s32.totalorder %v9428_v16, 1  ;;  %vm11268_vm6 = vcmp.eq.s32.totalorder %v9432_v29, 1 }
 0x3f8   : > { %v8975_v13 = vadd.f32 %v8757_v8, %v8643_v9  ;;  %v7986_v59 = vadd.f32 %v11414_v37, %v7654_v52  ;;  %v8316_v24 = vadd.f32 %v11418_v38, %v7984_v12  ;;  %v8646_v45 = vadd.f32 %v11101_v30, %v8314_v4 }
 0x3f9   : > { %v8759_v56 = vpop.f32.mrf.mxu0  ;;  %v8647_v51 = vadd.f32 %v11090_v41, %v8315_v40 }
 0x3fa   : > { %v8976_v9 = vadd.f32 %v8759_v56, %v8644_v20  ;;  %v8648_v63 = vadd.f32 %v11114_v61, %v8316_v24 }
 0x3fc   : > { %v8828_v18 = vpop.f32.mrf.mxu1 }
 0x3fd   : > { %v8977_v35 = vadd.f32 %v8828_v18, %v8645_v31  ;;  %v11422_v18 = vld [vmem:[#allocation23_spill] sm:$0xff] }
 0x3fe   : > { %v8830_v10 = vpop.f32.mrf.mxu1  ;;  %v8317_v20 = vadd.f32 %v11422_v18, %v7985_v58 }
 0x3ff   : > { %v8978_v12 = vadd.f32 %v8830_v10, %v8646_v45 }
 0x400   : > { %v11169_v1 = vpop.f32.mrf.mxu0  ;;  %v8649_v61 = vadd.f32 %v11116_v62, %v8317_v20 }
 0x401   : > { %v8979_v10 = vadd.f32 %v11169_v1, %v8647_v51 }
 0x402   : > { %v8901_v49 = vpop.f32.mrf.mxu0 }
 0x403   : > { %v8980_v29 = vadd.f32 %v8901_v49, %v8648_v63 }
 0x404   : > { %v8970_v57 = vpop.f32.mrf.mxu1 }
 0x406   : > { %v8972_v34 = vpop.f32.mrf.mxu1 }
 0x408   : > { %v9089_v8 = vpop.f32.mrf.mxu0 }
 0x409   : > { %v9307_v11 = vadd.f32 %v9089_v8, %v8975_v13  ;;  %v11423_v13 = vld [vmem:[#allocation25_spill] sm:$0xff] }
 0x40a   : > { %v9091_v46 = vpop.f32.mrf.mxu0  ;;  %v8318_v60 = vadd.f32 %v11423_v13, %v7986_v59 }
 0x40b   : > { %9315 = vst [vmem:[%s11209_s10] sm:$0xff] %v9307_v11  ;;  %v9365_v54 = vmul.f32 %v9307_v11, %v11419_v39  ;;  %v11226_v52 = vadd.f32 %v9091_v46, %v8976_v9  ;;  %v9441_v56 = vsel %vm9433_vm14, %v9307_v11, -inf  ;;  %v11239_v30 = vsel %vm9433_vm14, %v9307_v11, inf }
 0x40c   : > { %v9160_v28 = vpop.f32.mrf.mxu1  ;;  %v8650_v53 = vadd.f32 %v11140_v25, %v8318_v60  ;;  %v8981_v25 = vadd.f32 %v8970_v57, %v8649_v61 }
 0x40d   : > { %9316 = vst [vmem:[%s11209_s10 + $0x8] sm:$0xff] %v11226_v52  ;;  %v9366_v2 = vmul.f32 %v9332_v0, %v11226_v52  ;;  %v11251_v6 = vadd.f32 %v9160_v28, %v8977_v35  ;;  %v9442_v41 = vsel %vm11173_vm15, %v11226_v52, -inf  ;;  %v9382_v36 = vmul.f32 %v9365_v54, %v9307_v11 }
 0x40e   : > { %v9162_v23 = vpop.f32.mrf.mxu1  ;;  %v9459_v16 = vsel %vm11173_vm15, %v11226_v52, inf  ;;  %v8982_v57 = vadd.f32 %v8972_v34, %v8650_v53 }
 0x40f   : > { %v9373_v31 = vadd.f32 %v9366_v2, %v9365_v54  ;;  %v9383_v8 = vmul.f32 %v9366_v2, %v11226_v52  ;;  %9317 = vst [vmem:[%s11209_s10 + $0x10] sm:$0xff] %v11251_v6  ;;  %v9367_v62 = vmul.f32 %v9336_v14, %v11251_v6  ;;  %v11282_v1 = vadd.f32 %v9162_v23, %v8978_v12 }
 0x410   : > { %v9231_v17 = vpop.f32.mrf.mxu0  ;;  %v9443_v58 = vsel %vm11189_vm0, %v11251_v6, -inf  ;;  %v9460_v37 = vsel %vm11189_vm0, %v11251_v6, inf }
 0x411   : > { %v9390_v59 = vadd.f32 %v9383_v8, %v9382_v36  ;;  %v9384_v9 = vmul.f32 %v9367_v62, %v11251_v6  ;;  %9318 = vst [vmem:[%s11209_s10 + $0x18] sm:$0xff] %v11282_v1  ;;  %v9368_v7 = vmul.f32 %v9340_v27, %v11282_v1  ;;  %v9311_v14 = vadd.f32 %v9231_v17, %v8979_v10 }
 0x412   : > { %v9233_v49 = vpop.f32.mrf.mxu0  ;;  %v9374_v11 = vadd.f32 %v9373_v31, %v9367_v62  ;;  %v9444_v5 = vsel %vm11200_vm1, %v11282_v1, -inf  ;;  %v9461_v19 = vsel %vm11200_vm1, %v11282_v1, inf }
 0x413   : > { %v9385_v40 = vmul.f32 %v9368_v7, %v11282_v1  ;;  %9319 = vst [vmem:[%s11209_s10 + $0x20] sm:$0xff] %v9311_v14  ;;  %v9312_v38 = vadd.f32 %v9233_v49, %v8980_v29  ;;  %v9369_v33 = vmul.f32 %v9344_v15, %v9311_v14  ;;  %v9391_v27 = vadd.f32 %v9390_v59, %v9384_v9 }
 0x414   : > { %v9302_v24 = vpop.f32.mrf.mxu1  ;;  %v9375_v45 = vadd.f32 %v9374_v11, %v9368_v7  ;;  %v9445_v35 = vsel %vm11217_vm3, %v9311_v14, -inf  ;;  %v9462_v3 = vsel %vm11217_vm3, %v9311_v14, inf }
 0x415   : > { %9320 = vst [vmem:[%s11209_s10 + $0x28] sm:$0xff] %v9312_v38  ;;  %v9313_v46 = vadd.f32 %v9302_v24, %v8981_v25  ;;  %v9370_v39 = vmul.f32 %v9348_v48, %v9312_v38  ;;  %v9386_v54 = vmul.f32 %v9369_v33, %v9311_v14  ;;  %v9392_v22 = vadd.f32 %v9391_v27, %v9385_v40 }
 0x416   : > { %v9304_v15 = vpop.f32.mrf.mxu1  ;;  %v9376_v18 = vadd.f32 %v9375_v45, %v9369_v33  ;;  %v9446_v34 = vsel %vm11231_vm4, %v9312_v38, -inf  ;;  %v9449_v20 = vmax.f32 %v9441_v56, %v9445_v35  ;;  %v9463_v13 = vsel %vm11231_vm4, %v9312_v38, inf }
 0x417   : > { %9321 = vst [vmem:[%s11209_s10 + $0x30] sm:$0xff] %v9313_v46  ;;  %v9314_v43 = vadd.f32 %v9304_v15, %v8982_v57  ;;  %v9371_v60 = vmul.f32 %v9352_v42, %v9313_v46  ;;  %v9387_v47 = vmul.f32 %v9370_v39, %v9312_v38  ;;  %v9393_v48 = vadd.f32 %v9392_v22, %v9386_v54 }
 0x418   : > { %v9377_v51 = vadd.f32 %v9376_v18, %v9370_v39  ;;  %v9447_v63 = vsel %vm11256_vm5, %v9313_v46, -inf  ;;  %v9450_v28 = vmax.f32 %v9442_v41, %v9446_v34  ;;  %v9464_v12 = vsel %vm11256_vm5, %v9313_v46, inf }
 0x419   : > { %9322 = vst [vmem:[%s11209_s10 + $0x38] sm:$0xff] %v9314_v43  ;;  %v9372_v26 = vmul.f32 %v9356_v21, %v9314_v43  ;;  %v9388_v56 = vmul.f32 %v9371_v60, %v9313_v46  ;;  %v9394_v2 = vadd.f32 %v9393_v48, %v9387_v47  ;;  %v9448_v32 = vsel %vm11268_vm6, %v9314_v43, -inf }
 0x41a   : > { %v9378_v42 = vadd.f32 %v9377_v51, %v9371_v60  ;;  %v9451_v6 = vmax.f32 %v9443_v58, %v9447_v63  ;;  %v9452_v61 = vmax.f32 %v9444_v5, %v9448_v32  ;;  %v9453_v10 = vmax.f32 %v9449_v20, %v9450_v28 }
 0x41b   : > { %v9389_v36 = vmul.f32 %v9372_v26, %v9314_v43  ;;  %v9395_v23 = vadd.f32 %v9394_v2, %v9388_v56  ;;  %v9465_v4 = vsel %vm11268_vm6, %v9314_v43, inf  ;;  %v9466_v41 = vmin.f32 %v11239_v30, %v9462_v3 }
 0x41c   : > { %v9379_v31 = vadd.f32 %v9378_v42, %v9372_v26  ;;  %v9454_v8 = vmax.f32 %v9451_v6, %v9452_v61  ;;  %v9467_v55 = vmin.f32 %v9459_v16, %v9463_v13  ;;  %v9468_v50 = vmin.f32 %v9460_v37, %v9464_v12 }
 0x41d   : > { %v9396_v21 = vadd.f32 %v9395_v23, %v9389_v36  ;;  %v9469_v62 = vmin.f32 %v9461_v19, %v9465_v4 }
 0x41e   : > { %9380 = vadd.xlane.f32.xlu0 %v9379_v31  ;;  %v9455_v1 = vmax.f32 %v9453_v10, %v9454_v8  ;;  %v9470_v53 = vmin.f32 %v9466_v41, %v9467_v55 }
 0x41f   : > { %9397 = vadd.xlane.f32.xlu1 %v9396_v21  ;;  %v9471_v29 = vmin.f32 %v9468_v50, %v9469_v62 }
 0x421   : > { %v9472_v0 = vmin.f32 %v9470_v53, %v9471_v29 }
 0x422   : > { %9456 = vmax.xlane.f32.xlu0 %v9455_v1 }
 0x426   : > { %9473 = vmin.xlane.f32.xlu0 %v9472_v0 }
 0x4a7   : > { %v9381_v30 = vpop.xlane.xlu0 %9380 }
 0x4a8   : > { %v9398_v17 = vpop.xlane.xlu1 %9397 }
 0x4a9   : > { %v9476_v44 = vsel %vm9475_vm7, %v9381_v30, %v9398_v17 }
 0x4ab   : > { %v9457_v58 = vpop.xlane.xlu0 %9456 }
 0x4ac   : > { %v9478_v52 = vsel %vm9477_vm8, %v9476_v44, %v9457_v58 }
 0x4af   : > { %v9474_v16 = vpop.xlane.xlu0 %9473 }
 0x4b0   : > { %v9480_v37 = vsel %vm9479_vm9, %v9478_v52, %v9474_v16 }
 0x4b1   : > { %v9482_v59 = vsel %vm9481_vm10, %v9480_v37, 0.0 }
 0x4b2   : > { %9483 = vst.msk [vmem:[%s262_s13] sm:$0xff] %vm440_vm2, %v9482_v59 }
 0x4b3 PF: > { %s17_s21 = sadd.s32 1, %s9765_s21  }
 0x4b4   : > { %p14_p4 = scmp.ge.s32.totalorder %s17_s21, 4  }
 0x4b6   :  { %16 = sbr.rel (!%p14_p4) target bundleno = 1 (0x1), region = 108 }

// kernel: basic_block_forward.20
= control target key start
LH: loop header
LB: loop body
LE: loop exit
PB: predicated region body
PF: predicated region fallthrough
CT: control target
= control target key end

     0   :  { %s9679_s15 = smov 0   ;;  %s11088_s0 = inlined_call_operand.vmem [shape: f32[2,8,1024], index: 0, kind: input, shape index: {}]   ;;  %s11089_s1 = inlined_call_operand.vmem [shape: f32[27,8,8], index: 1, kind: input, shape index: {}]   ;;  %s11090_s2 = inlined_call_operand.vmem [shape: f32[1,1024], index: 2, kind: input, shape index: {}]   ;;  %s11091_s3 = inlined_call_operand.vmem [shape: f32[2,8,1024], index: 3, kind: output, shape index: {0}]   ;;  %s11092_s4 = inlined_call_operand.vmem [shape: f32[2,8,8], index: 4, kind: output, shape index: {1}]  }
   0x1 LB: > { %s9430_s16 = sadd.s32 4294967295, %s9623_s15   ;;  %p9434_p0 = scmp.ge.s32.totalorder %s9623_s15, 1  ;;  %s9623_s15 = sphi %s9679_s15, %s15_s15  }
   0x2   : > { %p165_p1 = scmp.lt.s32.totalorder %s9623_s15, 3 }
   0x4   : > { %p166_p2 = pnand %p9434_p0, %p165_p1 }
   0x6   : > { %169 = sbr.rel (%p166_p2) target bundleno = 1073 (0x431), region = 32 }
   0xb   : > { %p195_p3 = scmp.lt.s32.totalorder %s9430_s16, 1  ;;  %s9625_s21 = smov 111   ;;  %vm241_vm0 = vcmask 908288   ;;  %v9626_v12 = vmov 0.0   ;;  %vm283_vm1 = vcmask 1039360   ;;  %v9440_v32 = vld [vmem:[%s11089_s1 + $0x8] sm:$0xff] }
   0xc   : > { %368 = vmatprep.mubr.f32.mxu0 %v9626_v12  ;;  %439 = vmatprep.mubr.f32.mxu1 %v9626_v12  ;;  %s9627_s22 = smov 127   ;;  %s9628_s23 = smov 126   ;;  %vm300_vm2 = vcmask 64512   ;;  %vm9445_vm3 = vmneg %vm241_vm0  ;;  %vm895_vm4 = vcmask 1031168   ;;  %v260_v45 = vld [vmem:[%s11089_s1] sm:$0xff]  ;;  %v9451_v57 = vld [vmem:[%s11089_s1 + $0x10] sm:$0xff] }
   0xd   : > { %s11124_s16 = smov (!%p195_p3, %s9430_s16), 1  ;;  %s9629_s24 = smov 118   ;;  %vm1227_vm5 = vcmask 965632   ;;  %vm1559_vm6 = vcmask 957440   ;;  %vm1891_vm7 = vcmask 949248   ;;  %vm2223_vm8 = vcmask 883712  }
   0xe   : > { %s9578_s17 = sshll.u32 %s11124_s16, 6  ;;  %s9630_s25 = smov 117   ;;  %vm2555_vm9 = vcmask 875520   ;;  %vm2887_vm10 = vcmask 867328   ;;  %vm3219_vm11 = vcmask 228352   ;;  %vm3551_vm12 = vcmask 220160  }
   0xf   : > { %s199_s20 = scalar_lea.vmem %s11088_s0, %s9578_s17  ;;  %s9631_s26 = smov 116   ;;  %vm3883_vm13 = vcmask 211968   ;;  %vm4215_vm14 = vcmask 146432   ;;  %vm4547_vm15 = vcmask 138240  }
  0x10   : > { %v211_v0 = vld [vmem:[%s199_s20 + $0x10] sm:$0xff]  ;;  %v209_v1 = vld [vmem:[%s199_s20] sm:$0xff]  ;;  %v212_v2 = vld [vmem:[%s199_s20 + $0x18] sm:$0xff]  ;;  %s9632_s27 = smov 108   ;;  %s9633_s28 = smov 107  }
  0x11   : > { %229 = vrot.lane.b32.xlu1 %v211_v0, %s9625_s21  ;;  %225 = vrot.lane.b32.xlu0 %v209_v1, %s9625_s21  ;;  %v210_v3 = vld [vmem:[%s199_s20 + $0x8] sm:$0xff]  ;;  %v213_v4 = vld [vmem:[%s199_s20 + $0x20] sm:$0xff]  ;;  %s9634_s5 = smov 106   ;;  %s9635_s10 = smov 28  }
  0x12   : > { %v214_v5 = vld [vmem:[%s199_s20 + $0x28] sm:$0xff]  ;;  %v215_v6 = vld [vmem:[%s199_s20 + $0x30] sm:$0xff]  ;;  %v216_v7 = vld [vmem:[%s199_s20 + $0x38] sm:$0xff]  ;;  %s9636_s13 = smov 27   ;;  %s9637_s19 = smov 26  }
  0x13   : > { %s9642_s8 = smov 7   ;;  %s9643_s11 = smov 6  }
  0x14   : > { %s9644_s14 = smov 56   ;;  %s9645_s20 = smov 55  }
  0x15   : > { %231 = vrot.lane.b32.xlu1 %v212_v2, %s9625_s21  ;;  %227 = vrot.lane.b32.xlu0 %v210_v3, %s9625_s21  ;;  %s9648_s29 = smov 45   ;;  %s9649_s6 = smov 44  }
  0x16   : > { %s9650_s9 = smov 36   ;;  %s9651_s12 = smov 35  }
  0x17   : > { %s9652_s18 = smov 34  }
  0x19   : > { %233 = vrot.lane.b32.xlu0 %v213_v4, %s9625_s21  ;;  %235 = vrot.lane.b32.xlu1 %v214_v5, %s9625_s21  ;;  %v9456_v4 = vld [vmem:[%s11089_s1 + $0x18] sm:$0xff] }
  0x1d   : > { %237 = vrot.lane.b32.xlu0 %v215_v6, %s9625_s21  ;;  %239 = vrot.lane.b32.xlu1 %v216_v7, %s9625_s21 }
  0x83   : > { %v230_v8 = vpop.permute.xlu1 %229  ;;  %v9695_v9 = vpop.permute.xlu0 %225 }
  0x84   : > { %v9710_v17 = vsel %vm241_vm0, 0.0, %v9695_v9 }
  0x87   : > { %v232_v10 = vpop.permute.xlu1 %231  ;;  %v228_v11 = vpop.permute.xlu0 %227 }
  0x88   : > { %v9701_v13 = vsel %vm241_vm0, %v9695_v9, %v228_v11  ;;  %v9704_v14 = vsel %vm241_vm0, %v228_v11, %v230_v8  ;;  %v9713_v18 = vsel %vm241_vm0, %v230_v8, %v232_v10 }
  0x89   : > { %269 = vrot.lane.b32.xlu1 %v9704_v14, %s9627_s22  ;;  %267 = vrot.lane.b32.xlu0 %v9701_v13, %s9627_s22 }
  0x8b   : > { %v234_v15 = vpop.permute.xlu0 %233  ;;  %v236_v16 = vpop.permute.xlu1 %235 }
  0x8c   : > { %v9718_v19 = vsel %vm241_vm0, %v234_v15, %v236_v16  ;;  %v9721_v21 = vsel %vm241_vm0, %v232_v10, %v234_v15 }
  0x8d   : > { %271 = vrot.lane.b32.xlu1 %v9713_v18, %s9627_s22  ;;  %265 = vrot.lane.b32.xlu0 %v9710_v17, %s9627_s22 }
  0x8f   : > { %v240_v20 = vpop.permute.xlu1 %239  ;;  %v238_v22 = vpop.permute.xlu0 %237 }
  0x90   : > { %v9726_v23 = vsel %vm241_vm0, %v238_v22, %v240_v20  ;;  %v9729_v24 = vsel %vm241_vm0, %v236_v16, %v238_v22  ;;  %v9734_v25 = vsel %vm241_vm0, %v240_v20, 0.0  ;;  %vm4879_vm0 = vcmask 130048  }
  0x91   : > { %275 = vrot.lane.b32.xlu1 %v9718_v19, %s9627_s22  ;;  %273 = vrot.lane.b32.xlu0 %v9721_v21, %s9627_s22 }
  0x95   : > { %279 = vrot.lane.b32.xlu1 %v9726_v23, %s9627_s22  ;;  %277 = vrot.lane.b32.xlu0 %v9729_v24, %s9627_s22 }
  0x99   : > { %879 = vrot.lane.b32.xlu1 %v9701_v13, %s9628_s23  ;;  %281 = vrot.lane.b32.xlu0 %v9734_v25, %s9627_s22  ;;  %s9638_s22 = smov 18  }
  0x9d   : > { %877 = vrot.lane.b32.xlu1 %v9710_v17, %s9628_s23  ;;  %881 = vrot.lane.b32.xlu0 %v9704_v14, %s9628_s23 }
  0xa1   : > { %885 = vrot.lane.b32.xlu1 %v9721_v21, %s9628_s23  ;;  %883 = vrot.lane.b32.xlu0 %v9713_v18, %s9628_s23 }
  0xa5   : > { %889 = vrot.lane.b32.xlu1 %v9729_v24, %s9628_s23  ;;  %887 = vrot.lane.b32.xlu0 %v9718_v19, %s9628_s23 }
  0xa9   : > { %893 = vrot.lane.b32.xlu1 %v9734_v25, %s9628_s23  ;;  %891 = vrot.lane.b32.xlu0 %v9726_v23, %s9628_s23  ;;  %s9646_s23 = smov 54  }
  0xad   : > { %1213 = vrot.lane.b32.xlu1 %v9704_v14, %s9629_s24  ;;  %1211 = vrot.lane.b32.xlu0 %v9701_v13, %s9629_s24 }
  0xb1   : > { %1215 = vrot.lane.b32.xlu1 %v9713_v18, %s9629_s24  ;;  %1209 = vrot.lane.b32.xlu0 %v9710_v17, %s9629_s24 }
  0xb5   : > { %1219 = vrot.lane.b32.xlu1 %v9718_v19, %s9629_s24  ;;  %1217 = vrot.lane.b32.xlu0 %v9721_v21, %s9629_s24 }
  0xb9   : > { %1223 = vrot.lane.b32.xlu1 %v9726_v23, %s9629_s24  ;;  %1221 = vrot.lane.b32.xlu0 %v9729_v24, %s9629_s24 }
  0xbd   : > { %1543 = vrot.lane.b32.xlu1 %v9701_v13, %s9630_s25  ;;  %1225 = vrot.lane.b32.xlu0 %v9734_v25, %s9629_s24 }
  0xc1   : > { %1541 = vrot.lane.b32.xlu1 %v9710_v17, %s9630_s25  ;;  %1545 = vrot.lane.b32.xlu0 %v9704_v14, %s9630_s25 }
  0xc5   : > { %1549 = vrot.lane.b32.xlu1 %v9721_v21, %s9630_s25  ;;  %1547 = vrot.lane.b32.xlu0 %v9713_v18, %s9630_s25 }
  0xc9   : > { %1553 = vrot.lane.b32.xlu1 %v9729_v24, %s9630_s25  ;;  %1551 = vrot.lane.b32.xlu0 %v9718_v19, %s9630_s25 }
  0xcd   : > { %1557 = vrot.lane.b32.xlu1 %v9734_v25, %s9630_s25  ;;  %1555 = vrot.lane.b32.xlu0 %v9726_v23, %s9630_s25  ;;  %s9639_s25 = smov 17  }
  0xd1   : > { %1877 = vrot.lane.b32.xlu1 %v9704_v14, %s9631_s26  ;;  %1875 = vrot.lane.b32.xlu0 %v9701_v13, %s9631_s26 }
  0xd5   : > { %1879 = vrot.lane.b32.xlu1 %v9713_v18, %s9631_s26  ;;  %1873 = vrot.lane.b32.xlu0 %v9710_v17, %s9631_s26 }
  0xd9   : > { %1883 = vrot.lane.b32.xlu1 %v9718_v19, %s9631_s26  ;;  %1881 = vrot.lane.b32.xlu0 %v9721_v21, %s9631_s26 }
  0xdd   : > { %1887 = vrot.lane.b32.xlu1 %v9726_v23, %s9631_s26  ;;  %1885 = vrot.lane.b32.xlu0 %v9729_v24, %s9631_s26 }
  0xe1   : > { %2207 = vrot.lane.b32.xlu1 %v9701_v13, %s9632_s27  ;;  %1889 = vrot.lane.b32.xlu0 %v9734_v25, %s9631_s26  ;;  %s9647_s26 = smov 46  }
  0xe5   : > { %2205 = vrot.lane.b32.xlu1 %v9710_v17, %s9632_s27  ;;  %2209 = vrot.lane.b32.xlu0 %v9704_v14, %s9632_s27 }
  0xe9   : > { %2213 = vrot.lane.b32.xlu1 %v9721_v21, %s9632_s27  ;;  %2211 = vrot.lane.b32.xlu0 %v9713_v18, %s9632_s27 }
  0xed   : > { %2217 = vrot.lane.b32.xlu1 %v9729_v24, %s9632_s27  ;;  %2215 = vrot.lane.b32.xlu0 %v9718_v19, %s9632_s27 }
  0xf1   : > { %2221 = vrot.lane.b32.xlu1 %v9734_v25, %s9632_s27  ;;  %2219 = vrot.lane.b32.xlu0 %v9726_v23, %s9632_s27 }
  0xf5   : > { %2541 = vrot.lane.b32.xlu1 %v9704_v14, %s9633_s28  ;;  %2539 = vrot.lane.b32.xlu0 %v9701_v13, %s9633_s28 }
  0xf9   : > { %2543 = vrot.lane.b32.xlu1 %v9713_v18, %s9633_s28  ;;  %2537 = vrot.lane.b32.xlu0 %v9710_v17, %s9633_s28 }
  0xfb   : > { %v270_v26 = vpop.permute.xlu1 %269  ;;  %v268_v27 = vpop.permute.xlu0 %267 }
  0xfc   : > { %v285_v28 = vsel %vm283_vm1, %v268_v27, %v270_v26 }
  0xfd   : > { %2547 = vrot.lane.b32.xlu1 %v9718_v19, %s9633_s28  ;;  %2545 = vrot.lane.b32.xlu0 %v9721_v21, %s9633_s28 }
  0xfe   : > { %334 = vmatprep.subr.mxu0 %v285_v28 }
  0xff   : > { %v272_v29 = vpop.permute.xlu1 %271  ;;  %v266_v30 = vpop.permute.xlu0 %265 }
 0x100   : > { %v284_v31 = vsel %vm283_vm1, %v266_v30, %v268_v27  ;;  %v286_v36 = vsel %vm283_vm1, %v270_v26, %v272_v29 }
 0x101   : > { %2551 = vrot.lane.b32.xlu1 %v9726_v23, %s9633_s28  ;;  %2549 = vrot.lane.b32.xlu0 %v9729_v24, %s9633_s28 }
 0x102   : > { %335 = vmatpush1.msra.mxu0 %v284_v31 }
 0x103   : > { %v276_v33 = vpop.permute.xlu1 %275  ;;  %v274_v34 = vpop.permute.xlu0 %273  ;;  %9441 = vmatmul.mubr.msk.f32.vlgmr.msra.gmra.mxu0 %vm300_vm2, %v9440_v32 }
 0x104   : > { %v287_v35 = vsel %vm283_vm1, %v272_v29, %v274_v34  ;;  %510 = vmatprep.mubr.f32.mxu0 %v9626_v12  ;;  %v288_v40 = vsel %vm283_vm1, %v274_v34, %v276_v33 }
 0x105   : > { %2871 = vrot.lane.b32.xlu1 %v9701_v13, %s9634_s5  ;;  %2553 = vrot.lane.b32.xlu0 %v9734_v25, %s9633_s28  ;;  %s9640_s28 = smov 16  }
 0x106   : > { %405 = vmatprep.subr.mxu1 %v287_v35 }
 0x107   : > { %406 = vmatpush1.msra.mxu1 %v286_v36  ;;  %v280_v37 = vpop.permute.xlu1 %279  ;;  %v278_v38 = vpop.permute.xlu0 %277 }
 0x108   : > { %v289_v39 = vsel %vm283_vm1, %v276_v33, %v278_v38  ;;  %9442 = vmatmul.mubr.msk.f32.vlgmr.msra.gmra.mxu1 %vm300_vm2, %v9440_v32  ;;  %v290_v44 = vsel %vm283_vm1, %v278_v38, %v280_v37 }
 0x109   : > { %2869 = vrot.lane.b32.xlu1 %v9710_v17, %s9634_s5  ;;  %2873 = vrot.lane.b32.xlu0 %v9704_v14, %s9634_s5 }
 0x10a   : > { %476 = vmatprep.subr.mxu0 %v289_v39  ;;  %581 = vmatprep.mubr.f32.mxu1 %v9626_v12 }
 0x10b   : > { %477 = vmatpush1.msra.mxu0 %v288_v40  ;;  %v880_v41 = vpop.permute.xlu1 %879  ;;  %v282_v42 = vpop.permute.xlu0 %281 }
 0x10c   : > { %9443 = vmatmul.mubr.msk.f32.vlgmr.msra.gmra.mxu0 %vm300_vm2, %v9440_v32  ;;  %621 = vmatprep.subr.mxu0 %v9701_v13  ;;  %v291_v43 = vsel %vm283_vm1, %v280_v37, %v282_v42  ;;  %vm5542_vm1 = vcmask 56320  }
 0x10d   : > { %9446 = vmatpush1.msk.msra.mxu0 %vm9445_vm3, %v9695_v9  ;;  %2877 = vrot.lane.b32.xlu1 %v9721_v21, %s9634_s5  ;;  %vm5874_vm3 = vcmask 48128  }
 0x10e   : > { %2875 = vrot.lane.b32.xlu0 %v9713_v18, %s9634_s5  ;;  %547 = vmatprep.subr.mxu1 %v291_v43 }
 0x10f   : > { %763 = vmatprep.subr.mxu0 %v9718_v19  ;;  %548 = vmatpush1.msra.mxu1 %v290_v44  ;;  %v878_v46 = vpop.permute.xlu1 %877  ;;  %v882_v47 = vpop.permute.xlu0 %881 }
 0x110   : > { %655 = vmatprep.mubr.f32.mxu0 %v9626_v12  ;;  %9444 = vmatmul.mubr.msk.f32.vlgmr.msra.gmra.mxu1 %vm300_vm2, %v9440_v32  ;;  %v897_v48 = vsel %vm895_vm4, %v880_v41, %v882_v47  ;;  %v896_v51 = vsel %vm895_vm4, %v878_v46, %v880_v41  ;;  %v9461_v32 = vld [vmem:[%s11089_s1 + $0x20] sm:$0xff] }
 0x111   : > { %9447 = vmatmul.mubr.msk.f32.vlgmr.msra.gmra.mxu0 %vm300_vm2, %v260_v45  ;;  %692 = vmatprep.subr.mxu1 %v9713_v18 }
 0x112   : > { %764 = vmatpush1.msra.mxu0 %v9721_v21  ;;  %693 = vmatpush1.msra.mxu1 %v9704_v14 }
 0x113   : > { %2881 = vrot.lane.b32.xlu1 %v9729_v24, %s9634_s5  ;;  %2879 = vrot.lane.b32.xlu0 %v9718_v19, %s9634_s5  ;;  %v886_v49 = vpop.permute.xlu1 %885  ;;  %v884_v50 = vpop.permute.xlu0 %883 }
 0x114   : > { %834 = vmatprep.subr.mxu1 %v9726_v23  ;;  %945 = vmatprep.subr.mxu0 %v897_v48  ;;  %v899_v52 = vsel %vm895_vm4, %v884_v50, %v886_v49  ;;  %v898_v56 = vsel %vm895_vm4, %v882_v47, %v884_v50  ;;  %v9466_v50 = vld [vmem:[%s11089_s1 + $0x28] sm:$0xff] }
 0x115   : > { %726 = vmatprep.mubr.f32.mxu1 %v9626_v12  ;;  %797 = vmatprep.mubr.f32.mxu0 %v9626_v12 }
 0x116   : > { %9448 = vmatmul.mubr.msk.f32.vlgmr.msra.gmra.mxu1 %vm300_vm2, %v260_v45  ;;  %9449 = vmatmul.mubr.msk.f32.vlgmr.msra.gmra.mxu0 %vm300_vm2, %v260_v45 }
 0x117   : > { %835 = vmatpush1.msra.mxu1 %v9729_v24  ;;  %946 = vmatpush1.msra.mxu0 %v896_v51  ;;  %v890_v53 = vpop.permute.xlu1 %889  ;;  %v888_v54 = vpop.permute.xlu0 %887 }
 0x118   : > { %2885 = vrot.lane.b32.xlu1 %v9734_v25, %s9634_s5  ;;  %2883 = vrot.lane.b32.xlu0 %v9726_v23, %s9634_s5  ;;  %v901_v55 = vsel %vm895_vm4, %v888_v54, %v890_v53  ;;  %v900_v58 = vsel %vm895_vm4, %v886_v49, %v888_v54  ;;  %s9641_s5 = smov 8  }
 0x119   : > { %1016 = vmatprep.subr.mxu1 %v899_v52  ;;  %868 = vmatprep.mubr.f32.mxu1 %v9626_v12 }
 0x11a   : > { %9450 = vmatmul.mubr.msk.f32.vlgmr.msra.gmra.mxu1 %vm300_vm2, %v260_v45  ;;  %979 = vmatprep.mubr.f32.mxu0 %v9626_v12 }
 0x11b   : > { %1017 = vmatpush1.msra.mxu1 %v898_v56  ;;  %1087 = vmatprep.subr.mxu0 %v901_v55  ;;  %v894_v59 = vpop.permute.xlu1 %893  ;;  %v892_v60 = vpop.permute.xlu0 %891 }
 0x11c   : > { %3205 = vrot.lane.b32.xlu1 %v9704_v14, %s9635_s10  ;;  %3203 = vrot.lane.b32.xlu0 %v9701_v13, %s9635_s10  ;;  %v903_v61 = vsel %vm895_vm4, %v892_v60, %v894_v59  ;;  %v902_v62 = vsel %vm895_vm4, %v890_v53, %v892_v60  ;;  %vm6207_vm4 = vcmask 457728  }
 0x11d   : > { %9452 = vmatmul.mubr.msk.f32.vlgmr.msra.gmra.mxu0 %vm300_vm2, %v9451_v57  ;;  %1050 = vmatprep.mubr.f32.mxu1 %v9626_v12 }
 0x11e   : > { %1088 = vmatpush1.msra.mxu0 %v900_v58  ;;  %1158 = vmatprep.subr.mxu1 %v903_v61 }
 0x11f   : > { %9453 = vmatmul.mubr.msk.f32.vlgmr.msra.gmra.mxu1 %vm300_vm2, %v9451_v57  ;;  %v1214_v63 = vpop.permute.xlu1 %1213  ;;  %v1212_v0 = vpop.permute.xlu0 %1211  ;;  %1121 = vmatprep.mubr.f32.mxu0 %v9626_v12 }
 0x120   : > { %3207 = vrot.lane.b32.xlu1 %v9713_v18, %s9635_s10  ;;  %3201 = vrot.lane.b32.xlu0 %v9710_v17, %s9635_s10  ;;  %v1229_v1 = vsel %vm1227_vm5, %v1212_v0, %v1214_v63 }
 0x121   : > { %1159 = vmatpush1.msra.mxu1 %v902_v62  ;;  %1277 = vmatprep.subr.mxu0 %v1229_v1 }
 0x122   : > { %9454 = vmatmul.mubr.msk.f32.vlgmr.msra.gmra.mxu0 %vm300_vm2, %v9451_v57  ;;  %1192 = vmatprep.mubr.f32.mxu1 %v9626_v12 }
 0x123   : > { %v1216_v2 = vpop.permute.xlu1 %1215  ;;  %v1210_v3 = vpop.permute.xlu0 %1209  ;;  %9455 = vmatmul.mubr.msk.f32.vlgmr.msra.gmra.mxu1 %vm300_vm2, %v9451_v57  ;;  %1311 = vmatprep.mubr.f32.mxu0 %v9626_v12 }
 0x124   : > { %3211 = vrot.lane.b32.xlu1 %v9718_v19, %s9635_s10  ;;  %3209 = vrot.lane.b32.xlu0 %v9721_v21, %s9635_s10  ;;  %v1228_v5 = vsel %vm1227_vm5, %v1210_v3, %v1212_v0  ;;  %v1230_v9 = vsel %vm1227_vm5, %v1214_v63, %v1216_v2 }
 0x125   : > { %1278 = vmatpush1.msra.mxu0 %v1228_v5  ;;  %1382 = vmatprep.mubr.f32.mxu1 %v9626_v12 }
 0x126   : > { %9457 = vmatmul.mubr.msk.f32.vlgmr.msra.gmra.mxu0 %vm300_vm2, %v9456_v4 }
 0x127   : > { %v1220_v6 = vpop.permute.xlu1 %1219  ;;  %v1218_v7 = vpop.permute.xlu0 %1217  ;;  %1453 = vmatprep.mubr.f32.mxu0 %v9626_v12 }
 0x128   : > { %3215 = vrot.lane.b32.xlu1 %v9726_v23, %s9635_s10  ;;  %3213 = vrot.lane.b32.xlu0 %v9729_v24, %s9635_s10  ;;  %v1231_v8 = vsel %vm1227_vm5, %v1216_v2, %v1218_v7  ;;  %v1232_v16 = vsel %vm1227_vm5, %v1218_v7, %v1220_v6 }
 0x129   : > { %1348 = vmatprep.subr.mxu1 %v1231_v8 }
 0x12a   : > { %1349 = vmatpush1.msra.mxu1 %v1230_v9 }
 0x12b   : > { %v1224_v10 = vpop.permute.xlu1 %1223  ;;  %v1222_v11 = vpop.permute.xlu0 %1221  ;;  %9458 = vmatmul.mubr.msk.f32.vlgmr.msra.gmra.mxu1 %vm300_vm2, %v9456_v4 }
 0x12c   : > { %3535 = vrot.lane.b32.xlu1 %v9701_v13, %s9636_s13  ;;  %3217 = vrot.lane.b32.xlu0 %v9734_v25, %s9635_s10  ;;  %v1233_v15 = vsel %vm1227_vm5, %v1220_v6, %v1222_v11  ;;  %v1234_v27 = vsel %vm1227_vm5, %v1222_v11, %v1224_v10 }
 0x12d   : > { %1419 = vmatprep.subr.mxu0 %v1233_v15  ;;  %1524 = vmatprep.mubr.f32.mxu1 %v9626_v12 }
 0x12e   : > { %1420 = vmatpush1.msra.mxu0 %v1232_v16 }
 0x12f   : > { %v1544_v20 = vpop.permute.xlu1 %1543  ;;  %v1226_v22 = vpop.permute.xlu0 %1225  ;;  %9459 = vmatmul.mubr.msk.f32.vlgmr.msra.gmra.mxu0 %vm300_vm2, %v9456_v4 }
 0x130   : > { %3533 = vrot.lane.b32.xlu1 %v9710_v17, %s9636_s13  ;;  %3537 = vrot.lane.b32.xlu0 %v9704_v14, %s9636_s13  ;;  %v1235_v26 = vsel %vm1227_vm5, %v1224_v10, %v1226_v22  ;;  %vm6539_vm5 = vcmask 449536  }
 0x131   : > { %1490 = vmatprep.subr.mxu1 %v1235_v26  ;;  %1643 = vmatprep.mubr.f32.mxu0 %v9626_v12 }
 0x132   : > { %1491 = vmatpush1.msra.mxu1 %v1234_v27 }
 0x133   : > { %v1542_v28 = vpop.permute.xlu1 %1541  ;;  %v1546_v29 = vpop.permute.xlu0 %1545  ;;  %9460 = vmatmul.mubr.msk.f32.vlgmr.msra.gmra.mxu1 %vm300_vm2, %v9456_v4  ;;  %v9471_v4 = vld [vmem:[%s11089_s1 + $0x30] sm:$0xff] }
 0x134   : > { %3541 = vrot.lane.b32.xlu1 %v9721_v21, %s9636_s13  ;;  %3539 = vrot.lane.b32.xlu0 %v9713_v18, %s9636_s13  ;;  %v1560_v30 = vsel %vm1559_vm6, %v1542_v28, %v1544_v20  ;;  %v1561_v31 = vsel %vm1559_vm6, %v1544_v20, %v1546_v29 }
 0x135   : > { %1609 = vmatprep.subr.mxu0 %v1561_v31  ;;  %1714 = vmatprep.mubr.f32.mxu1 %v9626_v12 }
 0x136   : > { %1610 = vmatpush1.msra.mxu0 %v1560_v30 }
 0x137   : > { %v1550_v33 = vpop.permute.xlu1 %1549  ;;  %v1548_v34 = vpop.permute.xlu0 %1547  ;;  %9462 = vmatmul.mubr.msk.f32.vlgmr.msra.gmra.mxu0 %vm300_vm2, %v9461_v32 }
 0x138   : > { %3545 = vrot.lane.b32.xlu1 %v9729_v24, %s9636_s13  ;;  %3543 = vrot.lane.b32.xlu0 %v9718_v19, %s9636_s13  ;;  %v1563_v35 = vsel %vm1559_vm6, %v1548_v34, %v1550_v33  ;;  %v1562_v36 = vsel %vm1559_vm6, %v1546_v29, %v1548_v34 }
 0x139   : > { %1680 = vmatprep.subr.mxu1 %v1563_v35  ;;  %1785 = vmatprep.mubr.f32.mxu0 %v9626_v12 }
 0x13a   : > { %1681 = vmatpush1.msra.mxu1 %v1562_v36 }
 0x13b   : > { %v1554_v37 = vpop.permute.xlu1 %1553  ;;  %v1552_v38 = vpop.permute.xlu0 %1551  ;;  %9463 = vmatmul.mubr.msk.f32.vlgmr.msra.gmra.mxu1 %vm300_vm2, %v9461_v32 }
 0x13c   : > { %3549 = vrot.lane.b32.xlu1 %v9734_v25, %s9636_s13  ;;  %3547 = vrot.lane.b32.xlu0 %v9726_v23, %s9636_s13  ;;  %v1565_v39 = vsel %vm1559_vm6, %v1552_v38, %v1554_v37  ;;  %v1564_v40 = vsel %vm1559_vm6, %v1550_v33, %v1552_v38 }
 0x13d   : > { %1751 = vmatprep.subr.mxu0 %v1565_v39  ;;  %1856 = vmatprep.mubr.f32.mxu1 %v9626_v12 }
 0x13e   : > { %1752 = vmatpush1.msra.mxu0 %v1564_v40 }
 0x13f   : > { %v1558_v41 = vpop.permute.xlu1 %1557  ;;  %v1556_v42 = vpop.permute.xlu0 %1555  ;;  %9464 = vmatmul.mubr.msk.f32.vlgmr.msra.gmra.mxu0 %vm300_vm2, %v9461_v32 }
 0x140   : > { %3869 = vrot.lane.b32.xlu1 %v9704_v14, %s9637_s19  ;;  %3867 = vrot.lane.b32.xlu0 %v9701_v13, %s9637_s19  ;;  %v1567_v43 = vsel %vm1559_vm6, %v1556_v42, %v1558_v41  ;;  %v1566_v44 = vsel %vm1559_vm6, %v1554_v37, %v1556_v42  ;;  %vm6871_vm6 = vcmask 441344  }
 0x141   : > { %1822 = vmatprep.subr.mxu1 %v1567_v43  ;;  %1975 = vmatprep.mubr.f32.mxu0 %v9626_v12 }
 0x142   : > { %1823 = vmatpush1.msra.mxu1 %v1566_v44 }
 0x143   : > { %v1878_v45 = vpop.permute.xlu1 %1877  ;;  %v1876_v46 = vpop.permute.xlu0 %1875  ;;  %9465 = vmatmul.mubr.msk.f32.vlgmr.msra.gmra.mxu1 %vm300_vm2, %v9461_v32  ;;  %v9476_v32 = vld [vmem:[%s11089_s1 + $0x38] sm:$0xff] }
 0x144   : > { %3871 = vrot.lane.b32.xlu1 %v9713_v18, %s9637_s19  ;;  %3865 = vrot.lane.b32.xlu0 %v9710_v17, %s9637_s19  ;;  %v1893_v47 = vsel %vm1891_vm7, %v1876_v46, %v1878_v45 }
 0x145   : > { %1941 = vmatprep.subr.mxu0 %v1893_v47  ;;  %2046 = vmatprep.mubr.f32.mxu1 %v9626_v12 }
 0x147   : > { %v1880_v48 = vpop.permute.xlu1 %1879  ;;  %v1874_v49 = vpop.permute.xlu0 %1873 }
 0x148   : > { %3875 = vrot.lane.b32.xlu1 %v9718_v19, %s9637_s19  ;;  %3873 = vrot.lane.b32.xlu0 %v9721_v21, %s9637_s19  ;;  %v1892_v51 = vsel %vm1891_vm7, %v1874_v49, %v1876_v46  ;;  %v1894_v55 = vsel %vm1891_vm7, %v1878_v45, %v1880_v48 }
 0x149   : > { %1942 = vmatpush1.msra.mxu0 %v1892_v51 }
 0x14a   : > { %9467 = vmatmul.mubr.msk.f32.vlgmr.msra.gmra.mxu0 %vm300_vm2, %v9466_v50 }
 0x14b   : > { %v1884_v52 = vpop.permute.xlu1 %1883  ;;  %v1882_v53 = vpop.permute.xlu0 %1881  ;;  %2117 = vmatprep.mubr.f32.mxu0 %v9626_v12 }
 0x14c   : > { %3879 = vrot.lane.b32.xlu1 %v9726_v23, %s9637_s19  ;;  %3877 = vrot.lane.b32.xlu0 %v9729_v24, %s9637_s19  ;;  %v1895_v54 = vsel %vm1891_vm7, %v1880_v48, %v1882_v53  ;;  %v1896_v59 = vsel %vm1891_vm7, %v1882_v53, %v1884_v52 }
 0x14d   : > { %2012 = vmatprep.subr.mxu1 %v1895_v54 }
 0x14e   : > { %2013 = vmatpush1.msra.mxu1 %v1894_v55 }
 0x14f   : > { %v1888_v56 = vpop.permute.xlu1 %1887  ;;  %v1886_v57 = vpop.permute.xlu0 %1885  ;;  %9468 = vmatmul.mubr.msk.f32.vlgmr.msra.gmra.mxu1 %vm300_vm2, %v9466_v50 }
 0x150   : > { %4199 = vrot.lane.b32.xlu1 %v9701_v13, %s9638_s22  ;;  %3881 = vrot.lane.b32.xlu0 %v9734_v25, %s9637_s19  ;;  %v1897_v58 = vsel %vm1891_vm7, %v1884_v52, %v1886_v57  ;;  %v1898_v63 = vsel %vm1891_vm7, %v1886_v57, %v1888_v56 }
 0x151   : > { %2083 = vmatprep.subr.mxu0 %v1897_v58  ;;  %2188 = vmatprep.mubr.f32.mxu1 %v9626_v12 }
 0x152   : > { %2084 = vmatpush1.msra.mxu0 %v1896_v59 }
 0x153   : > { %v2208_v60 = vpop.permute.xlu1 %2207  ;;  %v1890_v61 = vpop.permute.xlu0 %1889  ;;  %9469 = vmatmul.mubr.msk.f32.vlgmr.msra.gmra.mxu0 %vm300_vm2, %v9466_v50 }
 0x154   : > { %4197 = vrot.lane.b32.xlu1 %v9710_v17, %s9638_s22  ;;  %4201 = vrot.lane.b32.xlu0 %v9704_v14, %s9638_s22  ;;  %v1899_v62 = vsel %vm1891_vm7, %v1888_v56, %v1890_v61  ;;  %vm7203_vm7 = vcmask 375808  }
 0x155   : > { %2154 = vmatprep.subr.mxu1 %v1899_v62  ;;  %2307 = vmatprep.mubr.f32.mxu0 %v9626_v12 }
 0x156   : > { %2155 = vmatpush1.msra.mxu1 %v1898_v63 }
 0x157   : > { %v2206_v0 = vpop.permute.xlu1 %2205  ;;  %v2210_v1 = vpop.permute.xlu0 %2209  ;;  %9470 = vmatmul.mubr.msk.f32.vlgmr.msra.gmra.mxu1 %vm300_vm2, %v9466_v50  ;;  %v9481_v50 = vld [vmem:[%s11089_s1 + $0x40] sm:$0xff] }
 0x158   : > { %4205 = vrot.lane.b32.xlu1 %v9721_v21, %s9638_s22  ;;  %4203 = vrot.lane.b32.xlu0 %v9713_v18, %s9638_s22  ;;  %v2224_v2 = vsel %vm2223_vm8, %v2206_v0, %v2208_v60  ;;  %v2225_v3 = vsel %vm2223_vm8, %v2208_v60, %v2210_v1 }
 0x159   : > { %2273 = vmatprep.subr.mxu0 %v2225_v3  ;;  %2378 = vmatprep.mubr.f32.mxu1 %v9626_v12 }
 0x15a   : > { %2274 = vmatpush1.msra.mxu0 %v2224_v2 }
 0x15b   : > { %v2214_v5 = vpop.permute.xlu1 %2213  ;;  %v2212_v6 = vpop.permute.xlu0 %2211  ;;  %9472 = vmatmul.mubr.msk.f32.vlgmr.msra.gmra.mxu0 %vm300_vm2, %v9471_v4 }
 0x15c   : > { %4209 = vrot.lane.b32.xlu1 %v9729_v24, %s9638_s22  ;;  %4207 = vrot.lane.b32.xlu0 %v9718_v19, %s9638_s22  ;;  %v2227_v7 = vsel %vm2223_vm8, %v2212_v6, %v2214_v5  ;;  %v2226_v8 = vsel %vm2223_vm8, %v2210_v1, %v2212_v6 }
 0x15d   : > { %2344 = vmatprep.subr.mxu1 %v2227_v7  ;;  %2449 = vmatprep.mubr.f32.mxu0 %v9626_v12 }
 0x15e   : > { %2345 = vmatpush1.msra.mxu1 %v2226_v8 }
 0x15f   : > { %v2218_v9 = vpop.permute.xlu1 %2217  ;;  %v2216_v10 = vpop.permute.xlu0 %2215  ;;  %9473 = vmatmul.mubr.msk.f32.vlgmr.msra.gmra.mxu1 %vm300_vm2, %v9471_v4 }
 0x160   : > { %4213 = vrot.lane.b32.xlu1 %v9734_v25, %s9638_s22  ;;  %4211 = vrot.lane.b32.xlu0 %v9726_v23, %s9638_s22  ;;  %v2229_v11 = vsel %vm2223_vm8, %v2216_v10, %v2218_v9  ;;  %v2228_v15 = vsel %vm2223_vm8, %v2214_v5, %v2216_v10  ;;  %v9486_v5 = vld [vmem:[%s11089_s1 + $0x48] sm:$0xff] }
 0x161   : > { %2415 = vmatprep.subr.mxu0 %v2229_v11  ;;  %2520 = vmatprep.mubr.f32.mxu1 %v9626_v12 }
 0x162   : > { %2416 = vmatpush1.msra.mxu0 %v2228_v15 }
 0x163   : > { %v2222_v16 = vpop.permute.xlu1 %2221  ;;  %v2220_v20 = vpop.permute.xlu0 %2219  ;;  %9474 = vmatmul.mubr.msk.f32.vlgmr.msra.gmra.mxu0 %vm300_vm2, %v9471_v4 }
 0x164   : > { %4533 = vrot.lane.b32.xlu1 %v9704_v14, %s9639_s25  ;;  %4531 = vrot.lane.b32.xlu0 %v9701_v13, %s9639_s25  ;;  %v2231_v22 = vsel %vm2223_vm8, %v2220_v20, %v2222_v16  ;;  %v2230_v26 = vsel %vm2223_vm8, %v2218_v9, %v2220_v20  ;;  %vm7535_vm8 = vcmask 367616  }
 0x165   : > { %2486 = vmatprep.subr.mxu1 %v2231_v22  ;;  %2639 = vmatprep.mubr.f32.mxu0 %v9626_v12 }
 0x166   : > { %2487 = vmatpush1.msra.mxu1 %v2230_v26 }
 0x167   : > { %v2542_v27 = vpop.permute.xlu1 %2541  ;;  %v2540_v28 = vpop.permute.xlu0 %2539  ;;  %9475 = vmatmul.mubr.msk.f32.vlgmr.msra.gmra.mxu1 %vm300_vm2, %v9471_v4 }
 0x168   : > { %4535 = vrot.lane.b32.xlu1 %v9713_v18, %s9639_s25  ;;  %4529 = vrot.lane.b32.xlu0 %v9710_v17, %s9639_s25  ;;  %v2557_v29 = vsel %vm2555_vm9, %v2540_v28, %v2542_v27 }
 0x169   : > { %2605 = vmatprep.subr.mxu0 %v2557_v29  ;;  %2710 = vmatprep.mubr.f32.mxu1 %v9626_v12 }
 0x16b   : > { %v2544_v30 = vpop.permute.xlu1 %2543  ;;  %v2538_v31 = vpop.permute.xlu0 %2537 }
 0x16c   : > { %4539 = vrot.lane.b32.xlu1 %v9718_v19, %s9639_s25  ;;  %4537 = vrot.lane.b32.xlu0 %v9721_v21, %s9639_s25  ;;  %v2556_v33 = vsel %vm2555_vm9, %v2538_v31, %v2540_v28  ;;  %v2558_v37 = vsel %vm2555_vm9, %v2542_v27, %v2544_v30 }
 0x16d   : > { %2606 = vmatpush1.msra.mxu0 %v2556_v33 }
 0x16e   : > { %9477 = vmatmul.mubr.msk.f32.vlgmr.msra.gmra.mxu0 %vm300_vm2, %v9476_v32 }
 0x16f   : > { %v2548_v34 = vpop.permute.xlu1 %2547  ;;  %v2546_v35 = vpop.permute.xlu0 %2545  ;;  %2781 = vmatprep.mubr.f32.mxu0 %v9626_v12 }
 0x170   : > { %4543 = vrot.lane.b32.xlu1 %v9726_v23, %s9639_s25  ;;  %4541 = vrot.lane.b32.xlu0 %v9729_v24, %s9639_s25  ;;  %v2559_v36 = vsel %vm2555_vm9, %v2544_v30, %v2546_v35  ;;  %v2560_v41 = vsel %vm2555_vm9, %v2546_v35, %v2548_v34 }
 0x171   : > { %2676 = vmatprep.subr.mxu1 %v2559_v36 }
 0x172   : > { %2677 = vmatpush1.msra.mxu1 %v2558_v37 }
 0x173   : > { %v2552_v38 = vpop.permute.xlu1 %2551  ;;  %v2550_v39 = vpop.permute.xlu0 %2549  ;;  %9478 = vmatmul.mubr.msk.f32.vlgmr.msra.gmra.mxu1 %vm300_vm2, %v9476_v32 }
 0x174   : > { %4863 = vrot.lane.b32.xlu1 %v9701_v13, %s9640_s28  ;;  %4545 = vrot.lane.b32.xlu0 %v9734_v25, %s9639_s25  ;;  %v2561_v40 = vsel %vm2555_vm9, %v2548_v34, %v2550_v39  ;;  %v2562_v45 = vsel %vm2555_vm9, %v2550_v39, %v2552_v38 }
 0x175   : > { %2747 = vmatprep.subr.mxu0 %v2561_v40  ;;  %2852 = vmatprep.mubr.f32.mxu1 %v9626_v12 }
 0x176   : > { %2748 = vmatpush1.msra.mxu0 %v2560_v41 }
 0x177   : > { %v2872_v42 = vpop.permute.xlu1 %2871  ;;  %v2554_v43 = vpop.permute.xlu0 %2553  ;;  %9479 = vmatmul.mubr.msk.f32.vlgmr.msra.gmra.mxu0 %vm300_vm2, %v9476_v32 }
 0x178   : > { %4861 = vrot.lane.b32.xlu1 %v9710_v17, %s9640_s28  ;;  %4865 = vrot.lane.b32.xlu0 %v9704_v14, %s9640_s28  ;;  %v2563_v44 = vsel %vm2555_vm9, %v2552_v38, %v2554_v43  ;;  %vm7867_vm9 = vcmask 359424  }
 0x179   : > { %2818 = vmatprep.subr.mxu1 %v2563_v44  ;;  %2971 = vmatprep.mubr.f32.mxu0 %v9626_v12 }
 0x17a   : > { %2819 = vmatpush1.msra.mxu1 %v2562_v45 }
 0x17b   : > { %v2870_v46 = vpop.permute.xlu1 %2869  ;;  %v2874_v47 = vpop.permute.xlu0 %2873  ;;  %9480 = vmatmul.mubr.msk.f32.vlgmr.msra.gmra.mxu1 %vm300_vm2, %v9476_v32  ;;  %v9491_v32 = vld [vmem:[%s11089_s1 + $0x50] sm:$0xff] }
 0x17c   : > { %4869 = vrot.lane.b32.xlu1 %v9721_v21, %s9640_s28  ;;  %4867 = vrot.lane.b32.xlu0 %v9713_v18, %s9640_s28  ;;  %v2888_v48 = vsel %vm2887_vm10, %v2870_v46, %v2872_v42  ;;  %v2889_v49 = vsel %vm2887_vm10, %v2872_v42, %v2874_v47 }
 0x17d   : > { %2937 = vmatprep.subr.mxu0 %v2889_v49  ;;  %3042 = vmatprep.mubr.f32.mxu1 %v9626_v12 }
 0x17e   : > { %2938 = vmatpush1.msra.mxu0 %v2888_v48 }
 0x17f   : > { %v2878_v51 = vpop.permute.xlu1 %2877  ;;  %9482 = vmatmul.mubr.msk.f32.vlgmr.msra.gmra.mxu0 %vm300_vm2, %v9481_v50 }
 0x180   : > { %4873 = vrot.lane.b32.xlu1 %v9729_v24, %s9640_s28  ;;  %4871 = vrot.lane.b32.xlu0 %v9718_v19, %s9640_s28  ;;  %v2876_v52 = vpop.permute.xlu0 %2875 }
 0x181   : > { %v2891_v53 = vsel %vm2887_vm10, %v2876_v52, %v2878_v51  ;;  %v2890_v54 = vsel %vm2887_vm10, %v2874_v47, %v2876_v52  ;;  %3113 = vmatprep.mubr.f32.mxu0 %v9626_v12 }
 0x182   : > { %3008 = vmatprep.subr.mxu1 %v2891_v53 }
 0x183   : > { %3009 = vmatpush1.msra.mxu1 %v2890_v54 }
 0x184   : > { %4877 = vrot.lane.b32.xlu1 %v9734_v25, %s9640_s28  ;;  %4875 = vrot.lane.b32.xlu0 %v9726_v23, %s9640_s28 }
 0x185   : > { %v2882_v55 = vpop.permute.xlu1 %2881  ;;  %v2880_v56 = vpop.permute.xlu0 %2879  ;;  %9483 = vmatmul.mubr.msk.f32.vlgmr.msra.gmra.mxu1 %vm300_vm2, %v9481_v50 }
 0x186   : > { %v2893_v57 = vsel %vm2887_vm10, %v2880_v56, %v2882_v55  ;;  %v2892_v58 = vsel %vm2887_vm10, %v2878_v51, %v2880_v56  ;;  %3184 = vmatprep.mubr.f32.mxu1 %v9626_v12 }
 0x187   : > { %3079 = vmatprep.subr.mxu0 %v2893_v57 }
 0x188   : > { %5197 = vrot.lane.b32.xlu1 %v9704_v14, %s9641_s5  ;;  %5195 = vrot.lane.b32.xlu0 %v9701_v13, %s9641_s5 }
 0x189   : > { %3080 = vmatpush1.msra.mxu0 %v2892_v58 }
 0x18a   : > { %v2886_v59 = vpop.permute.xlu1 %2885  ;;  %v2884_v60 = vpop.permute.xlu0 %2883  ;;  %9484 = vmatmul.mubr.msk.f32.vlgmr.msra.gmra.mxu0 %vm300_vm2, %v9481_v50 }
 0x18b   : > { %v2895_v61 = vsel %vm2887_vm10, %v2884_v60, %v2886_v59  ;;  %v2894_v62 = vsel %vm2887_vm10, %v2882_v55, %v2884_v60  ;;  %3303 = vmatprep.mubr.f32.mxu0 %v9626_v12  ;;  %vm8199_vm10 = vcmask 293888  }
 0x18c   : > { %5199 = vrot.lane.b32.xlu1 %v9713_v18, %s9641_s5  ;;  %5193 = vrot.lane.b32.xlu0 %v9710_v17, %s9641_s5 }
 0x18d   : > { %3150 = vmatprep.subr.mxu1 %v2895_v61 }
 0x18e   : > { %3151 = vmatpush1.msra.mxu1 %v2894_v62  ;;  %v3206_v63 = vpop.permute.xlu1 %3205  ;;  %v3204_v0 = vpop.permute.xlu0 %3203 }
 0x18f   : > { %v3221_v1 = vsel %vm3219_vm11, %v3204_v0, %v3206_v63  ;;  %9485 = vmatmul.mubr.msk.f32.vlgmr.msra.gmra.mxu1 %vm300_vm2, %v9481_v50  ;;  %v9496_v50 = vld [vmem:[%s11089_s1 + $0x58] sm:$0xff] }
 0x190   : > { %5203 = vrot.lane.b32.xlu1 %v9718_v19, %s9641_s5  ;;  %5201 = vrot.lane.b32.xlu0 %v9721_v21, %s9641_s5 }
 0x191   : > { %3269 = vmatprep.subr.mxu0 %v3221_v1  ;;  %3374 = vmatprep.mubr.f32.mxu1 %v9626_v12 }
 0x192   : > { %v3208_v2 = vpop.permute.xlu1 %3207  ;;  %v3202_v3 = vpop.permute.xlu0 %3201 }
 0x193   : > { %v3220_v4 = vsel %vm3219_vm11, %v3202_v3, %v3204_v0  ;;  %v3222_v9 = vsel %vm3219_vm11, %v3206_v63, %v3208_v2  ;;  %v9501_v3 = vld [vmem:[%s11089_s1 + $0x60] sm:$0xff] }
 0x194   : > { %5207 = vrot.lane.b32.xlu1 %v9726_v23, %s9641_s5  ;;  %5205 = vrot.lane.b32.xlu0 %v9729_v24, %s9641_s5 }
 0x195   : > { %3270 = vmatpush1.msra.mxu0 %v3220_v4 }
 0x196   : > { %v3212_v6 = vpop.permute.xlu1 %3211  ;;  %v3210_v7 = vpop.permute.xlu0 %3209  ;;  %9487 = vmatmul.mubr.msk.f32.vlgmr.msra.gmra.mxu0 %vm300_vm2, %v9486_v5 }
 0x197   : > { %v3223_v8 = vsel %vm3219_vm11, %v3208_v2, %v3210_v7  ;;  %3445 = vmatprep.mubr.f32.mxu0 %v9626_v12  ;;  %v3224_v16 = vsel %vm3219_vm11, %v3210_v7, %v3212_v6 }
 0x198   : > { %5526 = vrot.lane.b32.xlu1 %v9701_v13, %s9642_s8  ;;  %5209 = vrot.lane.b32.xlu0 %v9734_v25, %s9641_s5 }
 0x199   : > { %3340 = vmatprep.subr.mxu1 %v3223_v8 }
 0x19a   : > { %3341 = vmatpush1.msra.mxu1 %v3222_v9  ;;  %v3216_v10 = vpop.permute.xlu1 %3215  ;;  %v3214_v11 = vpop.permute.xlu0 %3213 }
 0x19b   : > { %v3225_v15 = vsel %vm3219_vm11, %v3212_v6, %v3214_v11  ;;  %9488 = vmatmul.mubr.msk.f32.vlgmr.msra.gmra.mxu1 %vm300_vm2, %v9486_v5  ;;  %v3226_v27 = vsel %vm3219_vm11, %v3214_v11, %v3216_v10 }
 0x19c   : > { %5524 = vrot.lane.b32.xlu1 %v9710_v17, %s9642_s8  ;;  %5528 = vrot.lane.b32.xlu0 %v9704_v14, %s9642_s8 }
 0x19d   : > { %3411 = vmatprep.subr.mxu0 %v3225_v15  ;;  %3516 = vmatprep.mubr.f32.mxu1 %v9626_v12 }
 0x19e   : > { %3412 = vmatpush1.msra.mxu0 %v3224_v16  ;;  %v3536_v20 = vpop.permute.xlu1 %3535  ;;  %v3218_v22 = vpop.permute.xlu0 %3217 }
 0x19f   : > { %v3227_v26 = vsel %vm3219_vm11, %v3216_v10, %v3218_v22  ;;  %9489 = vmatmul.mubr.msk.f32.vlgmr.msra.gmra.mxu0 %vm300_vm2, %v9486_v5  ;;  %vm8531_vm11 = vcmask 285696  }
 0x1a0   : > { %5532 = vrot.lane.b32.xlu1 %v9721_v21, %s9642_s8  ;;  %5530 = vrot.lane.b32.xlu0 %v9713_v18, %s9642_s8 }
 0x1a1   : > { %3482 = vmatprep.subr.mxu1 %v3227_v26  ;;  %3635 = vmatprep.mubr.f32.mxu0 %v9626_v12 }
 0x1a2   : > { %3483 = vmatpush1.msra.mxu1 %v3226_v27  ;;  %v3534_v28 = vpop.permute.xlu1 %3533  ;;  %v3538_v29 = vpop.permute.xlu0 %3537 }
 0x1a3   : > { %v3552_v30 = vsel %vm3551_vm12, %v3534_v28, %v3536_v20  ;;  %v3553_v31 = vsel %vm3551_vm12, %v3536_v20, %v3538_v29  ;;  %9490 = vmatmul.mubr.msk.f32.vlgmr.msra.gmra.mxu1 %vm300_vm2, %v9486_v5 }
 0x1a4   : > { %5536 = vrot.lane.b32.xlu1 %v9729_v24, %s9642_s8  ;;  %5534 = vrot.lane.b32.xlu0 %v9718_v19, %s9642_s8 }
 0x1a5   : > { %3601 = vmatprep.subr.mxu0 %v3553_v31  ;;  %3706 = vmatprep.mubr.f32.mxu1 %v9626_v12 }
 0x1a6   : > { %3602 = vmatpush1.msra.mxu0 %v3552_v30  ;;  %v3542_v33 = vpop.permute.xlu1 %3541  ;;  %v3540_v34 = vpop.permute.xlu0 %3539 }
 0x1a7   : > { %v3555_v35 = vsel %vm3551_vm12, %v3540_v34, %v3542_v33  ;;  %v3554_v36 = vsel %vm3551_vm12, %v3538_v29, %v3540_v34  ;;  %9492 = vmatmul.mubr.msk.f32.vlgmr.msra.gmra.mxu0 %vm300_vm2, %v9491_v32 }
 0x1a8   : > { %5540 = vrot.lane.b32.xlu1 %v9734_v25, %s9642_s8  ;;  %5538 = vrot.lane.b32.xlu0 %v9726_v23, %s9642_s8 }
 0x1a9   : > { %3672 = vmatprep.subr.mxu1 %v3555_v35  ;;  %3777 = vmatprep.mubr.f32.mxu0 %v9626_v12 }
 0x1aa   : > { %3673 = vmatpush1.msra.mxu1 %v3554_v36  ;;  %v3546_v37 = vpop.permute.xlu1 %3545  ;;  %v3544_v38 = vpop.permute.xlu0 %3543 }
 0x1ab   : > { %v3557_v39 = vsel %vm3551_vm12, %v3544_v38, %v3546_v37  ;;  %v3556_v40 = vsel %vm3551_vm12, %v3542_v33, %v3544_v38  ;;  %9493 = vmatmul.mubr.msk.f32.vlgmr.msra.gmra.mxu1 %vm300_vm2, %v9491_v32  ;;  %v10254_v38 = vld [vmem:[%s11089_s1 + $0x68] sm:$0xff] }
 0x1ac   : > { %5860 = vrot.lane.b32.xlu1 %v9704_v14, %s9643_s11  ;;  %5858 = vrot.lane.b32.xlu0 %v9701_v13, %s9643_s11 }
 0x1ad   : > { %3743 = vmatprep.subr.mxu0 %v3557_v39  ;;  %3848 = vmatprep.mubr.f32.mxu1 %v9626_v12 }
 0x1ae   : > { %3744 = vmatpush1.msra.mxu0 %v3556_v40  ;;  %v3550_v41 = vpop.permute.xlu1 %3549  ;;  %v3548_v42 = vpop.permute.xlu0 %3547 }
 0x1af   : > { %v3559_v43 = vsel %vm3551_vm12, %v3548_v42, %v3550_v41  ;;  %v3558_v44 = vsel %vm3551_vm12, %v3546_v37, %v3548_v42  ;;  %9494 = vmatmul.mubr.msk.f32.vlgmr.msra.gmra.mxu0 %vm300_vm2, %v9491_v32  ;;  %vm8863_vm12 = vcmask 277504  }
 0x1b0   : > { %5862 = vrot.lane.b32.xlu1 %v9713_v18, %s9643_s11  ;;  %5856 = vrot.lane.b32.xlu0 %v9710_v17, %s9643_s11 }
 0x1b1   : > { %3814 = vmatprep.subr.mxu1 %v3559_v43  ;;  %3967 = vmatprep.mubr.f32.mxu0 %v9626_v12 }
 0x1b2   : > { %3815 = vmatpush1.msra.mxu1 %v3558_v44  ;;  %v3870_v45 = vpop.permute.xlu1 %3869  ;;  %v3868_v46 = vpop.permute.xlu0 %3867 }
 0x1b3   : > { %v3885_v47 = vsel %vm3883_vm13, %v3868_v46, %v3870_v45  ;;  %9495 = vmatmul.mubr.msk.f32.vlgmr.msra.gmra.mxu1 %vm300_vm2, %v9491_v32 }
 0x1b4   : > { %5866 = vrot.lane.b32.xlu1 %v9718_v19, %s9643_s11  ;;  %5864 = vrot.lane.b32.xlu0 %v9721_v21, %s9643_s11 }
 0x1b5   : > { %3933 = vmatprep.subr.mxu0 %v3885_v47  ;;  %4038 = vmatprep.mubr.f32.mxu1 %v9626_v12 }
 0x1b6   : > { %v3872_v17 = vpop.permute.xlu1 %3871  ;;  %v3866_v48 = vpop.permute.xlu0 %3865 }
 0x1b7   : > { %v3884_v49 = vsel %vm3883_vm13, %v3866_v48, %v3868_v46  ;;  %v3886_v54 = vsel %vm3883_vm13, %v3870_v45, %v3872_v17 }
 0x1b8   : > { %5870 = vrot.lane.b32.xlu1 %v9726_v23, %s9643_s11  ;;  %5868 = vrot.lane.b32.xlu0 %v9729_v24, %s9643_s11 }
 0x1b9   : > { %3934 = vmatpush1.msra.mxu0 %v3884_v49 }
 0x1ba   : > { %v3876_v51 = vpop.permute.xlu1 %3875  ;;  %v3874_v52 = vpop.permute.xlu0 %3873  ;;  %9497 = vmatmul.mubr.msk.f32.vlgmr.msra.gmra.mxu0 %vm300_vm2, %v9496_v50 }
 0x1bb   : > { %v3887_v53 = vsel %vm3883_vm13, %v3872_v17, %v3874_v52  ;;  %4109 = vmatprep.mubr.f32.mxu0 %v9626_v12  ;;  %v3888_v58 = vsel %vm3883_vm13, %v3874_v52, %v3876_v51 }
 0x1bc   : > { %6191 = vrot.lane.b32.xlu1 %v9704_v14, %s9644_s14  ;;  %5872 = vrot.lane.b32.xlu0 %v9734_v25, %s9643_s11  ;;  %s11004_s11 = scalar_lea.vmem %s11091_s3, %s9578_s17  ;;  %s9439_s17 = sshll.u32 %s11124_s16, 3 }
 0x1bd   : > { %4004 = vmatprep.subr.mxu1 %v3887_v53 }
 0x1be   : > { %4005 = vmatpush1.msra.mxu1 %v3886_v54  ;;  %v3880_v55 = vpop.permute.xlu1 %3879  ;;  %v3878_v56 = vpop.permute.xlu0 %3877 }
 0x1bf   : > { %v3889_v57 = vsel %vm3883_vm13, %v3876_v51, %v3878_v56  ;;  %9498 = vmatmul.mubr.msk.f32.vlgmr.msra.gmra.mxu1 %vm300_vm2, %v9496_v50  ;;  %v3890_v62 = vsel %vm3883_vm13, %v3878_v56, %v3880_v55 }
 0x1c0   : > { %6189 = vrot.lane.b32.xlu1 %v9701_v13, %s9644_s14  ;;  %6193 = vrot.lane.b32.xlu0 %v9713_v18, %s9644_s14 }
 0x1c1   : > { %4075 = vmatprep.subr.mxu0 %v3889_v57  ;;  %4180 = vmatprep.mubr.f32.mxu1 %v9626_v12 }
 0x1c2   : > { %4076 = vmatpush1.msra.mxu0 %v3888_v58  ;;  %v4200_v59 = vpop.permute.xlu1 %4199  ;;  %v3882_v60 = vpop.permute.xlu0 %3881 }
 0x1c3   : > { %v3891_v61 = vsel %vm3883_vm13, %v3880_v55, %v3882_v60  ;;  %9499 = vmatmul.mubr.msk.f32.vlgmr.msra.gmra.mxu0 %vm300_vm2, %v9496_v50  ;;  %v370_v26 = vpop.f32.mrf.mxu0 }
 0x1c4   : > { %6197 = vrot.lane.b32.xlu1 %v9718_v19, %s9644_s14  ;;  %6195 = vrot.lane.b32.xlu0 %v9721_v21, %s9644_s14 }
 0x1c5   : > { %4146 = vmatprep.subr.mxu1 %v3891_v61  ;;  %4299 = vmatprep.mubr.f32.mxu0 %v9626_v12  ;;  %v372_v27 = vpop.f32.mrf.mxu0 }
 0x1c6   : > { %4147 = vmatpush1.msra.mxu1 %v3890_v62  ;;  %v4198_v63 = vpop.permute.xlu1 %4197  ;;  %v4202_v0 = vpop.permute.xlu0 %4201 }
 0x1c7   : > { %v4216_v1 = vsel %vm4215_vm14, %v4198_v63, %v4200_v59  ;;  %v4217_v2 = vsel %vm4215_vm14, %v4200_v59, %v4202_v0  ;;  %9500 = vmatmul.mubr.msk.f32.vlgmr.msra.gmra.mxu1 %vm300_vm2, %v9496_v50 }
 0x1c8   : > { %6201 = vrot.lane.b32.xlu1 %v9726_v23, %s9644_s14  ;;  %6199 = vrot.lane.b32.xlu0 %v9729_v24, %s9644_s14  ;;  %v441_v31 = vpop.f32.mrf.mxu1 }
 0x1c9   : > { %4265 = vmatprep.subr.mxu0 %v4217_v2  ;;  %4370 = vmatprep.mubr.f32.mxu1 %v9626_v12 }
 0x1ca   : > { %4266 = vmatpush1.msra.mxu0 %v4216_v1  ;;  %v4206_v4 = vpop.permute.xlu1 %4205  ;;  %v4204_v5 = vpop.permute.xlu0 %4203 }
 0x1cb   : > { %v4219_v6 = vsel %vm4215_vm14, %v4204_v5, %v4206_v4  ;;  %v4218_v7 = vsel %vm4215_vm14, %v4202_v0, %v4204_v5  ;;  %9502 = vmatmul.mubr.msk.f32.vlgmr.msra.gmra.mxu0 %vm300_vm2, %v9501_v3  ;;  %v443_v33 = vpop.f32.mrf.mxu1 }
 0x1cc   : > { %6205 = vrot.lane.b32.xlu1 %v9626_v12, %s9644_s14  ;;  %6203 = vrot.lane.b32.xlu0 %v9734_v25, %s9644_s14  ;;  %v512_v32 = vpop.f32.mrf.mxu0  ;;  %s208_s14 = scalar_lea.vmem %s11092_s4, %s9439_s17 }
 0x1cd   : > { %4336 = vmatprep.subr.mxu1 %v4219_v6  ;;  %4441 = vmatprep.mubr.f32.mxu0 %v9626_v12 }
 0x1ce   : > { %4337 = vmatpush1.msra.mxu1 %v4218_v7  ;;  %v4210_v8 = vpop.permute.xlu1 %4209  ;;  %v4208_v9 = vpop.permute.xlu0 %4207 }
 0x1cf   : > { %v4221_v10 = vsel %vm4215_vm14, %v4208_v9, %v4210_v8  ;;  %v4220_v11 = vsel %vm4215_vm14, %v4206_v4, %v4208_v9  ;;  %9503 = vmatmul.mubr.msk.f32.vlgmr.msra.gmra.mxu1 %vm300_vm2, %v9501_v3  ;;  %v514_v34 = vpop.f32.mrf.mxu0 }
 0x1d0   : > { %6525 = vrot.lane.b32.xlu1 %v9713_v18, %s9645_s20  ;;  %6523 = vrot.lane.b32.xlu0 %v9704_v14, %s9645_s20  ;;  %v583_v39 = vpop.f32.mrf.mxu1 }
 0x1d1   : > { %4407 = vmatprep.subr.mxu0 %v4221_v10  ;;  %4512 = vmatprep.mubr.f32.mxu1 %v9626_v12  ;;  %v657_v40 = vpop.f32.mrf.mxu0 }
 0x1d2   : > { %4408 = vmatpush1.msra.mxu0 %v4220_v11  ;;  %v4214_v15 = vpop.permute.xlu1 %4213  ;;  %v4212_v16 = vpop.permute.xlu0 %4211  ;;  %v658_v41 = vadd.f32 %v657_v40, %v370_v26 }
 0x1d3   : > { %v4223_v20 = vsel %vm4215_vm14, %v4212_v16, %v4214_v15  ;;  %v4222_v22 = vsel %vm4215_vm14, %v4210_v8, %v4212_v16  ;;  %9504 = vmatmul.mubr.msk.f32.vlgmr.msra.gmra.mxu0 %vm300_vm2, %v9501_v3  ;;  %v585_v42 = vpop.f32.mrf.mxu1  ;;  %v659_v43 = vpop.f32.mrf.mxu0 }
 0x1d4   : > { %6527 = vrot.lane.b32.xlu1 %v9721_v21, %s9645_s20  ;;  %6521 = vrot.lane.b32.xlu0 %v9701_v13, %s9645_s20  ;;  %v660_v47 = vadd.f32 %v659_v43, %v372_v27 }
 0x1d5   : > { %4478 = vmatprep.subr.mxu1 %v4223_v20  ;;  %4631 = vmatprep.mubr.f32.mxu0 %v9626_v12 }
 0x1d6   : > { %4479 = vmatpush1.msra.mxu1 %v4222_v22  ;;  %v4534_v28 = vpop.permute.xlu1 %4533  ;;  %v4532_v29 = vpop.permute.xlu0 %4531 }
 0x1d7   : > { %v4549_v30 = vsel %vm4547_vm15, %v4532_v29, %v4534_v28  ;;  %9505 = vmatmul.mubr.msk.f32.vlgmr.msra.gmra.mxu1 %vm300_vm2, %v9501_v3  ;;  %v728_v17 = vpop.f32.mrf.mxu1  ;;  %v799_v48 = vpop.f32.mrf.mxu0 }
 0x1d8   : > { %6531 = vrot.lane.b32.xlu1 %v9729_v24, %s9645_s20  ;;  %6529 = vrot.lane.b32.xlu0 %v9718_v19, %s9645_s20  ;;  %v729_v49 = vadd.f32 %v728_v17, %v441_v31  ;;  %v800_v50 = vadd.f32 %v799_v48, %v512_v32  ;;  %v9511_v32 = vld [vmem:[%s11089_s1 + $0x70] sm:$0xff] }
 0x1d9   : > { %4597 = vmatprep.subr.mxu0 %v4549_v30  ;;  %4702 = vmatprep.mubr.f32.mxu1 %v9626_v12  ;;  %v730_v52 = vpop.f32.mrf.mxu1  ;;  %v801_v53 = vpop.f32.mrf.mxu0 }
 0x1da   : > { %v4536_v35 = vpop.permute.xlu1 %4535  ;;  %v4530_v36 = vpop.permute.xlu0 %4529  ;;  %v731_v57 = vadd.f32 %v730_v52, %v443_v33  ;;  %v802_v58 = vadd.f32 %v801_v53, %v514_v34 }
 0x1db   : > { %v4548_v37 = vsel %vm4547_vm15, %v4530_v36, %v4532_v29  ;;  %v4550_v51 = vsel %vm4547_vm15, %v4534_v28, %v4536_v35  ;;  %v870_v59 = vpop.f32.mrf.mxu1 }
 0x1dc   : > { %6535 = vrot.lane.b32.xlu1 %v9734_v25, %s9645_s20  ;;  %6533 = vrot.lane.b32.xlu0 %v9726_v23, %s9645_s20  ;;  %v871_v61 = vadd.f32 %v870_v59, %v583_v39 }
 0x1dd   : > { %4598 = vmatpush1.msra.mxu0 %v4548_v37  ;;  %v981_v60 = vpop.f32.mrf.mxu0  ;;  %v872_v0 = vpop.f32.mrf.mxu1 }
 0x1de   : > { %v4540_v44 = vpop.permute.xlu1 %4539  ;;  %v4538_v45 = vpop.permute.xlu0 %4537  ;;  %9507 = vmatmul.mubr.msk.f32.vlgmr.msra.gmra.mxu0 %vm300_vm2, %v10254_v38  ;;  %v1199_v62 = vadd.f32 %v981_v60, %v658_v41  ;;  %v873_v4 = vadd.f32 %v872_v0, %v585_v42 }
 0x1df   : > { %v4551_v46 = vsel %vm4547_vm15, %v4536_v35, %v4538_v45  ;;  %4773 = vmatprep.mubr.f32.mxu0 %v9626_v12  ;;  %v4552_v63 = vsel %vm4547_vm15, %v4538_v45, %v4540_v44  ;;  %v983_v1 = vpop.f32.mrf.mxu0  ;;  %v1052_v7 = vpop.f32.mrf.mxu1 }
 0x1e0   : > { %6855 = vrot.lane.b32.xlu1 %v9704_v14, %s9646_s23  ;;  %6537 = vrot.lane.b32.xlu0 %v9626_v12, %s9645_s20  ;;  %v1200_v5 = vadd.f32 %v983_v1, %v660_v47  ;;  %v1201_v9 = vadd.f32 %v1052_v7, %v729_v49 }
 0x1e1   : > { %4668 = vmatprep.subr.mxu1 %v4551_v46  ;;  %v1054_v15 = vpop.f32.mrf.mxu1 }
 0x1e2   : > { %4669 = vmatpush1.msra.mxu1 %v4550_v51  ;;  %v4544_v54 = vpop.permute.xlu1 %4543  ;;  %v4542_v55 = vpop.permute.xlu0 %4541  ;;  %v1202_v28 = vadd.f32 %v1054_v15, %v731_v57  ;;  %v9516_v15 = vld [vmem:[%s11089_s1 + $0x78] sm:$0xff] }
 0x1e3   : > { %v4553_v56 = vsel %vm4547_vm15, %v4540_v44, %v4542_v55  ;;  %9508 = vmatmul.mubr.msk.f32.vlgmr.msra.gmra.mxu1 %vm300_vm2, %v10254_v38  ;;  %v1123_v8 = vpop.f32.mrf.mxu0  ;;  %v4554_v11 = vsel %vm4547_vm15, %v4542_v55, %v4544_v54  ;;  %v1194_v30 = vpop.f32.mrf.mxu1 }
 0x1e4   : > { %6853 = vrot.lane.b32.xlu1 %v9701_v13, %s9646_s23  ;;  %6857 = vrot.lane.b32.xlu0 %v9713_v18, %s9646_s23  ;;  %v1203_v10 = vadd.f32 %v1123_v8, %v800_v50  ;;  %v1205_v33 = vadd.f32 %v1194_v30, %v871_v61 }
 0x1e5   : > { %4739 = vmatprep.subr.mxu0 %v4553_v56  ;;  %4844 = vmatprep.mubr.f32.mxu1 %v9626_v12  ;;  %v1125_v16 = vpop.f32.mrf.mxu0  ;;  %v1196_v35 = vpop.f32.mrf.mxu1 }
 0x1e6   : > { %4740 = vmatpush1.msra.mxu0 %v4552_v63  ;;  %v4864_v2 = vpop.permute.xlu1 %4863  ;;  %v4546_v3 = vpop.permute.xlu0 %4545  ;;  %v1204_v29 = vadd.f32 %v1125_v16, %v802_v58  ;;  %v1206_v41 = vadd.f32 %v1196_v35, %v873_v4 }
 0x1e7   : > { %v4555_v6 = vsel %vm4547_vm15, %v4544_v54, %v4546_v3  ;;  %9509 = vmatmul.mubr.msk.f32.vlgmr.msra.gmra.mxu0 %vm300_vm2, %v10254_v38  ;;  %v1313_v31 = vpop.f32.mrf.mxu0 }
 0x1e8   : > { %6861 = vrot.lane.b32.xlu1 %v9718_v19, %s9646_s23  ;;  %6859 = vrot.lane.b32.xlu0 %v9721_v21, %s9646_s23  ;;  %v1531_v34 = vadd.f32 %v1313_v31, %v1199_v62 }
 0x1e9   : > { %4810 = vmatprep.subr.mxu1 %v4555_v6  ;;  %4963 = vmatprep.mubr.f32.mxu0 %v9626_v12  ;;  %v1315_v36 = vpop.f32.mrf.mxu0 }
 0x1ea   : > { %4811 = vmatpush1.msra.mxu1 %v4554_v11  ;;  %v4862_v20 = vpop.permute.xlu1 %4861  ;;  %v4866_v22 = vpop.permute.xlu0 %4865  ;;  %v1532_v42 = vadd.f32 %v1315_v36, %v1200_v5 }
 0x1eb   : > { %v4880_v26 = vsel %vm4879_vm0, %v4862_v20, %v4864_v2  ;;  %v4881_v27 = vsel %vm4879_vm0, %v4864_v2, %v4866_v22  ;;  %9510 = vmatmul.mubr.msk.f32.vlgmr.msra.gmra.mxu1 %vm300_vm2, %v10254_v38  ;;  %v1384_v43 = vpop.f32.mrf.mxu1 }
 0x1ec   : > { %6865 = vrot.lane.b32.xlu1 %v9726_v23, %s9646_s23  ;;  %6863 = vrot.lane.b32.xlu0 %v9729_v24, %s9646_s23  ;;  %v1533_v45 = vadd.f32 %v1384_v43, %v1201_v9 }
 0x1ed   : > { %4929 = vmatprep.subr.mxu0 %v4881_v27  ;;  %5034 = vmatprep.mubr.f32.mxu1 %v9626_v12  ;;  %v1386_v47 = vpop.f32.mrf.mxu1 }
 0x1ee   : > { %4930 = vmatpush1.msra.mxu0 %v4880_v26  ;;  %v4870_v37 = vpop.permute.xlu1 %4869  ;;  %v4868_v38 = vpop.permute.xlu0 %4867  ;;  %v1534_v52 = vadd.f32 %v1386_v47, %v1202_v28 }
 0x1ef   : > { %v4883_v39 = vsel %vm4879_vm0, %v4868_v38, %v4870_v37  ;;  %v4882_v40 = vsel %vm4879_vm0, %v4866_v22, %v4868_v38  ;;  %9512 = vmatmul.mubr.msk.f32.vlgmr.msra.gmra.mxu0 %vm300_vm2, %v9511_v32  ;;  %v1455_v44 = vpop.f32.mrf.mxu0 }
 0x1f0   : > { %6869 = vrot.lane.b32.xlu1 %v9626_v12, %s9646_s23  ;;  %6867 = vrot.lane.b32.xlu0 %v9734_v25, %s9646_s23  ;;  %v1535_v46 = vadd.f32 %v1455_v44, %v1203_v10 }
 0x1f1   : > { %5000 = vmatprep.subr.mxu1 %v4883_v39  ;;  %5105 = vmatprep.mubr.f32.mxu0 %v9626_v12  ;;  %v1457_v17 = vpop.f32.mrf.mxu0 }
 0x1f2   : > { %5001 = vmatpush1.msra.mxu1 %v4882_v40  ;;  %v4874_v48 = vpop.permute.xlu1 %4873  ;;  %v4872_v49 = vpop.permute.xlu0 %4871  ;;  %v1536_v53 = vadd.f32 %v1457_v17, %v1204_v29 }
 0x1f3   : > { %v4885_v50 = vsel %vm4879_vm0, %v4872_v49, %v4874_v48  ;;  %v4884_v51 = vsel %vm4879_vm0, %v4870_v37, %v4872_v49  ;;  %9513 = vmatmul.mubr.msk.f32.vlgmr.msra.gmra.mxu1 %vm300_vm2, %v9511_v32  ;;  %v1526_v54 = vpop.f32.mrf.mxu1 }
 0x1f4   : > { %7189 = vrot.lane.b32.xlu1 %v9713_v18, %s9647_s26  ;;  %7187 = vrot.lane.b32.xlu0 %v9704_v14, %s9647_s26  ;;  %v1537_v55 = vadd.f32 %v1526_v54, %v1205_v33 }
 0x1f5   : > { %5071 = vmatprep.subr.mxu0 %v4885_v50  ;;  %5176 = vmatprep.mubr.f32.mxu1 %v9626_v12  ;;  %v1528_v56 = vpop.f32.mrf.mxu1 }
 0x1f6   : > { %5072 = vmatpush1.msra.mxu0 %v4884_v51  ;;  %v4878_v57 = vpop.permute.xlu1 %4877  ;;  %v4876_v58 = vpop.permute.xlu0 %4875  ;;  %v1538_v59 = vadd.f32 %v1528_v56, %v1206_v41  ;;  %v9521_v51 = vld [vmem:[%s11089_s1 + $0x80] sm:$0xff] }
 0x1f7   : > { %v4887_v60 = vsel %vm4879_vm0, %v4876_v58, %v4878_v57  ;;  %v4886_v61 = vsel %vm4879_vm0, %v4874_v48, %v4876_v58  ;;  %9514 = vmatmul.mubr.msk.f32.vlgmr.msra.gmra.mxu0 %vm300_vm2, %v9511_v32  ;;  %v1645_v62 = vpop.f32.mrf.mxu0 }
 0x1f8   : > { %7191 = vrot.lane.b32.xlu1 %v9721_v21, %s9647_s26  ;;  %7185 = vrot.lane.b32.xlu0 %v9701_v13, %s9647_s26  ;;  %v1863_v63 = vadd.f32 %v1645_v62, %v1531_v34 }
 0x1f9   : > { %5142 = vmatprep.subr.mxu1 %v4887_v60  ;;  %5294 = vmatprep.mubr.f32.mxu0 %v9626_v12  ;;  %v1647_v0 = vpop.f32.mrf.mxu0 }
 0x1fa   : > { %5143 = vmatpush1.msra.mxu1 %v4886_v61  ;;  %v5198_v1 = vpop.permute.xlu1 %5197  ;;  %v5196_v2 = vpop.permute.xlu0 %5195  ;;  %v10323_v3 = vadd.f32 %v1647_v0, %v1532_v42 }
 0x1fb   : > { %v5212_v4 = vsel %vm300_vm2, %v5196_v2, %v5198_v1  ;;  %9515 = vmatmul.mubr.msk.f32.vlgmr.msra.gmra.mxu1 %vm300_vm2, %v9511_v32  ;;  %v1716_v5 = vpop.f32.mrf.mxu1 }
 0x1fc   : > { %7195 = vrot.lane.b32.xlu1 %v9729_v24, %s9647_s26  ;;  %7193 = vrot.lane.b32.xlu0 %v9718_v19, %s9647_s26  ;;  %v10331_v6 = vadd.f32 %v1716_v5, %v1533_v45 }
 0x1fd   : > { %5260 = vmatprep.subr.mxu0 %v5212_v4  ;;  %5365 = vmatprep.mubr.f32.mxu1 %v9626_v12  ;;  %v1718_v7 = vpop.f32.mrf.mxu1 }
 0x1fe   : > { %v5200_v8 = vpop.permute.xlu1 %5199  ;;  %v5194_v9 = vpop.permute.xlu0 %5193  ;;  %v10334_v10 = vadd.f32 %v1718_v7, %v1534_v52 }
 0x1ff   : > { %v5211_v11 = vsel %vm300_vm2, %v5194_v9, %v5196_v2  ;;  %v1787_v16 = vpop.f32.mrf.mxu0  ;;  %v5213_v32 = vsel %vm300_vm2, %v5198_v1, %v5200_v8 }
 0x200   : > { %7199 = vrot.lane.b32.xlu1 %v9734_v25, %s9647_s26  ;;  %7197 = vrot.lane.b32.xlu0 %v9726_v23, %s9647_s26  ;;  %v10344_v20 = vadd.f32 %v1787_v16, %v1535_v46 }
 0x201   : > { %5261 = vmatpush1.msra.mxu0 %v5211_v11  ;;  %v1789_v22 = vpop.f32.mrf.mxu0 }
 0x202   : > { %v5204_v26 = vpop.permute.xlu1 %5203  ;;  %v5202_v27 = vpop.permute.xlu0 %5201  ;;  %9517 = vmatmul.mubr.msk.f32.vlgmr.msra.gmra.mxu0 %vm300_vm2, %v9516_v15  ;;  %v10347_v28 = vadd.f32 %v1789_v22, %v1536_v53 }
 0x203   : > { %v5214_v29 = vsel %vm300_vm2, %v5200_v8, %v5202_v27  ;;  %5436 = vmatprep.mubr.f32.mxu0 %v9626_v12  ;;  %v1858_v30 = vpop.f32.mrf.mxu1  ;;  %v5215_v38 = vsel %vm300_vm2, %v5202_v27, %v5204_v26 }
 0x204   : > { %7519 = vrot.lane.b32.xlu1 %v9704_v14, %s9648_s29  ;;  %7201 = vrot.lane.b32.xlu0 %v9626_v12, %s9647_s26  ;;  %v10355_v31 = vadd.f32 %v1858_v30, %v1537_v55 }
 0x205   : > { %5331 = vmatprep.subr.mxu1 %v5214_v29  ;;  %v1860_v33 = vpop.f32.mrf.mxu1 }
 0x206   : > { %5332 = vmatpush1.msra.mxu1 %v5213_v32  ;;  %v5208_v34 = vpop.permute.xlu1 %5207  ;;  %v5206_v35 = vpop.permute.xlu0 %5205  ;;  %v10358_v36 = vadd.f32 %v1860_v33, %v1538_v59 }
 0x207   : > { %v5216_v37 = vsel %vm300_vm2, %v5204_v26, %v5206_v35  ;;  %9518 = vmatmul.mubr.msk.f32.vlgmr.msra.gmra.mxu1 %vm300_vm2, %v9516_v15  ;;  %v5217_v44 = vsel %vm300_vm2, %v5206_v35, %v5208_v34  ;;  %v9526_v35 = vld [vmem:[%s11089_s1 + $0x88] sm:$0xff] }
 0x208   : > { %7517 = vrot.lane.b32.xlu1 %v9701_v13, %s9648_s29  ;;  %7521 = vrot.lane.b32.xlu0 %v9713_v18, %s9648_s29 }
 0x209   : > { %5402 = vmatprep.subr.mxu0 %v5216_v37  ;;  %5507 = vmatprep.mubr.f32.mxu1 %v9626_v12 }
 0x20a   : > { %5403 = vmatpush1.msra.mxu0 %v5215_v38  ;;  %v5527_v39 = vpop.permute.xlu1 %5526  ;;  %v5210_v40 = vpop.permute.xlu0 %5209 }
 0x20b   : > { %v5218_v41 = vsel %vm300_vm2, %v5208_v34, %v5210_v40  ;;  %9519 = vmatmul.mubr.msk.f32.vlgmr.msra.gmra.mxu0 %vm300_vm2, %v9516_v15  ;;  %v1977_v42 = vpop.f32.mrf.mxu0 }
 0x20c   : > { %7525 = vrot.lane.b32.xlu1 %v9718_v19, %s9648_s29  ;;  %7523 = vrot.lane.b32.xlu0 %v9721_v21, %s9648_s29  ;;  %v2195_v43 = vadd.f32 %v1977_v42, %v1863_v63 }
 0x20d   : > { %5473 = vmatprep.subr.mxu1 %v5218_v41  ;;  %5626 = vmatprep.mubr.f32.mxu0 %v9626_v12  ;;  %v1979_v45 = vpop.f32.mrf.mxu0 }
 0x20e   : > { %5474 = vmatpush1.msra.mxu1 %v5217_v44  ;;  %v5525_v46 = vpop.permute.xlu1 %5524  ;;  %v5529_v47 = vpop.permute.xlu0 %5528  ;;  %v2196_v17 = vadd.f32 %v1979_v45, %v10323_v3 }
 0x20f   : > { %v5543_v48 = vsel %vm5542_vm1, %v5525_v46, %v5527_v39  ;;  %v5544_v49 = vsel %vm5542_vm1, %v5527_v39, %v5529_v47  ;;  %9520 = vmatmul.mubr.msk.f32.vlgmr.msra.gmra.mxu1 %vm300_vm2, %v9516_v15  ;;  %v2048_v50 = vpop.f32.mrf.mxu1 }
 0x210   : > { %7529 = vrot.lane.b32.xlu1 %v9726_v23, %s9648_s29  ;;  %7527 = vrot.lane.b32.xlu0 %v9729_v24, %s9648_s29  ;;  %v2197_v52 = vadd.f32 %v2048_v50, %v10331_v6 }
 0x211   : > { %5592 = vmatprep.subr.mxu0 %v5544_v49  ;;  %5697 = vmatprep.mubr.f32.mxu1 %v9626_v12  ;;  %v2050_v53 = vpop.f32.mrf.mxu1 }
 0x212   : > { %5593 = vmatpush1.msra.mxu0 %v5543_v48  ;;  %v5533_v54 = vpop.permute.xlu1 %5532  ;;  %v5531_v55 = vpop.permute.xlu0 %5530  ;;  %v2198_v56 = vadd.f32 %v2050_v53, %v10334_v10 }
 0x213   : > { %v5546_v57 = vsel %vm5542_vm1, %v5531_v55, %v5533_v54  ;;  %9522 = vmatmul.mubr.msk.f32.vlgmr.msra.gmra.mxu0 %vm300_vm2, %v9521_v51  ;;  %v5545_v58 = vsel %vm5542_vm1, %v5529_v47, %v5531_v55  ;;  %v2119_v59 = vpop.f32.mrf.mxu0 }
 0x214   : > { %7533 = vrot.lane.b32.xlu1 %v9626_v12, %s9648_s29  ;;  %7531 = vrot.lane.b32.xlu0 %v9734_v25, %s9648_s29  ;;  %v2199_v60 = vadd.f32 %v2119_v59, %v10344_v20 }
 0x215   : > { %5663 = vmatprep.subr.mxu1 %v5546_v57  ;;  %5768 = vmatprep.mubr.f32.mxu0 %v9626_v12  ;;  %v2121_v61 = vpop.f32.mrf.mxu0 }
 0x216   : > { %5664 = vmatpush1.msra.mxu1 %v5545_v58  ;;  %v5537_v62 = vpop.permute.xlu1 %5536  ;;  %v5535_v63 = vpop.permute.xlu0 %5534  ;;  %v2200_v0 = vadd.f32 %v2121_v61, %v10347_v28 }
 0x217   : > { %v5548_v1 = vsel %vm5542_vm1, %v5535_v63, %v5537_v62  ;;  %9523 = vmatmul.mubr.msk.f32.vlgmr.msra.gmra.mxu1 %vm300_vm2, %v9521_v51  ;;  %v5547_v2 = vsel %vm5542_vm1, %v5533_v54, %v5535_v63  ;;  %v2190_v3 = vpop.f32.mrf.mxu1 }
 0x218   : > { %7853 = vrot.lane.b32.xlu1 %v9713_v18, %s9649_s6  ;;  %7851 = vrot.lane.b32.xlu0 %v9704_v14, %s9649_s6  ;;  %v2201_v4 = vadd.f32 %v2190_v3, %v10355_v31 }
 0x219   : > { %5734 = vmatprep.subr.mxu0 %v5548_v1  ;;  %5839 = vmatprep.mubr.f32.mxu1 %v9626_v12  ;;  %v2192_v5 = vpop.f32.mrf.mxu1 }
 0x21a   : > { %5735 = vmatpush1.msra.mxu0 %v5547_v2  ;;  %v5541_v6 = vpop.permute.xlu1 %5540  ;;  %v5539_v7 = vpop.permute.xlu0 %5538  ;;  %v2202_v8 = vadd.f32 %v2192_v5, %v10358_v36 }
 0x21b   : > { %9524 = vmatmul.mubr.msk.f32.vlgmr.msra.gmra.mxu0 %vm300_vm2, %v9521_v51  ;;  %v5549_v9 = vsel %vm5542_vm1, %v5537_v62, %v5539_v7  ;;  %v5550_v10 = vsel %vm5542_vm1, %v5539_v7, %v5541_v6  ;;  %v2309_v11 = vpop.f32.mrf.mxu0 }
 0x21c   : > { %7855 = vrot.lane.b32.xlu1 %v9721_v21, %s9649_s6  ;;  %7849 = vrot.lane.b32.xlu0 %v9701_v13, %s9649_s6  ;;  %v2527_v15 = vadd.f32 %v2309_v11, %v2195_v43 }
 0x21d   : > { %5805 = vmatprep.subr.mxu1 %v5550_v10  ;;  %5958 = vmatprep.mubr.f32.mxu0 %v9626_v12  ;;  %v2311_v16 = vpop.f32.mrf.mxu0 }
 0x21e   : > { %5806 = vmatpush1.msra.mxu1 %v5549_v9  ;;  %v5861_v20 = vpop.permute.xlu1 %5860  ;;  %v5859_v22 = vpop.permute.xlu0 %5858  ;;  %v10418_v26 = vadd.f32 %v2311_v16, %v2196_v17 }
 0x21f   : > { %9525 = vmatmul.mubr.msk.f32.vlgmr.msra.gmra.mxu1 %vm300_vm2, %v9521_v51  ;;  %v5876_v27 = vsel %vm5874_vm3, %v5859_v22, %v5861_v20  ;;  %v2380_v28 = vpop.f32.mrf.mxu1 }
 0x220   : > { %7859 = vrot.lane.b32.xlu1 %v9729_v24, %s9649_s6  ;;  %7857 = vrot.lane.b32.xlu0 %v9718_v19, %s9649_s6  ;;  %v10426_v29 = vadd.f32 %v2380_v28, %v2197_v52 }
 0x221   : > { %5924 = vmatprep.subr.mxu0 %v5876_v27  ;;  %6029 = vmatprep.mubr.f32.mxu1 %v9626_v12  ;;  %v2382_v30 = vpop.f32.mrf.mxu1 }
 0x222   : > { %v5863_v31 = vpop.permute.xlu1 %5862  ;;  %v5857_v32 = vpop.permute.xlu0 %5856  ;;  %v10429_v33 = vadd.f32 %v2382_v30, %v2198_v56 }
 0x223   : > { %v5875_v34 = vsel %vm5874_vm3, %v5857_v32, %v5859_v22  ;;  %v2451_v36 = vpop.f32.mrf.mxu0  ;;  %v5877_v45 = vsel %vm5874_vm3, %v5861_v20, %v5863_v31 }
 0x224   : > { %7863 = vrot.lane.b32.xlu1 %v9734_v25, %s9649_s6  ;;  %7861 = vrot.lane.b32.xlu0 %v9726_v23, %s9649_s6  ;;  %v10439_v37 = vadd.f32 %v2451_v36, %v2199_v60 }
 0x225   : > { %5925 = vmatpush1.msra.mxu0 %v5875_v34  ;;  %v2453_v38 = vpop.f32.mrf.mxu0 }
 0x226   : > { %9527 = vmatmul.mubr.msk.f32.vlgmr.msra.gmra.mxu0 %vm300_vm2, %v9526_v35  ;;  %v5867_v39 = vpop.permute.xlu1 %5866  ;;  %v5865_v40 = vpop.permute.xlu0 %5864  ;;  %v10442_v41 = vadd.f32 %v2453_v38, %v2200_v0  ;;  %v9531_v0 = vld [vmem:[%s11089_s1 + $0x90] sm:$0xff] }
 0x227   : > { %v5878_v42 = vsel %vm5874_vm3, %v5863_v31, %v5865_v40  ;;  %6100 = vmatprep.mubr.f32.mxu0 %v9626_v12  ;;  %v2522_v43 = vpop.f32.mrf.mxu1  ;;  %v5879_v50 = vsel %vm5874_vm3, %v5865_v40, %v5867_v39 }
 0x228   : > { %8183 = vrot.lane.b32.xlu1 %v9704_v14, %s9650_s9  ;;  %7865 = vrot.lane.b32.xlu0 %v9626_v12, %s9649_s6  ;;  %v10450_v44 = vadd.f32 %v2522_v43, %v2201_v4 }
 0x229   : > { %5995 = vmatprep.subr.mxu1 %v5878_v42  ;;  %v2524_v46 = vpop.f32.mrf.mxu1 }
 0x22a   : > { %5996 = vmatpush1.msra.mxu1 %v5877_v45  ;;  %v5871_v47 = vpop.permute.xlu1 %5870  ;;  %v5869_v17 = vpop.permute.xlu0 %5868  ;;  %v10453_v48 = vadd.f32 %v2524_v46, %v2202_v8  ;;  %v9536_v46 = vld [vmem:[%s11089_s1 + $0x98] sm:$0xff] }
 0x22b   : > { %9528 = vmatmul.mubr.msk.f32.vlgmr.msra.gmra.mxu1 %vm300_vm2, %v9526_v35  ;;  %v5880_v49 = vsel %vm5874_vm3, %v5867_v39, %v5869_v17  ;;  %v5881_v56 = vsel %vm5874_vm3, %v5869_v17, %v5871_v47 }
 0x22c   : > { %8181 = vrot.lane.b32.xlu1 %v9701_v13, %s9650_s9  ;;  %8185 = vrot.lane.b32.xlu0 %v9713_v18, %s9650_s9 }
 0x22d   : > { %6066 = vmatprep.subr.mxu0 %v5880_v49  ;;  %6171 = vmatprep.mubr.f32.mxu1 %v9626_v12 }
 0x22e   : > { %6067 = vmatpush1.msra.mxu0 %v5879_v50  ;;  %v6192_v51 = vpop.permute.xlu1 %6191  ;;  %v5873_v52 = vpop.permute.xlu0 %5872 }
 0x22f   : > { %9529 = vmatmul.mubr.msk.f32.vlgmr.msra.gmra.mxu0 %vm300_vm2, %v9526_v35  ;;  %v5882_v53 = vsel %vm5874_vm3, %v5871_v47, %v5873_v52  ;;  %v2641_v54 = vpop.f32.mrf.mxu0 }
 0x230   : > { %8189 = vrot.lane.b32.xlu1 %v9718_v19, %s9650_s9  ;;  %8187 = vrot.lane.b32.xlu0 %v9721_v21, %s9650_s9  ;;  %v2859_v55 = vadd.f32 %v2641_v54, %v2527_v15 }
 0x231   : > { %6137 = vmatprep.subr.mxu1 %v5882_v53  ;;  %6291 = vmatprep.mubr.f32.mxu0 %v9626_v12  ;;  %v2643_v57 = vpop.f32.mrf.mxu0 }
 0x232   : > { %6138 = vmatpush1.msra.mxu1 %v5881_v56  ;;  %v6190_v58 = vpop.permute.xlu1 %6189  ;;  %v6194_v59 = vpop.permute.xlu0 %6193  ;;  %v2860_v60 = vadd.f32 %v2643_v57, %v10418_v26 }
 0x233   : > { %v6208_v61 = vsel %vm6207_vm4, %v6190_v58, %v6192_v51  ;;  %9530 = vmatmul.mubr.msk.f32.vlgmr.msra.gmra.mxu1 %vm300_vm2, %v9526_v35  ;;  %v6209_v62 = vsel %vm6207_vm4, %v6192_v51, %v6194_v59  ;;  %v2712_v63 = vpop.f32.mrf.mxu1 }
 0x234   : > { %8193 = vrot.lane.b32.xlu1 %v9726_v23, %s9650_s9  ;;  %8191 = vrot.lane.b32.xlu0 %v9729_v24, %s9650_s9  ;;  %v2861_v1 = vadd.f32 %v2712_v63, %v10426_v29 }
 0x235   : > { %6257 = vmatprep.subr.mxu0 %v6209_v62  ;;  %6362 = vmatprep.mubr.f32.mxu1 %v9626_v12  ;;  %v2714_v2 = vpop.f32.mrf.mxu1 }
 0x236   : > { %6258 = vmatpush1.msra.mxu0 %v6208_v61  ;;  %v6198_v3 = vpop.permute.xlu1 %6197  ;;  %v6196_v4 = vpop.permute.xlu0 %6195  ;;  %v2862_v5 = vadd.f32 %v2714_v2, %v10429_v33 }
 0x237   : > { %9532 = vmatmul.mubr.msk.f32.vlgmr.msra.gmra.mxu0 %vm300_vm2, %v9531_v0  ;;  %v6210_v6 = vsel %vm6207_vm4, %v6194_v59, %v6196_v4  ;;  %v6211_v7 = vsel %vm6207_vm4, %v6196_v4, %v6198_v3  ;;  %v2783_v8 = vpop.f32.mrf.mxu0 }
 0x238   : > { %8197 = vrot.lane.b32.xlu1 %v9626_v12, %s9650_s9  ;;  %8195 = vrot.lane.b32.xlu0 %v9734_v25, %s9650_s9  ;;  %v10493_v9 = vadd.f32 %v2783_v8, %v10439_v37 }
 0x239   : > { %6328 = vmatprep.subr.mxu1 %v6211_v7  ;;  %6433 = vmatprep.mubr.f32.mxu0 %v9626_v12  ;;  %v2785_v10 = vpop.f32.mrf.mxu0 }
 0x23a   : > { %6329 = vmatpush1.msra.mxu1 %v6210_v6  ;;  %v6202_v11 = vpop.permute.xlu1 %6201  ;;  %v6200_v15 = vpop.permute.xlu0 %6199  ;;  %v10497_v16 = vadd.f32 %v2785_v10, %v10442_v41 }
 0x23b   : > { %9533 = vmatmul.mubr.msk.f32.vlgmr.msra.gmra.mxu1 %vm300_vm2, %v9531_v0  ;;  %v6212_v20 = vsel %vm6207_vm4, %v6198_v3, %v6200_v15  ;;  %v6213_v22 = vsel %vm6207_vm4, %v6200_v15, %v6202_v11  ;;  %v2854_v26 = vpop.f32.mrf.mxu1 }
 0x23c   : > { %8517 = vrot.lane.b32.xlu1 %v9713_v18, %s9651_s12  ;;  %8515 = vrot.lane.b32.xlu0 %v9704_v14, %s9651_s12  ;;  %v2865_v27 = vadd.f32 %v2854_v26, %v10450_v44 }
 0x23d   : > { %6399 = vmatprep.subr.mxu0 %v6213_v22  ;;  %6504 = vmatprep.mubr.f32.mxu1 %v9626_v12  ;;  %v2856_v28 = vpop.f32.mrf.mxu1 }
 0x23e   : > { %6400 = vmatpush1.msra.mxu0 %v6212_v20  ;;  %v6206_v29 = vpop.permute.xlu1 %6205  ;;  %v6204_v30 = vpop.permute.xlu0 %6203  ;;  %v10509_v31 = vadd.f32 %v2856_v28, %v10453_v48 }
 0x23f   : > { %9534 = vmatmul.mubr.msk.f32.vlgmr.msra.gmra.mxu0 %vm300_vm2, %v9531_v0  ;;  %v6214_v32 = vsel %vm6207_vm4, %v6202_v11, %v6204_v30  ;;  %v6215_v33 = vsel %vm6207_vm4, %v6204_v30, %v6206_v29  ;;  %v2973_v34 = vpop.f32.mrf.mxu0 }
 0x240   : > { %8519 = vrot.lane.b32.xlu1 %v9721_v21, %s9651_s12  ;;  %8513 = vrot.lane.b32.xlu0 %v9701_v13, %s9651_s12  ;;  %v10518_v35 = vadd.f32 %v2973_v34, %v2859_v55 }
 0x241   : > { %6470 = vmatprep.subr.mxu1 %v6215_v33  ;;  %6623 = vmatprep.mubr.f32.mxu0 %v9626_v12  ;;  %v2975_v36 = vpop.f32.mrf.mxu0 }
 0x242   : > { %6471 = vmatpush1.msra.mxu1 %v6214_v32  ;;  %v6526_v37 = vpop.permute.xlu1 %6525  ;;  %v6524_v38 = vpop.permute.xlu0 %6523  ;;  %v10521_v39 = vadd.f32 %v2975_v36, %v2860_v60 }
 0x243   : > { %9535 = vmatmul.mubr.msk.f32.vlgmr.msra.gmra.mxu1 %vm300_vm2, %v9531_v0  ;;  %v6541_v40 = vsel %vm6539_vm5, %v6524_v38, %v6526_v37 }
 0x244   : > { %8523 = vrot.lane.b32.xlu1 %v9729_v24, %s9651_s12  ;;  %8521 = vrot.lane.b32.xlu0 %v9718_v19, %s9651_s12 }
 0x245   : > { %6589 = vmatprep.subr.mxu0 %v6541_v40  ;;  %6694 = vmatprep.mubr.f32.mxu1 %v9626_v12  ;;  %v3044_v41 = vpop.f32.mrf.mxu1 }
 0x246   : > { %v6528_v42 = vpop.permute.xlu1 %6527  ;;  %v6522_v43 = vpop.permute.xlu0 %6521  ;;  %v10530_v44 = vadd.f32 %v3044_v41, %v2861_v1 }
 0x247   : > { %v6540_v45 = vsel %vm6539_vm5, %v6522_v43, %v6524_v38  ;;  %v3046_v47 = vpop.f32.mrf.mxu1  ;;  %v6542_v53 = vsel %vm6539_vm5, %v6526_v37, %v6528_v42 }
 0x248   : > { %8527 = vrot.lane.b32.xlu1 %v9734_v25, %s9651_s12  ;;  %8525 = vrot.lane.b32.xlu0 %v9726_v23, %s9651_s12  ;;  %v10540_v17 = vadd.f32 %v3046_v47, %v2862_v5  ;;  %v9546_v47 = vld [vmem:[%s11089_s1 + $0xa8] sm:$0xff] }
 0x249   : > { %6590 = vmatpush1.msra.mxu0 %v6540_v45 }
 0x24a   : > { %9537 = vmatmul.mubr.msk.f32.vlgmr.msra.gmra.mxu0 %vm300_vm2, %v9536_v46  ;;  %v6532_v48 = vpop.permute.xlu1 %6531  ;;  %v6530_v49 = vpop.permute.xlu0 %6529 }
 0x24b   : > { %v6543_v50 = vsel %vm6539_vm5, %v6528_v42, %v6530_v49  ;;  %6765 = vmatprep.mubr.f32.mxu0 %v9626_v12  ;;  %v3115_v51 = vpop.f32.mrf.mxu0  ;;  %v6544_v60 = vsel %vm6539_vm5, %v6530_v49, %v6532_v48 }
 0x24c   : > { %8847 = vrot.lane.b32.xlu1 %v9704_v14, %s9652_s18  ;;  %8529 = vrot.lane.b32.xlu0 %v9626_v12, %s9651_s12  ;;  %v10550_v52 = vadd.f32 %v3115_v51, %v10493_v9 }
 0x24d   : > { %6660 = vmatprep.subr.mxu1 %v6543_v50  ;;  %v3117_v54 = vpop.f32.mrf.mxu0 }
 0x24e   : > { %6661 = vmatpush1.msra.mxu1 %v6542_v53  ;;  %v6536_v55 = vpop.permute.xlu1 %6535  ;;  %v6534_v56 = vpop.permute.xlu0 %6533  ;;  %v10554_v57 = vadd.f32 %v3117_v54, %v10497_v16 }
 0x24f   : > { %9538 = vmatmul.mubr.msk.f32.vlgmr.msra.gmra.mxu1 %vm300_vm2, %v9536_v46  ;;  %v6545_v14 = vsel %vm6539_vm5, %v6532_v48, %v6534_v56  ;;  %v3186_v58 = vpop.f32.mrf.mxu1 }
 0x250   : > { %8845 = vrot.lane.b32.xlu1 %v9701_v13, %s9652_s18  ;;  %8849 = vrot.lane.b32.xlu0 %v9713_v18, %s9652_s18  ;;  %v10562_v59 = vadd.f32 %v3186_v58, %v2865_v27  ;;  %v6546_v18 = vsel %vm6539_vm5, %v6534_v56, %v6536_v55 }
 0x251   : > { %6731 = vmatprep.subr.mxu0 %v6545_v14  ;;  %6836 = vmatprep.mubr.f32.mxu1 %v9626_v12  ;;  %v3188_v61 = vpop.f32.mrf.mxu1 }
 0x252   : > { %6732 = vmatpush1.msra.mxu0 %v6544_v60  ;;  %v6856_v62 = vpop.permute.xlu1 %6855  ;;  %v6538_v63 = vpop.permute.xlu0 %6537  ;;  %v10567_v0 = vadd.f32 %v3188_v61, %v10509_v31 }
 0x253   : > { %9539 = vmatmul.mubr.msk.f32.vlgmr.msra.gmra.mxu0 %vm300_vm2, %v9536_v46  ;;  %v6547_v13 = vsel %vm6539_vm5, %v6536_v55, %v6538_v63 }
 0x254   : > { %8853 = vrot.lane.b32.xlu1 %v9718_v19, %s9652_s18  ;;  %8851 = vrot.lane.b32.xlu0 %v9721_v21, %s9652_s18  ;;  %v9541_v19 = vld [vmem:[%s11089_s1 + $0xa0] sm:$0xff] }
 0x255   : > { %6802 = vmatprep.subr.mxu1 %v6547_v13  ;;  %6955 = vmatprep.mubr.f32.mxu0 %v9626_v12 }
 0x256   : > { %6803 = vmatpush1.msra.mxu1 %v6546_v18  ;;  %v6854_v1 = vpop.permute.xlu1 %6853  ;;  %v6858_v2 = vpop.permute.xlu0 %6857 }
 0x257   : > { %v6872_v3 = vsel %vm6871_vm6, %v6854_v1, %v6856_v62  ;;  %9540 = vmatmul.mubr.msk.f32.vlgmr.msra.gmra.mxu1 %vm300_vm2, %v9536_v46  ;;  %v6873_v4 = vsel %vm6871_vm6, %v6856_v62, %v6858_v2  ;;  %v3305_v5 = vpop.f32.mrf.mxu0 }
 0x258   : > { %8857 = vrot.lane.b32.xlu1 %v9726_v23, %s9652_s18  ;;  %8855 = vrot.lane.b32.xlu0 %v9729_v24, %s9652_s18  ;;  %v3523_v21 = vadd.f32 %v3305_v5, %v10518_v35 }
 0x259   : > { %6921 = vmatprep.subr.mxu0 %v6873_v4  ;;  %7026 = vmatprep.mubr.f32.mxu1 %v9626_v12  ;;  %v3307_v6 = vpop.f32.mrf.mxu0 }
 0x25a   : > { %6922 = vmatpush1.msra.mxu0 %v6872_v3  ;;  %v6862_v7 = vpop.permute.xlu1 %6861  ;;  %v6860_v8 = vpop.permute.xlu0 %6859  ;;  %v3524_v9 = vadd.f32 %v3307_v6, %v10521_v39 }
 0x25b   : > { %9542 = vmatmul.mubr.msk.f32.vlgmr.msra.gmra.mxu0 %vm300_vm2, %v9541_v19  ;;  %v6874_v23 = vsel %vm6871_vm6, %v6858_v2, %v6860_v8  ;;  %v6875_v24 = vsel %vm6871_vm6, %v6860_v8, %v6862_v7  ;;  %v3376_v10 = vpop.f32.mrf.mxu1  ;;  %v9551_v8 = vld [vmem:[%s11089_s1 + $0xb0] sm:$0xff] }
 0x25c   : > { %8861 = vrot.lane.b32.xlu1 %v9626_v12, %s9652_s18  ;;  %8859 = vrot.lane.b32.xlu0 %v9734_v25, %s9652_s18  ;;  %v3525_v11 = vadd.f32 %v3376_v10, %v10530_v44 }
 0x25d   : > { %6992 = vmatprep.subr.mxu1 %v6875_v24  ;;  %7097 = vmatprep.mubr.f32.mxu0 %v9626_v12  ;;  %v3378_v15 = vpop.f32.mrf.mxu1 }
 0x25e   : > { %6993 = vmatpush1.msra.mxu1 %v6874_v23  ;;  %v6866_v16 = vpop.permute.xlu1 %6865  ;;  %v6864_v20 = vpop.permute.xlu0 %6863  ;;  %v3526_v22 = vadd.f32 %v3378_v15, %v10540_v17 }
 0x25f   : > { %9543 = vmatmul.mubr.msk.f32.vlgmr.msra.gmra.mxu1 %vm300_vm2, %v9541_v19  ;;  %v6876_v26 = vsel %vm6871_vm6, %v6862_v7, %v6864_v20  ;;  %v6877_v27 = vsel %vm6871_vm6, %v6864_v20, %v6866_v16  ;;  %v3447_v28 = vpop.f32.mrf.mxu0 }
 0x260   : > { %7063 = vmatprep.subr.mxu0 %v6877_v27  ;;  %7168 = vmatprep.mubr.f32.mxu1 %v9626_v12  ;;  %v3527_v25 = vadd.f32 %v3447_v28, %v10550_v52 }
 0x261   : > { %7064 = vmatpush1.msra.mxu0 %v6876_v26  ;;  %v3449_v29 = vpop.f32.mrf.mxu0 }
 0x262   : > { %v6870_v30 = vpop.permute.xlu1 %6869  ;;  %9544 = vmatmul.mubr.msk.f32.vlgmr.msra.gmra.mxu0 %vm300_vm2, %v9541_v19  ;;  %v6868_v31 = vpop.permute.xlu0 %6867  ;;  %v3528_v32 = vadd.f32 %v3449_v29, %v10554_v57 }
 0x263   : > { %v6878_v33 = vsel %vm6871_vm6, %v6866_v16, %v6868_v31  ;;  %v6879_v34 = vsel %vm6871_vm6, %v6868_v31, %v6870_v30  ;;  %7287 = vmatprep.mubr.f32.mxu0 %v9626_v12  ;;  %v3518_v35 = vpop.f32.mrf.mxu1 }
 0x264   : > { %7134 = vmatprep.subr.mxu1 %v6879_v34  ;;  %v3529_v36 = vadd.f32 %v3518_v35, %v10562_v59 }
 0x265   : > { %7135 = vmatpush1.msra.mxu1 %v6878_v33  ;;  %v3520_v37 = vpop.f32.mrf.mxu1 }
 0x266   : > { %v7190_v38 = vpop.permute.xlu1 %7189  ;;  %9545 = vmatmul.mubr.msk.f32.vlgmr.msra.gmra.mxu1 %vm300_vm2, %v9541_v19  ;;  %v7188_v39 = vpop.permute.xlu0 %7187  ;;  %v3530_v40 = vadd.f32 %v3520_v37, %v10567_v0 }
 0x267   : > { %v7205_v41 = vsel %vm7203_vm7, %v7188_v39, %v7190_v38  ;;  %7358 = vmatprep.mubr.f32.mxu1 %v9626_v12  ;;  %v3637_v42 = vpop.f32.mrf.mxu0 }
 0x268   : > { %7253 = vmatprep.subr.mxu0 %v7205_v41  ;;  %v3855_v43 = vadd.f32 %v3637_v42, %v3523_v21 }
 0x269   : > { %v3639_v44 = vpop.f32.mrf.mxu0 }
 0x26a   : > { %v7192_v45 = vpop.permute.xlu1 %7191  ;;  %v7186_v46 = vpop.permute.xlu0 %7185  ;;  %v3856_v17 = vadd.f32 %v3639_v44, %v3524_v9 }
 0x26b   : > { %v7204_v48 = vsel %vm7203_vm7, %v7186_v46, %v7188_v39  ;;  %v3708_v49 = vpop.f32.mrf.mxu1  ;;  %v7206_v57 = vsel %vm7203_vm7, %v7190_v38, %v7192_v45 }
 0x26c   : > { %7254 = vmatpush1.msra.mxu0 %v7204_v48  ;;  %v3857_v50 = vadd.f32 %v3708_v49, %v3525_v11 }
 0x26d   : > { %9547 = vmatmul.mubr.msk.f32.vlgmr.msra.gmra.mxu0 %vm300_vm2, %v9546_v47  ;;  %v3710_v51 = vpop.f32.mrf.mxu1 }
 0x26e   : > { %v7196_v52 = vpop.permute.xlu1 %7195  ;;  %v7194_v53 = vpop.permute.xlu0 %7193  ;;  %7429 = vmatprep.mubr.f32.mxu0 %v9626_v12  ;;  %v3858_v54 = vadd.f32 %v3710_v51, %v3526_v22  ;;  %v9556_v51 = vld [vmem:[%s11089_s1 + $0xb8] sm:$0xff] }
 0x26f   : > { %v7207_v55 = vsel %vm7203_vm7, %v7192_v45, %v7194_v53  ;;  %v3779_v56 = vpop.f32.mrf.mxu0  ;;  %v7208_v0 = vsel %vm7203_vm7, %v7194_v53, %v7196_v52 }
 0x270   : > { %7324 = vmatprep.subr.mxu1 %v7207_v55  ;;  %v3859_v14 = vadd.f32 %v3779_v56, %v3527_v25 }
 0x271   : > { %7325 = vmatpush1.msra.mxu1 %v7206_v57  ;;  %v3781_v58 = vpop.f32.mrf.mxu0 }
 0x272   : > { %v7200_v59 = vpop.permute.xlu1 %7199  ;;  %9548 = vmatmul.mubr.msk.f32.vlgmr.msra.gmra.mxu1 %vm300_vm2, %v9546_v47  ;;  %v7198_v60 = vpop.permute.xlu0 %7197  ;;  %v3860_v61 = vadd.f32 %v3781_v58, %v3528_v32 }
 0x273   : > { %v7209_v62 = vsel %vm7203_vm7, %v7196_v52, %v7198_v60  ;;  %7500 = vmatprep.mubr.f32.mxu1 %v9626_v12  ;;  %v3850_v63 = vpop.f32.mrf.mxu1  ;;  %v7210_v5 = vsel %vm7203_vm7, %v7198_v60, %v7200_v59 }
 0x274   : > { %7395 = vmatprep.subr.mxu0 %v7209_v62  ;;  %v3861_v13 = vadd.f32 %v3850_v63, %v3529_v36 }
 0x275   : > { %7396 = vmatpush1.msra.mxu0 %v7208_v0  ;;  %v3852_v18 = vpop.f32.mrf.mxu1 }
 0x276   : > { %v7520_v1 = vpop.permute.xlu1 %7519  ;;  %9549 = vmatmul.mubr.msk.f32.vlgmr.msra.gmra.mxu0 %vm300_vm2, %v9546_v47  ;;  %v7202_v2 = vpop.permute.xlu0 %7201  ;;  %v3862_v3 = vadd.f32 %v3852_v18, %v3530_v40 }
 0x277   : > { %v7211_v4 = vsel %vm7203_vm7, %v7200_v59, %v7202_v2  ;;  %7619 = vmatprep.mubr.f32.mxu0 %v9626_v12  ;;  %vm9335_vm7 = vcmask 7168  }
 0x278   : > { %7466 = vmatprep.subr.mxu1 %v7211_v4 }
 0x279   : > { %7467 = vmatpush1.msra.mxu1 %v7210_v5 }
 0x27a   : > { %v7518_v19 = vpop.permute.xlu1 %7517  ;;  %9550 = vmatmul.mubr.msk.f32.vlgmr.msra.gmra.mxu1 %vm300_vm2, %v9546_v47  ;;  %v7522_v21 = vpop.permute.xlu0 %7521 }
 0x27b   : > { %v7536_v6 = vsel %vm7535_vm8, %v7518_v19, %v7520_v1  ;;  %v7537_v7 = vsel %vm7535_vm8, %v7520_v1, %v7522_v21  ;;  %7690 = vmatprep.mubr.f32.mxu1 %v9626_v12  ;;  %v3969_v9 = vpop.f32.mrf.mxu0 }
 0x27c   : > { %7585 = vmatprep.subr.mxu0 %v7537_v7  ;;  %v4187_v23 = vadd.f32 %v3969_v9, %v3855_v43 }
 0x27d   : > { %7586 = vmatpush1.msra.mxu0 %v7536_v6  ;;  %v3971_v24 = vpop.f32.mrf.mxu0 }
 0x27e   : > { %v7526_v10 = vpop.permute.xlu1 %7525  ;;  %9552 = vmatmul.mubr.msk.f32.vlgmr.msra.gmra.mxu0 %vm300_vm2, %v9551_v8  ;;  %v7524_v11 = vpop.permute.xlu0 %7523  ;;  %v4188_v15 = vadd.f32 %v3971_v24, %v3856_v17 }
 0x27f   : > { %v7538_v16 = vsel %vm7535_vm8, %v7522_v21, %v7524_v11  ;;  %v7539_v20 = vsel %vm7535_vm8, %v7524_v11, %v7526_v10  ;;  %7761 = vmatprep.mubr.f32.mxu0 %v9626_v12  ;;  %v4040_v22 = vpop.f32.mrf.mxu1  ;;  %v9561_v11 = vld [vmem:[%s11089_s1 + $0xc0] sm:$0xff] }
 0x280   : > { %7656 = vmatprep.subr.mxu1 %v7539_v20  ;;  %v4189_v26 = vadd.f32 %v4040_v22, %v3857_v50 }
 0x281   : > { %7657 = vmatpush1.msra.mxu1 %v7538_v16  ;;  %v4042_v27 = vpop.f32.mrf.mxu1 }
 0x282   : > { %v7530_v28 = vpop.permute.xlu1 %7529  ;;  %9553 = vmatmul.mubr.msk.f32.vlgmr.msra.gmra.mxu1 %vm300_vm2, %v9551_v8  ;;  %v7528_v25 = vpop.permute.xlu0 %7527  ;;  %v4190_v29 = vadd.f32 %v4042_v27, %v3858_v54 }
 0x283   : > { %v7540_v30 = vsel %vm7535_vm8, %v7526_v10, %v7528_v25  ;;  %v7541_v31 = vsel %vm7535_vm8, %v7528_v25, %v7530_v28  ;;  %7832 = vmatprep.mubr.f32.mxu1 %v9626_v12  ;;  %v4111_v32 = vpop.f32.mrf.mxu0 }
 0x284   : > { %7727 = vmatprep.subr.mxu0 %v7541_v31  ;;  %v4191_v33 = vadd.f32 %v4111_v32, %v3859_v14 }
 0x285   : > { %7728 = vmatpush1.msra.mxu0 %v7540_v30  ;;  %v4113_v34 = vpop.f32.mrf.mxu0 }
 0x286   : > { %v7534_v35 = vpop.permute.xlu1 %7533  ;;  %9554 = vmatmul.mubr.msk.f32.vlgmr.msra.gmra.mxu0 %vm300_vm2, %v9551_v8  ;;  %v7532_v36 = vpop.permute.xlu0 %7531  ;;  %v4192_v37 = vadd.f32 %v4113_v34, %v3860_v61 }
 0x287   : > { %v7542_v38 = vsel %vm7535_vm8, %v7530_v28, %v7532_v36  ;;  %v7543_v39 = vsel %vm7535_vm8, %v7532_v36, %v7534_v35  ;;  %7951 = vmatprep.mubr.f32.mxu0 %v9626_v12  ;;  %v4182_v40 = vpop.f32.mrf.mxu1  ;;  %vm9337_vm8 = vcmask 15360  }
 0x288   : > { %7798 = vmatprep.subr.mxu1 %v7543_v39  ;;  %v4193_v41 = vadd.f32 %v4182_v40, %v3861_v13 }
 0x289   : > { %7799 = vmatpush1.msra.mxu1 %v7542_v38  ;;  %v4184_v42 = vpop.f32.mrf.mxu1 }
 0x28a   : > { %v7854_v43 = vpop.permute.xlu1 %7853  ;;  %9555 = vmatmul.mubr.msk.f32.vlgmr.msra.gmra.mxu1 %vm300_vm2, %v9551_v8  ;;  %v7852_v44 = vpop.permute.xlu0 %7851  ;;  %v4194_v45 = vadd.f32 %v4184_v42, %v3862_v3 }
 0x28b   : > { %v7869_v46 = vsel %vm7867_vm9, %v7852_v44, %v7854_v43  ;;  %8022 = vmatprep.mubr.f32.mxu1 %v9626_v12  ;;  %v4301_v47 = vpop.f32.mrf.mxu0 }
 0x28c   : > { %7917 = vmatprep.subr.mxu0 %v7869_v46  ;;  %v4519_v17 = vadd.f32 %v4301_v47, %v4187_v23 }
 0x28d   : > { %v4303_v48 = vpop.f32.mrf.mxu0 }
 0x28e   : > { %v7856_v49 = vpop.permute.xlu1 %7855  ;;  %v7850_v50 = vpop.permute.xlu0 %7849  ;;  %v4520_v52 = vadd.f32 %v4303_v48, %v4188_v15 }
 0x28f   : > { %v7868_v53 = vsel %vm7867_vm9, %v7850_v50, %v7852_v44  ;;  %v4372_v54 = vpop.f32.mrf.mxu1  ;;  %v7870_v61 = vsel %vm7867_vm9, %v7854_v43, %v7856_v49 }
 0x290   : > { %7918 = vmatpush1.msra.mxu0 %v7868_v53  ;;  %v4521_v55 = vadd.f32 %v4372_v54, %v4189_v26 }
 0x291   : > { %9557 = vmatmul.mubr.msk.f32.vlgmr.msra.gmra.mxu0 %vm300_vm2, %v9556_v51  ;;  %v4374_v56 = vpop.f32.mrf.mxu1 }
 0x292   : > { %v7860_v57 = vpop.permute.xlu1 %7859  ;;  %v7858_v14 = vpop.permute.xlu0 %7857  ;;  %8093 = vmatprep.mubr.f32.mxu0 %v9626_v12  ;;  %v4522_v58 = vadd.f32 %v4374_v56, %v4190_v29  ;;  %v9566_v56 = vld [vmem:[%s11089_s1 + $0xc8] sm:$0xff] }
 0x293   : > { %v7871_v59 = vsel %vm7867_vm9, %v7856_v49, %v7858_v14  ;;  %v4443_v60 = vpop.f32.mrf.mxu0  ;;  %v7872_v3 = vsel %vm7867_vm9, %v7858_v14, %v7860_v57 }
 0x294   : > { %7988 = vmatprep.subr.mxu1 %v7871_v59  ;;  %v4523_v62 = vadd.f32 %v4443_v60, %v4191_v33 }
 0x295   : > { %7989 = vmatpush1.msra.mxu1 %v7870_v61  ;;  %v4445_v63 = vpop.f32.mrf.mxu0 }
 0x296   : > { %v7864_v0 = vpop.permute.xlu1 %7863  ;;  %9558 = vmatmul.mubr.msk.f32.vlgmr.msra.gmra.mxu1 %vm300_vm2, %v9556_v51  ;;  %v7862_v13 = vpop.permute.xlu0 %7861  ;;  %v4524_v18 = vadd.f32 %v4445_v63, %v4192_v37 }
 0x297   : > { %v7873_v1 = vsel %vm7867_vm9, %v7860_v57, %v7862_v13  ;;  %8164 = vmatprep.mubr.f32.mxu1 %v9626_v12  ;;  %v4514_v2 = vpop.f32.mrf.mxu1  ;;  %v7874_v8 = vsel %vm7867_vm9, %v7862_v13, %v7864_v0 }
 0x298   : > { %8059 = vmatprep.subr.mxu0 %v7873_v1  ;;  %v4525_v4 = vadd.f32 %v4514_v2, %v4193_v41 }
 0x299   : > { %8060 = vmatpush1.msra.mxu0 %v7872_v3  ;;  %v4516_v5 = vpop.f32.mrf.mxu1 }
 0x29a   : > { %v8184_v19 = vpop.permute.xlu1 %8183  ;;  %9559 = vmatmul.mubr.msk.f32.vlgmr.msra.gmra.mxu0 %vm300_vm2, %v9556_v51  ;;  %v7866_v21 = vpop.permute.xlu0 %7865  ;;  %v4526_v6 = vadd.f32 %v4516_v5, %v4194_v45 }
 0x29b   : > { %v7875_v7 = vsel %vm7867_vm9, %v7864_v0, %v7866_v21  ;;  %8283 = vmatprep.mubr.f32.mxu0 %v9626_v12  ;;  %vm9339_vm9 = vcmask 23552  }
 0x29c   : > { %8130 = vmatprep.subr.mxu1 %v7875_v7 }
 0x29d   : > { %8131 = vmatpush1.msra.mxu1 %v7874_v8 }
 0x29e   : > { %v8182_v9 = vpop.permute.xlu1 %8181  ;;  %9560 = vmatmul.mubr.msk.f32.vlgmr.msra.gmra.mxu1 %vm300_vm2, %v9556_v51  ;;  %v8186_v23 = vpop.permute.xlu0 %8185 }
 0x29f   : > { %v8200_v24 = vsel %vm8199_vm10, %v8182_v9, %v8184_v19  ;;  %v8201_v10 = vsel %vm8199_vm10, %v8184_v19, %v8186_v23  ;;  %8354 = vmatprep.mubr.f32.mxu1 %v9626_v12  ;;  %v4633_v15 = vpop.f32.mrf.mxu0 }
 0x2a0   : > { %8249 = vmatprep.subr.mxu0 %v8201_v10  ;;  %v4851_v16 = vadd.f32 %v4633_v15, %v4519_v17 }
 0x2a1   : > { %8250 = vmatpush1.msra.mxu0 %v8200_v24  ;;  %v4635_v20 = vpop.f32.mrf.mxu0 }
 0x2a2   : > { %v8190_v22 = vpop.permute.xlu1 %8189  ;;  %9562 = vmatmul.mubr.msk.f32.vlgmr.msra.gmra.mxu0 %vm300_vm2, %v9561_v11  ;;  %v8188_v26 = vpop.permute.xlu0 %8187  ;;  %v4852_v27 = vadd.f32 %v4635_v20, %v4520_v52 }
 0x2a3   : > { %v8202_v28 = vsel %vm8199_vm10, %v8186_v23, %v8188_v26  ;;  %v8203_v25 = vsel %vm8199_vm10, %v8188_v26, %v8190_v22  ;;  %8425 = vmatprep.mubr.f32.mxu0 %v9626_v12  ;;  %v4704_v29 = vpop.f32.mrf.mxu1  ;;  %v9571_v26 = vld [vmem:[%s11089_s1 + $0xd0] sm:$0xff] }
 0x2a4   : > { %8320 = vmatprep.subr.mxu1 %v8203_v25  ;;  %v4853_v30 = vadd.f32 %v4704_v29, %v4521_v55 }
 0x2a5   : > { %8321 = vmatpush1.msra.mxu1 %v8202_v28  ;;  %v4706_v31 = vpop.f32.mrf.mxu1 }
 0x2a6   : > { %v8194_v32 = vpop.permute.xlu1 %8193  ;;  %9563 = vmatmul.mubr.msk.f32.vlgmr.msra.gmra.mxu1 %vm300_vm2, %v9561_v11  ;;  %v8192_v33 = vpop.permute.xlu0 %8191  ;;  %v4854_v34 = vadd.f32 %v4706_v31, %v4522_v58 }
 0x2a7   : > { %v8204_v35 = vsel %vm8199_vm10, %v8190_v22, %v8192_v33  ;;  %v8205_v36 = vsel %vm8199_vm10, %v8192_v33, %v8194_v32  ;;  %8496 = vmatprep.mubr.f32.mxu1 %v9626_v12  ;;  %v4775_v37 = vpop.f32.mrf.mxu0 }
 0x2a8   : > { %8391 = vmatprep.subr.mxu0 %v8205_v36  ;;  %v4855_v38 = vadd.f32 %v4775_v37, %v4523_v62 }
 0x2a9   : > { %8392 = vmatpush1.msra.mxu0 %v8204_v35  ;;  %v4777_v39 = vpop.f32.mrf.mxu0 }
 0x2aa   : > { %v8198_v40 = vpop.permute.xlu1 %8197  ;;  %9564 = vmatmul.mubr.msk.f32.vlgmr.msra.gmra.mxu0 %vm300_vm2, %v9561_v11  ;;  %v8196_v41 = vpop.permute.xlu0 %8195  ;;  %v4856_v42 = vadd.f32 %v4777_v39, %v4524_v18 }
 0x2ab   : > { %v8206_v43 = vsel %vm8199_vm10, %v8194_v32, %v8196_v41  ;;  %v8207_v44 = vsel %vm8199_vm10, %v8196_v41, %v8198_v40  ;;  %8615 = vmatprep.mubr.f32.mxu0 %v9626_v12  ;;  %v4846_v45 = vpop.f32.mrf.mxu1  ;;  %vm9341_vm10 = vcmask 31744  }
 0x2ac   : > { %8462 = vmatprep.subr.mxu1 %v8207_v44  ;;  %v4857_v46 = vadd.f32 %v4846_v45, %v4525_v4 }
 0x2ad   : > { %8463 = vmatpush1.msra.mxu1 %v8206_v43  ;;  %v4848_v47 = vpop.f32.mrf.mxu1 }
 0x2ae   : > { %v8518_v17 = vpop.permute.xlu1 %8517  ;;  %9565 = vmatmul.mubr.msk.f32.vlgmr.msra.gmra.mxu1 %vm300_vm2, %v9561_v11  ;;  %v8516_v48 = vpop.permute.xlu0 %8515  ;;  %v4858_v49 = vadd.f32 %v4848_v47, %v4526_v6 }
 0x2af   : > { %v8533_v50 = vsel %vm8531_vm11, %v8516_v48, %v8518_v17  ;;  %8686 = vmatprep.mubr.f32.mxu1 %v9626_v12  ;;  %v4965_v51 = vpop.f32.mrf.mxu0 }
 0x2b0   : > { %8581 = vmatprep.subr.mxu0 %v8533_v50  ;;  %v5183_v52 = vadd.f32 %v4965_v51, %v4851_v16 }
 0x2b1   : > { %v4967_v53 = vpop.f32.mrf.mxu0 }
 0x2b2   : > { %v8520_v54 = vpop.permute.xlu1 %8519  ;;  %v8514_v55 = vpop.permute.xlu0 %8513  ;;  %v5184_v57 = vadd.f32 %v4967_v53, %v4852_v27 }
 0x2b3   : > { %v8532_v14 = vsel %vm8531_vm11, %v8514_v55, %v8516_v48  ;;  %v5036_v58 = vpop.f32.mrf.mxu1  ;;  %v8534_v18 = vsel %vm8531_vm11, %v8518_v17, %v8520_v54 }
 0x2b4   : > { %8582 = vmatpush1.msra.mxu0 %v8532_v14  ;;  %v5185_v59 = vadd.f32 %v5036_v58, %v4853_v30 }
 0x2b5   : > { %9567 = vmatmul.mubr.msk.f32.vlgmr.msra.gmra.mxu0 %vm300_vm2, %v9566_v56  ;;  %v5038_v60 = vpop.f32.mrf.mxu1 }
 0x2b6   : > { %v8524_v61 = vpop.permute.xlu1 %8523  ;;  %v8522_v62 = vpop.permute.xlu0 %8521  ;;  %8757 = vmatprep.mubr.f32.mxu0 %v9626_v12  ;;  %v5186_v63 = vadd.f32 %v5038_v60, %v4854_v34 }
 0x2b7   : > { %v8535_v0 = vsel %vm8531_vm11, %v8520_v54, %v8522_v62  ;;  %v5107_v13 = vpop.f32.mrf.mxu0  ;;  %v8536_v6 = vsel %vm8531_vm11, %v8522_v62, %v8524_v61 }
 0x2b8   : > { %8652 = vmatprep.subr.mxu1 %v8535_v0  ;;  %v5187_v1 = vadd.f32 %v5107_v13, %v4855_v38 }
 0x2b9   : > { %8653 = vmatpush1.msra.mxu1 %v8534_v18  ;;  %v5109_v2 = vpop.f32.mrf.mxu0 }
 0x2ba   : > { %v8528_v3 = vpop.permute.xlu1 %8527  ;;  %9568 = vmatmul.mubr.msk.f32.vlgmr.msra.gmra.mxu1 %vm300_vm2, %v9566_v56  ;;  %v8526_v4 = vpop.permute.xlu0 %8525  ;;  %v5188_v5 = vadd.f32 %v5109_v2, %v4856_v42 }
 0x2bb   : > { %v8537_v19 = vsel %vm8531_vm11, %v8524_v61, %v8526_v4  ;;  %8828 = vmatprep.mubr.f32.mxu1 %v9626_v12  ;;  %v5178_v21 = vpop.f32.mrf.mxu1  ;;  %v8538_v11 = vsel %vm8531_vm11, %v8526_v4, %v8528_v3 }
 0x2bc   : > { %8723 = vmatprep.subr.mxu0 %v8537_v19  ;;  %v5189_v7 = vadd.f32 %v5178_v21, %v4857_v46 }
 0x2bd   : > { %8724 = vmatpush1.msra.mxu0 %v8536_v6  ;;  %v5180_v8 = vpop.f32.mrf.mxu1 }
 0x2be   : > { %v8848_v9 = vpop.permute.xlu1 %8847  ;;  %9569 = vmatmul.mubr.msk.f32.vlgmr.msra.gmra.mxu0 %vm300_vm2, %v9566_v56  ;;  %v8530_v23 = vpop.permute.xlu0 %8529  ;;  %v5190_v24 = vadd.f32 %v5180_v8, %v4858_v49 }
 0x2bf   : > { %v8539_v10 = vsel %vm8531_vm11, %v8528_v3, %v8530_v23  ;;  %8947 = vmatprep.mubr.f32.mxu0 %v9626_v12 }
 0x2c0   : > { %8794 = vmatprep.subr.mxu1 %v8539_v10 }
 0x2c1   : > { %8795 = vmatpush1.msra.mxu1 %v8538_v11 }
 0x2c2   : > { %v8846_v15 = vpop.permute.xlu1 %8845  ;;  %9570 = vmatmul.mubr.msk.f32.vlgmr.msra.gmra.mxu1 %vm300_vm2, %v9566_v56  ;;  %v8850_v16 = vpop.permute.xlu0 %8849 }
 0x2c3   : > { %v8864_v20 = vsel %vm8863_vm12, %v8846_v15, %v8848_v9  ;;  %v8865_v22 = vsel %vm8863_vm12, %v8848_v9, %v8850_v16  ;;  %9018 = vmatprep.mubr.f32.mxu1 %v9626_v12  ;;  %v5296_v27 = vpop.f32.mrf.mxu0 }
 0x2c4   : > { %8913 = vmatprep.subr.mxu0 %v8865_v22  ;;  %v10714_v28 = vadd.f32 %v5296_v27, %v5183_v52 }
 0x2c5   : > { %8914 = vmatpush1.msra.mxu0 %v8864_v20  ;;  %v5298_v25 = vpop.f32.mrf.mxu0 }
 0x2c6   : > { %v8854_v29 = vpop.permute.xlu1 %8853  ;;  %9572 = vmatmul.mubr.msk.f32.vlgmr.msra.gmra.mxu0 %vm300_vm2, %v9571_v26  ;;  %v8852_v30 = vpop.permute.xlu0 %8851  ;;  %v10717_v31 = vadd.f32 %v5298_v25, %v5184_v57 }
 0x2c7   : > { %v8866_v32 = vsel %vm8863_vm12, %v8850_v16, %v8852_v30  ;;  %v8867_v33 = vsel %vm8863_vm12, %v8852_v30, %v8854_v29  ;;  %9089 = vmatprep.mubr.f32.mxu0 %v9626_v12  ;;  %v5367_v34 = vpop.f32.mrf.mxu1 }
 0x2c8   : > { %8984 = vmatprep.subr.mxu1 %v8867_v33  ;;  %v10722_v35 = vadd.f32 %v5367_v34, %v5185_v59 }
 0x2c9   : > { %8985 = vmatpush1.msra.mxu1 %v8866_v32  ;;  %v5369_v36 = vpop.f32.mrf.mxu1 }
 0x2ca   : > { %v8858_v37 = vpop.permute.xlu1 %8857  ;;  %9573 = vmatmul.mubr.msk.f32.vlgmr.msra.gmra.mxu1 %vm300_vm2, %v9571_v26  ;;  %v8856_v38 = vpop.permute.xlu0 %8855  ;;  %v10725_v39 = vadd.f32 %v5369_v36, %v5186_v63 }
 0x2cb   : > { %v8868_v40 = vsel %vm8863_vm12, %v8854_v29, %v8856_v38  ;;  %v8869_v41 = vsel %vm8863_vm12, %v8856_v38, %v8858_v37  ;;  %v5438_v42 = vpop.f32.mrf.mxu0  ;;  %9160 = vmatprep.mubr.f32.mxu1 %v9626_v12 }
 0x2cc   : > { %9055 = vmatprep.subr.mxu0 %v8869_v41  ;;  %v5518_v43 = vadd.f32 %v5438_v42, %v5187_v1 }
 0x2cd   : > { %9056 = vmatpush1.msra.mxu0 %v8868_v40  ;;  %v5440_v44 = vpop.f32.mrf.mxu0 }
 0x2ce   : > { %v8862_v45 = vpop.permute.xlu1 %8861  ;;  %9574 = vmatmul.mubr.msk.f32.vlgmr.msra.gmra.mxu0 %vm300_vm2, %v9571_v26  ;;  %v8860_v46 = vpop.permute.xlu0 %8859  ;;  %v5519_v47 = vadd.f32 %v5440_v44, %v5188_v5 }
 0x2cf   : > { %v8870_v17 = vsel %vm8863_vm12, %v8858_v37, %v8860_v46  ;;  %v8871_v48 = vsel %vm8863_vm12, %v8860_v46, %v8862_v45  ;;  %v5509_v49 = vpop.f32.mrf.mxu1 }
 0x2d0   : > { %9126 = vmatprep.subr.mxu1 %v8871_v48  ;;  %v5520_v50 = vadd.f32 %v5509_v49, %v5189_v7 }
 0x2d1   : > { %9127 = vmatpush1.msra.mxu1 %v8870_v17  ;;  %v5511_v51 = vpop.f32.mrf.mxu1 }
 0x2d2   : > { %9575 = vmatmul.mubr.msk.f32.vlgmr.msra.gmra.mxu1 %vm300_vm2, %v9571_v26  ;;  %v5521_v12 = vadd.f32 %v5511_v51, %v5190_v24 }
 0x2d3   : > { %v10734_v52 = vpop.f32.mrf.mxu0 }
 0x2d5   : > { %v10736_v53 = vpop.f32.mrf.mxu0 }
 0x2d7   : > { %v10738_v54 = vpop.f32.mrf.mxu1 }
 0x2d9   : > { %v10742_v57 = vpop.f32.mrf.mxu1 }
 0x2db   : > { %v5770_v55 = vpop.f32.mrf.mxu0 }
 0x2dc   : > { %v10740_v56 = vadd.f32 %v5770_v55, %v5518_v43 }
 0x2dd   : > { %v5772_v14 = vpop.f32.mrf.mxu0 }
 0x2de   : > { %v10744_v58 = vadd.f32 %v5772_v14, %v5519_v47 }
 0x2df   : > { %v5841_v59 = vpop.f32.mrf.mxu1 }
 0x2e0   : > { %v10746_v60 = vadd.f32 %v5841_v59, %v5520_v50 }
 0x2e1   : > { %v5843_v61 = vpop.f32.mrf.mxu1 }
 0x2e2   : > { %v10748_v62 = vadd.f32 %v5843_v61, %v5521_v12 }
 0x2e6   : > { %v10750_v63 = vpop.f32.mrf.mxu0 }
 0x2e8   : > { %v10752_v0 = vpop.f32.mrf.mxu0 }
 0x2eb   : > { %v10754_v13 = vpop.f32.mrf.mxu1 }
 0x2ed   : > { %v10758_v1 = vpop.f32.mrf.mxu1 }
 0x2ef   : > { %v10756_v18 = vpop.f32.mrf.mxu0 }
 0x2f1   : > { %v10760_v2 = vpop.f32.mrf.mxu0 }
 0x2f3   : > { %v10762_v3 = vpop.f32.mrf.mxu1 }
 0x2f5   : > { %v10766_v5 = vpop.f32.mrf.mxu1 }
 0x2f7   : > { %v10764_v4 = vpop.f32.mrf.mxu0 }
 0x2f9   : > { %v10768_v19 = vpop.f32.mrf.mxu0 }
 0x2fb   : > { %v10770_v21 = vpop.f32.mrf.mxu1 }
 0x2fd   : > { %v10774_v7 = vpop.f32.mrf.mxu1 }
 0x2ff   : > { %v10772_v6 = vpop.f32.mrf.mxu0 }
 0x301   : > { %v10776_v8 = vpop.f32.mrf.mxu0 }
 0x303   : > { %v10778_v9 = vpop.f32.mrf.mxu1 }
 0x305   : > { %v10782_v24 = vpop.f32.mrf.mxu1 }
 0x30a   : > { %v10780_v23 = vpop.f32.mrf.mxu0 }
 0x30c   : > { %v10784_v10 = vpop.f32.mrf.mxu0 }
 0x30f   : > { %v10786_v11 = vpop.f32.mrf.mxu1 }
 0x311   : > { %v10790_v16 = vpop.f32.mrf.mxu1 }
 0x313   : > { %v10788_v15 = vpop.f32.mrf.mxu0 }
 0x315   : > { %v10792_v20 = vpop.f32.mrf.mxu0 }
 0x317   : > { %v10794_v22 = vpop.f32.mrf.mxu1 }
 0x319   : > { %v10798_v27 = vpop.f32.mrf.mxu1 }
 0x31b   : > { %v10796_v26 = vpop.f32.mrf.mxu0 }
 0x31d   : > { %v10800_v25 = vpop.f32.mrf.mxu0 }
 0x31f   : > { %v10802_v29 = vpop.f32.mrf.mxu1 }
 0x321   : > { %v10806_v32 = vpop.f32.mrf.mxu1 }
 0x322   : > { %v10804_v30 = vpop.f32.mrf.mxu0 }
 0x324   : > { %v10808_v33 = vpop.f32.mrf.mxu0 }
 0x326   : > { %v10810_v34 = vpop.f32.mrf.mxu1 }
 0x328   : > { %v10814_v37 = vpop.f32.mrf.mxu1 }
 0x32d   : > { %v10812_v36 = vpop.f32.mrf.mxu0 }
 0x32f   : > { %v10816_v38 = vpop.f32.mrf.mxu0 }
 0x332   : > { %v10818_v40 = vpop.f32.mrf.mxu1 }
 0x334   : > { %v10822_v42 = vpop.f32.mrf.mxu1 }
 0x336   : > { %v10820_v41 = vpop.f32.mrf.mxu0 }
 0x338   : > { %v10824_v43 = vpop.f32.mrf.mxu0 }
 0x339   : > { %11093 = vst [vmem:[#allocation2_spill] sm:$0xff] %v10824_v43 }
 0x33a   : > { %v10826_v44 = vpop.f32.mrf.mxu1 }
 0x33b   : > { %11094 = vst [vmem:[#allocation3_spill] sm:$0xff] %v10826_v44 }
 0x33c   : > { %v10830_v46 = vpop.f32.mrf.mxu1 }
 0x33d   : > { %11095 = vst [vmem:[#allocation4_spill] sm:$0xff] %v10830_v46 }
 0x33e   : > { %v10828_v45 = vpop.f32.mrf.mxu0 }
 0x340   : > { %v10832_v47 = vpop.f32.mrf.mxu0 }
 0x342   : > { %v10834_v17 = vpop.f32.mrf.mxu1 }
 0x344   : > { %v10838_v49 = vpop.f32.mrf.mxu1 }
 0x345   : > { %11097 = vst [vmem:[#allocation6_spill] sm:$0xff] %v10838_v49  ;;  %v9185_v49 = vlaneseq }
 0x346   : > { %v10836_v48 = vpop.f32.mrf.mxu0 }
 0x347   : > { %11096 = vst [vmem:[#allocation5_spill] sm:$0xff] %v10836_v48  ;;  %v10869_v43 = vshrl.u32 %v9185_v49, 7 }
 0x348   : > { %v10840_v50 = vpop.f32.mrf.mxu0 }
 0x349   : > { %11098 = vst [vmem:[#allocation7_spill] sm:$0xff] %v10840_v50 }
 0x34a   : > { %v10842_v51 = vpop.f32.mrf.mxu1 }
 0x34b   : > { %11099 = vst [vmem:[#allocation8_spill] sm:$0xff] %v10842_v51  ;;  %v10865_v51 = vld [vmem:[%s11090_s2] sm:$0xff] }
 0x34c   : > { %v10846_v55 = vpop.f32.mrf.mxu1  ;;  %vm9259_vm13 = vcmp.gt.f32.partialorder %v10865_v51, 0.0 }
 0x34d   : > { %11100 = vst [vmem:[#allocation9_spill] sm:$0xff] %v10846_v55 }
 0x351   : > { %v10844_v12 = vpop.f32.mrf.mxu0 }
 0x353   : > { %v10848_v14 = vpop.f32.mrf.mxu0 }
 0x356   : > { %v10850_v59 = vpop.f32.mrf.mxu1 }
 0x357   : > { %11101 = vst [vmem:[#allocation10_spill] sm:$0xff] %v10850_v59 }
 0x358   : > { %v10854_v46 = vpop.f32.mrf.mxu1 }
 0x359   : > { %11103 = vst [vmem:[#allocation12_spill] sm:$0xff] %v10854_v46  ;;  %v5849_v46 = vadd.f32 %v10742_v57, %v10725_v39  ;;  %v6183_v39 = vadd.f32 %v10760_v2, %v10744_v58  ;;  %v6185_v57 = vadd.f32 %v10766_v5, %v10748_v62  ;;  %v9195_v2 = vsub.s32 2, %v10869_v43 }
 0x35a   : > { %v10852_v61 = vpop.f32.mrf.mxu0 }
 0x35b   : > { %11102 = vst [vmem:[#allocation11_spill] sm:$0xff] %v10852_v61  ;;  %v5846_v61 = vadd.f32 %v10734_v52, %v10714_v28  ;;  %v6516_v62 = vadd.f32 %v10776_v8, %v6183_v39  ;;  %v9207_v8 = vsub.s32 5, %v10869_v43 }
 0x35c   : > { %v10856_v44 = vpop.f32.mrf.mxu0 }
 0x35d   : > { %11104 = vst [vmem:[#allocation13_spill] sm:$0xff] %v10856_v44  ;;  %v5847_v44 = vadd.f32 %v10736_v53, %v10717_v31  ;;  %v6178_v49 = vadd.f32 %v10750_v63, %v5846_v61  ;;  %v6181_v31 = vadd.f32 %v10758_v1, %v5849_v46  ;;  %v9187_v53 = vsub.s32 0, %v10869_v43 }
 0x35e   : > { %v10858_v48 = vpop.f32.mrf.mxu1  ;;  %v9191_v63 = vsub.s32 1, %v10869_v43  ;;  %v10930_v61 = vrot.slane %v10865_v51, %v9195_v2 }
 0x35f   : > { %11105 = vst [vmem:[#allocation14_spill] sm:$0xff] %v10858_v48  ;;  %v5848_v48 = vadd.f32 %v10738_v54, %v10722_v35  ;;  %v6182_v35 = vadd.f32 %v10756_v18, %v10740_v56  ;;  %v6184_v54 = vadd.f32 %v10762_v3, %v10746_v60  ;;  %v6511_v1 = vadd.f32 %v10764_v4, %v6178_v49 }
 0x360   : > { %v10867_v55 = vpop.f32.mrf.mxu1  ;;  %v9199_v3 = vsub.s32 3, %v10869_v43  ;;  %v6518_v4 = vadd.f32 %v10782_v24, %v6185_v57  ;;  %v10927_v24 = vrot.slane %v10865_v51, %v9191_v63  ;;  %v9211_v49 = vsub.s32 6, %v10869_v43 }
 0x361   : > { %11107 = vst [vmem:[#allocation16_spill] sm:$0xff] %v10867_v55  ;;  %v6179_v55 = vadd.f32 %v10752_v0, %v5847_v44  ;;  %v6180_v28 = vadd.f32 %v10754_v13, %v5848_v48  ;;  %v9653_v0 = vmov 0   ;;  %v6514_v44 = vadd.f32 %v10774_v7, %v6181_v31 }
 0x362   : > { %v10860_v50 = vpop.f32.mrf.mxu0  ;;  %v9260_v13 = vsel %vm9259_vm13, 1, %v9653_v0  ;;  %v6515_v60 = vadd.f32 %v10772_v6, %v6182_v35  ;;  %v6517_v5 = vadd.f32 %v10778_v9, %v6184_v54  ;;  %v6843_v7 = vadd.f32 %v10780_v23, %v6511_v1 }
 0x363   : > { %11106 = vst [vmem:[#allocation15_spill] sm:$0xff] %v10860_v50  ;;  %v6512_v56 = vadd.f32 %v10768_v19, %v6179_v55  ;;  %v6513_v58 = vadd.f32 %v10770_v21, %v6180_v28  ;;  %v9203_v21 = vsub.s32 4, %v10869_v43  ;;  %v10917_v48 = vrot.slane %v9260_v13, %v9187_v53 }
 0x364   : > { %v10879_v59 = vpop.f32.mrf.mxu0  ;;  %v10921_v6 = vrot.slane %v10865_v51, %v9187_v53  ;;  %v10924_v55 = vrot.slane %v9260_v13, %v9191_v63  ;;  %v10933_v28 = vrot.slane %v9260_v13, %v9195_v2  ;;  %v7175_v31 = vadd.f32 %v10796_v26, %v6843_v7 }
 0x365   : > { %v6844_v23 = vadd.f32 %v10784_v10, %v6512_v56  ;;  %v9215_v35 = vsub.s32 7, %v10869_v43  ;;  %v10938_v39 = vrot.slane %v9260_v13, %v9199_v3  ;;  %v6845_v53 = vadd.f32 %v10786_v11, %v6513_v58 }
 0x366   : > { %v10881_v50 = vpop.f32.mrf.mxu1  ;;  %v10944_v57 = vrot.slane %v10865_v51, %v9199_v3  ;;  %v10947_v63 = vrot.slane %v10865_v51, %v9203_v21  ;;  %v10949_v0 = vrot.slane %v9260_v13, %v9203_v21  ;;  %v6846_v10 = vadd.f32 %v10790_v16, %v6514_v44 }
 0x367   : > { %v7176_v26 = vadd.f32 %v10800_v25, %v6844_v23  ;;  %v7507_v1 = vadd.f32 %v10812_v36, %v7175_v31  ;;  %v10954_v56 = vrot.slane %v9260_v13, %v9207_v8  ;;  %v6847_v11 = vadd.f32 %v10788_v15, %v6515_v60 }
 0x368   : > { %v10903_v18 = vpop.f32.mrf.mxu1  ;;  %v10958_v3 = vrot.slane %v10865_v51, %v9207_v8  ;;  %v10961_v7 = vrot.slane %v10865_v51, %v9211_v49  ;;  %v10963_v21 = vrot.slane %v9260_v13, %v9211_v49  ;;  %v7177_v16 = vadd.f32 %v10802_v29, %v6845_v53 }
 0x369   : > { %v7508_v25 = vadd.f32 %v10816_v38, %v7176_v26  ;;  %v7839_v36 = vadd.f32 %v10828_v45, %v7507_v1  ;;  %v10970_v44 = vrot.slane %v9260_v13, %v9215_v35  ;;  %v6848_v15 = vadd.f32 %v10792_v20, %v6516_v62 }
 0x36a   : > { %v10892_v52 = vpop.f32.mrf.mxu0  ;;  %v6849_v60 = vadd.f32 %v10794_v22, %v6517_v5  ;;  %v6850_v8 = vadd.f32 %v10798_v27, %v6518_v4  ;;  %v7178_v23 = vadd.f32 %v10806_v32, %v6846_v10  ;;  %v7179_v31 = vadd.f32 %v10804_v30, %v6847_v11  ;;  %v11111_v5 = vld [vmem:[#allocation4_spill] sm:$0xff]  ;;  %v11112_v4 = vld [vmem:[#allocation6_spill] sm:$0xff] }
 0x36b   : > { %v7509_v29 = vadd.f32 %v10818_v40, %v7177_v16  ;;  %v7840_v38 = vadd.f32 %v10832_v47, %v7508_v25  ;;  %v8171_v45 = vadd.f32 %v10844_v12, %v7839_v36  ;;  %v7180_v13 = vadd.f32 %v10808_v33, %v6848_v15  ;;  %v11108_v40 = vld [vmem:[#allocation15_spill] sm:$0xff]  ;;  %v11109_v33 = vld [vmem:[#allocation2_spill] sm:$0xff] }
 0x36c   : > { %v10912_v46 = vpop.f32.mrf.mxu0  ;;  %v7181_v53 = vadd.f32 %v10810_v34, %v6849_v60  ;;  %v7182_v20 = vadd.f32 %v10814_v37, %v6850_v8  ;;  %v7510_v22 = vadd.f32 %v10822_v42, %v7178_v23  ;;  %v7511_v32 = vadd.f32 %v10820_v41, %v7179_v31  ;;  %v11110_v12 = vld [vmem:[#allocation3_spill] sm:$0xff]  ;;  %v11116_v60 = vld [vmem:[#allocation8_spill] sm:$0xff]  ;;  %v11117_v23 = vld [vmem:[#allocation9_spill] sm:$0xff] }
 0x36d   : > { %v7841_v62 = vadd.f32 %v10834_v17, %v7509_v29  ;;  %v8172_v30 = vadd.f32 %v10848_v14, %v7840_v38  ;;  %v8503_v47 = vadd.f32 %v11108_v40, %v8171_v45  ;;  %vm9293_vm14 = vcmp.eq.s32.totalorder %v10917_v48, 1  ;;  %v11113_v17 = vld [vmem:[#allocation5_spill] sm:$0xff]  ;;  %v11114_v14 = vld [vmem:[#allocation10_spill] sm:$0xff]  ;;  %v11115_v36 = vld [vmem:[#allocation7_spill] sm:$0xff] }
 0x36e   : > { %v10914_v19 = vpop.f32.mrf.mxu1  ;;  %vm9294_vm15 = vcmp.eq.s32.totalorder %v10924_v55, 1  ;;  %v7512_v34 = vadd.f32 %v11109_v33, %v7180_v13  ;;  %v7513_v37 = vadd.f32 %v11110_v12, %v7181_v53  ;;  %v7514_v42 = vadd.f32 %v11111_v5, %v7182_v20  ;;  %v11118_v29 = vld [vmem:[#allocation12_spill] sm:$0xff]  ;;  %v11119_v38 = vld [vmem:[#allocation11_spill] sm:$0xff] }
 0x36f   : > { %v7842_v10 = vadd.f32 %v11112_v4, %v7510_v22  ;;  %v7843_v1 = vadd.f32 %v11113_v17, %v7511_v32  ;;  %v8173_v11 = vadd.f32 %v11114_v14, %v7841_v62  ;;  %v8504_v16 = vadd.f32 %v10879_v59, %v8172_v30  ;;  %v11120_v22 = vld [vmem:[#allocation13_spill] sm:$0xff]  ;;  %v11121_v62 = vld [vmem:[#allocation14_spill] sm:$0xff]  ;;  %v11122_v40 = vld [vmem:[#allocation16_spill] sm:$0xff] }
 0x370   : > { %v10941_v54 = vpop.f32.mrf.mxu1  ;;  %vm9295_vm0 = vcmp.eq.s32.totalorder %v10933_v28, 1  ;;  %vm9296_vm1 = vcmp.eq.s32.totalorder %v10938_v39, 1  ;;  %v7844_v15 = vadd.f32 %v11115_v36, %v7512_v34  ;;  %v7845_v8 = vadd.f32 %v11116_v60, %v7513_v37 }
 0x371   : > { %v7846_v31 = vadd.f32 %v11117_v23, %v7514_v42  ;;  %v8174_v59 = vadd.f32 %v11118_v29, %v7842_v10  ;;  %v8175_v45 = vadd.f32 %v11119_v38, %v7843_v1  ;;  %v8505_v13 = vadd.f32 %v10881_v50, %v8173_v11 }
 0x372   : > { %vm9297_vm3 = vcmp.eq.s32.totalorder %v10949_v0, 1  ;;  %v8176_v32 = vadd.f32 %v11120_v22, %v7844_v15  ;;  %v8177_v30 = vadd.f32 %v11121_v62, %v7845_v8  ;;  %vm9298_vm4 = vcmp.eq.s32.totalorder %v10954_v56, 1 }
 0x373   : > { %v8506_v33 = vadd.f32 %v10903_v18, %v8174_v59  ;;  %v8507_v37 = vadd.f32 %v10892_v52, %v8175_v45  ;;  %v11027_v18 = vrot.slane %v10865_v51, %v9215_v35  ;;  %vm9299_vm5 = vcmp.eq.s32.totalorder %v10963_v21, 1 }
 0x374   : > { %v8508_v42 = vadd.f32 %v10912_v46, %v8176_v32  ;;  %v8509_v4 = vadd.f32 %v10914_v19, %v8177_v30  ;;  %vm9300_vm6 = vcmp.eq.s32.totalorder %v10970_v44, 1 }
 0x375   : > { %v8617_v9 = vpop.f32.mrf.mxu0 }
 0x376   : > { %v8835_v25 = vadd.f32 %v8617_v9, %v8503_v47  ;;  %v8178_v47 = vadd.f32 %v11122_v40, %v7846_v31 }
 0x377   : > { %v8619_v58 = vpop.f32.mrf.mxu0 }
 0x378   : > { %v8836_v53 = vadd.f32 %v8619_v58, %v8504_v16  ;;  %v8510_v10 = vadd.f32 %v10941_v54, %v8178_v47 }
 0x37a   : > { %v8688_v2 = vpop.f32.mrf.mxu1 }
 0x37b   : > { %v8837_v5 = vadd.f32 %v8688_v2, %v8505_v13 }
 0x37c   : > { %v8690_v27 = vpop.f32.mrf.mxu1 }
 0x37d   : > { %v8838_v52 = vadd.f32 %v8690_v27, %v8506_v33 }
 0x37e   : > { %v8759_v49 = vpop.f32.mrf.mxu0 }
 0x37f   : > { %v8839_v2 = vadd.f32 %v8759_v49, %v8507_v37 }
 0x380   : > { %v8761_v41 = vpop.f32.mrf.mxu0 }
 0x381   : > { %v8840_v46 = vadd.f32 %v8761_v41, %v8508_v42 }
 0x382   : > { %v8830_v26 = vpop.f32.mrf.mxu1 }
 0x383   : > { %v8841_v14 = vadd.f32 %v8830_v26, %v8509_v4 }
 0x384   : > { %v8832_v34 = vpop.f32.mrf.mxu1 }
 0x385   : > { %v8842_v19 = vadd.f32 %v8832_v34, %v8510_v10 }
 0x386   : > { %v8949_v9 = vpop.f32.mrf.mxu0 }
 0x387   : > { %v9167_v20 = vadd.f32 %v8949_v9, %v8835_v25 }
 0x388   : > { %v8951_v12 = vpop.f32.mrf.mxu0 }
 0x389   : > { %9175 = vst [vmem:[%s11004_s11] sm:$0xff] %v9167_v20  ;;  %v9225_v50 = vmul.f32 %v10921_v6, %v9167_v20  ;;  %v9168_v58 = vadd.f32 %v8951_v12, %v8836_v53  ;;  %v11041_v41 = vsel %vm9293_vm14, %v9167_v20, inf }
 0x38a   : > { %v9020_v17 = vpop.f32.mrf.mxu1 }
 0x38b   : > { %9176 = vst [vmem:[%s11004_s11 + $0x8] sm:$0xff] %v9168_v58  ;;  %v9226_v6 = vmul.f32 %v10927_v24, %v9168_v58  ;;  %v9169_v1 = vadd.f32 %v9020_v17, %v8837_v5  ;;  %v9242_v54 = vmul.f32 %v9225_v50, %v9167_v20  ;;  %v9301_v24 = vsel %vm9293_vm14, %v9167_v20, -inf }
 0x38c   : > { %v9022_v11 = vpop.f32.mrf.mxu1  ;;  %v9302_v27 = vsel %vm9294_vm15, %v9168_v58, -inf  ;;  %v9319_v26 = vsel %vm9294_vm15, %v9168_v58, inf }
 0x38d   : > { %v9233_v43 = vadd.f32 %v9226_v6, %v9225_v50  ;;  %v9243_v16 = vmul.f32 %v9226_v6, %v9168_v58  ;;  %9177 = vst [vmem:[%s11004_s11 + $0x10] sm:$0xff] %v9169_v1  ;;  %v9227_v51 = vmul.f32 %v10930_v61, %v9169_v1  ;;  %v9170_v35 = vadd.f32 %v9022_v11, %v8838_v52 }
 0x38e   : > { %v9091_v49 = vpop.f32.mrf.mxu0  ;;  %v9303_v23 = vsel %vm9295_vm0, %v9169_v1, -inf  ;;  %v9320_v31 = vsel %vm9295_vm0, %v9169_v1, inf }
 0x38f   : > { %v9250_v25 = vadd.f32 %v9243_v16, %v9242_v54  ;;  %v9244_v36 = vmul.f32 %v9227_v51, %v9169_v1  ;;  %9178 = vst [vmem:[%s11004_s11 + $0x18] sm:$0xff] %v9170_v35  ;;  %v9228_v61 = vmul.f32 %v10944_v57, %v9170_v35  ;;  %v9171_v15 = vadd.f32 %v9091_v49, %v8839_v2 }
 0x390   : > { %v9093_v60 = vpop.f32.mrf.mxu0  ;;  %v9234_v8 = vadd.f32 %v9233_v43, %v9227_v51  ;;  %v9304_v48 = vsel %vm9296_vm1, %v9170_v35, -inf  ;;  %v9321_v13 = vsel %vm9296_vm1, %v9170_v35, inf }
 0x391   : > { %v9245_v55 = vmul.f32 %v9228_v61, %v9170_v35  ;;  %9179 = vst [vmem:[%s11004_s11 + $0x20] sm:$0xff] %v9171_v15  ;;  %v9172_v29 = vadd.f32 %v9093_v60, %v8840_v46  ;;  %v9229_v59 = vmul.f32 %v10947_v63, %v9171_v15  ;;  %v9251_v9 = vadd.f32 %v9250_v25, %v9244_v36 }
 0x392   : > { %v9162_v57 = vpop.f32.mrf.mxu1  ;;  %v9235_v38 = vadd.f32 %v9234_v8, %v9228_v61  ;;  %v9305_v45 = vsel %vm9297_vm3, %v9171_v15, -inf  ;;  %v9322_v53 = vsel %vm9297_vm3, %v9171_v15, inf }
 0x393   : > { %9180 = vst [vmem:[%s11004_s11 + $0x28] sm:$0xff] %v9172_v29  ;;  %v9173_v28 = vadd.f32 %v9162_v57, %v8841_v14  ;;  %v9230_v20 = vmul.f32 %v10958_v3, %v9172_v29  ;;  %v9246_v22 = vmul.f32 %v9229_v59, %v9171_v15  ;;  %v9252_v63 = vadd.f32 %v9251_v9, %v9245_v55 }
 0x394   : > { %v9164_v32 = vpop.f32.mrf.mxu1  ;;  %v9236_v62 = vadd.f32 %v9235_v38, %v9229_v59  ;;  %v9306_v30 = vsel %vm9298_vm4, %v9172_v29, -inf  ;;  %v9309_v40 = vmax.f32 %v9301_v24, %v9305_v45  ;;  %v9323_v39 = vsel %vm9298_vm4, %v9172_v29, inf }
 0x395   : > { %9181 = vst [vmem:[%s11004_s11 + $0x30] sm:$0xff] %v9173_v28  ;;  %v9174_v47 = vadd.f32 %v9164_v32, %v8842_v19  ;;  %v9231_v0 = vmul.f32 %v10961_v7, %v9173_v28  ;;  %v9247_v33 = vmul.f32 %v9230_v20, %v9172_v29  ;;  %v9253_v34 = vadd.f32 %v9252_v63, %v9246_v22 }
 0x396   : > { %v9237_v12 = vadd.f32 %v9236_v62, %v9230_v20  ;;  %v9307_v3 = vsel %vm9299_vm5, %v9173_v28, -inf  ;;  %v9310_v37 = vmax.f32 %v9302_v27, %v9306_v30  ;;  %v9324_v5 = vsel %vm9299_vm5, %v9173_v28, inf }
 0x397   : > { %9182 = vst [vmem:[%s11004_s11 + $0x38] sm:$0xff] %v9174_v47  ;;  %v9232_v50 = vmul.f32 %v11027_v18, %v9174_v47  ;;  %v9248_v58 = vmul.f32 %v9231_v0, %v9173_v28  ;;  %v9254_v56 = vadd.f32 %v9253_v34, %v9247_v33  ;;  %v9308_v42 = vsel %vm9300_vm6, %v9174_v47, -inf }
 0x398   : > { %v9238_v4 = vadd.f32 %v9237_v12, %v9231_v0  ;;  %v9311_v7 = vmax.f32 %v9303_v23, %v9307_v3  ;;  %v9312_v10 = vmax.f32 %v9304_v48, %v9308_v42  ;;  %v9313_v17 = vmax.f32 %v9309_v40, %v9310_v37 }
 0x399   : > { %v9249_v52 = vmul.f32 %v9232_v50, %v9174_v47  ;;  %v9255_v2 = vadd.f32 %v9254_v56, %v9248_v58  ;;  %v9325_v6 = vsel %vm9300_vm6, %v9174_v47, inf  ;;  %v9326_v21 = vmin.f32 %v11041_v41, %v9322_v53 }
 0x39a   : > { %v9239_v1 = vadd.f32 %v9238_v4, %v9232_v50  ;;  %v9314_v46 = vmax.f32 %v9311_v7, %v9312_v10  ;;  %v9327_v14 = vmin.f32 %v9319_v26, %v9323_v39  ;;  %v9328_v18 = vmin.f32 %v9320_v31, %v9324_v5 }
 0x39b   : > { %v9256_v19 = vadd.f32 %v9255_v2, %v9249_v52  ;;  %v9329_v54 = vmin.f32 %v9321_v13, %v9325_v6 }
 0x39c   : > { %9240 = vadd.xlane.f32.xlu0 %v9239_v1  ;;  %v9315_v11 = vmax.f32 %v9313_v17, %v9314_v46  ;;  %v9330_v43 = vmin.f32 %v9326_v21, %v9327_v14 }
 0x39d   : > { %9257 = vadd.xlane.f32.xlu1 %v9256_v19  ;;  %v9331_v16 = vmin.f32 %v9328_v18, %v9329_v54 }
 0x39f   : > { %v9332_v51 = vmin.f32 %v9330_v43, %v9331_v16 }
 0x3a0   : > { %9316 = vmax.xlane.f32.xlu0 %v9315_v11 }
 0x3a4   : > { %9333 = vmin.xlane.f32.xlu0 %v9332_v51 }
 0x425   : > { %v9241_v35 = vpop.xlane.xlu0 %9240 }
 0x426   : > { %v9258_v44 = vpop.xlane.xlu1 %9257 }
 0x427   : > { %v9336_v24 = vsel %vm9335_vm7, %v9241_v35, %v9258_v44 }
 0x429   : > { %v9317_v49 = vpop.xlane.xlu0 %9316 }
 0x42a   : > { %v9338_v27 = vsel %vm9337_vm8, %v9336_v24, %v9317_v49 }
 0x42d   : > { %v9334_v41 = vpop.xlane.xlu0 %9333 }
 0x42e   : > { %v9340_v26 = vsel %vm9339_vm9, %v9338_v27, %v9334_v41 }
 0x42f   : > { %v9342_v25 = vsel %vm9341_vm10, %v9340_v26, 0.0 }
 0x430   : > { %9343 = vst.msk [vmem:[%s208_s14] sm:$0xff] %vm300_vm2, %v9342_v25 }
 0x431 PF: > { %s15_s15 = sadd.s32 1, %s9623_s15  }
 0x432   : > { %p12_p4 = scmp.ge.s32.totalorder %s15_s15, 4  }
 0x434   :  { %14 = sbr.rel (!%p12_p4) target bundleno = 1 (0x1), region = 100 }

// kernel: basic_block_forward.23
= control target key start
LH: loop header
LB: loop body
LE: loop exit
PB: predicated region body
PF: predicated region fallthrough
CT: control target
= control target key end

     0   :  { %s595_s18 = smov 0   ;;  %s639_s0 = inlined_call_operand.vmem [shape: f32[2,8,1024], index: 0, kind: input, shape index: {}]   ;;  %s640_s1 = inlined_call_operand.vmem [shape: f32[2,8,1], index: 1, kind: input, shape index: {}]   ;;  %s641_s2 = inlined_call_operand.vmem [shape: f32[2,8,1], index: 2, kind: input, shape index: {}]   ;;  %s642_s3 = inlined_call_operand.vmem [shape: f32[2,1,1024], index: 3, kind: input, shape index: {}]   ;;  %s643_s4 = inlined_call_operand.vmem [shape: f32[2,8,1024], index: 4, kind: input, shape index: {}]   ;;  %s644_s5 = inlined_call_operand.vmem [shape: f32[2,8,1024], index: 5, kind: output, shape index: {}]  }
   0x1 LB: > { %s523_s19 = sadd.s32 4294967295, %s562_s18   ;;  %p527_p0 = scmp.ge.s32.totalorder %s562_s18, 1  ;;  %s562_s18 = sphi %s595_s18, %s15_s18  }
   0x2   : > { %p224_p1 = scmp.lt.s32.totalorder %s562_s18, 3 }
   0x4   : > { %p225_p2 = pnand %p527_p0, %p224_p1 }
   0x5   : > { %p269_p3 = scmp.lt.s32.totalorder (!%p225_p2), %s523_s19, 1 }
   0x6   : > { %228 = sbr.rel (%p225_p2) target bundleno = 155 (0x9b), region = 40 }
   0xb   : > { %v564_v0 = vmov 0   ;;  %s646_s19 = smov (!%p269_p3, %s523_s19), 1  ;;  %v340_v8 = vlaneseq }
   0xc   : > { %551 = vset.pattern.permute.xlu0 %v564_v0  ;;  %s530_s20 = sshll.u32 %s646_s19, 3  ;;  %s612_s30 = sshll.u32 %s646_s19, 6 }
   0xd   : > { %s277_s23 = scalar_lea.vmem %s640_s1, %s530_s20  ;;  %s281_s26 = scalar_lea.vmem %s641_s2, %s530_s20  ;;  %v341_v9 = vshrl.u32 %v340_v8, 7 }
   0xe   : > { %v304_v1 = vld [vmem:[%s277_s23] sm:$0xff]  ;;  %s285_s29 = scalar_lea.vmem %s642_s3, %s530_s20  ;;  %s273_s8 = scalar_lea.vmem %s639_s0, %s612_s30 }
   0xf   : > { %307 = vperm.xlu0 %551, %v304_v1   ;;  %v318_v2 = vld [vmem:[%s281_s26] sm:$0xff]  ;;  %v342_v10 = vsub.s32 0, %v341_v9  ;;  %v346_v11 = vsub.s32 1, %v341_v9  ;;  %v350_v12 = vsub.s32 2, %v341_v9  ;;  %v354_v13 = vsub.s32 3, %v341_v9  ;;  %v297_v20 = vld [vmem:[%s273_s8 + $0x8] sm:$0xff]  ;;  %s622_s11 = scalar_lea.vmem %s643_s4, %s612_s30  ;;  %s295_s14 = scalar_lea.vmem %s644_s5, %s612_s30 }
  0x10   : > { %v332_v3 = vld [vmem:[%s285_s29] sm:$0xff]  ;;  %v358_v15 = vsub.s32 4, %v341_v9  ;;  %v362_v16 = vsub.s32 5, %v341_v9  ;;  %v366_v17 = vsub.s32 6, %v341_v9  ;;  %v370_v18 = vsub.s32 7, %v341_v9  ;;  %v298_v22 = vld [vmem:[%s273_s8 + $0x10] sm:$0xff] }
  0x11   : > { %v333_v4 = vsub.f32 0.0, %v332_v3  ;;  %v296_v19 = vld [vmem:[%s273_s8] sm:$0xff]  ;;  %v299_v23 = vld [vmem:[%s273_s8 + $0x18] sm:$0xff]  ;;  %v301_v29 = vld [vmem:[%s273_s8 + $0x28] sm:$0xff] }
  0x12   : > { %v300_v24 = vld [vmem:[%s273_s8 + $0x20] sm:$0xff]  ;;  %v302_v30 = vld [vmem:[%s273_s8 + $0x30] sm:$0xff]  ;;  %v303_v31 = vld [vmem:[%s273_s8 + $0x38] sm:$0xff] }
  0x13   : > { %321 = vperm.xlu0 %551, %v318_v2   ;;  %v334_v5 = vmul.f32 1.442695, %v333_v4  ;;  %v388_v49 = vld [vmem:[%s622_s11] sm:$0xff]  ;;  %v389_v50 = vld [vmem:[%s622_s11 + $0x8] sm:$0xff]  ;;  %v390_v55 = vld [vmem:[%s622_s11 + $0x10] sm:$0xff] }
  0x14   : > { %v391_v56 = vld [vmem:[%s622_s11 + $0x18] sm:$0xff]  ;;  %v392_v57 = vld [vmem:[%s622_s11 + $0x20] sm:$0xff]  ;;  %v393_v62 = vld [vmem:[%s622_s11 + $0x28] sm:$0xff] }
  0x15   : > { %552 = vpow2.f32 %v334_v5  ;;  %v394_v63 = vld [vmem:[%s622_s11 + $0x30] sm:$0xff]  ;;  %v395_v0 = vld [vmem:[%s622_s11 + $0x38] sm:$0xff] }
  0x22   : > { %v553_v6 = vpop.eup %552 }
  0x23   : > { %v336_v7 = vadd.f32 1.0, %v553_v6 }
  0x25   : > { %554 = vrcp.f32 %v336_v7 }
  0x32   : > { %v555_v14 = vpop.eup %554 }
  0x33   : > { %v343_v25 = vrot.slane %v555_v14, %v342_v10  ;;  %v347_v26 = vrot.slane %v555_v14, %v346_v11  ;;  %v351_v27 = vrot.slane %v555_v14, %v350_v12  ;;  %v355_v28 = vrot.slane %v555_v14, %v354_v13 }
  0x34   : > { %v359_v32 = vrot.slane %v555_v14, %v358_v15  ;;  %v363_v33 = vrot.slane %v555_v14, %v362_v16  ;;  %v367_v34 = vrot.slane %v555_v14, %v366_v17  ;;  %v371_v35 = vrot.slane %v555_v14, %v370_v18 }
  0x8a   : > { %v308_v21 = vpop.permute.xlu0 %307 }
  0x8b   : > { %v310_v36 = vmul.f32 %v308_v21, %v296_v19  ;;  %v311_v37 = vmul.f32 %v308_v21, %v297_v20  ;;  %v312_v38 = vmul.f32 %v308_v21, %v298_v22  ;;  %v313_v39 = vmul.f32 %v308_v21, %v299_v23 }
  0x8c   : > { %v314_v41 = vmul.f32 %v308_v21, %v300_v24  ;;  %v315_v42 = vmul.f32 %v308_v21, %v301_v29  ;;  %v316_v43 = vmul.f32 %v308_v21, %v302_v30  ;;  %v317_v44 = vmul.f32 %v308_v21, %v303_v31 }
  0x8e   : > { %v322_v40 = vpop.permute.xlu0 %321 }
  0x8f   : > { %v324_v45 = vadd.f32 %v322_v40, %v310_v36  ;;  %v325_v46 = vadd.f32 %v322_v40, %v311_v37  ;;  %v326_v47 = vadd.f32 %v322_v40, %v312_v38  ;;  %v327_v48 = vadd.f32 %v322_v40, %v313_v39 }
  0x90   : > { %v328_v51 = vadd.f32 %v322_v40, %v314_v41  ;;  %v329_v52 = vadd.f32 %v322_v40, %v315_v42  ;;  %v330_v53 = vadd.f32 %v322_v40, %v316_v43  ;;  %v331_v54 = vadd.f32 %v322_v40, %v317_v44 }
  0x91   : > { %v380_v58 = vmul.f32 %v343_v25, %v324_v45  ;;  %v381_v59 = vmul.f32 %v347_v26, %v325_v46  ;;  %v382_v60 = vmul.f32 %v351_v27, %v326_v47  ;;  %v383_v61 = vmul.f32 %v355_v28, %v327_v48 }
  0x92   : > { %v384_v1 = vmul.f32 %v359_v32, %v328_v51  ;;  %v385_v2 = vmul.f32 %v363_v33, %v329_v52  ;;  %v386_v3 = vmul.f32 %v367_v34, %v330_v53  ;;  %v387_v4 = vmul.f32 %v371_v35, %v331_v54 }
  0x93   : > { %v396_v5 = vadd.f32 %v388_v49, %v380_v58  ;;  %v397_v6 = vadd.f32 %v389_v50, %v381_v59  ;;  %v398_v7 = vadd.f32 %v390_v55, %v382_v60  ;;  %v399_v8 = vadd.f32 %v391_v56, %v383_v61 }
  0x94   : > { %v400_v9 = vadd.f32 %v392_v57, %v384_v1  ;;  %v401_v10 = vadd.f32 %v393_v62, %v385_v2  ;;  %v402_v11 = vadd.f32 %v394_v63, %v386_v3  ;;  %v403_v12 = vadd.f32 %v395_v0, %v387_v4 }
  0x95   : > { %v404_v13 = vmax.f32 %v396_v5, 0.0  ;;  %v405_v14 = vmax.f32 %v397_v6, 0.0  ;;  %v406_v15 = vmax.f32 %v398_v7, 0.0  ;;  %v407_v16 = vmax.f32 %v399_v8, 0.0 }
  0x96   : > { %v408_v17 = vmax.f32 %v400_v9, 0.0  ;;  %v409_v18 = vmax.f32 %v401_v10, 0.0  ;;  %v410_v19 = vmax.f32 %v402_v11, 0.0  ;;  %v411_v20 = vmax.f32 %v403_v12, 0.0 }
  0x97   : > { %412 = vst [vmem:[%s295_s14] sm:$0xff] %v404_v13  ;;  %413 = vst [vmem:[%s295_s14 + $0x8] sm:$0xff] %v405_v14 }
  0x98   : > { %414 = vst [vmem:[%s295_s14 + $0x10] sm:$0xff] %v406_v15  ;;  %415 = vst [vmem:[%s295_s14 + $0x18] sm:$0xff] %v407_v16 }
  0x99   : > { %416 = vst [vmem:[%s295_s14 + $0x20] sm:$0xff] %v408_v17  ;;  %417 = vst [vmem:[%s295_s14 + $0x28] sm:$0xff] %v409_v18 }
  0x9a   : > { %418 = vst [vmem:[%s295_s14 + $0x30] sm:$0xff] %v410_v19  ;;  %419 = vst [vmem:[%s295_s14 + $0x38] sm:$0xff] %v411_v20 }
  0x9b PF: > { %s15_s18 = sadd.s32 1, %s562_s18  }
  0x9c   : > { %p12_p4 = scmp.ge.s32.totalorder %s15_s18, 4  }
  0x9e   :  { %14 = sbr.rel (!%p12_p4) target bundleno = 1 (0x1), region = 82 }

// kernel: basic_block_forward.16
= control target key start
LH: loop header
LB: loop body
LE: loop exit
PB: predicated region body
PF: predicated region fallthrough
CT: control target
= control target key end

     0   :  { %s2014_s15 = smov 0   ;;  %s2169_s0 = inlined_call_operand.vmem [shape: f32[2,8,384], index: 0, kind: input, shape index: {}]   ;;  %s2170_s1 = inlined_call_operand.vmem [shape: f32[9,8,8], index: 1, kind: input, shape index: {}]   ;;  %s2171_s2 = inlined_call_operand.vmem [shape: f32[1,384], index: 2, kind: input, shape index: {}]   ;;  %s2172_s3 = inlined_call_operand.vmem [shape: f32[2,8,384], index: 3, kind: output, shape index: {0}]   ;;  %s2173_s4 = inlined_call_operand.vmem [shape: f32[2,8,8], index: 4, kind: output, shape index: {1}]  }
   0x1 LB: > { %s1847_s16 = sadd.s32 4294967295, %s1975_s15   ;;  %p1851_p0 = scmp.ge.s32.totalorder %s1975_s15, 1  ;;  %s1975_s15 = sphi %s2014_s15, %s15_s15  }
   0x2   : > { %p165_p1 = scmp.lt.s32.totalorder %s1975_s15, 3 }
   0x4   : > { %p166_p2 = pnand %p1851_p0, %p165_p1 }
   0x5   : > { %p195_p3 = scmp.lt.s32.totalorder (!%p166_p2), %s1847_s16, 1  ;;  %s1977_s21 = smov (!%p166_p2), 19  }
   0x6   : > { %169 = sbr.rel (%p166_p2) target bundleno = 664 (0x298), region = 32  ;;  %s1980_s22 = smov (!%p166_p2), 127  }
   0x7   : > { %s1981_s23 = smov (!%p166_p2), 126   ;;  %s1982_s24 = smov (!%p166_p2), 110  }
   0x8   : > { %s1983_s25 = smov (!%p166_p2), 109   ;;  %s1984_s26 = smov (!%p166_p2), 108  }
   0x9   : > { %s1985_s27 = smov (!%p166_p2), 92   ;;  %s1986_s28 = smov (!%p166_p2), 91  }
   0xa   : > { %s1987_s29 = smov (!%p166_p2), 90  }
   0xb   : > { %s2175_s16 = smov (!%p195_p3, %s1847_s16), 1  ;;  %v1978_v3 = vmov 0.0   ;;  %vm1979_vm0 = vmmov 0   ;;  %vm221_vm1 = vcmask 154624   ;;  %vm243_vm2 = vcmask 1039360   ;;  %v1855_v18 = vld [vmem:[%s2170_s1 + $0x8] sm:$0xff] }
   0xc   : > { %s1948_s17 = smul.u32 24, %s2175_s16  ;;  %1903 = vmatprep.subr.mxu1 %v1978_v3  ;;  %318 = vmatprep.mubr.f32.mxu0 %v1978_v3  ;;  %vm250_vm3 = vcmask 64512   ;;  %vm1858_vm4 = vmneg %vm221_vm1  ;;  %vm549_vm5 = vcmask 1031168   ;;  %v230_v22 = vld [vmem:[%s2170_s1] sm:$0xff]  ;;  %v1862_v26 = vld [vmem:[%s2170_s1 + $0x10] sm:$0xff]  ;;  %vm713_vm6 = vcmask 900096  }
   0xd   : > { %1905 = vmatprep.mubr.msk.f32.mxu1 %vm1979_vm0, %v1978_v3  ;;  %v1865_v33 = vld [vmem:[%s2170_s1 + $0x18] sm:$0xff]  ;;  %vm877_vm7 = vcmask 891904   ;;  %v1868_v41 = vld [vmem:[%s2170_s1 + $0x20] sm:$0xff]  ;;  %vm1041_vm8 = vcmask 883712   ;;  %v1871_v49 = vld [vmem:[%s2170_s1 + $0x28] sm:$0xff]  ;;  %vm1205_vm9 = vcmask 752640  }
   0xe   : > { %s199_s20 = scalar_lea.vmem %s2169_s0, %s1948_s17  ;;  %v1874_v57 = vld [vmem:[%s2170_s1 + $0x30] sm:$0xff]  ;;  %vm1369_vm10 = vcmask 744448   ;;  %vm1533_vm11 = vcmask 736256  }
   0xf   : > { %v209_v0 = vld [vmem:[%s199_s20] sm:$0xff]  ;;  %v211_v1 = vld [vmem:[%s199_s20 + $0x10] sm:$0xff]  ;;  %v210_v2 = vld [vmem:[%s199_s20 + $0x8] sm:$0xff] }
  0x10   : > { %215 = vrot.lane.b32.xlu0 %v209_v0, %s1977_s21  ;;  %219 = vrot.lane.b32.xlu1 %v211_v1, %s1977_s21  ;;  %v1877_v1 = vld [vmem:[%s2170_s1 + $0x38] sm:$0xff] }
  0x14   : > { %217 = vrot.lane.b32.xlu0 %v210_v2, %s1977_s21 }
  0x82   : > { %v2034_v4 = vpop.permute.xlu0 %215  ;;  %v220_v5 = vpop.permute.xlu1 %219 }
  0x83   : > { %v229_v9 = vsel %vm221_vm1, %v220_v5, 0.0  ;;  %v228_v10 = vsel %vm221_vm1, 0.0, %v2034_v4 }
  0x86   : > { %v218_v6 = vpop.permute.xlu0 %217 }
  0x87   : > { %v222_v7 = vsel %vm221_vm1, %v2034_v4, %v218_v6  ;;  %v2039_v8 = vsel %vm221_vm1, %v218_v6, %v220_v5  ;;  %vm1754_vm1 = vcmask 15360  }
  0x88   : > { %239 = vrot.lane.b32.xlu0 %v2039_v8, %s1980_s22  ;;  %237 = vrot.lane.b32.xlu1 %v222_v7, %s1980_s22 }
  0x8c   : > { %241 = vrot.lane.b32.xlu0 %v229_v9, %s1980_s22  ;;  %235 = vrot.lane.b32.xlu1 %v228_v10, %s1980_s22 }
  0x90   : > { %545 = vrot.lane.b32.xlu0 %v2039_v8, %s1981_s23  ;;  %543 = vrot.lane.b32.xlu1 %v222_v7, %s1981_s23 }
  0x94   : > { %707 = vrot.lane.b32.xlu0 %v222_v7, %s1982_s24  ;;  %541 = vrot.lane.b32.xlu1 %v228_v10, %s1981_s23 }
  0x98   : > { %547 = vrot.lane.b32.xlu0 %v229_v9, %s1981_s23  ;;  %709 = vrot.lane.b32.xlu1 %v2039_v8, %s1982_s24 }
  0x9c   : > { %871 = vrot.lane.b32.xlu0 %v222_v7, %s1983_s25  ;;  %705 = vrot.lane.b32.xlu1 %v228_v10, %s1982_s24 }
  0xa0   : > { %711 = vrot.lane.b32.xlu0 %v229_v9, %s1982_s24  ;;  %873 = vrot.lane.b32.xlu1 %v2039_v8, %s1983_s25 }
  0xa4   : > { %1035 = vrot.lane.b32.xlu0 %v222_v7, %s1984_s26  ;;  %869 = vrot.lane.b32.xlu1 %v228_v10, %s1983_s25 }
  0xa8   : > { %875 = vrot.lane.b32.xlu0 %v229_v9, %s1983_s25  ;;  %1037 = vrot.lane.b32.xlu1 %v2039_v8, %s1984_s26 }
  0xac   : > { %1199 = vrot.lane.b32.xlu0 %v222_v7, %s1985_s27  ;;  %1033 = vrot.lane.b32.xlu1 %v228_v10, %s1984_s26 }
  0xb0   : > { %1039 = vrot.lane.b32.xlu0 %v229_v9, %s1984_s26  ;;  %1201 = vrot.lane.b32.xlu1 %v2039_v8, %s1985_s27 }
  0xb4   : > { %1363 = vrot.lane.b32.xlu0 %v222_v7, %s1986_s28  ;;  %1197 = vrot.lane.b32.xlu1 %v228_v10, %s1985_s27 }
  0xb8   : > { %1203 = vrot.lane.b32.xlu0 %v229_v9, %s1985_s27  ;;  %1365 = vrot.lane.b32.xlu1 %v2039_v8, %s1986_s28 }
  0xbc   : > { %1527 = vrot.lane.b32.xlu0 %v222_v7, %s1987_s29  ;;  %1361 = vrot.lane.b32.xlu1 %v228_v10, %s1986_s28 }
  0xc0   : > { %1367 = vrot.lane.b32.xlu0 %v229_v9, %s1986_s28  ;;  %1529 = vrot.lane.b32.xlu1 %v2039_v8, %s1987_s29 }
  0xc4   : > { %1531 = vrot.lane.b32.xlu0 %v229_v9, %s1987_s29  ;;  %1525 = vrot.lane.b32.xlu1 %v228_v10, %s1987_s29  ;;  %v1880_v10 = vld [vmem:[%s2170_s1 + $0x40] sm:$0xff]  ;;  %s204_s29 = scalar_lea.vmem %s2172_s3, %s1948_s17  ;;  %s1854_s17 = sshll.u32 %s2175_s16, 3 }
  0xc5   : > { %s208_s6 = scalar_lea.vmem %s2173_s4, %s1854_s17 }
  0xfa   : > { %v240_v11 = vpop.permute.xlu0 %239  ;;  %v238_v12 = vpop.permute.xlu1 %237 }
  0xfb   : > { %v245_v13 = vsel %vm243_vm2, %v238_v12, %v240_v11 }
  0xfc   : > { %284 = vmatprep.subr.mxu0 %v245_v13 }
  0xfe   : > { %v242_v14 = vpop.permute.xlu0 %241  ;;  %v236_v15 = vpop.permute.xlu1 %235 }
  0xff   : > { %v244_v16 = vsel %vm243_vm2, %v236_v15, %v238_v12  ;;  %v246_v17 = vsel %vm243_vm2, %v240_v11, %v242_v14  ;;  %vm1756_vm2 = vcmask 23552  }
 0x100   : > { %285 = vmatpush1.msra.mxu0 %v244_v16  ;;  %1904 = vmatpush3.msra.mxu1 %v246_v17 }
 0x101   : > { %428 = vmatprep.subr.mxu0 %v222_v7  ;;  %1908 = vmatprep.subr.mxu1 %v1978_v3 }
 0x102   : > { %1906 = vmatmul.mubr.msk.f32.vlgmr.msra.gmra.mxu1 %vm250_vm3, %v1855_v18  ;;  %v546_v19 = vpop.permute.xlu0 %545  ;;  %1856 = vmatmul.mubr.msk.f32.vlgmr.msra.gmra.mxu0 %vm250_vm3, %v1855_v18  ;;  %v544_v20 = vpop.permute.xlu1 %543 }
 0x103   : > { %1909 = vmatpush3.msra.mxu1 %v2039_v8  ;;  %1859 = vmatpush1.msk.msra.mxu0 %vm1858_vm4, %v2034_v4  ;;  %v551_v21 = vsel %vm549_vm5, %v544_v20, %v546_v19  ;;  %vm1758_vm4 = vcmask 31744  }
 0x104   : > { %589 = vmatprep.subr.mxu0 %v551_v21  ;;  %462 = vmatprep.mubr.f32.mxu0 %v1978_v3 }
 0x105   : > { %1910 = vmatprep.mubr.msk.f32.mxu1 %vm1979_vm0, %v1978_v3  ;;  %1913 = vmatprep.subr.mxu1 %v1978_v3 }
 0x106   : > { %v708_v23 = vpop.permute.xlu0 %707  ;;  %v542_v24 = vpop.permute.xlu1 %541  ;;  %1860 = vmatmul.mubr.msk.f32.vlgmr.msra.gmra.mxu0 %vm250_vm3, %v230_v22  ;;  %1911 = vmatmul.mubr.msk.f32.vlgmr.msra.gmra.mxu1 %vm250_vm3, %v230_v22 }
 0x107   : > { %v550_v25 = vsel %vm549_vm5, %v542_v24, %v544_v20  ;;  %623 = vmatprep.mubr.f32.mxu0 %v1978_v3  ;;  %1915 = vmatprep.mubr.msk.f32.mxu1 %vm1979_vm0, %v1978_v3 }
 0x108   : > { %590 = vmatpush1.msra.mxu0 %v550_v25 }
 0x10a   : > { %v548_v27 = vpop.permute.xlu0 %547  ;;  %v710_v28 = vpop.permute.xlu1 %709  ;;  %1863 = vmatmul.mubr.msk.f32.vlgmr.msra.gmra.mxu0 %vm250_vm3, %v1862_v26 }
 0x10b   : > { %v552_v29 = vsel %vm549_vm5, %v546_v19, %v548_v27  ;;  %v715_v30 = vsel %vm713_vm6, %v708_v23, %v710_v28  ;;  %787 = vmatprep.mubr.f32.mxu0 %v1978_v3 }
 0x10c   : > { %1914 = vmatpush3.msra.mxu1 %v552_v29  ;;  %753 = vmatprep.subr.mxu0 %v715_v30 }
 0x10d   : > { %1918 = vmatprep.subr.mxu1 %v1978_v3  ;;  %1916 = vmatmul.mubr.msk.f32.vlgmr.msra.gmra.mxu1 %vm250_vm3, %v1862_v26 }
 0x10e   : > { %v872_v31 = vpop.permute.xlu0 %871  ;;  %v706_v32 = vpop.permute.xlu1 %705  ;;  %1920 = vmatprep.mubr.msk.f32.mxu1 %vm1979_vm0, %v1978_v3 }
 0x10f   : > { %v714_v34 = vsel %vm713_vm6, %v706_v32, %v708_v23 }
 0x110   : > { %754 = vmatpush1.msra.mxu0 %v714_v34 }
 0x111   : > { %1866 = vmatmul.mubr.msk.f32.vlgmr.msra.gmra.mxu0 %vm250_vm3, %v1865_v33 }
 0x112   : > { %v712_v35 = vpop.permute.xlu0 %711  ;;  %v874_v36 = vpop.permute.xlu1 %873  ;;  %951 = vmatprep.mubr.f32.mxu0 %v1978_v3 }
 0x113   : > { %v716_v37 = vsel %vm713_vm6, %v710_v28, %v712_v35  ;;  %v879_v38 = vsel %vm877_vm7, %v872_v31, %v874_v36 }
 0x114   : > { %1919 = vmatpush3.msra.mxu1 %v716_v37  ;;  %917 = vmatprep.subr.mxu0 %v879_v38 }
 0x115   : > { %1923 = vmatprep.subr.mxu1 %v1978_v3  ;;  %1921 = vmatmul.mubr.msk.f32.vlgmr.msra.gmra.mxu1 %vm250_vm3, %v1865_v33 }
 0x116   : > { %v1036_v39 = vpop.permute.xlu0 %1035  ;;  %v870_v40 = vpop.permute.xlu1 %869  ;;  %1925 = vmatprep.mubr.msk.f32.mxu1 %vm1979_vm0, %v1978_v3 }
 0x117   : > { %v878_v42 = vsel %vm877_vm7, %v870_v40, %v872_v31 }
 0x118   : > { %918 = vmatpush1.msra.mxu0 %v878_v42 }
 0x119   : > { %1869 = vmatmul.mubr.msk.f32.vlgmr.msra.gmra.mxu0 %vm250_vm3, %v1868_v41 }
 0x11a   : > { %v876_v43 = vpop.permute.xlu0 %875  ;;  %v1038_v44 = vpop.permute.xlu1 %1037  ;;  %1115 = vmatprep.mubr.f32.mxu0 %v1978_v3 }
 0x11b   : > { %v880_v45 = vsel %vm877_vm7, %v874_v36, %v876_v43  ;;  %v1043_v46 = vsel %vm1041_vm8, %v1036_v39, %v1038_v44 }
 0x11c   : > { %1924 = vmatpush3.msra.mxu1 %v880_v45  ;;  %1081 = vmatprep.subr.mxu0 %v1043_v46 }
 0x11d   : > { %1928 = vmatprep.subr.mxu1 %v1978_v3  ;;  %1926 = vmatmul.mubr.msk.f32.vlgmr.msra.gmra.mxu1 %vm250_vm3, %v1868_v41  ;;  %v1692_v41 = vlaneseq }
 0x11e   : > { %v1200_v47 = vpop.permute.xlu0 %1199  ;;  %v1034_v48 = vpop.permute.xlu1 %1033  ;;  %1930 = vmatprep.mubr.msk.f32.mxu1 %vm1979_vm0, %v1978_v3 }
 0x11f   : > { %v1042_v50 = vsel %vm1041_vm8, %v1034_v48, %v1036_v39  ;;  %v1693_v48 = vshrl.u32 %v1692_v41, 7 }
 0x120   : > { %1082 = vmatpush1.msra.mxu0 %v1042_v50 }
 0x121   : > { %1872 = vmatmul.mubr.msk.f32.vlgmr.msra.gmra.mxu0 %vm250_vm3, %v1871_v49 }
 0x122   : > { %v1040_v51 = vpop.permute.xlu0 %1039  ;;  %v1202_v52 = vpop.permute.xlu1 %1201  ;;  %1279 = vmatprep.mubr.f32.mxu0 %v1978_v3 }
 0x123   : > { %v1044_v53 = vsel %vm1041_vm8, %v1038_v44, %v1040_v51  ;;  %v1207_v54 = vsel %vm1205_vm9, %v1200_v47, %v1202_v52 }
 0x124   : > { %1929 = vmatpush3.msra.mxu1 %v1044_v53  ;;  %1245 = vmatprep.subr.mxu0 %v1207_v54 }
 0x125   : > { %1931 = vmatmul.mubr.msk.f32.vlgmr.msra.gmra.mxu1 %vm250_vm3, %v1871_v49  ;;  %1933 = vmatprep.subr.mxu1 %v1978_v3 }
 0x126   : > { %v1364_v55 = vpop.permute.xlu0 %1363  ;;  %v1198_v56 = vpop.permute.xlu1 %1197  ;;  %1935 = vmatprep.mubr.msk.f32.mxu1 %vm1979_vm0, %v1978_v3 }
 0x127   : > { %v1206_v58 = vsel %vm1205_vm9, %v1198_v56, %v1200_v47 }
 0x128   : > { %1246 = vmatpush1.msra.mxu0 %v1206_v58 }
 0x129   : > { %1875 = vmatmul.mubr.msk.f32.vlgmr.msra.gmra.mxu0 %vm250_vm3, %v1874_v57 }
 0x12a   : > { %v1204_v59 = vpop.permute.xlu0 %1203  ;;  %v1366_v60 = vpop.permute.xlu1 %1365  ;;  %1443 = vmatprep.mubr.f32.mxu0 %v1978_v3 }
 0x12b   : > { %v1208_v61 = vsel %vm1205_vm9, %v1202_v52, %v1204_v59  ;;  %v1371_v62 = vsel %vm1369_vm10, %v1364_v55, %v1366_v60  ;;  %v1690_v52 = vld [vmem:[%s2171_s2] sm:$0x7]  ;;  %v1698_v59 = vsub.s32 1, %v1693_v48 }
 0x12c   : > { %1934 = vmatpush3.msra.mxu1 %v1208_v61  ;;  %1409 = vmatprep.subr.mxu0 %v1371_v62  ;;  %vm1721_vm12 = vcmp.gt.f32.partialorder %v1690_v52, 0.0  ;;  %v1702_v61 = vsub.s32 2, %v1693_v48 }
 0x12d   : > { %1936 = vmatmul.mubr.msk.f32.vlgmr.msra.gmra.mxu1 %vm250_vm3, %v1874_v57  ;;  %1938 = vmatprep.subr.mxu1 %v1978_v3 }
 0x12e   : > { %v1528_v63 = vpop.permute.xlu0 %1527  ;;  %v1362_v0 = vpop.permute.xlu1 %1361  ;;  %1940 = vmatprep.mubr.msk.f32.mxu1 %vm1979_vm0, %v1978_v3 }
 0x12f   : > { %v1370_v2 = vsel %vm1369_vm10, %v1362_v0, %v1364_v55  ;;  %v1694_v55 = vsub.s32 0, %v1693_v48 }
 0x130   : > { %1410 = vmatpush1.msra.mxu0 %v1370_v2 }
 0x131   : > { %1878 = vmatmul.mubr.msk.f32.vlgmr.msra.gmra.mxu0 %vm250_vm3, %v1877_v1 }
 0x132   : > { %v1368_v4 = vpop.permute.xlu0 %1367  ;;  %v1530_v5 = vpop.permute.xlu1 %1529  ;;  %1607 = vmatprep.mubr.f32.mxu0 %v1978_v3 }
 0x133   : > { %v1372_v6 = vsel %vm1369_vm10, %v1366_v60, %v1368_v4  ;;  %v1535_v7 = vsel %vm1533_vm11, %v1528_v63, %v1530_v5 }
 0x134   : > { %1939 = vmatpush3.msra.mxu1 %v1372_v6  ;;  %1573 = vmatprep.subr.mxu0 %v1535_v7  ;;  %v1695_v6 = vrot.slane %v1690_v52, %v1694_v55 }
 0x135   : > { %1941 = vmatmul.mubr.msk.f32.vlgmr.msra.gmra.mxu1 %vm250_vm3, %v1877_v1  ;;  %1943 = vmatprep.subr.mxu1 %v1978_v3  ;;  %v1988_v1 = vmov 0  }
 0x136   : > { %v1532_v8 = vpop.permute.xlu0 %1531  ;;  %v1526_v9 = vpop.permute.xlu1 %1525  ;;  %1945 = vmatprep.mubr.msk.f32.mxu1 %vm1979_vm0, %v1978_v3  ;;  %v1722_v2 = vsel %vm1721_vm12, 1, %v1988_v1  ;;  %vm1752_vm0 = vcmask 7168  }
 0x137   : > { %v1536_v11 = vsel %vm1533_vm11, %v1530_v5, %v1532_v8  ;;  %v1534_v12 = vsel %vm1533_vm11, %v1526_v9, %v1528_v63 }
 0x138   : > { %1574 = vmatpush1.msra.mxu0 %v1534_v12  ;;  %1944 = vmatpush3.msra.mxu1 %v1536_v11 }
 0x139   : > { %1881 = vmatmul.mubr.msk.f32.vlgmr.msra.gmra.mxu0 %vm250_vm3, %v1880_v10  ;;  %1946 = vmatmul.mubr.msk.f32.vlgmr.msra.gmra.mxu1 %vm250_vm3, %v1880_v10  ;;  %v1730_v10 = vrot.slane %v1722_v2, %v1698_v59 }
 0x13b   : > { %vm1736_vm13 = vcmp.eq.s32.totalorder %v1730_v10, 1 }
 0x1c2   : > { %v320_v13 = vpop.f32.mrf.mxu0  ;;  %v391_v14 = vpop.f32.mrf.mxu1 }
 0x1c4   : > { %v322_v15 = vpop.f32.mrf.mxu0  ;;  %v1907_v16 = vpop.f32.mrf.mxu1 }
 0x1c6   : > { %v535_v17 = vpop.f32.mrf.mxu1  ;;  %v464_v3 = vpop.f32.mrf.mxu0 }
 0x1c7   : > { %v465_v32 = vadd.f32 %v464_v3, %v320_v13  ;;  %v536_v33 = vadd.f32 %v535_v17, %v391_v14  ;;  %v1703_v13 = vrot.slane %v1690_v52, %v1702_v61  ;;  %v1726_v14 = vrot.slane %v1722_v2, %v1694_v55 }
 0x1c8   : > { %v1912_v18 = vpop.f32.mrf.mxu1  ;;  %v466_v19 = vpop.f32.mrf.mxu0  ;;  %v1699_v3 = vrot.slane %v1690_v52, %v1698_v59 }
 0x1c9   : > { %v467_v37 = vadd.f32 %v466_v19, %v322_v15  ;;  %vm1735_vm14 = vcmp.eq.s32.totalorder %v1726_v14, 1 }
 0x1ca   : > { %v625_v21 = vpop.f32.mrf.mxu0 }
 0x1cb   : > { %v700_v38 = vadd.f32 %v625_v21, %v465_v32 }
 0x1cc   : > { %v627_v23 = vpop.f32.mrf.mxu0 }
 0x1cd   : > { %v696_v20 = vpop.f32.mrf.mxu1  ;;  %v701_v42 = vadd.f32 %v627_v23, %v467_v37 }
 0x1ce   : > { %v702_v39 = vadd.f32 %v696_v20, %v536_v33 }
 0x1cf   : > { %v1917_v22 = vpop.f32.mrf.mxu1 }
 0x1d0   : > { %v1734_v22 = vrot.slane %v1722_v2, %v1702_v61 }
 0x1d1   : > { %v789_v25 = vpop.f32.mrf.mxu0 }
 0x1d2   : > { %v864_v43 = vadd.f32 %v789_v25, %v700_v38  ;;  %vm1737_vm15 = vcmp.eq.s32.totalorder %v1734_v22, 1 }
 0x1d3   : > { %v791_v27 = vpop.f32.mrf.mxu0 }
 0x1d4   : > { %v865_v49 = vadd.f32 %v791_v27, %v701_v42 }
 0x1d5   : > { %v860_v24 = vpop.f32.mrf.mxu1 }
 0x1d6   : > { %v866_v44 = vadd.f32 %v860_v24, %v702_v39 }
 0x1d7   : > { %v1922_v26 = vpop.f32.mrf.mxu1 }
 0x1d9   : > { %v953_v29 = vpop.f32.mrf.mxu0 }
 0x1da   : > { %v1028_v50 = vadd.f32 %v953_v29, %v864_v43 }
 0x1db   : > { %v955_v31 = vpop.f32.mrf.mxu0 }
 0x1dc   : > { %v1029_v56 = vadd.f32 %v955_v31, %v865_v49 }
 0x1dd   : > { %v1024_v28 = vpop.f32.mrf.mxu1 }
 0x1de   : > { %v1030_v51 = vadd.f32 %v1024_v28, %v866_v44 }
 0x1df   : > { %v1927_v30 = vpop.f32.mrf.mxu1 }
 0x1e1   : > { %v1117_v35 = vpop.f32.mrf.mxu0 }
 0x1e2   : > { %v1192_v57 = vadd.f32 %v1117_v35, %v1028_v50 }
 0x1e3   : > { %v1119_v40 = vpop.f32.mrf.mxu0 }
 0x1e4   : > { %v1193_v62 = vadd.f32 %v1119_v40, %v1029_v56 }
 0x1e5   : > { %v1188_v34 = vpop.f32.mrf.mxu1 }
 0x1e6   : > { %v1194_v58 = vadd.f32 %v1188_v34, %v1030_v51 }
 0x1e7   : > { %v1932_v36 = vpop.f32.mrf.mxu1 }
 0x1e9   : > { %v1281_v45 = vpop.f32.mrf.mxu0 }
 0x1ea   : > { %v1356_v63 = vadd.f32 %v1281_v45, %v1192_v57 }
 0x1eb   : > { %v1283_v53 = vpop.f32.mrf.mxu0 }
 0x1ec   : > { %v1357_v7 = vadd.f32 %v1283_v53, %v1193_v62 }
 0x1ed   : > { %v1352_v46 = vpop.f32.mrf.mxu1 }
 0x1ee   : > { %v1358_v0 = vadd.f32 %v1352_v46, %v1194_v58 }
 0x1ef   : > { %v1937_v47 = vpop.f32.mrf.mxu1 }
 0x1f1   : > { %v1445_v54 = vpop.f32.mrf.mxu0 }
 0x1f2   : > { %v1520_v8 = vadd.f32 %v1445_v54, %v1356_v63 }
 0x1f3   : > { %v1447_v4 = vpop.f32.mrf.mxu0 }
 0x1f4   : > { %v1521_v15 = vadd.f32 %v1447_v4, %v1357_v7 }
 0x1f5   : > { %v1516_v60 = vpop.f32.mrf.mxu1 }
 0x1f6   : > { %v1522_v9 = vadd.f32 %v1516_v60, %v1358_v0 }
 0x1f7   : > { %v1942_v5 = vpop.f32.mrf.mxu1 }
 0x1f9   : > { %v1609_v11 = vpop.f32.mrf.mxu0  ;;  %v1680_v12 = vpop.f32.mrf.mxu1 }
 0x1fa   : > { %v1684_v16 = vadd.f32 %v1609_v11, %v1520_v8  ;;  %v1686_v17 = vadd.f32 %v1680_v12, %v1522_v9 }
 0x1fb   : > { %v1611_v18 = vpop.f32.mrf.mxu0  ;;  %v1947_v19 = vpop.f32.mrf.mxu1 }
 0x1fc   : > { %1687 = vst [vmem:[%s204_s29] sm:$0xff] %v1684_v16  ;;  %1689 = vst [vmem:[%s204_s29 + $0x10] sm:$0xff] %v1686_v17  ;;  %v1685_v20 = vadd.f32 %v1611_v18, %v1521_v15  ;;  %v1707_v21 = vmul.f32 %v1695_v6, %v1684_v16  ;;  %v1709_v24 = vmul.f32 %v1703_v13, %v1686_v17  ;;  %v1745_v29 = vsel %vm1735_vm14, %v1684_v16, inf }
 0x1fd   : > { %v1738_v35 = vsel %vm1735_vm14, %v1684_v16, -inf  ;;  %v1747_v38 = vsel %vm1737_vm15, %v1686_v17, inf  ;;  %v1740_v40 = vsel %vm1737_vm15, %v1686_v17, -inf }
 0x1fe   : > { %1688 = vst [vmem:[%s204_s29 + $0x8] sm:$0xff] %v1685_v20  ;;  %v1708_v23 = vmul.f32 %v1699_v3, %v1685_v20  ;;  %v1746_v25 = vsel %vm1736_vm13, %v1685_v20, inf  ;;  %v1714_v27 = vmul.f32 %v1707_v21, %v1684_v16  ;;  %v1739_v30 = vsel %vm1736_vm13, %v1685_v20, -inf }
 0x1ff   : > { %v1716_v32 = vmul.f32 %v1709_v24, %v1686_v17  ;;  %v1748_v34 = vmin.f32 %v1745_v29, %v1746_v25  ;;  %v1741_v37 = vmax.f32 %v1738_v35, %v1739_v30 }
 0x200   : > { %v1710_v26 = vadd.f32 %v1708_v23, %v1707_v21  ;;  %v1715_v28 = vmul.f32 %v1708_v23, %v1685_v20 }
 0x201   : > { %v1749_v39 = vmin.f32 %v1748_v34, %v1747_v38  ;;  %v1742_v41 = vmax.f32 %v1741_v37, %v1740_v40 }
 0x202   : > { %v1711_v31 = vadd.f32 %v1710_v26, %v1709_v24  ;;  %v1717_v33 = vadd.f32 %v1715_v28, %v1714_v27 }
 0x204   : > { %1712 = vadd.xlane.f32.xlu1 %v1711_v31  ;;  %v1718_v36 = vadd.f32 %v1717_v33, %v1716_v32 }
 0x206   : > { %1719 = vadd.xlane.f32.xlu0 %v1718_v36 }
 0x208   : > { %1750 = vmin.xlane.f32.xlu1 %v1749_v39 }
 0x20a   : > { %1743 = vmax.xlane.f32.xlu0 %v1742_v41 }
 0x28d   : > { %v1713_v42 = vpop.xlane.xlu1 %1712 }
 0x28f   : > { %v1720_v43 = vpop.xlane.xlu0 %1719 }
 0x290   : > { %v1753_v44 = vsel %vm1752_vm0, %v1713_v42, %v1720_v43 }
 0x291   : > { %v1751_v46 = vpop.xlane.xlu1 %1750 }
 0x293   : > { %v1744_v45 = vpop.xlane.xlu0 %1743 }
 0x294   : > { %v1755_v47 = vsel %vm1754_vm1, %v1753_v44, %v1744_v45 }
 0x295   : > { %v1757_v48 = vsel %vm1756_vm2, %v1755_v47, %v1751_v46 }
 0x296   : > { %v1759_v49 = vsel %vm1758_vm4, %v1757_v48, 0.0 }
 0x297   : > { %1760 = vst.msk [vmem:[%s208_s6] sm:$0xff] %vm250_vm3, %v1759_v49 }
 0x298 PF: > { %s15_s15 = sadd.s32 1, %s1975_s15  }
 0x299   : > { %p12_p4 = scmp.ge.s32.totalorder %s15_s15, 4  }
 0x29b   :  { %14 = sbr.rel (!%p12_p4) target bundleno = 1 (0x1), region = 82 }

// kernel: basic_block_forward.18
= control target key start
LH: loop header
LB: loop body
LE: loop exit
PB: predicated region body
PF: predicated region fallthrough
CT: control target
= control target key end

     0   :  { %s430_s12 = smov 0   ;;  %s458_s0 = inlined_call_operand.vmem [shape: f32[2,8,384], index: 0, kind: input, shape index: {}]   ;;  %s459_s1 = inlined_call_operand.vmem [shape: f32[2,8,1], index: 1, kind: input, shape index: {}]   ;;  %s460_s2 = inlined_call_operand.vmem [shape: f32[2,8,1], index: 2, kind: input, shape index: {}]   ;;  %s461_s3 = inlined_call_operand.vmem [shape: f32[2,2,384], index: 3, kind: output, shape index: {}]  }
   0x1 LB: > { %s376_s13 = sadd.s32 4294967295, %s406_s12   ;;  %p380_p0 = scmp.ge.s32.totalorder %s406_s12, 1  ;;  %s406_s12 = sphi %s430_s12, %s13_s12  }
   0x2   : > { %p155_p1 = scmp.lt.s32.totalorder %s406_s12, 3 }
   0x4   : > { %p156_p2 = pnand %p380_p0, %p155_p1 }
   0x5   : > { %p187_p3 = scmp.lt.s32.totalorder (!%p156_p2), %s376_s13, 1 }
   0x6   : > { %159 = sbr.rel (%p156_p2) target bundleno = 169 (0xa9), region = 32 }
   0xb   : > { %v408_v0 = vmov 0   ;;  %s463_s13 = smov (!%p187_p3, %s376_s13), 1  ;;  %vm226_vm0 = vcmask 1043456   ;;  %v409_v34 = vmov 1983009808   ;;  %v283_v36 = vlaneseq }
   0xc   : > { %399 = vset.pattern.permute.xlu0 %v408_v0  ;;  %s382_s14 = sshll.u32 %s463_s13, 3  ;;  %s387_s21 = smul.u32 24, %s463_s13  ;;  %v281_v35 = vunpack.c.l.s4 %v409_v34  ;;  %vm272_vm1 = vcmask 1040384  }
   0xd   : > { %s195_s17 = scalar_lea.vmem %s459_s1, %s382_s14  ;;  %s199_s20 = scalar_lea.vmem %s460_s2, %s382_s14  ;;  %v284_v49 = vshrl.u32 %v283_v36, 7 }
   0xe   : > { %v208_v1 = vld [vmem:[%s195_s17] sm:$0xff]  ;;  %s191_s24 = scalar_lea.vmem %s458_s0, %s387_s21  ;;  %v282_v52 = vunpack.c.0.s8 %v281_v35  ;;  %s388_s25 = smul.u32 6, %s463_s13 }
   0xf   : > { %211 = vperm.xlu0 %399, %v208_v1   ;;  %v217_v2 = vld [vmem:[%s199_s20] sm:$0xff]  ;;  %v206_v5 = vld [vmem:[%s191_s24 + $0x8] sm:$0xff]  ;;  %v207_v6 = vld [vmem:[%s191_s24 + $0x10] sm:$0xff] }
  0x10   : > { %v205_v4 = vld [vmem:[%s191_s24] sm:$0xff]  ;;  %v285_v0 = vsub.s32 %v282_v52, %v284_v49  ;;  %s204_s28 = scalar_lea.vmem %s461_s3, %s388_s25 }
  0x13   : > { %220 = vperm.xlu0 %399, %v217_v2  }
  0x8a   : > { %v212_v3 = vpop.permute.xlu0 %211 }
  0x8b   : > { %v214_v7 = vmul.f32 %v212_v3, %v205_v4  ;;  %v215_v8 = vmul.f32 %v212_v3, %v206_v5  ;;  %v216_v9 = vmul.f32 %v212_v3, %v207_v6 }
  0x8e   : > { %v221_v10 = vpop.permute.xlu0 %220 }
  0x8f   : > { %v223_v11 = vadd.f32 %v221_v10, %v214_v7  ;;  %v224_v12 = vadd.f32 %v221_v10, %v215_v8  ;;  %v225_v13 = vadd.f32 %v221_v10, %v216_v9 }
  0x91   : > { %v227_v14 = vsel %vm226_vm0, %v223_v11, 0.0  ;;  %v234_v15 = vsel %vm226_vm0, %v224_v12, 0.0  ;;  %v241_v16 = vsel %vm226_vm0, %v225_v13, 0.0  ;;  %v251_v17 = vsel %vm226_vm0, %v223_v11, -inf }
  0x92   : > { %v228_v18 = vrot.slane %v227_v14, 4  ;;  %v235_v19 = vrot.slane %v234_v15, 4  ;;  %v242_v20 = vrot.slane %v241_v16, 4  ;;  %v252_v21 = vrot.slane %v251_v17, 4 }
  0x93   : > { %v258_v22 = vsel %vm226_vm0, %v224_v12, -inf  ;;  %v265_v23 = vsel %vm226_vm0, %v225_v13, -inf }
  0x94   : > { %v229_v24 = vadd.f32 %v228_v18, %v227_v14  ;;  %v236_v25 = vadd.f32 %v235_v19, %v234_v15  ;;  %v243_v26 = vadd.f32 %v242_v20, %v241_v16  ;;  %v253_v27 = vmax.f32 %v251_v17, %v252_v21 }
  0x95   : > { %v259_v28 = vrot.slane %v258_v22, 4  ;;  %v266_v29 = vrot.slane %v265_v23, 4 }
  0x96   : > { %v230_v30 = vrot.slane %v229_v24, 2  ;;  %v237_v31 = vrot.slane %v236_v25, 2  ;;  %v244_v32 = vrot.slane %v243_v26, 2  ;;  %v254_v33 = vrot.slane %v253_v27, 2 }
  0x97   : > { %v260_v37 = vmax.f32 %v258_v22, %v259_v28  ;;  %v267_v38 = vmax.f32 %v265_v23, %v266_v29 }
  0x98   : > { %v231_v39 = vadd.f32 %v230_v30, %v229_v24  ;;  %v238_v40 = vadd.f32 %v237_v31, %v236_v25  ;;  %v245_v41 = vadd.f32 %v244_v32, %v243_v26  ;;  %v255_v42 = vmax.f32 %v253_v27, %v254_v33 }
  0x99   : > { %v261_v43 = vrot.slane %v260_v37, 2  ;;  %v268_v44 = vrot.slane %v267_v38, 2 }
  0x9a   : > { %v232_v45 = vrot.slane %v231_v39, 1  ;;  %v239_v46 = vrot.slane %v238_v40, 1  ;;  %v246_v47 = vrot.slane %v245_v41, 1  ;;  %v256_v48 = vrot.slane %v255_v42, 1 }
  0x9b   : > { %v262_v50 = vmax.f32 %v260_v37, %v261_v43  ;;  %v269_v51 = vmax.f32 %v267_v38, %v268_v44 }
  0x9c   : > { %v233_v53 = vadd.f32 %v232_v45, %v231_v39  ;;  %v240_v54 = vadd.f32 %v239_v46, %v238_v40  ;;  %v247_v55 = vadd.f32 %v246_v47, %v245_v41  ;;  %v257_v61 = vmax.f32 %v255_v42, %v256_v48 }
  0x9d   : > { %v263_v56 = vrot.slane %v262_v50, 1  ;;  %v270_v57 = vrot.slane %v269_v51, 1 }
  0x9e   : > { %v248_v58 = vmul.f32 0.25, %v233_v53  ;;  %v249_v59 = vmul.f32 0.25, %v240_v54  ;;  %v250_v60 = vmul.f32 0.25, %v247_v55 }
  0x9f   : > { %v264_v62 = vmax.f32 %v262_v50, %v263_v56  ;;  %v271_v63 = vmax.f32 %v269_v51, %v270_v57 }
  0xa0   : > { %v273_v1 = vsel %vm272_vm1, %v248_v58, %v257_v61 }
  0xa1   : > { %v274_v2 = vsel %vm272_vm1, %v249_v59, %v264_v62  ;;  %v275_v3 = vsel %vm272_vm1, %v250_v60, %v271_v63 }
  0xa2   : > { %v279_v4 = vcombine.low %v273_v1, %v274_v2  ;;  %v293_v6 = vrot.slane %v275_v3, %v285_v0 }
  0xa4   : > { %v286_v5 = vrot.slane %v279_v4, %v285_v0 }
  0xa6   : > { %v294_v7 = vcombine.low %v286_v5, %v293_v6 }
  0xa8   : > { %296 = vst [vmem:[%s204_s28] sm:$0x3f] %v294_v7 }
  0xa9 PF: > { %s13_s12 = sadd.s32 1, %s406_s12  }
  0xaa   : > { %p10_p4 = scmp.ge.s32.totalorder %s13_s12, 4  }
  0xac   :  { %12 = sbr.rel (!%p10_p4) target bundleno = 1 (0x1), region = 68 }

// kernel: basic_block_forward.17
= control target key start
LH: loop header
LB: loop body
LE: loop exit
PB: predicated region body
PF: predicated region fallthrough
CT: control target
= control target key end

     0   :  { %s2120_s21 = smov 0   ;;  %s2325_s0 = inlined_call_operand.vmem [shape: f32[2,8,384], index: 0, kind: input, shape index: {}]   ;;  %s2326_s1 = inlined_call_operand.vmem [shape: f32[9,8,8], index: 1, kind: input, shape index: {}]   ;;  %s2327_s2 = inlined_call_operand.vmem [shape: f32[1,384], index: 2, kind: input, shape index: {}]   ;;  %s2328_s3 = inlined_call_operand.vmem [shape: f32[8,1], index: 3, kind: input, shape index: {}]   ;;  %s2329_s4 = inlined_call_operand.vmem [shape: f32[8,1], index: 4, kind: input, shape index: {}]   ;;  %s2330_s5 = inlined_call_operand.vmem [shape: f32[2,8,384], index: 5, kind: output, shape index: {0}]   ;;  %s2331_s6 = inlined_call_operand.vmem [shape: f32[2,8,8], index: 6, kind: output, shape index: {1}]  }
   0x1 LB: > { %s1942_s22 = sadd.s32 4294967295, %s2071_s21   ;;  %p1946_p0 = scmp.ge.s32.totalorder %s2071_s21, 1  ;;  %s2071_s21 = sphi %s2120_s21, %s17_s21  }
   0x2   : > { %p215_p1 = scmp.lt.s32.totalorder %s2071_s21, 3 }
   0x4   : > { %p216_p2 = pnand %p1946_p0, %p215_p1 }
   0x5   : > { %p249_p3 = scmp.lt.s32.totalorder (!%p216_p2), %s1942_s22, 1  ;;  %s2074_s9 = smov (!%p216_p2), 19  }
   0x6   : > { %219 = sbr.rel (%p216_p2) target bundleno = 795 (0x31b), region = 40  ;;  %s2077_s10 = smov (!%p216_p2), 127  }
   0x7   : > { %s2078_s11 = smov (!%p216_p2), 126   ;;  %s2079_s12 = smov (!%p216_p2), 110  }
   0x8   : > { %s2080_s13 = smov (!%p216_p2), 109   ;;  %s2081_s14 = smov (!%p216_p2), 108  }
   0x9   : > { %s2082_s15 = smov (!%p216_p2), 92   ;;  %s2083_s16 = smov (!%p216_p2), 91  }
   0xa   : > { %s2084_s17 = smov (!%p216_p2), 90  }
   0xb   : > { %v266_v0 = vld [vmem:[%s2328_s3] sm:$0xff]  ;;  %v2073_v1 = vmov 0   ;;  %s2339_s22 = smov (!%p249_p3, %s1942_s22), 1  ;;  %v289_v3 = vlaneseq  ;;  %v2075_v29 = vmov 0.0   ;;  %vm2076_vm0 = vmmov 0   ;;  %v1950_v44 = vld [vmem:[%s2326_s1 + $0x8] sm:$0xff] }
   0xc   : > { %2064 = vset.pattern.permute.xlu0 %v2073_v1  ;;  %v275_v2 = vld [vmem:[%s2329_s4] sm:$0xff]  ;;  %s2043_s27 = smul.u32 24, %s2339_s22  ;;  %1998 = vmatprep.subr.mxu1 %v2075_v29  ;;  %vm316_vm1 = vcmask 154624   ;;  %vm338_vm2 = vcmask 1039360   ;;  %vm345_vm3 = vcmask 64512   ;;  %vm644_vm5 = vcmask 1031168  }
   0xd   : > { %269 = vperm.xlu0 %2064, %v266_v0   ;;  %v290_v4 = vshrl.u32 %v289_v3, 7  ;;  %v287_v11 = vld [vmem:[%s2327_s2] sm:$0x7]  ;;  %413 = vmatprep.mubr.f32.mxu0 %v2075_v29  ;;  %vm1953_vm4 = vmneg %vm316_vm1  ;;  %v1957_v52 = vld [vmem:[%s2326_s1 + $0x10] sm:$0xff]  ;;  %vm808_vm6 = vcmask 900096   ;;  %vm972_vm7 = vcmask 891904  }
   0xe   : > { %s253_s30 = scalar_lea.vmem %s2325_s0, %s2043_s27  ;;  %2000 = vmatprep.mubr.msk.f32.mxu1 %vm2076_vm0, %v2075_v29  ;;  %v325_v48 = vld [vmem:[%s2326_s1] sm:$0xff]  ;;  %v1960_v59 = vld [vmem:[%s2326_s1 + $0x18] sm:$0xff]  ;;  %vm1136_vm8 = vcmask 883712   ;;  %vm1300_vm9 = vcmask 752640   ;;  %vm1464_vm10 = vcmask 744448   ;;  %vm1628_vm11 = vcmask 736256   ;;  %s258_s19 = scalar_lea.vmem %s2330_s5, %s2043_s27 }
   0xf   : > { %v2143_v5 = vsub.s32 2, %v290_v4  ;;  %v263_v7 = vld [vmem:[%s253_s30] sm:$0xff]  ;;  %v264_v8 = vld [vmem:[%s253_s30 + $0x8] sm:$0xff]  ;;  %v265_v9 = vld [vmem:[%s253_s30 + $0x10] sm:$0xff]  ;;  %v2145_v10 = vsub.s32 0, %v290_v4  ;;  %v2150_v15 = vsub.s32 1, %v290_v4 }
  0x10   : > { %v1963_v4 = vld [vmem:[%s2326_s1 + $0x20] sm:$0xff]  ;;  %s1949_s27 = sshll.u32 %s2339_s22, 3 }
  0x11   : > { %278 = vperm.xlu0 %2064, %v275_v2   ;;  %v300_v17 = vrot.slane %v287_v11, %v2143_v5  ;;  %v292_v21 = vrot.slane %v287_v11, %v2145_v10  ;;  %v296_v27 = vrot.slane %v287_v11, %v2150_v15  ;;  %s262_s24 = scalar_lea.vmem %s2331_s6, %s1949_s27 }
  0x88   : > { %v270_v6 = vpop.permute.xlu0 %269 }
  0x89   : > { %v272_v12 = vmul.f32 %v270_v6, %v263_v7  ;;  %v273_v13 = vmul.f32 %v270_v6, %v264_v8  ;;  %v274_v14 = vmul.f32 %v270_v6, %v265_v9 }
  0x8c   : > { %v279_v16 = vpop.permute.xlu0 %278 }
  0x8d   : > { %v281_v18 = vadd.f32 %v279_v16, %v272_v12  ;;  %v282_v19 = vadd.f32 %v279_v16, %v273_v13  ;;  %v283_v20 = vadd.f32 %v279_v16, %v274_v14  ;;  %v1966_v14 = vld [vmem:[%s2326_s1 + $0x28] sm:$0xff] }
  0x8f   : > { %v286_v22 = vmax.f32 %v283_v20, 0.0  ;;  %v284_v23 = vmax.f32 %v281_v18, 0.0  ;;  %v285_v24 = vmax.f32 %v282_v19, 0.0 }
  0x91   : > { %v306_v25 = vmul.f32 %v300_v17, %v286_v22  ;;  %v304_v26 = vmul.f32 %v292_v21, %v284_v23  ;;  %v305_v28 = vmul.f32 %v296_v27, %v285_v24  ;;  %v1969_v23 = vld [vmem:[%s2326_s1 + $0x30] sm:$0xff] }
  0x93   : > { %314 = vrot.lane.b32.xlu0 %v306_v25, %s2074_s9  ;;  %310 = vrot.lane.b32.xlu1 %v304_v26, %s2074_s9 }
  0x97   : > { %312 = vrot.lane.b32.xlu1 %v305_v28, %s2074_s9 }
 0x105   : > { %v2159_v30 = vpop.permute.xlu1 %310  ;;  %v315_v31 = vpop.permute.xlu0 %314 }
 0x106   : > { %v324_v35 = vsel %vm316_vm1, %v315_v31, 0.0  ;;  %v323_v36 = vsel %vm316_vm1, 0.0, %v2159_v30 }
 0x109   : > { %v313_v32 = vpop.permute.xlu1 %312 }
 0x10a   : > { %v317_v33 = vsel %vm316_vm1, %v2159_v30, %v313_v32  ;;  %v2164_v34 = vsel %vm316_vm1, %v313_v32, %v315_v31  ;;  %v1972_v32 = vld [vmem:[%s2326_s1 + $0x38] sm:$0xff]  ;;  %vm1849_vm1 = vcmask 15360  }
 0x10b   : > { %334 = vrot.lane.b32.xlu0 %v2164_v34, %s2077_s10  ;;  %332 = vrot.lane.b32.xlu1 %v317_v33, %s2077_s10 }
 0x10f   : > { %336 = vrot.lane.b32.xlu0 %v324_v35, %s2077_s10  ;;  %330 = vrot.lane.b32.xlu1 %v323_v36, %s2077_s10 }
 0x113   : > { %640 = vrot.lane.b32.xlu0 %v2164_v34, %s2078_s11  ;;  %638 = vrot.lane.b32.xlu1 %v317_v33, %s2078_s11 }
 0x117   : > { %802 = vrot.lane.b32.xlu0 %v317_v33, %s2079_s12  ;;  %636 = vrot.lane.b32.xlu1 %v323_v36, %s2078_s11 }
 0x11b   : > { %642 = vrot.lane.b32.xlu0 %v324_v35, %s2078_s11  ;;  %804 = vrot.lane.b32.xlu1 %v2164_v34, %s2079_s12 }
 0x11f   : > { %966 = vrot.lane.b32.xlu0 %v317_v33, %s2080_s13  ;;  %800 = vrot.lane.b32.xlu1 %v323_v36, %s2079_s12 }
 0x123   : > { %806 = vrot.lane.b32.xlu0 %v324_v35, %s2079_s12  ;;  %968 = vrot.lane.b32.xlu1 %v2164_v34, %s2080_s13 }
 0x127   : > { %1130 = vrot.lane.b32.xlu0 %v317_v33, %s2081_s14  ;;  %964 = vrot.lane.b32.xlu1 %v323_v36, %s2080_s13 }
 0x12b   : > { %970 = vrot.lane.b32.xlu0 %v324_v35, %s2080_s13  ;;  %1132 = vrot.lane.b32.xlu1 %v2164_v34, %s2081_s14 }
 0x12f   : > { %1294 = vrot.lane.b32.xlu0 %v317_v33, %s2082_s15  ;;  %1128 = vrot.lane.b32.xlu1 %v323_v36, %s2081_s14 }
 0x133   : > { %1134 = vrot.lane.b32.xlu0 %v324_v35, %s2081_s14  ;;  %1296 = vrot.lane.b32.xlu1 %v2164_v34, %s2082_s15 }
 0x137   : > { %1458 = vrot.lane.b32.xlu0 %v317_v33, %s2083_s16  ;;  %1292 = vrot.lane.b32.xlu1 %v323_v36, %s2082_s15 }
 0x13b   : > { %1298 = vrot.lane.b32.xlu0 %v324_v35, %s2082_s15  ;;  %1460 = vrot.lane.b32.xlu1 %v2164_v34, %s2083_s16 }
 0x13f   : > { %1622 = vrot.lane.b32.xlu0 %v317_v33, %s2084_s17  ;;  %1456 = vrot.lane.b32.xlu1 %v323_v36, %s2083_s16 }
 0x143   : > { %1462 = vrot.lane.b32.xlu0 %v324_v35, %s2083_s16  ;;  %1624 = vrot.lane.b32.xlu1 %v2164_v34, %s2084_s17 }
 0x147   : > { %1626 = vrot.lane.b32.xlu0 %v324_v35, %s2084_s17  ;;  %1620 = vrot.lane.b32.xlu1 %v323_v36, %s2084_s17 }
 0x17d   : > { %v335_v37 = vpop.permute.xlu0 %334  ;;  %v333_v38 = vpop.permute.xlu1 %332 }
 0x17e   : > { %v340_v39 = vsel %vm338_vm2, %v333_v38, %v335_v37 }
 0x17f   : > { %379 = vmatprep.subr.mxu0 %v340_v39 }
 0x181   : > { %v337_v40 = vpop.permute.xlu0 %336  ;;  %v331_v41 = vpop.permute.xlu1 %330 }
 0x182   : > { %v339_v42 = vsel %vm338_vm2, %v331_v41, %v333_v38  ;;  %v341_v43 = vsel %vm338_vm2, %v335_v37, %v337_v40  ;;  %v1975_v40 = vld [vmem:[%s2326_s1 + $0x40] sm:$0xff]  ;;  %vm1851_vm2 = vcmask 23552  }
 0x183   : > { %380 = vmatpush1.msra.mxu0 %v339_v42  ;;  %1999 = vmatpush3.msra.mxu1 %v341_v43 }
 0x184   : > { %523 = vmatprep.subr.mxu0 %v317_v33  ;;  %2003 = vmatprep.subr.mxu1 %v2075_v29 }
 0x185   : > { %2001 = vmatmul.mubr.msk.f32.vlgmr.msra.gmra.mxu1 %vm345_vm3, %v1950_v44  ;;  %v641_v45 = vpop.permute.xlu0 %640  ;;  %1951 = vmatmul.mubr.msk.f32.vlgmr.msra.gmra.mxu0 %vm345_vm3, %v1950_v44  ;;  %v639_v46 = vpop.permute.xlu1 %638 }
 0x186   : > { %2004 = vmatpush3.msra.mxu1 %v2164_v34  ;;  %1954 = vmatpush1.msk.msra.mxu0 %vm1953_vm4, %v2159_v30  ;;  %v646_v47 = vsel %vm644_vm5, %v639_v46, %v641_v45  ;;  %vm1853_vm4 = vcmask 31744  }
 0x187   : > { %684 = vmatprep.subr.mxu0 %v646_v47  ;;  %557 = vmatprep.mubr.f32.mxu0 %v2075_v29 }
 0x188   : > { %2005 = vmatprep.mubr.msk.f32.mxu1 %vm2076_vm0, %v2075_v29  ;;  %2008 = vmatprep.subr.mxu1 %v2075_v29 }
 0x189   : > { %v803_v49 = vpop.permute.xlu0 %802  ;;  %v637_v50 = vpop.permute.xlu1 %636  ;;  %1955 = vmatmul.mubr.msk.f32.vlgmr.msra.gmra.mxu0 %vm345_vm3, %v325_v48  ;;  %2006 = vmatmul.mubr.msk.f32.vlgmr.msra.gmra.mxu1 %vm345_vm3, %v325_v48 }
 0x18a   : > { %v645_v51 = vsel %vm644_vm5, %v637_v50, %v639_v46  ;;  %718 = vmatprep.mubr.f32.mxu0 %v2075_v29  ;;  %2010 = vmatprep.mubr.msk.f32.mxu1 %vm2076_vm0, %v2075_v29 }
 0x18b   : > { %685 = vmatpush1.msra.mxu0 %v645_v51 }
 0x18d   : > { %v643_v53 = vpop.permute.xlu0 %642  ;;  %v805_v54 = vpop.permute.xlu1 %804  ;;  %1958 = vmatmul.mubr.msk.f32.vlgmr.msra.gmra.mxu0 %vm345_vm3, %v1957_v52 }
 0x18e   : > { %v647_v55 = vsel %vm644_vm5, %v641_v45, %v643_v53  ;;  %v810_v56 = vsel %vm808_vm6, %v803_v49, %v805_v54  ;;  %882 = vmatprep.mubr.f32.mxu0 %v2075_v29 }
 0x18f   : > { %2009 = vmatpush3.msra.mxu1 %v647_v55  ;;  %848 = vmatprep.subr.mxu0 %v810_v56 }
 0x190   : > { %2013 = vmatprep.subr.mxu1 %v2075_v29  ;;  %2011 = vmatmul.mubr.msk.f32.vlgmr.msra.gmra.mxu1 %vm345_vm3, %v1957_v52 }
 0x191   : > { %v967_v57 = vpop.permute.xlu0 %966  ;;  %v801_v58 = vpop.permute.xlu1 %800  ;;  %2015 = vmatprep.mubr.msk.f32.mxu1 %vm2076_vm0, %v2075_v29 }
 0x192   : > { %v809_v60 = vsel %vm808_vm6, %v801_v58, %v803_v49 }
 0x193   : > { %849 = vmatpush1.msra.mxu0 %v809_v60 }
 0x194   : > { %1961 = vmatmul.mubr.msk.f32.vlgmr.msra.gmra.mxu0 %vm345_vm3, %v1960_v59 }
 0x195   : > { %v807_v61 = vpop.permute.xlu0 %806  ;;  %v969_v62 = vpop.permute.xlu1 %968  ;;  %1046 = vmatprep.mubr.f32.mxu0 %v2075_v29 }
 0x196   : > { %v811_v63 = vsel %vm808_vm6, %v805_v54, %v807_v61  ;;  %v974_v0 = vsel %vm972_vm7, %v967_v57, %v969_v62 }
 0x197   : > { %2014 = vmatpush3.msra.mxu1 %v811_v63  ;;  %1012 = vmatprep.subr.mxu0 %v974_v0 }
 0x198   : > { %2018 = vmatprep.subr.mxu1 %v2075_v29  ;;  %2016 = vmatmul.mubr.msk.f32.vlgmr.msra.gmra.mxu1 %vm345_vm3, %v1960_v59 }
 0x199   : > { %v1131_v2 = vpop.permute.xlu0 %1130  ;;  %v965_v3 = vpop.permute.xlu1 %964  ;;  %2020 = vmatprep.mubr.msk.f32.mxu1 %vm2076_vm0, %v2075_v29 }
 0x19a   : > { %v973_v6 = vsel %vm972_vm7, %v965_v3, %v967_v57 }
 0x19b   : > { %1013 = vmatpush1.msra.mxu0 %v973_v6 }
 0x19c   : > { %1964 = vmatmul.mubr.msk.f32.vlgmr.msra.gmra.mxu0 %vm345_vm3, %v1963_v4 }
 0x19d   : > { %v971_v7 = vpop.permute.xlu0 %970  ;;  %v1133_v8 = vpop.permute.xlu1 %1132  ;;  %1210 = vmatprep.mubr.f32.mxu0 %v2075_v29 }
 0x19e   : > { %v975_v9 = vsel %vm972_vm7, %v969_v62, %v971_v7  ;;  %v1138_v11 = vsel %vm1136_vm8, %v1131_v2, %v1133_v8 }
 0x19f   : > { %2019 = vmatpush3.msra.mxu1 %v975_v9  ;;  %1176 = vmatprep.subr.mxu0 %v1138_v11 }
 0x1a0   : > { %2023 = vmatprep.subr.mxu1 %v2075_v29  ;;  %2021 = vmatmul.mubr.msk.f32.vlgmr.msra.gmra.mxu1 %vm345_vm3, %v1963_v4 }
 0x1a1   : > { %v1295_v12 = vpop.permute.xlu0 %1294  ;;  %v1129_v13 = vpop.permute.xlu1 %1128  ;;  %2025 = vmatprep.mubr.msk.f32.mxu1 %vm2076_vm0, %v2075_v29 }
 0x1a2   : > { %v1137_v16 = vsel %vm1136_vm8, %v1129_v13, %v1131_v2 }
 0x1a3   : > { %1177 = vmatpush1.msra.mxu0 %v1137_v16 }
 0x1a4   : > { %1967 = vmatmul.mubr.msk.f32.vlgmr.msra.gmra.mxu0 %vm345_vm3, %v1966_v14 }
 0x1a5   : > { %v1135_v17 = vpop.permute.xlu0 %1134  ;;  %v1297_v18 = vpop.permute.xlu1 %1296  ;;  %1374 = vmatprep.mubr.f32.mxu0 %v2075_v29 }
 0x1a6   : > { %v1139_v19 = vsel %vm1136_vm8, %v1133_v8, %v1135_v17  ;;  %v1302_v20 = vsel %vm1300_vm9, %v1295_v12, %v1297_v18  ;;  %v1785_v17 = vld [vmem:[%s2327_s2] sm:$0x7] }
 0x1a7   : > { %2024 = vmatpush3.msra.mxu1 %v1139_v19  ;;  %1340 = vmatprep.subr.mxu0 %v1302_v20  ;;  %vm1816_vm12 = vcmp.gt.f32.partialorder %v1785_v17, 0.0 }
 0x1a8   : > { %2026 = vmatmul.mubr.msk.f32.vlgmr.msra.gmra.mxu1 %vm345_vm3, %v1966_v14  ;;  %2028 = vmatprep.subr.mxu1 %v2075_v29 }
 0x1a9   : > { %v1459_v21 = vpop.permute.xlu0 %1458  ;;  %v1293_v22 = vpop.permute.xlu1 %1292  ;;  %2030 = vmatprep.mubr.msk.f32.mxu1 %vm2076_vm0, %v2075_v29 }
 0x1aa   : > { %v1301_v24 = vsel %vm1300_vm9, %v1293_v22, %v1295_v12 }
 0x1ab   : > { %1341 = vmatpush1.msra.mxu0 %v1301_v24 }
 0x1ac   : > { %1970 = vmatmul.mubr.msk.f32.vlgmr.msra.gmra.mxu0 %vm345_vm3, %v1969_v23 }
 0x1ad   : > { %v1299_v25 = vpop.permute.xlu0 %1298  ;;  %v1461_v26 = vpop.permute.xlu1 %1460  ;;  %1538 = vmatprep.mubr.f32.mxu0 %v2075_v29 }
 0x1ae   : > { %v1303_v27 = vsel %vm1300_vm9, %v1297_v18, %v1299_v25  ;;  %v1466_v28 = vsel %vm1464_vm10, %v1459_v21, %v1461_v26 }
 0x1af   : > { %2029 = vmatpush3.msra.mxu1 %v1303_v27  ;;  %1504 = vmatprep.subr.mxu0 %v1466_v28  ;;  %v1817_v27 = vsel %vm1816_vm12, 1, %v2073_v1 }
 0x1b0   : > { %2031 = vmatmul.mubr.msk.f32.vlgmr.msra.gmra.mxu1 %vm345_vm3, %v1969_v23  ;;  %2033 = vmatprep.subr.mxu1 %v2075_v29 }
 0x1b1   : > { %v1623_v30 = vpop.permute.xlu0 %1622  ;;  %v1457_v31 = vpop.permute.xlu1 %1456  ;;  %2035 = vmatprep.mubr.msk.f32.mxu1 %vm2076_vm0, %v2075_v29 }
 0x1b2   : > { %v1465_v33 = vsel %vm1464_vm10, %v1457_v31, %v1459_v21 }
 0x1b3   : > { %1505 = vmatpush1.msra.mxu0 %v1465_v33 }
 0x1b4   : > { %1973 = vmatmul.mubr.msk.f32.vlgmr.msra.gmra.mxu0 %vm345_vm3, %v1972_v32 }
 0x1b5   : > { %v1463_v34 = vpop.permute.xlu0 %1462  ;;  %v1625_v35 = vpop.permute.xlu1 %1624  ;;  %1702 = vmatprep.mubr.f32.mxu0 %v2075_v29 }
 0x1b6   : > { %v1467_v36 = vsel %vm1464_vm10, %v1461_v26, %v1463_v34  ;;  %v1630_v37 = vsel %vm1628_vm11, %v1623_v30, %v1625_v35 }
 0x1b7   : > { %2034 = vmatpush3.msra.mxu1 %v1467_v36  ;;  %1668 = vmatprep.subr.mxu0 %v1630_v37 }
 0x1b8   : > { %2036 = vmatmul.mubr.msk.f32.vlgmr.msra.gmra.mxu1 %vm345_vm3, %v1972_v32  ;;  %2038 = vmatprep.subr.mxu1 %v2075_v29  ;;  %v1825_v32 = vrot.slane %v1817_v27, %v2150_v15 }
 0x1b9   : > { %v1627_v38 = vpop.permute.xlu0 %1626  ;;  %v1621_v39 = vpop.permute.xlu1 %1620  ;;  %2040 = vmatprep.mubr.msk.f32.mxu1 %vm2076_vm0, %v2075_v29  ;;  %vm1847_vm0 = vcmask 7168  }
 0x1ba   : > { %v1631_v41 = vsel %vm1628_vm11, %v1625_v35, %v1627_v38  ;;  %v1629_v42 = vsel %vm1628_vm11, %v1621_v39, %v1623_v30  ;;  %v1790_v38 = vrot.slane %v1785_v17, %v2145_v10  ;;  %v1821_v39 = vrot.slane %v1817_v27, %v2145_v10 }
 0x1bb   : > { %1669 = vmatpush1.msra.mxu0 %v1629_v42  ;;  %2039 = vmatpush3.msra.mxu1 %v1631_v41  ;;  %v1798_v41 = vrot.slane %v1785_v17, %v2143_v5  ;;  %vm2292_vm13 = vcmp.eq.s32.totalorder %v1825_v32, 1 }
 0x1bc   : > { %1976 = vmatmul.mubr.msk.f32.vlgmr.msra.gmra.mxu0 %vm345_vm3, %v1975_v40  ;;  %2041 = vmatmul.mubr.msk.f32.vlgmr.msra.gmra.mxu1 %vm345_vm3, %v1975_v40  ;;  %vm2297_vm14 = vcmp.eq.s32.totalorder %v1821_v39, 1 }
 0x245   : > { %v415_v43 = vpop.f32.mrf.mxu0  ;;  %v486_v44 = vpop.f32.mrf.mxu1 }
 0x247   : > { %v417_v45 = vpop.f32.mrf.mxu0  ;;  %v2002_v46 = vpop.f32.mrf.mxu1 }
 0x249   : > { %v630_v47 = vpop.f32.mrf.mxu1  ;;  %v559_v29 = vpop.f32.mrf.mxu0 }
 0x24a   : > { %v560_v62 = vadd.f32 %v559_v29, %v415_v43  ;;  %v631_v63 = vadd.f32 %v630_v47, %v486_v44 }
 0x24b   : > { %v2007_v48 = vpop.f32.mrf.mxu1  ;;  %v561_v49 = vpop.f32.mrf.mxu0 }
 0x24c   : > { %v562_v4 = vadd.f32 %v561_v49, %v417_v45  ;;  %v1794_v45 = vrot.slane %v1785_v17, %v2150_v15  ;;  %v1829_v49 = vrot.slane %v1817_v27, %v2143_v5 }
 0x24d   : > { %v720_v51 = vpop.f32.mrf.mxu0 }
 0x24e   : > { %v795_v6 = vadd.f32 %v720_v51, %v560_v62  ;;  %vm2303_vm15 = vcmp.eq.s32.totalorder %v1829_v49, 1 }
 0x24f   : > { %v722_v53 = vpop.f32.mrf.mxu0 }
 0x250   : > { %v791_v50 = vpop.f32.mrf.mxu1  ;;  %v796_v9 = vadd.f32 %v722_v53, %v562_v4 }
 0x251   : > { %v797_v7 = vadd.f32 %v791_v50, %v631_v63 }
 0x252   : > { %v2012_v52 = vpop.f32.mrf.mxu1 }
 0x254   : > { %v884_v55 = vpop.f32.mrf.mxu0 }
 0x255   : > { %v959_v11 = vadd.f32 %v884_v55, %v795_v6 }
 0x256   : > { %v886_v57 = vpop.f32.mrf.mxu0 }
 0x257   : > { %v960_v18 = vadd.f32 %v886_v57, %v796_v9 }
 0x258   : > { %v955_v54 = vpop.f32.mrf.mxu1 }
 0x259   : > { %v961_v12 = vadd.f32 %v955_v54, %v797_v7 }
 0x25a   : > { %v2017_v56 = vpop.f32.mrf.mxu1 }
 0x25c   : > { %v1048_v59 = vpop.f32.mrf.mxu0 }
 0x25d   : > { %v1123_v19 = vadd.f32 %v1048_v59, %v959_v11 }
 0x25e   : > { %v1050_v61 = vpop.f32.mrf.mxu0 }
 0x25f   : > { %v1124_v23 = vadd.f32 %v1050_v61, %v960_v18 }
 0x260   : > { %v1119_v58 = vpop.f32.mrf.mxu1 }
 0x261   : > { %v1125_v20 = vadd.f32 %v1119_v58, %v961_v12 }
 0x262   : > { %v2022_v60 = vpop.f32.mrf.mxu1 }
 0x264   : > { %v1212_v2 = vpop.f32.mrf.mxu0 }
 0x265   : > { %v1287_v24 = vadd.f32 %v1212_v2, %v1123_v19 }
 0x266   : > { %v1214_v8 = vpop.f32.mrf.mxu0 }
 0x267   : > { %v1288_v28 = vadd.f32 %v1214_v8, %v1124_v23 }
 0x268   : > { %v1283_v0 = vpop.f32.mrf.mxu1 }
 0x269   : > { %v1289_v25 = vadd.f32 %v1283_v0, %v1125_v20 }
 0x26a   : > { %v2027_v3 = vpop.f32.mrf.mxu1 }
 0x26c   : > { %v1376_v13 = vpop.f32.mrf.mxu0 }
 0x26d   : > { %v1451_v30 = vadd.f32 %v1376_v13, %v1287_v24 }
 0x26e   : > { %v1378_v21 = vpop.f32.mrf.mxu0 }
 0x26f   : > { %v1452_v35 = vadd.f32 %v1378_v21, %v1288_v28 }
 0x270   : > { %v1447_v14 = vpop.f32.mrf.mxu1 }
 0x271   : > { %v1453_v31 = vadd.f32 %v1447_v14, %v1289_v25 }
 0x272   : > { %v2032_v16 = vpop.f32.mrf.mxu1 }
 0x274   : > { %v1540_v22 = vpop.f32.mrf.mxu0 }
 0x275   : > { %v1615_v36 = vadd.f32 %v1540_v22, %v1451_v30 }
 0x276   : > { %v1542_v33 = vpop.f32.mrf.mxu0 }
 0x277   : > { %v1616_v42 = vadd.f32 %v1542_v33, %v1452_v35 }
 0x278   : > { %v1611_v26 = vpop.f32.mrf.mxu1 }
 0x279   : > { %v1617_v37 = vadd.f32 %v1611_v26, %v1453_v31 }
 0x27a   : > { %v2037_v34 = vpop.f32.mrf.mxu1 }
 0x27c   : > { %v1704_v1 = vpop.f32.mrf.mxu0  ;;  %v1775_v40 = vpop.f32.mrf.mxu1 }
 0x27d   : > { %v1779_v43 = vadd.f32 %v1704_v1, %v1615_v36  ;;  %v1781_v44 = vadd.f32 %v1775_v40, %v1617_v37 }
 0x27e   : > { %v1706_v46 = vpop.f32.mrf.mxu0  ;;  %v2042_v47 = vpop.f32.mrf.mxu1 }
 0x27f   : > { %1782 = vst [vmem:[%s258_s19] sm:$0xff] %v1779_v43  ;;  %1784 = vst [vmem:[%s258_s19 + $0x10] sm:$0xff] %v1781_v44  ;;  %v1780_v10 = vadd.f32 %v1706_v46, %v1616_v42  ;;  %v1802_v48 = vmul.f32 %v1790_v38, %v1779_v43  ;;  %v1804_v52 = vmul.f32 %v1798_v41, %v1781_v44  ;;  %v1840_v5 = vsel %vm2297_vm14, %v1779_v43, inf }
 0x280   : > { %v1833_v62 = vsel %vm2297_vm14, %v1779_v43, -inf  ;;  %v1842_v2 = vsel %vm2303_vm15, %v1781_v44, inf  ;;  %v1835_v4 = vsel %vm2303_vm15, %v1781_v44, -inf }
 0x281   : > { %1783 = vst [vmem:[%s258_s19 + $0x8] sm:$0xff] %v1780_v10  ;;  %v1803_v51 = vmul.f32 %v1794_v45, %v1780_v10  ;;  %v1841_v15 = vsel %vm2292_vm13, %v1780_v10, inf  ;;  %v1809_v54 = vmul.f32 %v1802_v48, %v1779_v43  ;;  %v1834_v57 = vsel %vm2292_vm13, %v1780_v10, -inf }
 0x282   : > { %v1811_v59 = vmul.f32 %v1804_v52, %v1781_v44  ;;  %v1843_v61 = vmin.f32 %v1840_v5, %v1841_v15  ;;  %v1836_v0 = vmax.f32 %v1833_v62, %v1834_v57 }
 0x283   : > { %v1805_v53 = vadd.f32 %v1803_v51, %v1802_v48  ;;  %v1810_v55 = vmul.f32 %v1803_v51, %v1780_v10 }
 0x284   : > { %v1844_v3 = vmin.f32 %v1843_v61, %v1842_v2  ;;  %v1837_v6 = vmax.f32 %v1836_v0, %v1835_v4 }
 0x285   : > { %v1806_v58 = vadd.f32 %v1805_v53, %v1804_v52  ;;  %v1812_v60 = vadd.f32 %v1810_v55, %v1809_v54 }
 0x287   : > { %1807 = vadd.xlane.f32.xlu1 %v1806_v58  ;;  %v1813_v63 = vadd.f32 %v1812_v60, %v1811_v59 }
 0x289   : > { %1814 = vadd.xlane.f32.xlu0 %v1813_v63 }
 0x28b   : > { %1845 = vmin.xlane.f32.xlu1 %v1844_v3 }
 0x28d   : > { %1838 = vmax.xlane.f32.xlu0 %v1837_v6 }
 0x310   : > { %v1808_v7 = vpop.xlane.xlu1 %1807 }
 0x312   : > { %v1815_v8 = vpop.xlane.xlu0 %1814 }
 0x313   : > { %v1848_v9 = vsel %vm1847_vm0, %v1808_v7, %v1815_v8 }
 0x314   : > { %v1846_v12 = vpop.xlane.xlu1 %1845 }
 0x316   : > { %v1839_v11 = vpop.xlane.xlu0 %1838 }
 0x317   : > { %v1850_v13 = vsel %vm1849_vm1, %v1848_v9, %v1839_v11 }
 0x318   : > { %v1852_v14 = vsel %vm1851_vm2, %v1850_v13, %v1846_v12 }
 0x319   : > { %v1854_v16 = vsel %vm1853_vm4, %v1852_v14, 0.0 }
 0x31a   : > { %1855 = vst.msk [vmem:[%s262_s24] sm:$0xff] %vm345_vm3, %v1854_v16 }
 0x31b PF: > { %s17_s21 = sadd.s32 1, %s2071_s21  }
 0x31c   : > { %p14_p4 = scmp.ge.s32.totalorder %s17_s21, 4  }
 0x31e   :  { %16 = sbr.rel (!%p14_p4) target bundleno = 1 (0x1), region = 90 }

// kernel: basic_block_forward.19
= control target key start
LH: loop header
LB: loop body
LE: loop exit
PB: predicated region body
PF: predicated region fallthrough
CT: control target
= control target key end

     0   :  { %s525_s18 = smov 0   ;;  %s559_s0 = inlined_call_operand.vmem [shape: f32[2,8,384], index: 0, kind: input, shape index: {}]   ;;  %s560_s1 = inlined_call_operand.vmem [shape: f32[2,8,1], index: 1, kind: input, shape index: {}]   ;;  %s561_s2 = inlined_call_operand.vmem [shape: f32[2,8,1], index: 2, kind: input, shape index: {}]   ;;  %s562_s3 = inlined_call_operand.vmem [shape: f32[2,1,384], index: 3, kind: input, shape index: {}]   ;;  %s563_s4 = inlined_call_operand.vmem [shape: f32[2,8,384], index: 4, kind: input, shape index: {}]   ;;  %s564_s5 = inlined_call_operand.vmem [shape: f32[2,8,384], index: 5, kind: output, shape index: {}]  }
   0x1 LB: > { %s458_s19 = sadd.s32 4294967295, %s492_s18   ;;  %p462_p0 = scmp.ge.s32.totalorder %s492_s18, 1  ;;  %s492_s18 = sphi %s525_s18, %s15_s18  }
   0x2   : > { %p224_p1 = scmp.lt.s32.totalorder %s492_s18, 3 }
   0x4   : > { %p225_p2 = pnand %p462_p0, %p224_p1 }
   0x5   : > { %p269_p3 = scmp.lt.s32.totalorder (!%p225_p2), %s458_s19, 1 }
   0x6   : > { %228 = sbr.rel (%p225_p2) target bundleno = 153 (0x99), region = 40 }
   0xb   : > { %v494_v0 = vmov 0   ;;  %s566_s19 = smov (!%p269_p3, %s458_s19), 1  ;;  %v325_v8 = vlaneseq }
   0xc   : > { %481 = vset.pattern.permute.xlu0 %v494_v0  ;;  %s464_s20 = sshll.u32 %s566_s19, 3  ;;  %s471_s27 = smul.u32 3, %s566_s19 }
   0xd   : > { %s277_s23 = scalar_lea.vmem %s560_s1, %s464_s20  ;;  %s281_s26 = scalar_lea.vmem %s561_s2, %s464_s20  ;;  %v326_v9 = vshrl.u32 %v325_v8, 7 }
   0xe   : > { %v299_v1 = vld [vmem:[%s277_s23] sm:$0xff]  ;;  %s285_s30 = scalar_lea.vmem %s562_s3, %s471_s27  ;;  %s542_s6 = smul.u32 24, %s566_s19 }
   0xf   : > { %302 = vperm.xlu0 %481, %v299_v1   ;;  %v308_v2 = vld [vmem:[%s281_s26] sm:$0xff]  ;;  %v327_v10 = vsub.s32 0, %v326_v9  ;;  %v331_v11 = vsub.s32 1, %v326_v9  ;;  %v335_v13 = vsub.s32 2, %v326_v9 }
  0x10   : > { %v317_v3 = vld [vmem:[%s285_s30] sm:$0x7]  ;;  %s273_s9 = scalar_lea.vmem %s559_s0, %s542_s6  ;;  %s290_s12 = scalar_lea.vmem %s563_s4, %s542_s6 }
  0x11   : > { %v318_v4 = vsub.f32 0.0, %v317_v3  ;;  %v296_v15 = vld [vmem:[%s273_s9] sm:$0xff]  ;;  %v297_v16 = vld [vmem:[%s273_s9 + $0x8] sm:$0xff]  ;;  %v298_v17 = vld [vmem:[%s273_s9 + $0x10] sm:$0xff]  ;;  %s295_s15 = scalar_lea.vmem %s564_s5, %s542_s6 }
  0x12   : > { %v343_v28 = vld [vmem:[%s290_s12] sm:$0xff]  ;;  %v344_v29 = vld [vmem:[%s290_s12 + $0x8] sm:$0xff]  ;;  %v345_v30 = vld [vmem:[%s290_s12 + $0x10] sm:$0xff] }
  0x13   : > { %311 = vperm.xlu0 %481, %v308_v2   ;;  %v319_v5 = vmul.f32 1.442695, %v318_v4 }
  0x15   : > { %482 = vpow2.f32 %v319_v5 }
  0x22   : > { %v483_v6 = vpop.eup %482 }
  0x23   : > { %v321_v7 = vadd.f32 1.0, %v483_v6 }
  0x25   : > { %484 = vrcp.f32 %v321_v7 }
  0x32   : > { %v485_v12 = vpop.eup %484 }
  0x33   : > { %v328_v18 = vrot.slane %v485_v12, %v327_v10  ;;  %v332_v19 = vrot.slane %v485_v12, %v331_v11  ;;  %v336_v23 = vrot.slane %v485_v12, %v335_v13 }
  0x8a   : > { %v303_v14 = vpop.permute.xlu0 %302 }
  0x8b   : > { %v305_v20 = vmul.f32 %v303_v14, %v296_v15  ;;  %v306_v21 = vmul.f32 %v303_v14, %v297_v16  ;;  %v307_v22 = vmul.f32 %v303_v14, %v298_v17 }
  0x8e   : > { %v312_v24 = vpop.permute.xlu0 %311 }
  0x8f   : > { %v314_v25 = vadd.f32 %v312_v24, %v305_v20  ;;  %v315_v26 = vadd.f32 %v312_v24, %v306_v21  ;;  %v316_v27 = vadd.f32 %v312_v24, %v307_v22 }
  0x91   : > { %v340_v31 = vmul.f32 %v328_v18, %v314_v25  ;;  %v341_v32 = vmul.f32 %v332_v19, %v315_v26  ;;  %v342_v33 = vmul.f32 %v336_v23, %v316_v27 }
  0x93   : > { %v346_v34 = vadd.f32 %v343_v28, %v340_v31  ;;  %v347_v35 = vadd.f32 %v344_v29, %v341_v32  ;;  %v348_v36 = vadd.f32 %v345_v30, %v342_v33 }
  0x95   : > { %v349_v37 = vmax.f32 %v346_v34, 0.0  ;;  %v350_v38 = vmax.f32 %v347_v35, 0.0  ;;  %v351_v39 = vmax.f32 %v348_v36, 0.0 }
  0x97   : > { %352 = vst [vmem:[%s295_s15] sm:$0xff] %v349_v37  ;;  %353 = vst [vmem:[%s295_s15 + $0x8] sm:$0xff] %v350_v38 }
  0x98   : > { %354 = vst [vmem:[%s295_s15 + $0x10] sm:$0xff] %v351_v39 }
  0x99 PF: > { %s15_s18 = sadd.s32 1, %s492_s18  }
  0x9a   : > { %p12_p4 = scmp.ge.s32.totalorder %s15_s18, 4  }
  0x9c   :  { %14 = sbr.rel (!%p12_p4) target bundleno = 1 (0x1), region = 82 }

// kernel: basic_block_forward.12
= control target key start
LH: loop header
LB: loop body
LE: loop exit
PB: predicated region body
PF: predicated region fallthrough
CT: control target
= control target key end

     0   :  { %s664_s15 = smov 0   ;;  %s712_s0 = inlined_call_operand.vmem [shape: f32[2,8,128], index: 0, kind: input, shape index: {}]   ;;  %s713_s1 = inlined_call_operand.vmem [shape: f32[3,8,8], index: 1, kind: input, shape index: {}]   ;;  %s714_s2 = inlined_call_operand.vmem [shape: f32[1,128], index: 2, kind: input, shape index: {}]   ;;  %s715_s3 = inlined_call_operand.vmem [shape: f32[2,8,128], index: 3, kind: output, shape index: {0}]   ;;  %s716_s4 = inlined_call_operand.vmem [shape: f32[2,8,8], index: 4, kind: output, shape index: {1}]  }
   0x1 LB: > { %s573_s16 = sadd.s32 4294967295, %s631_s15   ;;  %p577_p0 = scmp.ge.s32.totalorder %s631_s15, 1  ;;  %s631_s15 = sphi %s664_s15, %s15_s15  }
   0x2   : > { %p164_p1 = scmp.lt.s32.totalorder %s631_s15, 3 }
   0x4   : > { %p165_p2 = pnand %p577_p0, %p164_p1 }
   0x5   : > { %p192_p3 = scmp.lt.s32.totalorder (!%p165_p2), %s573_s16, 1  ;;  %s634_s21 = smov (!%p165_p2), 1  }
   0x6   : > { %168 = sbr.rel (%p165_p2) target bundleno = 597 (0x255), region = 32  ;;  %s636_s24 = smov (!%p165_p2), 127  }
   0x7   : > { %s637_s25 = smov (!%p165_p2), 126  }
   0xb   : > { %v633_v0 = vmov 0.0   ;;  %s718_s16 = smov (!%p192_p3, %s573_s16), 1  ;;  %vm635_vm0 = vmmov 0   ;;  %vm209_vm1 = vcmask 7168   ;;  %vm224_vm3 = vcmask 64512   ;;  %v212_v3 = vld [vmem:[%s713_s1] sm:$0xff] }
   0xc   : > { %601 = vmatprep.subr.mxu1 %v633_v0  ;;  %596 = vmatprep.subr.mxu0 %v633_v0  ;;  %s672_s17 = sshll.u32 %s718_s16, 3  ;;  %vm583_vm2 = vmneg %vm209_vm1  ;;  %vm221_vm4 = vcmask 1039360   ;;  %v581_v8 = vld [vmem:[%s713_s1 + $0x8] sm:$0xff]  ;;  %vm377_vm5 = vcmask 1031168   ;;  %v586_v12 = vld [vmem:[%s713_s1 + $0x10] sm:$0xff]  ;;  %v457_v16 = vlaneseq  ;;  %v638_v22 = vmov 0  }
   0xd   : > { %s195_s20 = scalar_lea.vmem %s712_s0, %s672_s17  ;;  %598 = vmatprep.mubr.msk.f32.mxu0 %vm635_vm0, %v633_v0  ;;  %603 = vmatprep.mubr.msk.f32.mxu1 %vm635_vm0, %v633_v0  ;;  %v455_v18 = vld [vmem:[%s714_s2] sm:$0x1]  ;;  %s199_s8 = scalar_lea.vmem %s715_s3, %s672_s17  ;;  %vm482_vm8 = vcmask 15360   ;;  %vm484_vm9 = vcmask 23552   ;;  %vm486_vm10 = vcmask 31744  }
   0xe   : > { %v204_v1 = vld [vmem:[%s195_s20] sm:$0xff]  ;;  %v458_v17 = vshrl.u32 %v457_v16, 7  ;;  %vm468_vm6 = vcmp.gt.f32.partialorder %v455_v18, 0.0  ;;  %s203_s11 = scalar_lea.vmem %s716_s4, %s672_s17 }
   0xf   : > { %206 = vrot.lane.b32.xlu0 %v204_v1, %s634_s21  ;;  %v469_v23 = vsel %vm468_vm6, 1, %v638_v22 }
  0x10   : > { %v459_v19 = vsub.s32 0, %v458_v17 }
  0x12   : > { %v460_v25 = vrot.slane %v455_v18, %v459_v19  ;;  %v473_v28 = vrot.slane %v469_v23, %v459_v19 }
  0x14   : > { %vm474_vm7 = vcmp.eq.s32.totalorder %v473_v28, 1 }
  0x81   : > { %v207_v2 = vpop.permute.xlu0 %206 }
  0x82   : > { %602 = vmatpush3.msk.msra.mxu1 %vm583_vm2, %v207_v2  ;;  %v211_v4 = vsel %vm209_vm1, %v207_v2, 0.0  ;;  %v210_v5 = vsel %vm209_vm1, 0.0, %v207_v2 }
  0x83   : > { %219 = vrot.lane.b32.xlu1 %v211_v4, %s636_s24  ;;  %217 = vrot.lane.b32.xlu0 %v210_v5, %s636_s24 }
  0x84   : > { %604 = vmatmul.mubr.msk.f32.vlgmr.msra.gmra.mxu1 %vm224_vm3, %v212_v3 }
  0x87   : > { %373 = vrot.lane.b32.xlu1 %v210_v5, %s637_s25  ;;  %375 = vrot.lane.b32.xlu0 %v211_v4, %s637_s25 }
  0xf5   : > { %v220_v6 = vpop.permute.xlu1 %219  ;;  %v218_v7 = vpop.permute.xlu0 %217 }
  0xf6   : > { %v222_v9 = vsel %vm221_vm4, %v218_v7, %v220_v6 }
  0xf7   : > { %597 = vmatpush3.msra.mxu0 %v222_v9 }
  0xf8   : > { %599 = vmatmul.mubr.msk.f32.vlgmr.msra.gmra.mxu0 %vm224_vm3, %v581_v8  ;;  %606 = vmatprep.subr.mxu0 %v633_v0 }
  0xf9   : > { %v374_v10 = vpop.permute.xlu1 %373  ;;  %v376_v11 = vpop.permute.xlu0 %375  ;;  %608 = vmatprep.mubr.msk.f32.mxu0 %vm635_vm0, %v633_v0 }
  0xfa   : > { %v378_v13 = vsel %vm377_vm5, %v374_v10, %v376_v11 }
  0xfb   : > { %607 = vmatpush3.msra.mxu0 %v378_v13 }
  0xfc   : > { %609 = vmatmul.mubr.msk.f32.vlgmr.msra.gmra.mxu0 %vm224_vm3, %v586_v12 }
 0x144   : > { %v367_v14 = vpop.f32.mrf.mxu1 }
 0x146   : > { %v605_v15 = vpop.f32.mrf.mxu1 }
 0x1b8   : > { %v294_v20 = vpop.f32.mrf.mxu0 }
 0x1b9   : > { %v368_v24 = vadd.f32 %v367_v14, %v294_v20 }
 0x1ba   : > { %v600_v21 = vpop.f32.mrf.mxu0 }
 0x1bc   : > { %v449_v26 = vpop.f32.mrf.mxu0 }
 0x1bd   : > { %v453_v27 = vadd.f32 %v449_v26, %v368_v24 }
 0x1be   : > { %v610_v29 = vpop.f32.mrf.mxu0 }
 0x1bf   : > { %454 = vst [vmem:[%s199_s8] sm:$0xff] %v453_v27  ;;  %v462_v30 = vmul.f32 %v460_v25, %v453_v27  ;;  %v478_v32 = vsel %vm474_vm7, %v453_v27, inf  ;;  %v475_v33 = vsel %vm474_vm7, %v453_v27, -inf }
 0x1c1   : > { %463 = vadd.xlane.f32.xlu1 %v462_v30  ;;  %v465_v31 = vmul.f32 %v462_v30, %v453_v27 }
 0x1c3   : > { %466 = vadd.xlane.f32.xlu0 %v465_v31 }
 0x1c5   : > { %479 = vmin.xlane.f32.xlu1 %v478_v32 }
 0x1c7   : > { %476 = vmax.xlane.f32.xlu0 %v475_v33 }
 0x24a   : > { %v464_v34 = vpop.xlane.xlu1 %463 }
 0x24c   : > { %v467_v35 = vpop.xlane.xlu0 %466 }
 0x24d   : > { %v481_v36 = vsel %vm209_vm1, %v464_v34, %v467_v35 }
 0x24e   : > { %v480_v38 = vpop.xlane.xlu1 %479 }
 0x250   : > { %v477_v37 = vpop.xlane.xlu0 %476 }
 0x251   : > { %v483_v39 = vsel %vm482_vm8, %v481_v36, %v477_v37 }
 0x252   : > { %v485_v40 = vsel %vm484_vm9, %v483_v39, %v480_v38 }
 0x253   : > { %v487_v41 = vsel %vm486_vm10, %v485_v40, 0.0 }
 0x254   : > { %488 = vst.msk [vmem:[%s203_s11] sm:$0xff] %vm224_vm3, %v487_v41 }
 0x255 PF: > { %s15_s15 = sadd.s32 1, %s631_s15  }
 0x256   : > { %p12_p4 = scmp.ge.s32.totalorder %s15_s15, 4  }
 0x258   :  { %14 = sbr.rel (!%p12_p4) target bundleno = 1 (0x1), region = 76 }

// kernel: basic_block_forward.13
= control target key start
LH: loop header
LB: loop body
LE: loop exit
PB: predicated region body
PF: predicated region fallthrough
CT: control target
= control target key end

     0   :  { %s753_s21 = smov 0   ;;  %s812_s0 = inlined_call_operand.vmem [shape: f32[2,8,128], index: 0, kind: input, shape index: {}]   ;;  %s813_s1 = inlined_call_operand.vmem [shape: f32[3,8,8], index: 1, kind: input, shape index: {}]   ;;  %s814_s2 = inlined_call_operand.vmem [shape: f32[1,128], index: 2, kind: input, shape index: {}]   ;;  %s815_s3 = inlined_call_operand.vmem [shape: f32[8,1], index: 3, kind: input, shape index: {}]   ;;  %s816_s4 = inlined_call_operand.vmem [shape: f32[8,1], index: 4, kind: input, shape index: {}]   ;;  %s817_s5 = inlined_call_operand.vmem [shape: f32[2,8,128], index: 5, kind: output, shape index: {0}]   ;;  %s818_s6 = inlined_call_operand.vmem [shape: f32[2,8,8], index: 6, kind: output, shape index: {1}]  }
   0x1 LB: > { %s650_s22 = sadd.s32 4294967295, %s710_s21   ;;  %p654_p0 = scmp.ge.s32.totalorder %s710_s21, 1  ;;  %s710_s21 = sphi %s753_s21, %s17_s21  }
   0x2   : > { %p214_p1 = scmp.lt.s32.totalorder %s710_s21, 3 }
   0x4   : > { %p215_p2 = pnand %p654_p0, %p214_p1 }
   0x5   : > { %p246_p3 = scmp.lt.s32.totalorder (!%p215_p2), %s650_s22, 1  ;;  %s714_s9 = smov (!%p215_p2), 1  }
   0x6   : > { %218 = sbr.rel (%p215_p2) target bundleno = 729 (0x2d9), region = 40  ;;  %s716_s12 = smov (!%p215_p2), 127  }
   0x7   : > { %s717_s13 = smov (!%p215_p2), 126  }
   0xb   : > { %v259_v0 = vld [vmem:[%s815_s3] sm:$0xff]  ;;  %v712_v1 = vmov 0   ;;  %v713_v3 = vmov 0.0   ;;  %s820_s22 = smov (!%p246_p3, %s650_s22), 1  ;;  %vm715_vm0 = vmmov 0   ;;  %vm286_vm1 = vcmask 7168  }
   0xc   : > { %703 = vset.pattern.permute.xlu0 %v712_v1  ;;  %v266_v2 = vld [vmem:[%s816_s4] sm:$0xff]  ;;  %679 = vmatprep.subr.mxu1 %v713_v3  ;;  %s768_s27 = sshll.u32 %s820_s22, 3  ;;  %vm661_vm2 = vmneg %vm286_vm1  ;;  %vm301_vm3 = vcmask 64512   ;;  %vm298_vm4 = vcmask 1039360   ;;  %v659_v18 = vld [vmem:[%s813_s1 + $0x8] sm:$0xff]  ;;  %vm454_vm5 = vcmask 1031168   ;;  %v534_v26 = vlaneseq }
   0xd   : > { %262 = vperm.xlu0 %703, %v259_v0   ;;  %674 = vmatprep.subr.mxu0 %v713_v3  ;;  %s249_s30 = scalar_lea.vmem %s812_s0, %s768_s27  ;;  %v658_v9 = vld [vmem:[%s814_s2] ss:$0 sm:$0xff]  ;;  %v664_v22 = vld [vmem:[%s813_s1 + $0x10] sm:$0xff]  ;;  %s253_s23 = scalar_lea.vmem %s817_s5, %s768_s27  ;;  %vm559_vm8 = vcmask 15360   ;;  %vm561_vm9 = vcmask 23552   ;;  %vm563_vm10 = vcmask 31744  }
   0xe   : > { %v258_v5 = vld [vmem:[%s249_s30] sm:$0xff]  ;;  %676 = vmatprep.mubr.msk.f32.mxu0 %vm715_vm0, %v713_v3  ;;  %681 = vmatprep.mubr.msk.f32.mxu1 %vm715_vm0, %v713_v3  ;;  %v535_v27 = vshrl.u32 %v534_v26, 7  ;;  %s257_s26 = scalar_lea.vmem %s818_s6, %s768_s27 }
   0xf   : > { %v289_v13 = vld [vmem:[%s813_s1] sm:$0xff] }
  0x10   : > { %v532_v28 = vld [vmem:[%s814_s2] sm:$0x1]  ;;  %v536_v29 = vsub.s32 0, %v535_v27 }
  0x11   : > { %269 = vperm.xlu0 %703, %v266_v2   ;;  %vm545_vm6 = vcmp.gt.f32.partialorder %v532_v28, 0.0 }
  0x12   : > { %v546_v31 = vsel %vm545_vm6, 1, %v712_v1  ;;  %v537_v34 = vrot.slane %v532_v28, %v536_v29 }
  0x13   : > { %v550_v37 = vrot.slane %v546_v31, %v536_v29 }
  0x15   : > { %vm551_vm7 = vcmp.eq.s32.totalorder %v550_v37, 1 }
  0x88   : > { %v263_v4 = vpop.permute.xlu0 %262 }
  0x89   : > { %v265_v6 = vmul.f32 %v263_v4, %v258_v5 }
  0x8c   : > { %v270_v7 = vpop.permute.xlu0 %269 }
  0x8d   : > { %v272_v8 = vadd.f32 %v270_v7, %v265_v6 }
  0x8f   : > { %v273_v10 = vmax.f32 %v272_v8, 0.0 }
  0x91   : > { %v281_v11 = vmul.f32 %v658_v9, %v273_v10 }
  0x93   : > { %283 = vrot.lane.b32.xlu1 %v281_v11, %s714_s9 }
 0x105   : > { %v284_v12 = vpop.permute.xlu1 %283 }
 0x106   : > { %680 = vmatpush3.msk.msra.mxu1 %vm661_vm2, %v284_v12  ;;  %v288_v14 = vsel %vm286_vm1, %v284_v12, 0.0  ;;  %v287_v15 = vsel %vm286_vm1, 0.0, %v284_v12 }
 0x107   : > { %296 = vrot.lane.b32.xlu0 %v288_v14, %s716_s12  ;;  %294 = vrot.lane.b32.xlu1 %v287_v15, %s716_s12 }
 0x108   : > { %682 = vmatmul.mubr.msk.f32.vlgmr.msra.gmra.mxu1 %vm301_vm3, %v289_v13 }
 0x10b   : > { %452 = vrot.lane.b32.xlu0 %v288_v14, %s717_s13  ;;  %450 = vrot.lane.b32.xlu1 %v287_v15, %s717_s13 }
 0x179   : > { %v297_v16 = vpop.permute.xlu0 %296  ;;  %v295_v17 = vpop.permute.xlu1 %294 }
 0x17a   : > { %v299_v19 = vsel %vm298_vm4, %v295_v17, %v297_v16 }
 0x17b   : > { %675 = vmatpush3.msra.mxu0 %v299_v19 }
 0x17c   : > { %677 = vmatmul.mubr.msk.f32.vlgmr.msra.gmra.mxu0 %vm301_vm3, %v659_v18  ;;  %684 = vmatprep.subr.mxu0 %v713_v3 }
 0x17d   : > { %v453_v20 = vpop.permute.xlu0 %452  ;;  %v451_v21 = vpop.permute.xlu1 %450  ;;  %686 = vmatprep.mubr.msk.f32.mxu0 %vm715_vm0, %v713_v3 }
 0x17e   : > { %v455_v23 = vsel %vm454_vm5, %v451_v21, %v453_v20 }
 0x17f   : > { %685 = vmatpush3.msra.mxu0 %v455_v23 }
 0x180   : > { %687 = vmatmul.mubr.msk.f32.vlgmr.msra.gmra.mxu0 %vm301_vm3, %v664_v22 }
 0x1c8   : > { %v444_v24 = vpop.f32.mrf.mxu1 }
 0x1ca   : > { %v683_v25 = vpop.f32.mrf.mxu1 }
 0x23c   : > { %v371_v30 = vpop.f32.mrf.mxu0 }
 0x23d   : > { %v445_v33 = vadd.f32 %v444_v24, %v371_v30 }
 0x23e   : > { %v678_v32 = vpop.f32.mrf.mxu0 }
 0x240   : > { %v526_v35 = vpop.f32.mrf.mxu0 }
 0x241   : > { %v530_v36 = vadd.f32 %v526_v35, %v445_v33 }
 0x242   : > { %v688_v38 = vpop.f32.mrf.mxu0 }
 0x243   : > { %531 = vst [vmem:[%s253_s23] sm:$0xff] %v530_v36  ;;  %v539_v39 = vmul.f32 %v537_v34, %v530_v36  ;;  %v555_v41 = vsel %vm551_vm7, %v530_v36, inf  ;;  %v552_v42 = vsel %vm551_vm7, %v530_v36, -inf }
 0x245   : > { %540 = vadd.xlane.f32.xlu1 %v539_v39  ;;  %v542_v40 = vmul.f32 %v539_v39, %v530_v36 }
 0x247   : > { %543 = vadd.xlane.f32.xlu0 %v542_v40 }
 0x249   : > { %556 = vmin.xlane.f32.xlu1 %v555_v41 }
 0x24b   : > { %553 = vmax.xlane.f32.xlu0 %v552_v42 }
 0x2ce   : > { %v541_v43 = vpop.xlane.xlu1 %540 }
 0x2d0   : > { %v544_v44 = vpop.xlane.xlu0 %543 }
 0x2d1   : > { %v558_v45 = vsel %vm286_vm1, %v541_v43, %v544_v44 }
 0x2d2   : > { %v557_v47 = vpop.xlane.xlu1 %556 }
 0x2d4   : > { %v554_v46 = vpop.xlane.xlu0 %553 }
 0x2d5   : > { %v560_v48 = vsel %vm559_vm8, %v558_v45, %v554_v46 }
 0x2d6   : > { %v562_v49 = vsel %vm561_vm9, %v560_v48, %v557_v47 }
 0x2d7   : > { %v564_v50 = vsel %vm563_vm10, %v562_v49, 0.0 }
 0x2d8   : > { %565 = vst.msk [vmem:[%s257_s26] sm:$0xff] %vm301_vm3, %v564_v50 }
 0x2d9 PF: > { %s17_s21 = sadd.s32 1, %s710_s21  }
 0x2da   : > { %p14_p4 = scmp.ge.s32.totalorder %s17_s21, 4  }
 0x2dc   :  { %16 = sbr.rel (!%p14_p4) target bundleno = 1 (0x1), region = 84 }

// kernel: basic_block_forward.14
= control target key start
LH: loop header
LB: loop body
LE: loop exit
PB: predicated region body
PF: predicated region fallthrough
CT: control target
= control target key end

     0   :  { %s361_s12 = smov 0   ;;  %s388_s0 = inlined_call_operand.vmem [shape: f32[2,8,128], index: 0, kind: input, shape index: {}]   ;;  %s389_s1 = inlined_call_operand.vmem [shape: f32[2,8,1], index: 1, kind: input, shape index: {}]   ;;  %s390_s2 = inlined_call_operand.vmem [shape: f32[2,8,1], index: 2, kind: input, shape index: {}]   ;;  %s391_s3 = inlined_call_operand.vmem [shape: f32[2,2,128], index: 3, kind: output, shape index: {}]  }
   0x1 LB: > { %s311_s13 = sadd.s32 4294967295, %s338_s12   ;;  %p315_p0 = scmp.ge.s32.totalorder %s338_s12, 1  ;;  %s338_s12 = sphi %s361_s12, %s13_s12  }
   0x2   : > { %p154_p1 = scmp.lt.s32.totalorder %s338_s12, 3 }
   0x4   : > { %p155_p2 = pnand %p315_p0, %p154_p1 }
   0x5   : > { %p184_p3 = scmp.lt.s32.totalorder (!%p155_p2), %s311_s13, 1 }
   0x6   : > { %158 = sbr.rel (%p155_p2) target bundleno = 162 (0xa2), region = 32 }
   0xb   : > { %v340_v0 = vmov 0   ;;  %s393_s13 = smov (!%p184_p3, %s311_s13), 1  ;;  %vm215_vm0 = vcmask 1043456   ;;  %vm231_vm1 = vcmask 1040384  }
   0xc   : > { %331 = vset.pattern.permute.xlu0 %v340_v0  ;;  %s316_s14 = sshll.u32 %s393_s13, 3  ;;  %s319_s24 = sshll.u32 %s393_s13, 1 }
   0xd   : > { %s191_s17 = scalar_lea.vmem %s389_s1, %s316_s14  ;;  %s195_s20 = scalar_lea.vmem %s390_s2, %s316_s14 }
   0xe   : > { %v201_v1 = vld [vmem:[%s191_s17] sm:$0xff]  ;;  %s187_s23 = scalar_lea.vmem %s388_s0, %s316_s14  ;;  %s199_s27 = scalar_lea.vmem %s391_s3, %s319_s24 }
   0xf   : > { %204 = vperm.xlu0 %331, %v201_v1   ;;  %v208_v2 = vld [vmem:[%s195_s20] sm:$0xff] }
  0x10   : > { %v200_v4 = vld [vmem:[%s187_s23] sm:$0xff] }
  0x13   : > { %211 = vperm.xlu0 %331, %v208_v2  }
  0x8a   : > { %v205_v3 = vpop.permute.xlu0 %204 }
  0x8b   : > { %v207_v5 = vmul.f32 %v205_v3, %v200_v4 }
  0x8e   : > { %v212_v6 = vpop.permute.xlu0 %211 }
  0x8f   : > { %v214_v7 = vadd.f32 %v212_v6, %v207_v5 }
  0x91   : > { %v216_v8 = vsel %vm215_vm0, %v214_v7, 0.0  ;;  %v224_v9 = vsel %vm215_vm0, %v214_v7, -inf }
  0x92   : > { %v217_v10 = vrot.slane %v216_v8, 4  ;;  %v225_v11 = vrot.slane %v224_v9, 4 }
  0x94   : > { %v218_v12 = vadd.f32 %v217_v10, %v216_v8  ;;  %v226_v13 = vmax.f32 %v224_v9, %v225_v11 }
  0x96   : > { %v219_v14 = vrot.slane %v218_v12, 2  ;;  %v227_v15 = vrot.slane %v226_v13, 2 }
  0x98   : > { %v220_v16 = vadd.f32 %v219_v14, %v218_v12  ;;  %v228_v17 = vmax.f32 %v226_v13, %v227_v15 }
  0x9a   : > { %v221_v18 = vrot.slane %v220_v16, 1  ;;  %v229_v19 = vrot.slane %v228_v17, 1 }
  0x9c   : > { %v222_v20 = vadd.f32 %v221_v18, %v220_v16  ;;  %v230_v22 = vmax.f32 %v228_v17, %v229_v19 }
  0x9e   : > { %v223_v21 = vmul.f32 0.25, %v222_v20 }
  0xa0   : > { %v232_v23 = vsel %vm231_vm1, %v223_v21, %v230_v22 }
  0xa1   : > { %233 = vst [vmem:[%s199_s27] sm:$0x3] %v232_v23 }
  0xa2 PF: > { %s13_s12 = sadd.s32 1, %s338_s12  }
  0xa3   : > { %p10_p4 = scmp.ge.s32.totalorder %s13_s12, 4  }
  0xa5   :  { %12 = sbr.rel (!%p10_p4) target bundleno = 1 (0x1), region = 68 }

// kernel: basic_block_forward.15
= control target key start
LH: loop header
LB: loop body
LE: loop exit
PB: predicated region body
PF: predicated region fallthrough
CT: control target
= control target key end

     0   :  { %s481_s18 = smov 0   ;;  %s517_s0 = inlined_call_operand.vmem [shape: f32[2,8,128], index: 0, kind: input, shape index: {}]   ;;  %s518_s1 = inlined_call_operand.vmem [shape: f32[2,8,1], index: 1, kind: input, shape index: {}]   ;;  %s519_s2 = inlined_call_operand.vmem [shape: f32[2,8,1], index: 2, kind: input, shape index: {}]   ;;  %s520_s3 = inlined_call_operand.vmem [shape: f32[2,1,128], index: 3, kind: input, shape index: {}]   ;;  %s521_s4 = inlined_call_operand.vmem [shape: f32[2,8,128], index: 4, kind: input, shape index: {}]   ;;  %s522_s5 = inlined_call_operand.vmem [shape: f32[2,8,128], index: 5, kind: output, shape index: {}]  }
   0x1 LB: > { %s416_s19 = sadd.s32 4294967295, %s448_s18   ;;  %p420_p0 = scmp.ge.s32.totalorder %s448_s18, 1  ;;  %s448_s18 = sphi %s481_s18, %s15_s18  }
   0x2   : > { %p221_p1 = scmp.lt.s32.totalorder %s448_s18, 3 }
   0x4   : > { %p222_p2 = pnand %p420_p0, %p221_p1 }
   0x5   : > { %p262_p3 = scmp.lt.s32.totalorder (!%p222_p2), %s416_s19, 1 }
   0x6   : > { %225 = sbr.rel (%p222_p2) target bundleno = 152 (0x98), region = 40 }
   0xb   : > { %v450_v0 = vmov 0   ;;  %s524_s19 = smov (!%p262_p3, %s416_s19), 1  ;;  %v308_v8 = vlaneseq }
   0xc   : > { %437 = vset.pattern.permute.xlu0 %v450_v0  ;;  %s489_s20 = sshll.u32 %s524_s19, 3  ;;  %s276_s29 = scalar_lea.vmem %s520_s3, %s524_s19 }
   0xd   : > { %s269_s23 = scalar_lea.vmem %s518_s1, %s489_s20  ;;  %s273_s26 = scalar_lea.vmem %s519_s2, %s489_s20  ;;  %v300_v3 = vld [vmem:[%s276_s29] sm:$0x1]  ;;  %v309_v9 = vshrl.u32 %v308_v8, 7 }
   0xe   : > { %v286_v1 = vld [vmem:[%s269_s23] sm:$0xff]  ;;  %v301_v4 = vsub.f32 0.0, %v300_v3  ;;  %s265_s7 = scalar_lea.vmem %s517_s0, %s489_s20  ;;  %s280_s10 = scalar_lea.vmem %s521_s4, %s489_s20 }
   0xf   : > { %289 = vperm.xlu0 %437, %v286_v1   ;;  %v293_v2 = vld [vmem:[%s273_s26] sm:$0xff]  ;;  %v310_v10 = vsub.s32 0, %v309_v9  ;;  %s284_s13 = scalar_lea.vmem %s522_s5, %s489_s20 }
  0x10   : > { %v302_v5 = vmul.f32 1.442695, %v301_v4  ;;  %v285_v13 = vld [vmem:[%s265_s7] sm:$0xff] }
  0x11   : > { %v314_v18 = vld [vmem:[%s280_s10] sm:$0xff] }
  0x12   : > { %438 = vpow2.f32 %v302_v5 }
  0x13   : > { %296 = vperm.xlu0 %437, %v293_v2  }
  0x1f   : > { %v439_v6 = vpop.eup %438 }
  0x20   : > { %v304_v7 = vadd.f32 1.0, %v439_v6 }
  0x22   : > { %440 = vrcp.f32 %v304_v7 }
  0x2f   : > { %v441_v11 = vpop.eup %440 }
  0x30   : > { %v311_v15 = vrot.slane %v441_v11, %v310_v10 }
  0x8a   : > { %v290_v12 = vpop.permute.xlu0 %289 }
  0x8b   : > { %v292_v14 = vmul.f32 %v290_v12, %v285_v13 }
  0x8e   : > { %v297_v16 = vpop.permute.xlu0 %296 }
  0x8f   : > { %v299_v17 = vadd.f32 %v297_v16, %v292_v14 }
  0x91   : > { %v313_v19 = vmul.f32 %v311_v15, %v299_v17 }
  0x93   : > { %v315_v20 = vadd.f32 %v314_v18, %v313_v19 }
  0x95   : > { %v316_v21 = vmax.f32 %v315_v20, 0.0 }
  0x97   : > { %317 = vst [vmem:[%s284_s13] sm:$0xff] %v316_v21 }
  0x98 PF: > { %s15_s18 = sadd.s32 1, %s448_s18  }
  0x99   : > { %p12_p4 = scmp.ge.s32.totalorder %s15_s18, 4  }
  0x9b   :  { %14 = sbr.rel (!%p12_p4) target bundleno = 1 (0x1), region = 82 }

</bundles_post_ra>
